<compile_context>
chip_gen: v7x
topology: tpu7x:2x2x1
jax: 0.10.0
libtpu: 0.0.40
codegen_flags: <defaults>
</compile_context>

<pallas_src>
import functools

import numpy as np
import jax
import jax.numpy as jnp
from jax import lax
from jax.experimental import pallas as pl
from jax.experimental.pallas import tpu as pltpu

K = 7      # conv kernel size
HALF = 3   # "same" padding for 7x7 stride-1


def _is_single_tensorcore_chip():
    """v5e / v6e have one TensorCore per chip -> merge the batch into one
    grid step there.  Anything else (v7x, megacore v4/v5p, unknown) keeps a
    parallel per-image grid.  Both paths are correct; this only picks perf."""
    try:
        kind = jax.devices()[0].device_kind.lower()
    except Exception:
        return False
    return any(tag in kind for tag in ("v5 lite", "v5e", "v6 lite", "v6e"))


_SINGLE_TC = _is_single_tensorcore_chip()


def _fused_kernel(x_ref, y_ref, w_ref, b_ref, m_ref, o_ref, f_ref, c_ref, *,
                  n_imgs, Wp, B, WR, HWp_pad):
    # x_ref: (n_imgs, C, HWp_pad)   row-padded, lane-padded input image(s)
    # y_ref: (n_imgs, C, HWp_pad)   row-padded residual for stage 2
    # w_ref: (3, C, K*K*C)          packed weights: w[s][co, (ky*K+kx)*C+ci]
    # b_ref: (3, C, 1)              biases
    # m_ref: (1, HWp_pad)           valid-output-column mask (0/1)
    # o_ref: (n_imgs, C, HWp_pad)   output (row-padded layout)
    # f_ref: (C, L)                 flat zero-guarded scratch image (VMEM)
    # c_ref: (K*K*C, HWp_pad)       chunk scratch feeding the MXU (VMEM)
    C = x_ref.shape[1]
    L = f_ref.shape[1]

    # Zero only the guard regions; the interior [WR, WR+HWp_pad) is fully
    # overwritten at the start of every conv stage.
    f_ref[:, :WR] = jnp.zeros((C, WR), jnp.float32)
    tail = L - (WR + HWp_pad)
    if tail > 0:
        f_ref[:, WR + HWp_pad:WR + HWp_pad + tail] = jnp.zeros(
            (C, tail), jnp.float32)

    mask = m_ref[...]                                    # (1, HWp_pad)

    def conv_stage(stage):
        # Build the (49*C, HWp_pad) chunk: each tap is a contiguous
        # lane-shifted slice of the row-padded scratch (no masking needed).
        t = 0
        for ky in range(K):
            for kx in range(K):
                s = B + ky * Wp + kx - HALF
                c_ref[t * C:(t + 1) * C, :] = f_ref[:, s:s + HWp_pad]
                t += 1
        raw = jnp.dot(w_ref[stage], c_ref[...],
                      preferred_element_type=jnp.float32)  # (C, HWp_pad)
        # One small mask multiply per stage zeroes the pad lanes so the
        # writeback doubles as the next stage's zero padding.
        return (raw + b_ref[stage]) * mask

    for i in range(n_imgs):
        # stage 1: v1 = conv1(x)
        f_ref[:, WR:WR + HWp_pad] = x_ref[i]
        v1 = conv_stage(0)

        # stage 2: v3 = relu(conv2(v1) + y)
        f_ref[:, WR:WR + HWp_pad] = v1
        v3 = jnp.maximum(conv_stage(1) + y_ref[i], 0.0)

        # stage 3: v6 = relu(conv3(v3) + v1)
        f_ref[:, WR:WR + HWp_pad] = v3
        v6 = jnp.maximum(conv_stage(2) + v1, 0.0)

        o_ref[i] = v6.astype(o_ref.dtype)


def fused_forward(x, y, w_packed, b_packed):
    """x, y: (N, C, H, W) float32 -> (N, C, H, W) float32."""
    N, C, H, W = x.shape
    Wp = W + 2 * HALF                      # row-padded row stride
    HWp = H * Wp                           # interior width (row-padded)
    HWp_pad = ((HWp + 127) // 128) * 128   # lane-dense accumulator width
    # 128-aligned interior offset; guarantees padded-row-0 offset B >= HALF.
    WR = ((HALF * Wp + HALF + 127) // 128) * 128
    B = WR - HALF * Wp
    t_max = B + (K - 1) * Wp + (K - 1) - HALF       # last tap-slice start
    L = ((t_max + HWp_pad + 127) // 128) * 128      # scratch length

    # Mask of valid output columns in the row-padded layout (static numpy).
    j = np.arange(HWp_pad)
    h = j // Wp
    u = j % Wp
    valid = (h < H) & (u >= HALF) & (u < HALF + W)
    mask = jnp.asarray(valid.astype(np.float32)[None, :])   # (1, HWp_pad)

    def prep(a):
        # (N,C,H,W) -> row-padded (N,C,H,Wp) -> flat (N,C,HWp) -> lane-padded.
        a = jnp.pad(a, ((0, 0), (0, 0), (0, 0), (HALF, HALF)))
        a = a.reshape(N, C, HWp)
        return jnp.pad(a, ((0, 0), (0, 0), (0, HWp_pad - HWp)))

    xp = prep(x)
    yp = prep(y)

    # Batch layout: merged single step on 1-TC chips, parallel grid otherwise.
    n_per_step = N if (_SINGLE_TC and N > 1) else 1
    if N % n_per_step:
        n_per_step = 1
    grid = (N // n_per_step,)

    kern = functools.partial(_fused_kernel, n_imgs=n_per_step, Wp=Wp, B=B,
                             WR=WR, HWp_pad=HWp_pad)
    out = pl.pallas_call(
        kern,
        out_shape=jax.ShapeDtypeStruct((N, C, HWp_pad), jnp.float32),
        grid=grid,
        in_specs=[
            pl.BlockSpec((n_per_step, C, HWp_pad), lambda n: (n, 0, 0)),
            pl.BlockSpec((n_per_step, C, HWp_pad), lambda n: (n, 0, 0)),
            pl.BlockSpec((3, C, K * K * C), lambda n: (0, 0, 0)),
            pl.BlockSpec((3, C, 1), lambda n: (0, 0, 0)),
            pl.BlockSpec((1, HWp_pad), lambda n: (0, 0)),
        ],
        out_specs=pl.BlockSpec((n_per_step, C, HWp_pad), lambda n: (n, 0, 0)),
        scratch_shapes=[
            pltpu.VMEM((C, L), jnp.float32),
            pltpu.VMEM((K * K * C, HWp_pad), jnp.float32),
        ],
        compiler_params=pltpu.CompilerParams(
            dimension_semantics=("parallel",)),
    )(xp, yp, w_packed, b_packed, mask)

    # Strip the row padding: (N,C,HWp_pad) -> (N,C,H,W).
    out = out[:, :, :HWp].reshape(N, C, H, Wp)[:, :, :, HALF:HALF + W]
    return out


model_forward = jax.jit(fused_forward)


def pack_params(params):
    """Repack ONCE: (O,I,kH,kW) -> (3, O, kH*kW*I) matching the chunk order
    (ky-major, then kx, then input channel); biases -> (3, O, 1)."""
    ws, bs = [], []
    for name in ("conv1", "conv2", "conv3"):
        w, b = params[name]                        # (O, I, K, K), (O,)
        o, i, kh, kw = w.shape
        wp = jnp.transpose(w, (0, 2, 3, 1)).reshape(o, kh * kw * i)
        ws.append(wp)
        bs.append(b[:, None])
    return jnp.stack(ws), jnp.stack(bs)


def init_params(key, channels=16):
    """Deterministic PyTorch-Conv2d-style init (uniform +- 1/sqrt(fan_in))."""
    params = {}
    fan_in = channels * K * K
    bound = 1.0 / float(fan_in) ** 0.5
    for idx, name in enumerate(("conv1", "conv2", "conv3")):
        kw_key, kb_key = jax.random.split(jax.random.fold_in(key, idx))
        w = jax.random.uniform(kw_key, (channels, channels, K, K),
                               jnp.float32, -bound, bound)   # OIHW
        b = jax.random.uniform(kb_key, (channels,), jnp.float32, -bound, bound)
        params[name] = (w, b)
    return params


def reference_forward(x, y, params):
    """Pure-JAX (XLA conv) reference for correctness checking."""
    def conv(inp, w, b):
        out = lax.conv_general_dilated(
            inp, w, window_strides=(1, 1),
            padding=[(HALF, HALF), (HALF, HALF)],
            dimension_numbers=("NCHW", "OIHW", "NCHW"))
        return out + b[None, :, None, None]

    w1, b1 = params["conv1"]
    w2, b2 = params["conv2"]
    w3, b3 = params["conv3"]
    v1 = conv(x, w1, b1)
    v3 = jnp.maximum(conv(v1, w2, b2) + y, 0.0)
    v6 = jnp.maximum(conv(v3, w3, b3) + v1, 0.0)
    return v6


if __name__ == "__main__":
    key = jax.random.PRNGKey(0)
    k_x, k_y, k_p = jax.random.split(key, 3)

    # Small shapes consistent with the module (channels must be 16).
    N, C, H, W = 2, 16, 16, 16
    x = jax.random.normal(k_x, (N, C, H, W), jnp.float32)
    y = jax.random.normal(k_y, (N, C, H, W), jnp.float32)
    params = init_params(k_p, channels=C)

    # Pack weights once, outside the per-call forward path.
    w_packed, b_packed = pack_params(params)
    w_packed = jax.block_until_ready(w_packed)
    b_packed = jax.block_until_ready(b_packed)

    out = model_forward(x, y, w_packed, b_packed)
    out = jax.block_until_ready(out)

    ref = reference_forward(x, y, params)
    err = float(jnp.max(jnp.abs(out - ref)))
    assert out.shape == (N, C, H, W)
    assert err < 2e-3, err

    print("KERNEL_OK")
</pallas_src>

<mosaic_0001>
module attributes {stable_mosaic.version = 11 : i64} {
  func.func @_fused_kernel(%arg0: i32, %arg1: memref<1x16x384xf32, #tpu.memory_space<vmem>>, %arg2: memref<1x16x384xf32, #tpu.memory_space<vmem>>, %arg3: memref<3x16x784xf32, #tpu.memory_space<vmem>>, %arg4: memref<3x16x1xf32, #tpu.memory_space<vmem>>, %arg5: memref<1x384xf32, #tpu.memory_space<vmem>>, %arg6: memref<1x16x384xf32, #tpu.memory_space<vmem>>, %arg7: memref<16x640xf32, #tpu.memory_space<vmem>>, %arg8: memref<784x384xf32, #tpu.memory_space<vmem>>) attributes {dimension_semantics = [#tpu.dimension_semantics<parallel>], iteration_bounds = array<i64: 2>, scalar_prefetch = 0 : i64, scratch_operands = 2 : i64, tpu.core_type = #tpu.core_type<tc>, window_params = [{transform_indices = @transform_0, window_bounds = array<i64: 1, 16, 384>}, {transform_indices = @transform_1, window_bounds = array<i64: 1, 16, 384>}, {pipeline_mode = #tpu.pipeline_mode<synchronous>, transform_indices = @transform_2, window_bounds = array<i64: 3, 16, 784>}, {pipeline_mode = #tpu.pipeline_mode<synchronous>, transform_indices = @transform_3, window_bounds = array<i64: 3, 16, 1>}, {pipeline_mode = #tpu.pipeline_mode<synchronous>, transform_indices = @transform_4, window_bounds = array<i64: 1, 384>}, {transform_indices = @transform_5, window_bounds = array<i64: 1, 16, 384>}]} {
    %cst = arith.constant 0.000000e+00 : f32
    %0 = vector.broadcast %cst : f32 to vector<16x128xf32>
    %c0 = arith.constant 0 : index
    %c0_0 = arith.constant 0 : index
    %1 = vector.load %arg7[%c0, %c0_0] : memref<16x640xf32, #tpu.memory_space<vmem>>, vector<16x128xf32>
    tpu.vector_store %arg7[%c0, %c0_0], %0 {strides = array<i32>} : memref<16x640xf32, #tpu.memory_space<vmem>>, vector<16x128xf32>,
    %cst_1 = arith.constant 0.000000e+00 : f32
    %2 = vector.broadcast %cst_1 : f32 to vector<16x128xf32>
    %c0_2 = arith.constant 0 : index
    %c512 = arith.constant 512 : index
    %3 = vector.load %arg7[%c0_2, %c512] : memref<16x640xf32, #tpu.memory_space<vmem>>, vector<16x128xf32>
    tpu.vector_store %arg7[%c0_2, %c512], %2 {strides = array<i32>} : memref<16x640xf32, #tpu.memory_space<vmem>>, vector<16x128xf32>,
    %c0_3 = arith.constant 0 : index
    %c0_4 = arith.constant 0 : index
    %4 = vector.load %arg5[%c0_3, %c0_4] : memref<1x384xf32, #tpu.memory_space<vmem>>, vector<1x384xf32>
    %c0_5 = arith.constant 0 : index
    %c0_6 = arith.constant 0 : index
    %c0_7 = arith.constant 0 : index
    %5 = vector.load %arg1[%c0_5, %c0_6, %c0_7] : memref<1x16x384xf32, #tpu.memory_space<vmem>>, vector<1x16x384xf32>
    %6 = vector.shape_cast %5 : vector<1x16x384xf32> to vector<16x384xf32>
    %c0_8 = arith.constant 0 : index
    %c128 = arith.constant 128 : index
    %7 = vector.load %arg7[%c0_8, %c128] : memref<16x640xf32, #tpu.memory_space<vmem>>, vector<16x384xf32>
    tpu.vector_store %arg7[%c0_8, %c128], %6 {strides = array<i32>} : memref<16x640xf32, #tpu.memory_space<vmem>>, vector<16x384xf32>,
    %c0_9 = arith.constant 0 : index
    %c59 = arith.constant 59 : index
    %8 = vector.load %arg7[%c0_9, %c59] : memref<16x640xf32, #tpu.memory_space<vmem>>, vector<16x384xf32>
    %c0_10 = arith.constant 0 : index
    %c0_11 = arith.constant 0 : index
    %9 = vector.load %arg8[%c0_10, %c0_11] : memref<784x384xf32, #tpu.memory_space<vmem>>, vector<16x384xf32>
    tpu.vector_store %arg8[%c0_10, %c0_11], %8 {strides = array<i32>} : memref<784x384xf32, #tpu.memory_space<vmem>>, vector<16x384xf32>,
    %c0_12 = arith.constant 0 : index
    %c60 = arith.constant 60 : index
    %10 = vector.load %arg7[%c0_12, %c60] : memref<16x640xf32, #tpu.memory_space<vmem>>, vector<16x384xf32>
    %c16 = arith.constant 16 : index
    %c0_13 = arith.constant 0 : index
    %11 = vector.load %arg8[%c16, %c0_13] : memref<784x384xf32, #tpu.memory_space<vmem>>, vector<16x384xf32>
    tpu.vector_store %arg8[%c16, %c0_13], %10 {strides = array<i32>} : memref<784x384xf32, #tpu.memory_space<vmem>>, vector<16x384xf32>,
    %c0_14 = arith.constant 0 : index
    %c61 = arith.constant 61 : index
    %12 = vector.load %arg7[%c0_14, %c61] : memref<16x640xf32, #tpu.memory_space<vmem>>, vector<16x384xf32>
    %c32 = arith.constant 32 : index
    %c0_15 = arith.constant 0 : index
    %13 = vector.load %arg8[%c32, %c0_15] : memref<784x384xf32, #tpu.memory_space<vmem>>, vector<16x384xf32>
    tpu.vector_store %arg8[%c32, %c0_15], %12 {strides = array<i32>} : memref<784x384xf32, #tpu.memory_space<vmem>>, vector<16x384xf32>,
    %c0_16 = arith.constant 0 : index
    %c62 = arith.constant 62 : index
    %14 = vector.load %arg7[%c0_16, %c62] : memref<16x640xf32, #tpu.memory_space<vmem>>, vector<16x384xf32>
    %c48 = arith.constant 48 : index
    %c0_17 = arith.constant 0 : index
    %15 = vector.load %arg8[%c48, %c0_17] : memref<784x384xf32, #tpu.memory_space<vmem>>, vector<16x384xf32>
    tpu.vector_store %arg8[%c48, %c0_17], %14 {strides = array<i32>} : memref<784x384xf32, #tpu.memory_space<vmem>>, vector<16x384xf32>,
    %c0_18 = arith.constant 0 : index
    %c63 = arith.constant 63 : index
    %16 = vector.load %arg7[%c0_18, %c63] : memref<16x640xf32, #tpu.memory_space<vmem>>, vector<16x384xf32>
    %c64 = arith.constant 64 : index
    %c0_19 = arith.constant 0 : index
    %17 = vector.load %arg8[%c64, %c0_19] : memref<784x384xf32, #tpu.memory_space<vmem>>, vector<16x384xf32>
    tpu.vector_store %arg8[%c64, %c0_19], %16 {strides = array<i32>} : memref<784x384xf32, #tpu.memory_space<vmem>>, vector<16x384xf32>,
    %c0_20 = arith.constant 0 : index
    %c64_21 = arith.constant 64 : index
    %18 = vector.load %arg7[%c0_20, %c64_21] : memref<16x640xf32, #tpu.memory_space<vmem>>, vector<16x384xf32>
    %c80 = arith.constant 80 : index
    %c0_22 = arith.constant 0 : index
    %19 = vector.load %arg8[%c80, %c0_22] : memref<784x384xf32, #tpu.memory_space<vmem>>, vector<16x384xf32>
    tpu.vector_store %arg8[%c80, %c0_22], %18 {strides = array<i32>} : memref<784x384xf32, #tpu.memory_space<vmem>>, vector<16x384xf32>,
    %c0_23 = arith.constant 0 : index
    %c65 = arith.constant 65 : index
    %20 = vector.load %arg7[%c0_23, %c65] : memref<16x640xf32, #tpu.memory_space<vmem>>, vector<16x384xf32>
    %c96 = arith.constant 96 : index
    %c0_24 = arith.constant 0 : index
    %21 = vector.load %arg8[%c96, %c0_24] : memref<784x384xf32, #tpu.memory_space<vmem>>, vector<16x384xf32>
    tpu.vector_store %arg8[%c96, %c0_24], %20 {strides = array<i32>} : memref<784x384xf32, #tpu.memory_space<vmem>>, vector<16x384xf32>,
    %c0_25 = arith.constant 0 : index
    %c81 = arith.constant 81 : index
    %22 = vector.load %arg7[%c0_25, %c81] : memref<16x640xf32, #tpu.memory_space<vmem>>, vector<16x384xf32>
    %c112 = arith.constant 112 : index
    %c0_26 = arith.constant 0 : index
    %23 = vector.load %arg8[%c112, %c0_26] : memref<784x384xf32, #tpu.memory_space<vmem>>, vector<16x384xf32>
    tpu.vector_store %arg8[%c112, %c0_26], %22 {strides = array<i32>} : memref<784x384xf32, #tpu.memory_space<vmem>>, vector<16x384xf32>,
    %c0_27 = arith.constant 0 : index
    %c82 = arith.constant 82 : index
    %24 = vector.load %arg7[%c0_27, %c82] : memref<16x640xf32, #tpu.memory_space<vmem>>, vector<16x384xf32>
    %c128_28 = arith.constant 128 : index
    %c0_29 = arith.constant 0 : index
    %25 = vector.load %arg8[%c128_28, %c0_29] : memref<784x384xf32, #tpu.memory_space<vmem>>, vector<16x384xf32>
    tpu.vector_store %arg8[%c128_28, %c0_29], %24 {strides = array<i32>} : memref<784x384xf32, #tpu.memory_space<vmem>>, vector<16x384xf32>,
    %c0_30 = arith.constant 0 : index
    %c83 = arith.constant 83 : index
    %26 = vector.load %arg7[%c0_30, %c83] : memref<16x640xf32, #tpu.memory_space<vmem>>, vector<16x384xf32>
    %c144 = arith.constant 144 : index
    %c0_31 = arith.constant 0 : index
    %27 = vector.load %arg8[%c144, %c0_31] : memref<784x384xf32, #tpu.memory_space<vmem>>, vector<16x384xf32>
    tpu.vector_store %arg8[%c144, %c0_31], %26 {strides = array<i32>} : memref<784x384xf32, #tpu.memory_space<vmem>>, vector<16x384xf32>,
    %c0_32 = arith.constant 0 : index
    %c84 = arith.constant 84 : index
    %28 = vector.load %arg7[%c0_32, %c84] : memref<16x640xf32, #tpu.memory_space<vmem>>, vector<16x384xf32>
    %c160 = arith.constant 160 : index
    %c0_33 = arith.constant 0 : index
    %29 = vector.load %arg8[%c160, %c0_33] : memref<784x384xf32, #tpu.memory_space<vmem>>, vector<16x384xf32>
    tpu.vector_store %arg8[%c160, %c0_33], %28 {strides = array<i32>} : memref<784x384xf32, #tpu.memory_space<vmem>>, vector<16x384xf32>,
    %c0_34 = arith.constant 0 : index
    %c85 = arith.constant 85 : index
    %30 = vector.load %arg7[%c0_34, %c85] : memref<16x640xf32, #tpu.memory_space<vmem>>, vector<16x384xf32>
    %c176 = arith.constant 176 : index
    %c0_35 = arith.constant 0 : index
    %31 = vector.load %arg8[%c176, %c0_35] : memref<784x384xf32, #tpu.memory_space<vmem>>, vector<16x384xf32>
    tpu.vector_store %arg8[%c176, %c0_35], %30 {strides = array<i32>} : memref<784x384xf32, #tpu.memory_space<vmem>>, vector<16x384xf32>,
    %c0_36 = arith.constant 0 : index
    %c86 = arith.constant 86 : index
    %32 = vector.load %arg7[%c0_36, %c86] : memref<16x640xf32, #tpu.memory_space<vmem>>, vector<16x384xf32>
    %c192 = arith.constant 192 : index
    %c0_37 = arith.constant 0 : index
    %33 = vector.load %arg8[%c192, %c0_37] : memref<784x384xf32, #tpu.memory_space<vmem>>, vector<16x384xf32>
    tpu.vector_store %arg8[%c192, %c0_37], %32 {strides = array<i32>} : memref<784x384xf32, #tpu.memory_space<vmem>>, vector<16x384xf32>,
    %c0_38 = arith.constant 0 : index
    %c87 = arith.constant 87 : index
    %34 = vector.load %arg7[%c0_38, %c87] : memref<16x640xf32, #tpu.memory_space<vmem>>, vector<16x384xf32>
    %c208 = arith.constant 208 : index
    %c0_39 = arith.constant 0 : index
    %35 = vector.load %arg8[%c208, %c0_39] : memref<784x384xf32, #tpu.memory_space<vmem>>, vector<16x384xf32>
    tpu.vector_store %arg8[%c208, %c0_39], %34 {strides = array<i32>} : memref<784x384xf32, #tpu.memory_space<vmem>>, vector<16x384xf32>,
    %c0_40 = arith.constant 0 : index
    %c103 = arith.constant 103 : index
    %36 = vector.load %arg7[%c0_40, %c103] : memref<16x640xf32, #tpu.memory_space<vmem>>, vector<16x384xf32>
    %c224 = arith.constant 224 : index
    %c0_41 = arith.constant 0 : index
    %37 = vector.load %arg8[%c224, %c0_41] : memref<784x384xf32, #tpu.memory_space<vmem>>, vector<16x384xf32>
    tpu.vector_store %arg8[%c224, %c0_41], %36 {strides = array<i32>} : memref<784x384xf32, #tpu.memory_space<vmem>>, vector<16x384xf32>,
    %c0_42 = arith.constant 0 : index
    %c104 = arith.constant 104 : index
    %38 = vector.load %arg7[%c0_42, %c104] : memref<16x640xf32, #tpu.memory_space<vmem>>, vector<16x384xf32>
    %c240 = arith.constant 240 : index
    %c0_43 = arith.constant 0 : index
    %39 = vector.load %arg8[%c240, %c0_43] : memref<784x384xf32, #tpu.memory_space<vmem>>, vector<16x384xf32>
    tpu.vector_store %arg8[%c240, %c0_43], %38 {strides = array<i32>} : memref<784x384xf32, #tpu.memory_space<vmem>>, vector<16x384xf32>,
    %c0_44 = arith.constant 0 : index
    %c105 = arith.constant 105 : index
    %40 = vector.load %arg7[%c0_44, %c105] : memref<16x640xf32, #tpu.memory_space<vmem>>, vector<16x384xf32>
    %c256 = arith.constant 256 : index
    %c0_45 = arith.constant 0 : index
    %41 = vector.load %arg8[%c256, %c0_45] : memref<784x384xf32, #tpu.memory_space<vmem>>, vector<16x384xf32>
    tpu.vector_store %arg8[%c256, %c0_45], %40 {strides = array<i32>} : memref<784x384xf32, #tpu.memory_space<vmem>>, vector<16x384xf32>,
    %c0_46 = arith.constant 0 : index
    %c106 = arith.constant 106 : index
    %42 = vector.load %arg7[%c0_46, %c106] : memref<16x640xf32, #tpu.memory_space<vmem>>, vector<16x384xf32>
    %c272 = arith.constant 272 : index
    %c0_47 = arith.constant 0 : index
    %43 = vector.load %arg8[%c272, %c0_47] : memref<784x384xf32, #tpu.memory_space<vmem>>, vector<16x384xf32>
    tpu.vector_store %arg8[%c272, %c0_47], %42 {strides = array<i32>} : memref<784x384xf32, #tpu.memory_space<vmem>>, vector<16x384xf32>,
    %c0_48 = arith.constant 0 : index
    %c107 = arith.constant 107 : index
    %44 = vector.load %arg7[%c0_48, %c107] : memref<16x640xf32, #tpu.memory_space<vmem>>, vector<16x384xf32>
    %c288 = arith.constant 288 : index
    %c0_49 = arith.constant 0 : index
    %45 = vector.load %arg8[%c288, %c0_49] : memref<784x384xf32, #tpu.memory_space<vmem>>, vector<16x384xf32>
    tpu.vector_store %arg8[%c288, %c0_49], %44 {strides = array<i32>} : memref<784x384xf32, #tpu.memory_space<vmem>>, vector<16x384xf32>,
    %c0_50 = arith.constant 0 : index
    %c108 = arith.constant 108 : index
    %46 = vector.load %arg7[%c0_50, %c108] : memref<16x640xf32, #tpu.memory_space<vmem>>, vector<16x384xf32>
    %c304 = arith.constant 304 : index
    %c0_51 = arith.constant 0 : index
    %47 = vector.load %arg8[%c304, %c0_51] : memref<784x384xf32, #tpu.memory_space<vmem>>, vector<16x384xf32>
    tpu.vector_store %arg8[%c304, %c0_51], %46 {strides = array<i32>} : memref<784x384xf32, #tpu.memory_space<vmem>>, vector<16x384xf32>,
    %c0_52 = arith.constant 0 : index
    %c109 = arith.constant 109 : index
    %48 = vector.load %arg7[%c0_52, %c109] : memref<16x640xf32, #tpu.memory_space<vmem>>, vector<16x384xf32>
    %c320 = arith.constant 320 : index
    %c0_53 = arith.constant 0 : index
    %49 = vector.load %arg8[%c320, %c0_53] : memref<784x384xf32, #tpu.memory_space<vmem>>, vector<16x384xf32>
    tpu.vector_store %arg8[%c320, %c0_53], %48 {strides = array<i32>} : memref<784x384xf32, #tpu.memory_space<vmem>>, vector<16x384xf32>,
    %c0_54 = arith.constant 0 : index
    %c125 = arith.constant 125 : index
    %50 = vector.load %arg7[%c0_54, %c125] : memref<16x640xf32, #tpu.memory_space<vmem>>, vector<16x384xf32>
    %c336 = arith.constant 336 : index
    %c0_55 = arith.constant 0 : index
    %51 = vector.load %arg8[%c336, %c0_55] : memref<784x384xf32, #tpu.memory_space<vmem>>, vector<16x384xf32>
    tpu.vector_store %arg8[%c336, %c0_55], %50 {strides = array<i32>} : memref<784x384xf32, #tpu.memory_space<vmem>>, vector<16x384xf32>,
    %c0_56 = arith.constant 0 : index
    %c126 = arith.constant 126 : index
    %52 = vector.load %arg7[%c0_56, %c126] : memref<16x640xf32, #tpu.memory_space<vmem>>, vector<16x384xf32>
    %c352 = arith.constant 352 : index
    %c0_57 = arith.constant 0 : index
    %53 = vector.load %arg8[%c352, %c0_57] : memref<784x384xf32, #tpu.memory_space<vmem>>, vector<16x384xf32>
    tpu.vector_store %arg8[%c352, %c0_57], %52 {strides = array<i32>} : memref<784x384xf32, #tpu.memory_space<vmem>>, vector<16x384xf32>,
    %c0_58 = arith.constant 0 : index
    %c127 = arith.constant 127 : index
    %54 = vector.load %arg7[%c0_58, %c127] : memref<16x640xf32, #tpu.memory_space<vmem>>, vector<16x384xf32>
    %c368 = arith.constant 368 : index
    %c0_59 = arith.constant 0 : index
    %55 = vector.load %arg8[%c368, %c0_59] : memref<784x384xf32, #tpu.memory_space<vmem>>, vector<16x384xf32>
    tpu.vector_store %arg8[%c368, %c0_59], %54 {strides = array<i32>} : memref<784x384xf32, #tpu.memory_space<vmem>>, vector<16x384xf32>,
    %c0_60 = arith.constant 0 : index
    %c128_61 = arith.constant 128 : index
    %56 = vector.load %arg7[%c0_60, %c128_61] : memref<16x640xf32, #tpu.memory_space<vmem>>, vector<16x384xf32>
    %c384 = arith.constant 384 : index
    %c0_62 = arith.constant 0 : index
    %57 = vector.load %arg8[%c384, %c0_62] : memref<784x384xf32, #tpu.memory_space<vmem>>, vector<16x384xf32>
    tpu.vector_store %arg8[%c384, %c0_62], %56 {strides = array<i32>} : memref<784x384xf32, #tpu.memory_space<vmem>>, vector<16x384xf32>,
    %c0_63 = arith.constant 0 : index
    %c129 = arith.constant 129 : index
    %58 = vector.load %arg7[%c0_63, %c129] : memref<16x640xf32, #tpu.memory_space<vmem>>, vector<16x384xf32>
    %c400 = arith.constant 400 : index
    %c0_64 = arith.constant 0 : index
    %59 = vector.load %arg8[%c400, %c0_64] : memref<784x384xf32, #tpu.memory_space<vmem>>, vector<16x384xf32>
    tpu.vector_store %arg8[%c400, %c0_64], %58 {strides = array<i32>} : memref<784x384xf32, #tpu.memory_space<vmem>>, vector<16x384xf32>,
    %c0_65 = arith.constant 0 : index
    %c130 = arith.constant 130 : index
    %60 = vector.load %arg7[%c0_65, %c130] : memref<16x640xf32, #tpu.memory_space<vmem>>, vector<16x384xf32>
    %c416 = arith.constant 416 : index
    %c0_66 = arith.constant 0 : index
    %61 = vector.load %arg8[%c416, %c0_66] : memref<784x384xf32, #tpu.memory_space<vmem>>, vector<16x384xf32>
    tpu.vector_store %arg8[%c416, %c0_66], %60 {strides = array<i32>} : memref<784x384xf32, #tpu.memory_space<vmem>>, vector<16x384xf32>,
    %c0_67 = arith.constant 0 : index
    %c131 = arith.constant 131 : index
    %62 = vector.load %arg7[%c0_67, %c131] : memref<16x640xf32, #tpu.memory_space<vmem>>, vector<16x384xf32>
    %c432 = arith.constant 432 : index
    %c0_68 = arith.constant 0 : index
    %63 = vector.load %arg8[%c432, %c0_68] : memref<784x384xf32, #tpu.memory_space<vmem>>, vector<16x384xf32>
    tpu.vector_store %arg8[%c432, %c0_68], %62 {strides = array<i32>} : memref<784x384xf32, #tpu.memory_space<vmem>>, vector<16x384xf32>,
    %c0_69 = arith.constant 0 : index
    %c147 = arith.constant 147 : index
    %64 = vector.load %arg7[%c0_69, %c147] : memref<16x640xf32, #tpu.memory_space<vmem>>, vector<16x384xf32>
    %c448 = arith.constant 448 : index
    %c0_70 = arith.constant 0 : index
    %65 = vector.load %arg8[%c448, %c0_70] : memref<784x384xf32, #tpu.memory_space<vmem>>, vector<16x384xf32>
    tpu.vector_store %arg8[%c448, %c0_70], %64 {strides = array<i32>} : memref<784x384xf32, #tpu.memory_space<vmem>>, vector<16x384xf32>,
    %c0_71 = arith.constant 0 : index
    %c148 = arith.constant 148 : index
    %66 = vector.load %arg7[%c0_71, %c148] : memref<16x640xf32, #tpu.memory_space<vmem>>, vector<16x384xf32>
    %c464 = arith.constant 464 : index
    %c0_72 = arith.constant 0 : index
    %67 = vector.load %arg8[%c464, %c0_72] : memref<784x384xf32, #tpu.memory_space<vmem>>, vector<16x384xf32>
    tpu.vector_store %arg8[%c464, %c0_72], %66 {strides = array<i32>} : memref<784x384xf32, #tpu.memory_space<vmem>>, vector<16x384xf32>,
    %c0_73 = arith.constant 0 : index
    %c149 = arith.constant 149 : index
    %68 = vector.load %arg7[%c0_73, %c149] : memref<16x640xf32, #tpu.memory_space<vmem>>, vector<16x384xf32>
    %c480 = arith.constant 480 : index
    %c0_74 = arith.constant 0 : index
    %69 = vector.load %arg8[%c480, %c0_74] : memref<784x384xf32, #tpu.memory_space<vmem>>, vector<16x384xf32>
    tpu.vector_store %arg8[%c480, %c0_74], %68 {strides = array<i32>} : memref<784x384xf32, #tpu.memory_space<vmem>>, vector<16x384xf32>,
    %c0_75 = arith.constant 0 : index
    %c150 = arith.constant 150 : index
    %70 = vector.load %arg7[%c0_75, %c150] : memref<16x640xf32, #tpu.memory_space<vmem>>, vector<16x384xf32>
    %c496 = arith.constant 496 : index
    %c0_76 = arith.constant 0 : index
    %71 = vector.load %arg8[%c496, %c0_76] : memref<784x384xf32, #tpu.memory_space<vmem>>, vector<16x384xf32>
    tpu.vector_store %arg8[%c496, %c0_76], %70 {strides = array<i32>} : memref<784x384xf32, #tpu.memory_space<vmem>>, vector<16x384xf32>,
    %c0_77 = arith.constant 0 : index
    %c151 = arith.constant 151 : index
    %72 = vector.load %arg7[%c0_77, %c151] : memref<16x640xf32, #tpu.memory_space<vmem>>, vector<16x384xf32>
    %c512_78 = arith.constant 512 : index
    %c0_79 = arith.constant 0 : index
    %73 = vector.load %arg8[%c512_78, %c0_79] : memref<784x384xf32, #tpu.memory_space<vmem>>, vector<16x384xf32>
    tpu.vector_store %arg8[%c512_78, %c0_79], %72 {strides = array<i32>} : memref<784x384xf32, #tpu.memory_space<vmem>>, vector<16x384xf32>,
    %c0_80 = arith.constant 0 : index
    %c152 = arith.constant 152 : index
    %74 = vector.load %arg7[%c0_80, %c152] : memref<16x640xf32, #tpu.memory_space<vmem>>, vector<16x384xf32>
    %c528 = arith.constant 528 : index
    %c0_81 = arith.constant 0 : index
    %75 = vector.load %arg8[%c528, %c0_81] : memref<784x384xf32, #tpu.memory_space<vmem>>, vector<16x384xf32>
    tpu.vector_store %arg8[%c528, %c0_81], %74 {strides = array<i32>} : memref<784x384xf32, #tpu.memory_space<vmem>>, vector<16x384xf32>,
    %c0_82 = arith.constant 0 : index
    %c153 = arith.constant 153 : index
    %76 = vector.load %arg7[%c0_82, %c153] : memref<16x640xf32, #tpu.memory_space<vmem>>, vector<16x384xf32>
    %c544 = arith.constant 544 : index
    %c0_83 = arith.constant 0 : index
    %77 = vector.load %arg8[%c544, %c0_83] : memref<784x384xf32, #tpu.memory_space<vmem>>, vector<16x384xf32>
    tpu.vector_store %arg8[%c544, %c0_83], %76 {strides = array<i32>} : memref<784x384xf32, #tpu.memory_space<vmem>>, vector<16x384xf32>,
    %c0_84 = arith.constant 0 : index
    %c169 = arith.constant 169 : index
    %78 = vector.load %arg7[%c0_84, %c169] : memref<16x640xf32, #tpu.memory_space<vmem>>, vector<16x384xf32>
    %c560 = arith.constant 560 : index
    %c0_85 = arith.constant 0 : index
    %79 = vector.load %arg8[%c560, %c0_85] : memref<784x384xf32, #tpu.memory_space<vmem>>, vector<16x384xf32>
    tpu.vector_store %arg8[%c560, %c0_85], %78 {strides = array<i32>} : memref<784x384xf32, #tpu.memory_space<vmem>>, vector<16x384xf32>,
    %c0_86 = arith.constant 0 : index
    %c170 = arith.constant 170 : index
    %80 = vector.load %arg7[%c0_86, %c170] : memref<16x640xf32, #tpu.memory_space<vmem>>, vector<16x384xf32>
    %c576 = arith.constant 576 : index
    %c0_87 = arith.constant 0 : index
    %81 = vector.load %arg8[%c576, %c0_87] : memref<784x384xf32, #tpu.memory_space<vmem>>, vector<16x384xf32>
    tpu.vector_store %arg8[%c576, %c0_87], %80 {strides = array<i32>} : memref<784x384xf32, #tpu.memory_space<vmem>>, vector<16x384xf32>,
    %c0_88 = arith.constant 0 : index
    %c171 = arith.constant 171 : index
    %82 = vector.load %arg7[%c0_88, %c171] : memref<16x640xf32, #tpu.memory_space<vmem>>, vector<16x384xf32>
    %c592 = arith.constant 592 : index
    %c0_89 = arith.constant 0 : index
    %83 = vector.load %arg8[%c592, %c0_89] : memref<784x384xf32, #tpu.memory_space<vmem>>, vector<16x384xf32>
    tpu.vector_store %arg8[%c592, %c0_89], %82 {strides = array<i32>} : memref<784x384xf32, #tpu.memory_space<vmem>>, vector<16x384xf32>,
    %c0_90 = arith.constant 0 : index
    %c172 = arith.constant 172 : index
    %84 = vector.load %arg7[%c0_90, %c172] : memref<16x640xf32, #tpu.memory_space<vmem>>, vector<16x384xf32>
    %c608 = arith.constant 608 : index
    %c0_91 = arith.constant 0 : index
    %85 = vector.load %arg8[%c608, %c0_91] : memref<784x384xf32, #tpu.memory_space<vmem>>, vector<16x384xf32>
    tpu.vector_store %arg8[%c608, %c0_91], %84 {strides = array<i32>} : memref<784x384xf32, #tpu.memory_space<vmem>>, vector<16x384xf32>,
    %c0_92 = arith.constant 0 : index
    %c173 = arith.constant 173 : index
    %86 = vector.load %arg7[%c0_92, %c173] : memref<16x640xf32, #tpu.memory_space<vmem>>, vector<16x384xf32>
    %c624 = arith.constant 624 : index
    %c0_93 = arith.constant 0 : index
    %87 = vector.load %arg8[%c624, %c0_93] : memref<784x384xf32, #tpu.memory_space<vmem>>, vector<16x384xf32>
    tpu.vector_store %arg8[%c624, %c0_93], %86 {strides = array<i32>} : memref<784x384xf32, #tpu.memory_space<vmem>>, vector<16x384xf32>,
    %c0_94 = arith.constant 0 : index
    %c174 = arith.constant 174 : index
    %88 = vector.load %arg7[%c0_94, %c174] : memref<16x640xf32, #tpu.memory_space<vmem>>, vector<16x384xf32>
    %c640 = arith.constant 640 : index
    %c0_95 = arith.constant 0 : index
    %89 = vector.load %arg8[%c640, %c0_95] : memref<784x384xf32, #tpu.memory_space<vmem>>, vector<16x384xf32>
    tpu.vector_store %arg8[%c640, %c0_95], %88 {strides = array<i32>} : memref<784x384xf32, #tpu.memory_space<vmem>>, vector<16x384xf32>,
    %c0_96 = arith.constant 0 : index
    %c175 = arith.constant 175 : index
    %90 = vector.load %arg7[%c0_96, %c175] : memref<16x640xf32, #tpu.memory_space<vmem>>, vector<16x384xf32>
    %c656 = arith.constant 656 : index
    %c0_97 = arith.constant 0 : index
    %91 = vector.load %arg8[%c656, %c0_97] : memref<784x384xf32, #tpu.memory_space<vmem>>, vector<16x384xf32>
    tpu.vector_store %arg8[%c656, %c0_97], %90 {strides = array<i32>} : memref<784x384xf32, #tpu.memory_space<vmem>>, vector<16x384xf32>,
    %c0_98 = arith.constant 0 : index
    %c191 = arith.constant 191 : index
    %92 = vector.load %arg7[%c0_98, %c191] : memref<16x640xf32, #tpu.memory_space<vmem>>, vector<16x384xf32>
    %c672 = arith.constant 672 : index
    %c0_99 = arith.constant 0 : index
    %93 = vector.load %arg8[%c672, %c0_99] : memref<784x384xf32, #tpu.memory_space<vmem>>, vector<16x384xf32>
    tpu.vector_store %arg8[%c672, %c0_99], %92 {strides = array<i32>} : memref<784x384xf32, #tpu.memory_space<vmem>>, vector<16x384xf32>,
    %c0_100 = arith.constant 0 : index
    %c192_101 = arith.constant 192 : index
    %94 = vector.load %arg7[%c0_100, %c192_101] : memref<16x640xf32, #tpu.memory_space<vmem>>, vector<16x384xf32>
    %c688 = arith.constant 688 : index
    %c0_102 = arith.constant 0 : index
    %95 = vector.load %arg8[%c688, %c0_102] : memref<784x384xf32, #tpu.memory_space<vmem>>, vector<16x384xf32>
    tpu.vector_store %arg8[%c688, %c0_102], %94 {strides = array<i32>} : memref<784x384xf32, #tpu.memory_space<vmem>>, vector<16x384xf32>,
    %c0_103 = arith.constant 0 : index
    %c193 = arith.constant 193 : index
    %96 = vector.load %arg7[%c0_103, %c193] : memref<16x640xf32, #tpu.memory_space<vmem>>, vector<16x384xf32>
    %c704 = arith.constant 704 : index
    %c0_104 = arith.constant 0 : index
    %97 = vector.load %arg8[%c704, %c0_104] : memref<784x384xf32, #tpu.memory_space<vmem>>, vector<16x384xf32>
    tpu.vector_store %arg8[%c704, %c0_104], %96 {strides = array<i32>} : memref<784x384xf32, #tpu.memory_space<vmem>>, vector<16x384xf32>,
    %c0_105 = arith.constant 0 : index
    %c194 = arith.constant 194 : index
    %98 = vector.load %arg7[%c0_105, %c194] : memref<16x640xf32, #tpu.memory_space<vmem>>, vector<16x384xf32>
    %c720 = arith.constant 720 : index
    %c0_106 = arith.constant 0 : index
    %99 = vector.load %arg8[%c720, %c0_106] : memref<784x384xf32, #tpu.memory_space<vmem>>, vector<16x384xf32>
    tpu.vector_store %arg8[%c720, %c0_106], %98 {strides = array<i32>} : memref<784x384xf32, #tpu.memory_space<vmem>>, vector<16x384xf32>,
    %c0_107 = arith.constant 0 : index
    %c195 = arith.constant 195 : index
    %100 = vector.load %arg7[%c0_107, %c195] : memref<16x640xf32, #tpu.memory_space<vmem>>, vector<16x384xf32>
    %c736 = arith.constant 736 : index
    %c0_108 = arith.constant 0 : index
    %101 = vector.load %arg8[%c736, %c0_108] : memref<784x384xf32, #tpu.memory_space<vmem>>, vector<16x384xf32>
    tpu.vector_store %arg8[%c736, %c0_108], %100 {strides = array<i32>} : memref<784x384xf32, #tpu.memory_space<vmem>>, vector<16x384xf32>,
    %c0_109 = arith.constant 0 : index
    %c196 = arith.constant 196 : index
    %102 = vector.load %arg7[%c0_109, %c196] : memref<16x640xf32, #tpu.memory_space<vmem>>, vector<16x384xf32>
    %c752 = arith.constant 752 : index
    %c0_110 = arith.constant 0 : index
    %103 = vector.load %arg8[%c752, %c0_110] : memref<784x384xf32, #tpu.memory_space<vmem>>, vector<16x384xf32>
    tpu.vector_store %arg8[%c752, %c0_110], %102 {strides = array<i32>} : memref<784x384xf32, #tpu.memory_space<vmem>>, vector<16x384xf32>,
    %c0_111 = arith.constant 0 : index
    %c197 = arith.constant 197 : index
    %104 = vector.load %arg7[%c0_111, %c197] : memref<16x640xf32, #tpu.memory_space<vmem>>, vector<16x384xf32>
    %c768 = arith.constant 768 : index
    %c0_112 = arith.constant 0 : index
    %105 = vector.load %arg8[%c768, %c0_112] : memref<784x384xf32, #tpu.memory_space<vmem>>, vector<16x384xf32>
    tpu.vector_store %arg8[%c768, %c0_112], %104 {strides = array<i32>} : memref<784x384xf32, #tpu.memory_space<vmem>>, vector<16x384xf32>,
    %c0_113 = arith.constant 0 : index
    %c0_114 = arith.constant 0 : index
    %c0_115 = arith.constant 0 : index
    %106 = vector.load %arg3[%c0_113, %c0_114, %c0_115] : memref<3x16x784xf32, #tpu.memory_space<vmem>>, vector<1x16x784xf32>
    %107 = vector.shape_cast %106 : vector<1x16x784xf32> to vector<16x784xf32>
    %c0_116 = arith.constant 0 : index
    %c0_117 = arith.constant 0 : index
    %108 = vector.load %arg8[%c0_116, %c0_117] : memref<784x384xf32, #tpu.memory_space<vmem>>, vector<784x384xf32>
    %cst_118 = arith.constant dense<0.000000e+00> : vector<16x384xf32>
    %109 = tpu.matmul %107, %108, %cst_118 {dimension_numbers = #tpu.dot_dimension_numbers<[1], [0], [0], [1], [0, 0, 1, 1], [], []>} : vector<16x784xf32>, vector<784x384xf32>, vector<16x384xf32> -> vector<16x384xf32>
    %c0_119 = arith.constant 0 : index
    %c0_120 = arith.constant 0 : index
    %c0_121 = arith.constant 0 : index
    %110 = vector.load %arg4[%c0_119, %c0_120, %c0_121] : memref<3x16x1xf32, #tpu.memory_space<vmem>>, vector<1x16x1xf32>
    %111 = vector.shape_cast %110 : vector<1x16x1xf32> to vector<16x1xf32>
    %112 = vector.broadcast %111 : vector<16x1xf32> to vector<16x384xf32>
    %113 = arith.addf %109, %112 : vector<16x384xf32>
    %114 = vector.broadcast %4 : vector<1x384xf32> to vector<16x384xf32>
    %115 = arith.mulf %113, %114 : vector<16x384xf32>
    %c0_122 = arith.constant 0 : index
    %c128_123 = arith.constant 128 : index
    %116 = vector.load %arg7[%c0_122, %c128_123] : memref<16x640xf32, #tpu.memory_space<vmem>>, vector<16x384xf32>
    tpu.vector_store %arg7[%c0_122, %c128_123], %115 {strides = array<i32>} : memref<16x640xf32, #tpu.memory_space<vmem>>, vector<16x384xf32>,
    %c0_124 = arith.constant 0 : index
    %c59_125 = arith.constant 59 : index
    %117 = vector.load %arg7[%c0_124, %c59_125] : memref<16x640xf32, #tpu.memory_space<vmem>>, vector<16x384xf32>
    %c0_126 = arith.constant 0 : index
    %c0_127 = arith.constant 0 : index
    %118 = vector.load %arg8[%c0_126, %c0_127] : memref<784x384xf32, #tpu.memory_space<vmem>>, vector<16x384xf32>
    tpu.vector_store %arg8[%c0_126, %c0_127], %117 {strides = array<i32>} : memref<784x384xf32, #tpu.memory_space<vmem>>, vector<16x384xf32>,
    %c0_128 = arith.constant 0 : index
    %c60_129 = arith.constant 60 : index
    %119 = vector.load %arg7[%c0_128, %c60_129] : memref<16x640xf32, #tpu.memory_space<vmem>>, vector<16x384xf32>
    %c16_130 = arith.constant 16 : index
    %c0_131 = arith.constant 0 : index
    %120 = vector.load %arg8[%c16_130, %c0_131] : memref<784x384xf32, #tpu.memory_space<vmem>>, vector<16x384xf32>
    tpu.vector_store %arg8[%c16_130, %c0_131], %119 {strides = array<i32>} : memref<784x384xf32, #tpu.memory_space<vmem>>, vector<16x384xf32>,
    %c0_132 = arith.constant 0 : index
    %c61_133 = arith.constant 61 : index
    %121 = vector.load %arg7[%c0_132, %c61_133] : memref<16x640xf32, #tpu.memory_space<vmem>>, vector<16x384xf32>
    %c32_134 = arith.constant 32 : index
    %c0_135 = arith.constant 0 : index
    %122 = vector.load %arg8[%c32_134, %c0_135] : memref<784x384xf32, #tpu.memory_space<vmem>>, vector<16x384xf32>
    tpu.vector_store %arg8[%c32_134, %c0_135], %121 {strides = array<i32>} : memref<784x384xf32, #tpu.memory_space<vmem>>, vector<16x384xf32>,
    %c0_136 = arith.constant 0 : index
    %c62_137 = arith.constant 62 : index
    %123 = vector.load %arg7[%c0_136, %c62_137] : memref<16x640xf32, #tpu.memory_space<vmem>>, vector<16x384xf32>
    %c48_138 = arith.constant 48 : index
    %c0_139 = arith.constant 0 : index
    %124 = vector.load %arg8[%c48_138, %c0_139] : memref<784x384xf32, #tpu.memory_space<vmem>>, vector<16x384xf32>
    tpu.vector_store %arg8[%c48_138, %c0_139], %123 {strides = array<i32>} : memref<784x384xf32, #tpu.memory_space<vmem>>, vector<16x384xf32>,
    %c0_140 = arith.constant 0 : index
    %c63_141 = arith.constant 63 : index
    %125 = vector.load %arg7[%c0_140, %c63_141] : memref<16x640xf32, #tpu.memory_space<vmem>>, vector<16x384xf32>
    %c64_142 = arith.constant 64 : index
    %c0_143 = arith.constant 0 : index
    %126 = vector.load %arg8[%c64_142, %c0_143] : memref<784x384xf32, #tpu.memory_space<vmem>>, vector<16x384xf32>
    tpu.vector_store %arg8[%c64_142, %c0_143], %125 {strides = array<i32>} : memref<784x384xf32, #tpu.memory_space<vmem>>, vector<16x384xf32>,
    %c0_144 = arith.constant 0 : index
    %c64_145 = arith.constant 64 : index
    %127 = vector.load %arg7[%c0_144, %c64_145] : memref<16x640xf32, #tpu.memory_space<vmem>>, vector<16x384xf32>
    %c80_146 = arith.constant 80 : index
    %c0_147 = arith.constant 0 : index
    %128 = vector.load %arg8[%c80_146, %c0_147] : memref<784x384xf32, #tpu.memory_space<vmem>>, vector<16x384xf32>
    tpu.vector_store %arg8[%c80_146, %c0_147], %127 {strides = array<i32>} : memref<784x384xf32, #tpu.memory_space<vmem>>, vector<16x384xf32>,
    %c0_148 = arith.constant 0 : index
    %c65_149 = arith.constant 65 : index
    %129 = vector.load %arg7[%c0_148, %c65_149] : memref<16x640xf32, #tpu.memory_space<vmem>>, vector<16x384xf32>
    %c96_150 = arith.constant 96 : index
    %c0_151 = arith.constant 0 : index
    %130 = vector.load %arg8[%c96_150, %c0_151] : memref<784x384xf32, #tpu.memory_space<vmem>>, vector<16x384xf32>
    tpu.vector_store %arg8[%c96_150, %c0_151], %129 {strides = array<i32>} : memref<784x384xf32, #tpu.memory_space<vmem>>, vector<16x384xf32>,
    %c0_152 = arith.constant 0 : index
    %c81_153 = arith.constant 81 : index
    %131 = vector.load %arg7[%c0_152, %c81_153] : memref<16x640xf32, #tpu.memory_space<vmem>>, vector<16x384xf32>
    %c112_154 = arith.constant 112 : index
    %c0_155 = arith.constant 0 : index
    %132 = vector.load %arg8[%c112_154, %c0_155] : memref<784x384xf32, #tpu.memory_space<vmem>>, vector<16x384xf32>
    tpu.vector_store %arg8[%c112_154, %c0_155], %131 {strides = array<i32>} : memref<784x384xf32, #tpu.memory_space<vmem>>, vector<16x384xf32>,
    %c0_156 = arith.constant 0 : index
    %c82_157 = arith.constant 82 : index
    %133 = vector.load %arg7[%c0_156, %c82_157] : memref<16x640xf32, #tpu.memory_space<vmem>>, vector<16x384xf32>
    %c128_158 = arith.constant 128 : index
    %c0_159 = arith.constant 0 : index
    %134 = vector.load %arg8[%c128_158, %c0_159] : memref<784x384xf32, #tpu.memory_space<vmem>>, vector<16x384xf32>
    tpu.vector_store %arg8[%c128_158, %c0_159], %133 {strides = array<i32>} : memref<784x384xf32, #tpu.memory_space<vmem>>, vector<16x384xf32>,
    %c0_160 = arith.constant 0 : index
    %c83_161 = arith.constant 83 : index
    %135 = vector.load %arg7[%c0_160, %c83_161] : memref<16x640xf32, #tpu.memory_space<vmem>>, vector<16x384xf32>
    %c144_162 = arith.constant 144 : index
    %c0_163 = arith.constant 0 : index
    %136 = vector.load %arg8[%c144_162, %c0_163] : memref<784x384xf32, #tpu.memory_space<vmem>>, vector<16x384xf32>
    tpu.vector_store %arg8[%c144_162, %c0_163], %135 {strides = array<i32>} : memref<784x384xf32, #tpu.memory_space<vmem>>, vector<16x384xf32>,
    %c0_164 = arith.constant 0 : index
    %c84_165 = arith.constant 84 : index
    %137 = vector.load %arg7[%c0_164, %c84_165] : memref<16x640xf32, #tpu.memory_space<vmem>>, vector<16x384xf32>
    %c160_166 = arith.constant 160 : index
    %c0_167 = arith.constant 0 : index
    %138 = vector.load %arg8[%c160_166, %c0_167] : memref<784x384xf32, #tpu.memory_space<vmem>>, vector<16x384xf32>
    tpu.vector_store %arg8[%c160_166, %c0_167], %137 {strides = array<i32>} : memref<784x384xf32, #tpu.memory_space<vmem>>, vector<16x384xf32>,
    %c0_168 = arith.constant 0 : index
    %c85_169 = arith.constant 85 : index
    %139 = vector.load %arg7[%c0_168, %c85_169] : memref<16x640xf32, #tpu.memory_space<vmem>>, vector<16x384xf32>
    %c176_170 = arith.constant 176 : index
    %c0_171 = arith.constant 0 : index
    %140 = vector.load %arg8[%c176_170, %c0_171] : memref<784x384xf32, #tpu.memory_space<vmem>>, vector<16x384xf32>
    tpu.vector_store %arg8[%c176_170, %c0_171], %139 {strides = array<i32>} : memref<784x384xf32, #tpu.memory_space<vmem>>, vector<16x384xf32>,
    %c0_172 = arith.constant 0 : index
    %c86_173 = arith.constant 86 : index
    %141 = vector.load %arg7[%c0_172, %c86_173] : memref<16x640xf32, #tpu.memory_space<vmem>>, vector<16x384xf32>
    %c192_174 = arith.constant 192 : index
    %c0_175 = arith.constant 0 : index
    %142 = vector.load %arg8[%c192_174, %c0_175] : memref<784x384xf32, #tpu.memory_space<vmem>>, vector<16x384xf32>
    tpu.vector_store %arg8[%c192_174, %c0_175], %141 {strides = array<i32>} : memref<784x384xf32, #tpu.memory_space<vmem>>, vector<16x384xf32>,
    %c0_176 = arith.constant 0 : index
    %c87_177 = arith.constant 87 : index
    %143 = vector.load %arg7[%c0_176, %c87_177] : memref<16x640xf32, #tpu.memory_space<vmem>>, vector<16x384xf32>
    %c208_178 = arith.constant 208 : index
    %c0_179 = arith.constant 0 : index
    %144 = vector.load %arg8[%c208_178, %c0_179] : memref<784x384xf32, #tpu.memory_space<vmem>>, vector<16x384xf32>
    tpu.vector_store %arg8[%c208_178, %c0_179], %143 {strides = array<i32>} : memref<784x384xf32, #tpu.memory_space<vmem>>, vector<16x384xf32>,
    %c0_180 = arith.constant 0 : index
    %c103_181 = arith.constant 103 : index
    %145 = vector.load %arg7[%c0_180, %c103_181] : memref<16x640xf32, #tpu.memory_space<vmem>>, vector<16x384xf32>
    %c224_182 = arith.constant 224 : index
    %c0_183 = arith.constant 0 : index
    %146 = vector.load %arg8[%c224_182, %c0_183] : memref<784x384xf32, #tpu.memory_space<vmem>>, vector<16x384xf32>
    tpu.vector_store %arg8[%c224_182, %c0_183], %145 {strides = array<i32>} : memref<784x384xf32, #tpu.memory_space<vmem>>, vector<16x384xf32>,
    %c0_184 = arith.constant 0 : index
    %c104_185 = arith.constant 104 : index
    %147 = vector.load %arg7[%c0_184, %c104_185] : memref<16x640xf32, #tpu.memory_space<vmem>>, vector<16x384xf32>
    %c240_186 = arith.constant 240 : index
    %c0_187 = arith.constant 0 : index
    %148 = vector.load %arg8[%c240_186, %c0_187] : memref<784x384xf32, #tpu.memory_space<vmem>>, vector<16x384xf32>
    tpu.vector_store %arg8[%c240_186, %c0_187], %147 {strides = array<i32>} : memref<784x384xf32, #tpu.memory_space<vmem>>, vector<16x384xf32>,
    %c0_188 = arith.constant 0 : index
    %c105_189 = arith.constant 105 : index
    %149 = vector.load %arg7[%c0_188, %c105_189] : memref<16x640xf32, #tpu.memory_space<vmem>>, vector<16x384xf32>
    %c256_190 = arith.constant 256 : index
    %c0_191 = arith.constant 0 : index
    %150 = vector.load %arg8[%c256_190, %c0_191] : memref<784x384xf32, #tpu.memory_space<vmem>>, vector<16x384xf32>
    tpu.vector_store %arg8[%c256_190, %c0_191], %149 {strides = array<i32>} : memref<784x384xf32, #tpu.memory_space<vmem>>, vector<16x384xf32>,
    %c0_192 = arith.constant 0 : index
    %c106_193 = arith.constant 106 : index
    %151 = vector.load %arg7[%c0_192, %c106_193] : memref<16x640xf32, #tpu.memory_space<vmem>>, vector<16x384xf32>
    %c272_194 = arith.constant 272 : index
    %c0_195 = arith.constant 0 : index
    %152 = vector.load %arg8[%c272_194, %c0_195] : memref<784x384xf32, #tpu.memory_space<vmem>>, vector<16x384xf32>
    tpu.vector_store %arg8[%c272_194, %c0_195], %151 {strides = array<i32>} : memref<784x384xf32, #tpu.memory_space<vmem>>, vector<16x384xf32>,
    %c0_196 = arith.constant 0 : index
    %c107_197 = arith.constant 107 : index
    %153 = vector.load %arg7[%c0_196, %c107_197] : memref<16x640xf32, #tpu.memory_space<vmem>>, vector<16x384xf32>
    %c288_198 = arith.constant 288 : index
    %c0_199 = arith.constant 0 : index
    %154 = vector.load %arg8[%c288_198, %c0_199] : memref<784x384xf32, #tpu.memory_space<vmem>>, vector<16x384xf32>
    tpu.vector_store %arg8[%c288_198, %c0_199], %153 {strides = array<i32>} : memref<784x384xf32, #tpu.memory_space<vmem>>, vector<16x384xf32>,
    %c0_200 = arith.constant 0 : index
    %c108_201 = arith.constant 108 : index
    %155 = vector.load %arg7[%c0_200, %c108_201] : memref<16x640xf32, #tpu.memory_space<vmem>>, vector<16x384xf32>
    %c304_202 = arith.constant 304 : index
    %c0_203 = arith.constant 0 : index
    %156 = vector.load %arg8[%c304_202, %c0_203] : memref<784x384xf32, #tpu.memory_space<vmem>>, vector<16x384xf32>
    tpu.vector_store %arg8[%c304_202, %c0_203], %155 {strides = array<i32>} : memref<784x384xf32, #tpu.memory_space<vmem>>, vector<16x384xf32>,
    %c0_204 = arith.constant 0 : index
    %c109_205 = arith.constant 109 : index
    %157 = vector.load %arg7[%c0_204, %c109_205] : memref<16x640xf32, #tpu.memory_space<vmem>>, vector<16x384xf32>
    %c320_206 = arith.constant 320 : index
    %c0_207 = arith.constant 0 : index
    %158 = vector.load %arg8[%c320_206, %c0_207] : memref<784x384xf32, #tpu.memory_space<vmem>>, vector<16x384xf32>
    tpu.vector_store %arg8[%c320_206, %c0_207], %157 {strides = array<i32>} : memref<784x384xf32, #tpu.memory_space<vmem>>, vector<16x384xf32>,
    %c0_208 = arith.constant 0 : index
    %c125_209 = arith.constant 125 : index
    %159 = vector.load %arg7[%c0_208, %c125_209] : memref<16x640xf32, #tpu.memory_space<vmem>>, vector<16x384xf32>
    %c336_210 = arith.constant 336 : index
    %c0_211 = arith.constant 0 : index
    %160 = vector.load %arg8[%c336_210, %c0_211] : memref<784x384xf32, #tpu.memory_space<vmem>>, vector<16x384xf32>
    tpu.vector_store %arg8[%c336_210, %c0_211], %159 {strides = array<i32>} : memref<784x384xf32, #tpu.memory_space<vmem>>, vector<16x384xf32>,
    %c0_212 = arith.constant 0 : index
    %c126_213 = arith.constant 126 : index
    %161 = vector.load %arg7[%c0_212, %c126_213] : memref<16x640xf32, #tpu.memory_space<vmem>>, vector<16x384xf32>
    %c352_214 = arith.constant 352 : index
    %c0_215 = arith.constant 0 : index
    %162 = vector.load %arg8[%c352_214, %c0_215] : memref<784x384xf32, #tpu.memory_space<vmem>>, vector<16x384xf32>
    tpu.vector_store %arg8[%c352_214, %c0_215], %161 {strides = array<i32>} : memref<784x384xf32, #tpu.memory_space<vmem>>, vector<16x384xf32>,
    %c0_216 = arith.constant 0 : index
    %c127_217 = arith.constant 127 : index
    %163 = vector.load %arg7[%c0_216, %c127_217] : memref<16x640xf32, #tpu.memory_space<vmem>>, vector<16x384xf32>
    %c368_218 = arith.constant 368 : index
    %c0_219 = arith.constant 0 : index
    %164 = vector.load %arg8[%c368_218, %c0_219] : memref<784x384xf32, #tpu.memory_space<vmem>>, vector<16x384xf32>
    tpu.vector_store %arg8[%c368_218, %c0_219], %163 {strides = array<i32>} : memref<784x384xf32, #tpu.memory_space<vmem>>, vector<16x384xf32>,
    %c0_220 = arith.constant 0 : index
    %c128_221 = arith.constant 128 : index
    %165 = vector.load %arg7[%c0_220, %c128_221] : memref<16x640xf32, #tpu.memory_space<vmem>>, vector<16x384xf32>
    %c384_222 = arith.constant 384 : index
    %c0_223 = arith.constant 0 : index
    %166 = vector.load %arg8[%c384_222, %c0_223] : memref<784x384xf32, #tpu.memory_space<vmem>>, vector<16x384xf32>
    tpu.vector_store %arg8[%c384_222, %c0_223], %165 {strides = array<i32>} : memref<784x384xf32, #tpu.memory_space<vmem>>, vector<16x384xf32>,
    %c0_224 = arith.constant 0 : index
    %c129_225 = arith.constant 129 : index
    %167 = vector.load %arg7[%c0_224, %c129_225] : memref<16x640xf32, #tpu.memory_space<vmem>>, vector<16x384xf32>
    %c400_226 = arith.constant 400 : index
    %c0_227 = arith.constant 0 : index
    %168 = vector.load %arg8[%c400_226, %c0_227] : memref<784x384xf32, #tpu.memory_space<vmem>>, vector<16x384xf32>
    tpu.vector_store %arg8[%c400_226, %c0_227], %167 {strides = array<i32>} : memref<784x384xf32, #tpu.memory_space<vmem>>, vector<16x384xf32>,
    %c0_228 = arith.constant 0 : index
    %c130_229 = arith.constant 130 : index
    %169 = vector.load %arg7[%c0_228, %c130_229] : memref<16x640xf32, #tpu.memory_space<vmem>>, vector<16x384xf32>
    %c416_230 = arith.constant 416 : index
    %c0_231 = arith.constant 0 : index
    %170 = vector.load %arg8[%c416_230, %c0_231] : memref<784x384xf32, #tpu.memory_space<vmem>>, vector<16x384xf32>
    tpu.vector_store %arg8[%c416_230, %c0_231], %169 {strides = array<i32>} : memref<784x384xf32, #tpu.memory_space<vmem>>, vector<16x384xf32>,
    %c0_232 = arith.constant 0 : index
    %c131_233 = arith.constant 131 : index
    %171 = vector.load %arg7[%c0_232, %c131_233] : memref<16x640xf32, #tpu.memory_space<vmem>>, vector<16x384xf32>
    %c432_234 = arith.constant 432 : index
    %c0_235 = arith.constant 0 : index
    %172 = vector.load %arg8[%c432_234, %c0_235] : memref<784x384xf32, #tpu.memory_space<vmem>>, vector<16x384xf32>
    tpu.vector_store %arg8[%c432_234, %c0_235], %171 {strides = array<i32>} : memref<784x384xf32, #tpu.memory_space<vmem>>, vector<16x384xf32>,
    %c0_236 = arith.constant 0 : index
    %c147_237 = arith.constant 147 : index
    %173 = vector.load %arg7[%c0_236, %c147_237] : memref<16x640xf32, #tpu.memory_space<vmem>>, vector<16x384xf32>
    %c448_238 = arith.constant 448 : index
    %c0_239 = arith.constant 0 : index
    %174 = vector.load %arg8[%c448_238, %c0_239] : memref<784x384xf32, #tpu.memory_space<vmem>>, vector<16x384xf32>
    tpu.vector_store %arg8[%c448_238, %c0_239], %173 {strides = array<i32>} : memref<784x384xf32, #tpu.memory_space<vmem>>, vector<16x384xf32>,
    %c0_240 = arith.constant 0 : index
    %c148_241 = arith.constant 148 : index
    %175 = vector.load %arg7[%c0_240, %c148_241] : memref<16x640xf32, #tpu.memory_space<vmem>>, vector<16x384xf32>
    %c464_242 = arith.constant 464 : index
    %c0_243 = arith.constant 0 : index
    %176 = vector.load %arg8[%c464_242, %c0_243] : memref<784x384xf32, #tpu.memory_space<vmem>>, vector<16x384xf32>
    tpu.vector_store %arg8[%c464_242, %c0_243], %175 {strides = array<i32>} : memref<784x384xf32, #tpu.memory_space<vmem>>, vector<16x384xf32>,
    %c0_244 = arith.constant 0 : index
    %c149_245 = arith.constant 149 : index
    %177 = vector.load %arg7[%c0_244, %c149_245] : memref<16x640xf32, #tpu.memory_space<vmem>>, vector<16x384xf32>
    %c480_246 = arith.constant 480 : index
    %c0_247 = arith.constant 0 : index
    %178 = vector.load %arg8[%c480_246, %c0_247] : memref<784x384xf32, #tpu.memory_space<vmem>>, vector<16x384xf32>
    tpu.vector_store %arg8[%c480_246, %c0_247], %177 {strides = array<i32>} : memref<784x384xf32, #tpu.memory_space<vmem>>, vector<16x384xf32>,
    %c0_248 = arith.constant 0 : index
    %c150_249 = arith.constant 150 : index
    %179 = vector.load %arg7[%c0_248, %c150_249] : memref<16x640xf32, #tpu.memory_space<vmem>>, vector<16x384xf32>
    %c496_250 = arith.constant 496 : index
    %c0_251 = arith.constant 0 : index
    %180 = vector.load %arg8[%c496_250, %c0_251] : memref<784x384xf32, #tpu.memory_space<vmem>>, vector<16x384xf32>
    tpu.vector_store %arg8[%c496_250, %c0_251], %179 {strides = array<i32>} : memref<784x384xf32, #tpu.memory_space<vmem>>, vector<16x384xf32>,
    %c0_252 = arith.constant 0 : index
    %c151_253 = arith.constant 151 : index
    %181 = vector.load %arg7[%c0_252, %c151_253] : memref<16x640xf32, #tpu.memory_space<vmem>>, vector<16x384xf32>
    %c512_254 = arith.constant 512 : index
    %c0_255 = arith.constant 0 : index
    %182 = vector.load %arg8[%c512_254, %c0_255] : memref<784x384xf32, #tpu.memory_space<vmem>>, vector<16x384xf32>
    tpu.vector_store %arg8[%c512_254, %c0_255], %181 {strides = array<i32>} : memref<784x384xf32, #tpu.memory_space<vmem>>, vector<16x384xf32>,
    %c0_256 = arith.constant 0 : index
    %c152_257 = arith.constant 152 : index
    %183 = vector.load %arg7[%c0_256, %c152_257] : memref<16x640xf32, #tpu.memory_space<vmem>>, vector<16x384xf32>
    %c528_258 = arith.constant 528 : index
    %c0_259 = arith.constant 0 : index
    %184 = vector.load %arg8[%c528_258, %c0_259] : memref<784x384xf32, #tpu.memory_space<vmem>>, vector<16x384xf32>
    tpu.vector_store %arg8[%c528_258, %c0_259], %183 {strides = array<i32>} : memref<784x384xf32, #tpu.memory_space<vmem>>, vector<16x384xf32>,
    %c0_260 = arith.constant 0 : index
    %c153_261 = arith.constant 153 : index
    %185 = vector.load %arg7[%c0_260, %c153_261] : memref<16x640xf32, #tpu.memory_space<vmem>>, vector<16x384xf32>
    %c544_262 = arith.constant 544 : index
    %c0_263 = arith.constant 0 : index
    %186 = vector.load %arg8[%c544_262, %c0_263] : memref<784x384xf32, #tpu.memory_space<vmem>>, vector<16x384xf32>
    tpu.vector_store %arg8[%c544_262, %c0_263], %185 {strides = array<i32>} : memref<784x384xf32, #tpu.memory_space<vmem>>, vector<16x384xf32>,
    %c0_264 = arith.constant 0 : index
    %c169_265 = arith.constant 169 : index
    %187 = vector.load %arg7[%c0_264, %c169_265] : memref<16x640xf32, #tpu.memory_space<vmem>>, vector<16x384xf32>
    %c560_266 = arith.constant 560 : index
    %c0_267 = arith.constant 0 : index
    %188 = vector.load %arg8[%c560_266, %c0_267] : memref<784x384xf32, #tpu.memory_space<vmem>>, vector<16x384xf32>
    tpu.vector_store %arg8[%c560_266, %c0_267], %187 {strides = array<i32>} : memref<784x384xf32, #tpu.memory_space<vmem>>, vector<16x384xf32>,
    %c0_268 = arith.constant 0 : index
    %c170_269 = arith.constant 170 : index
    %189 = vector.load %arg7[%c0_268, %c170_269] : memref<16x640xf32, #tpu.memory_space<vmem>>, vector<16x384xf32>
    %c576_270 = arith.constant 576 : index
    %c0_271 = arith.constant 0 : index
    %190 = vector.load %arg8[%c576_270, %c0_271] : memref<784x384xf32, #tpu.memory_space<vmem>>, vector<16x384xf32>
    tpu.vector_store %arg8[%c576_270, %c0_271], %189 {strides = array<i32>} : memref<784x384xf32, #tpu.memory_space<vmem>>, vector<16x384xf32>,
    %c0_272 = arith.constant 0 : index
    %c171_273 = arith.constant 171 : index
    %191 = vector.load %arg7[%c0_272, %c171_273] : memref<16x640xf32, #tpu.memory_space<vmem>>, vector<16x384xf32>
    %c592_274 = arith.constant 592 : index
    %c0_275 = arith.constant 0 : index
    %192 = vector.load %arg8[%c592_274, %c0_275] : memref<784x384xf32, #tpu.memory_space<vmem>>, vector<16x384xf32>
    tpu.vector_store %arg8[%c592_274, %c0_275], %191 {strides = array<i32>} : memref<784x384xf32, #tpu.memory_space<vmem>>, vector<16x384xf32>,
    %c0_276 = arith.constant 0 : index
    %c172_277 = arith.constant 172 : index
    %193 = vector.load %arg7[%c0_276, %c172_277] : memref<16x640xf32, #tpu.memory_space<vmem>>, vector<16x384xf32>
    %c608_278 = arith.constant 608 : index
    %c0_279 = arith.constant 0 : index
    %194 = vector.load %arg8[%c608_278, %c0_279] : memref<784x384xf32, #tpu.memory_space<vmem>>, vector<16x384xf32>
    tpu.vector_store %arg8[%c608_278, %c0_279], %193 {strides = array<i32>} : memref<784x384xf32, #tpu.memory_space<vmem>>, vector<16x384xf32>,
    %c0_280 = arith.constant 0 : index
    %c173_281 = arith.constant 173 : index
    %195 = vector.load %arg7[%c0_280, %c173_281] : memref<16x640xf32, #tpu.memory_space<vmem>>, vector<16x384xf32>
    %c624_282 = arith.constant 624 : index
    %c0_283 = arith.constant 0 : index
    %196 = vector.load %arg8[%c624_282, %c0_283] : memref<784x384xf32, #tpu.memory_space<vmem>>, vector<16x384xf32>
    tpu.vector_store %arg8[%c624_282, %c0_283], %195 {strides = array<i32>} : memref<784x384xf32, #tpu.memory_space<vmem>>, vector<16x384xf32>,
    %c0_284 = arith.constant 0 : index
    %c174_285 = arith.constant 174 : index
    %197 = vector.load %arg7[%c0_284, %c174_285] : memref<16x640xf32, #tpu.memory_space<vmem>>, vector<16x384xf32>
    %c640_286 = arith.constant 640 : index
    %c0_287 = arith.constant 0 : index
    %198 = vector.load %arg8[%c640_286, %c0_287] : memref<784x384xf32, #tpu.memory_space<vmem>>, vector<16x384xf32>
    tpu.vector_store %arg8[%c640_286, %c0_287], %197 {strides = array<i32>} : memref<784x384xf32, #tpu.memory_space<vmem>>, vector<16x384xf32>,
    %c0_288 = arith.constant 0 : index
    %c175_289 = arith.constant 175 : index
    %199 = vector.load %arg7[%c0_288, %c175_289] : memref<16x640xf32, #tpu.memory_space<vmem>>, vector<16x384xf32>
    %c656_290 = arith.constant 656 : index
    %c0_291 = arith.constant 0 : index
    %200 = vector.load %arg8[%c656_290, %c0_291] : memref<784x384xf32, #tpu.memory_space<vmem>>, vector<16x384xf32>
    tpu.vector_store %arg8[%c656_290, %c0_291], %199 {strides = array<i32>} : memref<784x384xf32, #tpu.memory_space<vmem>>, vector<16x384xf32>,
    %c0_292 = arith.constant 0 : index
    %c191_293 = arith.constant 191 : index
    %201 = vector.load %arg7[%c0_292, %c191_293] : memref<16x640xf32, #tpu.memory_space<vmem>>, vector<16x384xf32>
    %c672_294 = arith.constant 672 : index
    %c0_295 = arith.constant 0 : index
    %202 = vector.load %arg8[%c672_294, %c0_295] : memref<784x384xf32, #tpu.memory_space<vmem>>, vector<16x384xf32>
    tpu.vector_store %arg8[%c672_294, %c0_295], %201 {strides = array<i32>} : memref<784x384xf32, #tpu.memory_space<vmem>>, vector<16x384xf32>,
    %c0_296 = arith.constant 0 : index
    %c192_297 = arith.constant 192 : index
    %203 = vector.load %arg7[%c0_296, %c192_297] : memref<16x640xf32, #tpu.memory_space<vmem>>, vector<16x384xf32>
    %c688_298 = arith.constant 688 : index
    %c0_299 = arith.constant 0 : index
    %204 = vector.load %arg8[%c688_298, %c0_299] : memref<784x384xf32, #tpu.memory_space<vmem>>, vector<16x384xf32>
    tpu.vector_store %arg8[%c688_298, %c0_299], %203 {strides = array<i32>} : memref<784x384xf32, #tpu.memory_space<vmem>>, vector<16x384xf32>,
    %c0_300 = arith.constant 0 : index
    %c193_301 = arith.constant 193 : index
    %205 = vector.load %arg7[%c0_300, %c193_301] : memref<16x640xf32, #tpu.memory_space<vmem>>, vector<16x384xf32>
    %c704_302 = arith.constant 704 : index
    %c0_303 = arith.constant 0 : index
    %206 = vector.load %arg8[%c704_302, %c0_303] : memref<784x384xf32, #tpu.memory_space<vmem>>, vector<16x384xf32>
    tpu.vector_store %arg8[%c704_302, %c0_303], %205 {strides = array<i32>} : memref<784x384xf32, #tpu.memory_space<vmem>>, vector<16x384xf32>,
    %c0_304 = arith.constant 0 : index
    %c194_305 = arith.constant 194 : index
    %207 = vector.load %arg7[%c0_304, %c194_305] : memref<16x640xf32, #tpu.memory_space<vmem>>, vector<16x384xf32>
    %c720_306 = arith.constant 720 : index
    %c0_307 = arith.constant 0 : index
    %208 = vector.load %arg8[%c720_306, %c0_307] : memref<784x384xf32, #tpu.memory_space<vmem>>, vector<16x384xf32>
    tpu.vector_store %arg8[%c720_306, %c0_307], %207 {strides = array<i32>} : memref<784x384xf32, #tpu.memory_space<vmem>>, vector<16x384xf32>,
    %c0_308 = arith.constant 0 : index
    %c195_309 = arith.constant 195 : index
    %209 = vector.load %arg7[%c0_308, %c195_309] : memref<16x640xf32, #tpu.memory_space<vmem>>, vector<16x384xf32>
    %c736_310 = arith.constant 736 : index
    %c0_311 = arith.constant 0 : index
    %210 = vector.load %arg8[%c736_310, %c0_311] : memref<784x384xf32, #tpu.memory_space<vmem>>, vector<16x384xf32>
    tpu.vector_store %arg8[%c736_310, %c0_311], %209 {strides = array<i32>} : memref<784x384xf32, #tpu.memory_space<vmem>>, vector<16x384xf32>,
    %c0_312 = arith.constant 0 : index
    %c196_313 = arith.constant 196 : index
    %211 = vector.load %arg7[%c0_312, %c196_313] : memref<16x640xf32, #tpu.memory_space<vmem>>, vector<16x384xf32>
    %c752_314 = arith.constant 752 : index
    %c0_315 = arith.constant 0 : index
    %212 = vector.load %arg8[%c752_314, %c0_315] : memref<784x384xf32, #tpu.memory_space<vmem>>, vector<16x384xf32>
    tpu.vector_store %arg8[%c752_314, %c0_315], %211 {strides = array<i32>} : memref<784x384xf32, #tpu.memory_space<vmem>>, vector<16x384xf32>,
    %c0_316 = arith.constant 0 : index
    %c197_317 = arith.constant 197 : index
    %213 = vector.load %arg7[%c0_316, %c197_317] : memref<16x640xf32, #tpu.memory_space<vmem>>, vector<16x384xf32>
    %c768_318 = arith.constant 768 : index
    %c0_319 = arith.constant 0 : index
    %214 = vector.load %arg8[%c768_318, %c0_319] : memref<784x384xf32, #tpu.memory_space<vmem>>, vector<16x384xf32>
    tpu.vector_store %arg8[%c768_318, %c0_319], %213 {strides = array<i32>} : memref<784x384xf32, #tpu.memory_space<vmem>>, vector<16x384xf32>,
    %c1 = arith.constant 1 : index
    %c0_320 = arith.constant 0 : index
    %c0_321 = arith.constant 0 : index
    %215 = vector.load %arg3[%c1, %c0_320, %c0_321] : memref<3x16x784xf32, #tpu.memory_space<vmem>>, vector<1x16x784xf32>
    %216 = vector.shape_cast %215 : vector<1x16x784xf32> to vector<16x784xf32>
    %c0_322 = arith.constant 0 : index
    %c0_323 = arith.constant 0 : index
    %217 = vector.load %arg8[%c0_322, %c0_323] : memref<784x384xf32, #tpu.memory_space<vmem>>, vector<784x384xf32>
    %cst_324 = arith.constant dense<0.000000e+00> : vector<16x384xf32>
    %218 = tpu.matmul %216, %217, %cst_324 {dimension_numbers = #tpu.dot_dimension_numbers<[1], [0], [0], [1], [0, 0, 1, 1], [], []>} : vector<16x784xf32>, vector<784x384xf32>, vector<16x384xf32> -> vector<16x384xf32>
    %c1_325 = arith.constant 1 : index
    %c0_326 = arith.constant 0 : index
    %c0_327 = arith.constant 0 : index
    %219 = vector.load %arg4[%c1_325, %c0_326, %c0_327] : memref<3x16x1xf32, #tpu.memory_space<vmem>>, vector<1x16x1xf32>
    %220 = vector.shape_cast %219 : vector<1x16x1xf32> to vector<16x1xf32>
    %221 = vector.broadcast %220 : vector<16x1xf32> to vector<16x384xf32>
    %222 = arith.addf %218, %221 : vector<16x384xf32>
    %223 = vector.broadcast %4 : vector<1x384xf32> to vector<16x384xf32>
    %224 = arith.mulf %222, %223 : vector<16x384xf32>
    %c0_328 = arith.constant 0 : index
    %c0_329 = arith.constant 0 : index
    %c0_330 = arith.constant 0 : index
    %225 = vector.load %arg2[%c0_328, %c0_329, %c0_330] : memref<1x16x384xf32, #tpu.memory_space<vmem>>, vector<1x16x384xf32>
    %226 = vector.shape_cast %225 : vector<1x16x384xf32> to vector<16x384xf32>
    %227 = arith.addf %224, %226 : vector<16x384xf32>
    %cst_331 = arith.constant 0.000000e+00 : f32
    %228 = vector.broadcast %cst_331 : f32 to vector<16x384xf32>
    %229 = arith.maximumf %227, %228 : vector<16x384xf32>
    %c0_332 = arith.constant 0 : index
    %c128_333 = arith.constant 128 : index
    %230 = vector.load %arg7[%c0_332, %c128_333] : memref<16x640xf32, #tpu.memory_space<vmem>>, vector<16x384xf32>
    tpu.vector_store %arg7[%c0_332, %c128_333], %229 {strides = array<i32>} : memref<16x640xf32, #tpu.memory_space<vmem>>, vector<16x384xf32>,
    %c0_334 = arith.constant 0 : index
    %c59_335 = arith.constant 59 : index
    %231 = vector.load %arg7[%c0_334, %c59_335] : memref<16x640xf32, #tpu.memory_space<vmem>>, vector<16x384xf32>
    %c0_336 = arith.constant 0 : index
    %c0_337 = arith.constant 0 : index
    %232 = vector.load %arg8[%c0_336, %c0_337] : memref<784x384xf32, #tpu.memory_space<vmem>>, vector<16x384xf32>
    tpu.vector_store %arg8[%c0_336, %c0_337], %231 {strides = array<i32>} : memref<784x384xf32, #tpu.memory_space<vmem>>, vector<16x384xf32>,
    %c0_338 = arith.constant 0 : index
    %c60_339 = arith.constant 60 : index
    %233 = vector.load %arg7[%c0_338, %c60_339] : memref<16x640xf32, #tpu.memory_space<vmem>>, vector<16x384xf32>
    %c16_340 = arith.constant 16 : index
    %c0_341 = arith.constant 0 : index
    %234 = vector.load %arg8[%c16_340, %c0_341] : memref<784x384xf32, #tpu.memory_space<vmem>>, vector<16x384xf32>
    tpu.vector_store %arg8[%c16_340, %c0_341], %233 {strides = array<i32>} : memref<784x384xf32, #tpu.memory_space<vmem>>, vector<16x384xf32>,
    %c0_342 = arith.constant 0 : index
    %c61_343 = arith.constant 61 : index
    %235 = vector.load %arg7[%c0_342, %c61_343] : memref<16x640xf32, #tpu.memory_space<vmem>>, vector<16x384xf32>
    %c32_344 = arith.constant 32 : index
    %c0_345 = arith.constant 0 : index
    %236 = vector.load %arg8[%c32_344, %c0_345] : memref<784x384xf32, #tpu.memory_space<vmem>>, vector<16x384xf32>
    tpu.vector_store %arg8[%c32_344, %c0_345], %235 {strides = array<i32>} : memref<784x384xf32, #tpu.memory_space<vmem>>, vector<16x384xf32>,
    %c0_346 = arith.constant 0 : index
    %c62_347 = arith.constant 62 : index
    %237 = vector.load %arg7[%c0_346, %c62_347] : memref<16x640xf32, #tpu.memory_space<vmem>>, vector<16x384xf32>
    %c48_348 = arith.constant 48 : index
    %c0_349 = arith.constant 0 : index
    %238 = vector.load %arg8[%c48_348, %c0_349] : memref<784x384xf32, #tpu.memory_space<vmem>>, vector<16x384xf32>
    tpu.vector_store %arg8[%c48_348, %c0_349], %237 {strides = array<i32>} : memref<784x384xf32, #tpu.memory_space<vmem>>, vector<16x384xf32>,
    %c0_350 = arith.constant 0 : index
    %c63_351 = arith.constant 63 : index
    %239 = vector.load %arg7[%c0_350, %c63_351] : memref<16x640xf32, #tpu.memory_space<vmem>>, vector<16x384xf32>
    %c64_352 = arith.constant 64 : index
    %c0_353 = arith.constant 0 : index
    %240 = vector.load %arg8[%c64_352, %c0_353] : memref<784x384xf32, #tpu.memory_space<vmem>>, vector<16x384xf32>
    tpu.vector_store %arg8[%c64_352, %c0_353], %239 {strides = array<i32>} : memref<784x384xf32, #tpu.memory_space<vmem>>, vector<16x384xf32>,
    %c0_354 = arith.constant 0 : index
    %c64_355 = arith.constant 64 : index
    %241 = vector.load %arg7[%c0_354, %c64_355] : memref<16x640xf32, #tpu.memory_space<vmem>>, vector<16x384xf32>
    %c80_356 = arith.constant 80 : index
    %c0_357 = arith.constant 0 : index
    %242 = vector.load %arg8[%c80_356, %c0_357] : memref<784x384xf32, #tpu.memory_space<vmem>>, vector<16x384xf32>
    tpu.vector_store %arg8[%c80_356, %c0_357], %241 {strides = array<i32>} : memref<784x384xf32, #tpu.memory_space<vmem>>, vector<16x384xf32>,
    %c0_358 = arith.constant 0 : index
    %c65_359 = arith.constant 65 : index
    %243 = vector.load %arg7[%c0_358, %c65_359] : memref<16x640xf32, #tpu.memory_space<vmem>>, vector<16x384xf32>
    %c96_360 = arith.constant 96 : index
    %c0_361 = arith.constant 0 : index
    %244 = vector.load %arg8[%c96_360, %c0_361] : memref<784x384xf32, #tpu.memory_space<vmem>>, vector<16x384xf32>
    tpu.vector_store %arg8[%c96_360, %c0_361], %243 {strides = array<i32>} : memref<784x384xf32, #tpu.memory_space<vmem>>, vector<16x384xf32>,
    %c0_362 = arith.constant 0 : index
    %c81_363 = arith.constant 81 : index
    %245 = vector.load %arg7[%c0_362, %c81_363] : memref<16x640xf32, #tpu.memory_space<vmem>>, vector<16x384xf32>
    %c112_364 = arith.constant 112 : index
    %c0_365 = arith.constant 0 : index
    %246 = vector.load %arg8[%c112_364, %c0_365] : memref<784x384xf32, #tpu.memory_space<vmem>>, vector<16x384xf32>
    tpu.vector_store %arg8[%c112_364, %c0_365], %245 {strides = array<i32>} : memref<784x384xf32, #tpu.memory_space<vmem>>, vector<16x384xf32>,
    %c0_366 = arith.constant 0 : index
    %c82_367 = arith.constant 82 : index
    %247 = vector.load %arg7[%c0_366, %c82_367] : memref<16x640xf32, #tpu.memory_space<vmem>>, vector<16x384xf32>
    %c128_368 = arith.constant 128 : index
    %c0_369 = arith.constant 0 : index
    %248 = vector.load %arg8[%c128_368, %c0_369] : memref<784x384xf32, #tpu.memory_space<vmem>>, vector<16x384xf32>
    tpu.vector_store %arg8[%c128_368, %c0_369], %247 {strides = array<i32>} : memref<784x384xf32, #tpu.memory_space<vmem>>, vector<16x384xf32>,
    %c0_370 = arith.constant 0 : index
    %c83_371 = arith.constant 83 : index
    %249 = vector.load %arg7[%c0_370, %c83_371] : memref<16x640xf32, #tpu.memory_space<vmem>>, vector<16x384xf32>
    %c144_372 = arith.constant 144 : index
    %c0_373 = arith.constant 0 : index
    %250 = vector.load %arg8[%c144_372, %c0_373] : memref<784x384xf32, #tpu.memory_space<vmem>>, vector<16x384xf32>
    tpu.vector_store %arg8[%c144_372, %c0_373], %249 {strides = array<i32>} : memref<784x384xf32, #tpu.memory_space<vmem>>, vector<16x384xf32>,
    %c0_374 = arith.constant 0 : index
    %c84_375 = arith.constant 84 : index
    %251 = vector.load %arg7[%c0_374, %c84_375] : memref<16x640xf32, #tpu.memory_space<vmem>>, vector<16x384xf32>
    %c160_376 = arith.constant 160 : index
    %c0_377 = arith.constant 0 : index
    %252 = vector.load %arg8[%c160_376, %c0_377] : memref<784x384xf32, #tpu.memory_space<vmem>>, vector<16x384xf32>
    tpu.vector_store %arg8[%c160_376, %c0_377], %251 {strides = array<i32>} : memref<784x384xf32, #tpu.memory_space<vmem>>, vector<16x384xf32>,
    %c0_378 = arith.constant 0 : index
    %c85_379 = arith.constant 85 : index
    %253 = vector.load %arg7[%c0_378, %c85_379] : memref<16x640xf32, #tpu.memory_space<vmem>>, vector<16x384xf32>
    %c176_380 = arith.constant 176 : index
    %c0_381 = arith.constant 0 : index
    %254 = vector.load %arg8[%c176_380, %c0_381] : memref<784x384xf32, #tpu.memory_space<vmem>>, vector<16x384xf32>
    tpu.vector_store %arg8[%c176_380, %c0_381], %253 {strides = array<i32>} : memref<784x384xf32, #tpu.memory_space<vmem>>, vector<16x384xf32>,
    %c0_382 = arith.constant 0 : index
    %c86_383 = arith.constant 86 : index
    %255 = vector.load %arg7[%c0_382, %c86_383] : memref<16x640xf32, #tpu.memory_space<vmem>>, vector<16x384xf32>
    %c192_384 = arith.constant 192 : index
    %c0_385 = arith.constant 0 : index
    %256 = vector.load %arg8[%c192_384, %c0_385] : memref<784x384xf32, #tpu.memory_space<vmem>>, vector<16x384xf32>
    tpu.vector_store %arg8[%c192_384, %c0_385], %255 {strides = array<i32>} : memref<784x384xf32, #tpu.memory_space<vmem>>, vector<16x384xf32>,
    %c0_386 = arith.constant 0 : index
    %c87_387 = arith.constant 87 : index
    %257 = vector.load %arg7[%c0_386, %c87_387] : memref<16x640xf32, #tpu.memory_space<vmem>>, vector<16x384xf32>
    %c208_388 = arith.constant 208 : index
    %c0_389 = arith.constant 0 : index
    %258 = vector.load %arg8[%c208_388, %c0_389] : memref<784x384xf32, #tpu.memory_space<vmem>>, vector<16x384xf32>
    tpu.vector_store %arg8[%c208_388, %c0_389], %257 {strides = array<i32>} : memref<784x384xf32, #tpu.memory_space<vmem>>, vector<16x384xf32>,
    %c0_390 = arith.constant 0 : index
    %c103_391 = arith.constant 103 : index
    %259 = vector.load %arg7[%c0_390, %c103_391] : memref<16x640xf32, #tpu.memory_space<vmem>>, vector<16x384xf32>
    %c224_392 = arith.constant 224 : index
    %c0_393 = arith.constant 0 : index
    %260 = vector.load %arg8[%c224_392, %c0_393] : memref<784x384xf32, #tpu.memory_space<vmem>>, vector<16x384xf32>
    tpu.vector_store %arg8[%c224_392, %c0_393], %259 {strides = array<i32>} : memref<784x384xf32, #tpu.memory_space<vmem>>, vector<16x384xf32>,
    %c0_394 = arith.constant 0 : index
    %c104_395 = arith.constant 104 : index
    %261 = vector.load %arg7[%c0_394, %c104_395] : memref<16x640xf32, #tpu.memory_space<vmem>>, vector<16x384xf32>
    %c240_396 = arith.constant 240 : index
    %c0_397 = arith.constant 0 : index
    %262 = vector.load %arg8[%c240_396, %c0_397] : memref<784x384xf32, #tpu.memory_space<vmem>>, vector<16x384xf32>
    tpu.vector_store %arg8[%c240_396, %c0_397], %261 {strides = array<i32>} : memref<784x384xf32, #tpu.memory_space<vmem>>, vector<16x384xf32>,
    %c0_398 = arith.constant 0 : index
    %c105_399 = arith.constant 105 : index
    %263 = vector.load %arg7[%c0_398, %c105_399] : memref<16x640xf32, #tpu.memory_space<vmem>>, vector<16x384xf32>
    %c256_400 = arith.constant 256 : index
    %c0_401 = arith.constant 0 : index
    %264 = vector.load %arg8[%c256_400, %c0_401] : memref<784x384xf32, #tpu.memory_space<vmem>>, vector<16x384xf32>
    tpu.vector_store %arg8[%c256_400, %c0_401], %263 {strides = array<i32>} : memref<784x384xf32, #tpu.memory_space<vmem>>, vector<16x384xf32>,
    %c0_402 = arith.constant 0 : index
    %c106_403 = arith.constant 106 : index
    %265 = vector.load %arg7[%c0_402, %c106_403] : memref<16x640xf32, #tpu.memory_space<vmem>>, vector<16x384xf32>
    %c272_404 = arith.constant 272 : index
    %c0_405 = arith.constant 0 : index
    %266 = vector.load %arg8[%c272_404, %c0_405] : memref<784x384xf32, #tpu.memory_space<vmem>>, vector<16x384xf32>
    tpu.vector_store %arg8[%c272_404, %c0_405], %265 {strides = array<i32>} : memref<784x384xf32, #tpu.memory_space<vmem>>, vector<16x384xf32>,
    %c0_406 = arith.constant 0 : index
    %c107_407 = arith.constant 107 : index
    %267 = vector.load %arg7[%c0_406, %c107_407] : memref<16x640xf32, #tpu.memory_space<vmem>>, vector<16x384xf32>
    %c288_408 = arith.constant 288 : index
    %c0_409 = arith.constant 0 : index
    %268 = vector.load %arg8[%c288_408, %c0_409] : memref<784x384xf32, #tpu.memory_space<vmem>>, vector<16x384xf32>
    tpu.vector_store %arg8[%c288_408, %c0_409], %267 {strides = array<i32>} : memref<784x384xf32, #tpu.memory_space<vmem>>, vector<16x384xf32>,
    %c0_410 = arith.constant 0 : index
    %c108_411 = arith.constant 108 : index
    %269 = vector.load %arg7[%c0_410, %c108_411] : memref<16x640xf32, #tpu.memory_space<vmem>>, vector<16x384xf32>
    %c304_412 = arith.constant 304 : index
    %c0_413 = arith.constant 0 : index
    %270 = vector.load %arg8[%c304_412, %c0_413] : memref<784x384xf32, #tpu.memory_space<vmem>>, vector<16x384xf32>
    tpu.vector_store %arg8[%c304_412, %c0_413], %269 {strides = array<i32>} : memref<784x384xf32, #tpu.memory_space<vmem>>, vector<16x384xf32>,
    %c0_414 = arith.constant 0 : index
    %c109_415 = arith.constant 109 : index
    %271 = vector.load %arg7[%c0_414, %c109_415] : memref<16x640xf32, #tpu.memory_space<vmem>>, vector<16x384xf32>
    %c320_416 = arith.constant 320 : index
    %c0_417 = arith.constant 0 : index
    %272 = vector.load %arg8[%c320_416, %c0_417] : memref<784x384xf32, #tpu.memory_space<vmem>>, vector<16x384xf32>
    tpu.vector_store %arg8[%c320_416, %c0_417], %271 {strides = array<i32>} : memref<784x384xf32, #tpu.memory_space<vmem>>, vector<16x384xf32>,
    %c0_418 = arith.constant 0 : index
    %c125_419 = arith.constant 125 : index
    %273 = vector.load %arg7[%c0_418, %c125_419] : memref<16x640xf32, #tpu.memory_space<vmem>>, vector<16x384xf32>
    %c336_420 = arith.constant 336 : index
    %c0_421 = arith.constant 0 : index
    %274 = vector.load %arg8[%c336_420, %c0_421] : memref<784x384xf32, #tpu.memory_space<vmem>>, vector<16x384xf32>
    tpu.vector_store %arg8[%c336_420, %c0_421], %273 {strides = array<i32>} : memref<784x384xf32, #tpu.memory_space<vmem>>, vector<16x384xf32>,
    %c0_422 = arith.constant 0 : index
    %c126_423 = arith.constant 126 : index
    %275 = vector.load %arg7[%c0_422, %c126_423] : memref<16x640xf32, #tpu.memory_space<vmem>>, vector<16x384xf32>
    %c352_424 = arith.constant 352 : index
    %c0_425 = arith.constant 0 : index
    %276 = vector.load %arg8[%c352_424, %c0_425] : memref<784x384xf32, #tpu.memory_space<vmem>>, vector<16x384xf32>
    tpu.vector_store %arg8[%c352_424, %c0_425], %275 {strides = array<i32>} : memref<784x384xf32, #tpu.memory_space<vmem>>, vector<16x384xf32>,
    %c0_426 = arith.constant 0 : index
    %c127_427 = arith.constant 127 : index
    %277 = vector.load %arg7[%c0_426, %c127_427] : memref<16x640xf32, #tpu.memory_space<vmem>>, vector<16x384xf32>
    %c368_428 = arith.constant 368 : index
    %c0_429 = arith.constant 0 : index
    %278 = vector.load %arg8[%c368_428, %c0_429] : memref<784x384xf32, #tpu.memory_space<vmem>>, vector<16x384xf32>
    tpu.vector_store %arg8[%c368_428, %c0_429], %277 {strides = array<i32>} : memref<784x384xf32, #tpu.memory_space<vmem>>, vector<16x384xf32>,
    %c0_430 = arith.constant 0 : index
    %c128_431 = arith.constant 128 : index
    %279 = vector.load %arg7[%c0_430, %c128_431] : memref<16x640xf32, #tpu.memory_space<vmem>>, vector<16x384xf32>
    %c384_432 = arith.constant 384 : index
    %c0_433 = arith.constant 0 : index
    %280 = vector.load %arg8[%c384_432, %c0_433] : memref<784x384xf32, #tpu.memory_space<vmem>>, vector<16x384xf32>
    tpu.vector_store %arg8[%c384_432, %c0_433], %279 {strides = array<i32>} : memref<784x384xf32, #tpu.memory_space<vmem>>, vector<16x384xf32>,
    %c0_434 = arith.constant 0 : index
    %c129_435 = arith.constant 129 : index
    %281 = vector.load %arg7[%c0_434, %c129_435] : memref<16x640xf32, #tpu.memory_space<vmem>>, vector<16x384xf32>
    %c400_436 = arith.constant 400 : index
    %c0_437 = arith.constant 0 : index
    %282 = vector.load %arg8[%c400_436, %c0_437] : memref<784x384xf32, #tpu.memory_space<vmem>>, vector<16x384xf32>
    tpu.vector_store %arg8[%c400_436, %c0_437], %281 {strides = array<i32>} : memref<784x384xf32, #tpu.memory_space<vmem>>, vector<16x384xf32>,
    %c0_438 = arith.constant 0 : index
    %c130_439 = arith.constant 130 : index
    %283 = vector.load %arg7[%c0_438, %c130_439] : memref<16x640xf32, #tpu.memory_space<vmem>>, vector<16x384xf32>
    %c416_440 = arith.constant 416 : index
    %c0_441 = arith.constant 0 : index
    %284 = vector.load %arg8[%c416_440, %c0_441] : memref<784x384xf32, #tpu.memory_space<vmem>>, vector<16x384xf32>
    tpu.vector_store %arg8[%c416_440, %c0_441], %283 {strides = array<i32>} : memref<784x384xf32, #tpu.memory_space<vmem>>, vector<16x384xf32>,
    %c0_442 = arith.constant 0 : index
    %c131_443 = arith.constant 131 : index
    %285 = vector.load %arg7[%c0_442, %c131_443] : memref<16x640xf32, #tpu.memory_space<vmem>>, vector<16x384xf32>
    %c432_444 = arith.constant 432 : index
    %c0_445 = arith.constant 0 : index
    %286 = vector.load %arg8[%c432_444, %c0_445] : memref<784x384xf32, #tpu.memory_space<vmem>>, vector<16x384xf32>
    tpu.vector_store %arg8[%c432_444, %c0_445], %285 {strides = array<i32>} : memref<784x384xf32, #tpu.memory_space<vmem>>, vector<16x384xf32>,
    %c0_446 = arith.constant 0 : index
    %c147_447 = arith.constant 147 : index
    %287 = vector.load %arg7[%c0_446, %c147_447] : memref<16x640xf32, #tpu.memory_space<vmem>>, vector<16x384xf32>
    %c448_448 = arith.constant 448 : index
    %c0_449 = arith.constant 0 : index
    %288 = vector.load %arg8[%c448_448, %c0_449] : memref<784x384xf32, #tpu.memory_space<vmem>>, vector<16x384xf32>
    tpu.vector_store %arg8[%c448_448, %c0_449], %287 {strides = array<i32>} : memref<784x384xf32, #tpu.memory_space<vmem>>, vector<16x384xf32>,
    %c0_450 = arith.constant 0 : index
    %c148_451 = arith.constant 148 : index
    %289 = vector.load %arg7[%c0_450, %c148_451] : memref<16x640xf32, #tpu.memory_space<vmem>>, vector<16x384xf32>
    %c464_452 = arith.constant 464 : index
    %c0_453 = arith.constant 0 : index
    %290 = vector.load %arg8[%c464_452, %c0_453] : memref<784x384xf32, #tpu.memory_space<vmem>>, vector<16x384xf32>
    tpu.vector_store %arg8[%c464_452, %c0_453], %289 {strides = array<i32>} : memref<784x384xf32, #tpu.memory_space<vmem>>, vector<16x384xf32>,
    %c0_454 = arith.constant 0 : index
    %c149_455 = arith.constant 149 : index
    %291 = vector.load %arg7[%c0_454, %c149_455] : memref<16x640xf32, #tpu.memory_space<vmem>>, vector<16x384xf32>
    %c480_456 = arith.constant 480 : index
    %c0_457 = arith.constant 0 : index
    %292 = vector.load %arg8[%c480_456, %c0_457] : memref<784x384xf32, #tpu.memory_space<vmem>>, vector<16x384xf32>
    tpu.vector_store %arg8[%c480_456, %c0_457], %291 {strides = array<i32>} : memref<784x384xf32, #tpu.memory_space<vmem>>, vector<16x384xf32>,
    %c0_458 = arith.constant 0 : index
    %c150_459 = arith.constant 150 : index
    %293 = vector.load %arg7[%c0_458, %c150_459] : memref<16x640xf32, #tpu.memory_space<vmem>>, vector<16x384xf32>
    %c496_460 = arith.constant 496 : index
    %c0_461 = arith.constant 0 : index
    %294 = vector.load %arg8[%c496_460, %c0_461] : memref<784x384xf32, #tpu.memory_space<vmem>>, vector<16x384xf32>
    tpu.vector_store %arg8[%c496_460, %c0_461], %293 {strides = array<i32>} : memref<784x384xf32, #tpu.memory_space<vmem>>, vector<16x384xf32>,
    %c0_462 = arith.constant 0 : index
    %c151_463 = arith.constant 151 : index
    %295 = vector.load %arg7[%c0_462, %c151_463] : memref<16x640xf32, #tpu.memory_space<vmem>>, vector<16x384xf32>
    %c512_464 = arith.constant 512 : index
    %c0_465 = arith.constant 0 : index
    %296 = vector.load %arg8[%c512_464, %c0_465] : memref<784x384xf32, #tpu.memory_space<vmem>>, vector<16x384xf32>
    tpu.vector_store %arg8[%c512_464, %c0_465], %295 {strides = array<i32>} : memref<784x384xf32, #tpu.memory_space<vmem>>, vector<16x384xf32>,
    %c0_466 = arith.constant 0 : index
    %c152_467 = arith.constant 152 : index
    %297 = vector.load %arg7[%c0_466, %c152_467] : memref<16x640xf32, #tpu.memory_space<vmem>>, vector<16x384xf32>
    %c528_468 = arith.constant 528 : index
    %c0_469 = arith.constant 0 : index
    %298 = vector.load %arg8[%c528_468, %c0_469] : memref<784x384xf32, #tpu.memory_space<vmem>>, vector<16x384xf32>
    tpu.vector_store %arg8[%c528_468, %c0_469], %297 {strides = array<i32>} : memref<784x384xf32, #tpu.memory_space<vmem>>, vector<16x384xf32>,
    %c0_470 = arith.constant 0 : index
    %c153_471 = arith.constant 153 : index
    %299 = vector.load %arg7[%c0_470, %c153_471] : memref<16x640xf32, #tpu.memory_space<vmem>>, vector<16x384xf32>
    %c544_472 = arith.constant 544 : index
    %c0_473 = arith.constant 0 : index
    %300 = vector.load %arg8[%c544_472, %c0_473] : memref<784x384xf32, #tpu.memory_space<vmem>>, vector<16x384xf32>
    tpu.vector_store %arg8[%c544_472, %c0_473], %299 {strides = array<i32>} : memref<784x384xf32, #tpu.memory_space<vmem>>, vector<16x384xf32>,
    %c0_474 = arith.constant 0 : index
    %c169_475 = arith.constant 169 : index
    %301 = vector.load %arg7[%c0_474, %c169_475] : memref<16x640xf32, #tpu.memory_space<vmem>>, vector<16x384xf32>
    %c560_476 = arith.constant 560 : index
    %c0_477 = arith.constant 0 : index
    %302 = vector.load %arg8[%c560_476, %c0_477] : memref<784x384xf32, #tpu.memory_space<vmem>>, vector<16x384xf32>
    tpu.vector_store %arg8[%c560_476, %c0_477], %301 {strides = array<i32>} : memref<784x384xf32, #tpu.memory_space<vmem>>, vector<16x384xf32>,
    %c0_478 = arith.constant 0 : index
    %c170_479 = arith.constant 170 : index
    %303 = vector.load %arg7[%c0_478, %c170_479] : memref<16x640xf32, #tpu.memory_space<vmem>>, vector<16x384xf32>
    %c576_480 = arith.constant 576 : index
    %c0_481 = arith.constant 0 : index
    %304 = vector.load %arg8[%c576_480, %c0_481] : memref<784x384xf32, #tpu.memory_space<vmem>>, vector<16x384xf32>
    tpu.vector_store %arg8[%c576_480, %c0_481], %303 {strides = array<i32>} : memref<784x384xf32, #tpu.memory_space<vmem>>, vector<16x384xf32>,
    %c0_482 = arith.constant 0 : index
    %c171_483 = arith.constant 171 : index
    %305 = vector.load %arg7[%c0_482, %c171_483] : memref<16x640xf32, #tpu.memory_space<vmem>>, vector<16x384xf32>
    %c592_484 = arith.constant 592 : index
    %c0_485 = arith.constant 0 : index
    %306 = vector.load %arg8[%c592_484, %c0_485] : memref<784x384xf32, #tpu.memory_space<vmem>>, vector<16x384xf32>
    tpu.vector_store %arg8[%c592_484, %c0_485], %305 {strides = array<i32>} : memref<784x384xf32, #tpu.memory_space<vmem>>, vector<16x384xf32>,
    %c0_486 = arith.constant 0 : index
    %c172_487 = arith.constant 172 : index
    %307 = vector.load %arg7[%c0_486, %c172_487] : memref<16x640xf32, #tpu.memory_space<vmem>>, vector<16x384xf32>
    %c608_488 = arith.constant 608 : index
    %c0_489 = arith.constant 0 : index
    %308 = vector.load %arg8[%c608_488, %c0_489] : memref<784x384xf32, #tpu.memory_space<vmem>>, vector<16x384xf32>
    tpu.vector_store %arg8[%c608_488, %c0_489], %307 {strides = array<i32>} : memref<784x384xf32, #tpu.memory_space<vmem>>, vector<16x384xf32>,
    %c0_490 = arith.constant 0 : index
    %c173_491 = arith.constant 173 : index
    %309 = vector.load %arg7[%c0_490, %c173_491] : memref<16x640xf32, #tpu.memory_space<vmem>>, vector<16x384xf32>
    %c624_492 = arith.constant 624 : index
    %c0_493 = arith.constant 0 : index
    %310 = vector.load %arg8[%c624_492, %c0_493] : memref<784x384xf32, #tpu.memory_space<vmem>>, vector<16x384xf32>
    tpu.vector_store %arg8[%c624_492, %c0_493], %309 {strides = array<i32>} : memref<784x384xf32, #tpu.memory_space<vmem>>, vector<16x384xf32>,
    %c0_494 = arith.constant 0 : index
    %c174_495 = arith.constant 174 : index
    %311 = vector.load %arg7[%c0_494, %c174_495] : memref<16x640xf32, #tpu.memory_space<vmem>>, vector<16x384xf32>
    %c640_496 = arith.constant 640 : index
    %c0_497 = arith.constant 0 : index
    %312 = vector.load %arg8[%c640_496, %c0_497] : memref<784x384xf32, #tpu.memory_space<vmem>>, vector<16x384xf32>
    tpu.vector_store %arg8[%c640_496, %c0_497], %311 {strides = array<i32>} : memref<784x384xf32, #tpu.memory_space<vmem>>, vector<16x384xf32>,
    %c0_498 = arith.constant 0 : index
    %c175_499 = arith.constant 175 : index
    %313 = vector.load %arg7[%c0_498, %c175_499] : memref<16x640xf32, #tpu.memory_space<vmem>>, vector<16x384xf32>
    %c656_500 = arith.constant 656 : index
    %c0_501 = arith.constant 0 : index
    %314 = vector.load %arg8[%c656_500, %c0_501] : memref<784x384xf32, #tpu.memory_space<vmem>>, vector<16x384xf32>
    tpu.vector_store %arg8[%c656_500, %c0_501], %313 {strides = array<i32>} : memref<784x384xf32, #tpu.memory_space<vmem>>, vector<16x384xf32>,
    %c0_502 = arith.constant 0 : index
    %c191_503 = arith.constant 191 : index
    %315 = vector.load %arg7[%c0_502, %c191_503] : memref<16x640xf32, #tpu.memory_space<vmem>>, vector<16x384xf32>
    %c672_504 = arith.constant 672 : index
    %c0_505 = arith.constant 0 : index
    %316 = vector.load %arg8[%c672_504, %c0_505] : memref<784x384xf32, #tpu.memory_space<vmem>>, vector<16x384xf32>
    tpu.vector_store %arg8[%c672_504, %c0_505], %315 {strides = array<i32>} : memref<784x384xf32, #tpu.memory_space<vmem>>, vector<16x384xf32>,
    %c0_506 = arith.constant 0 : index
    %c192_507 = arith.constant 192 : index
    %317 = vector.load %arg7[%c0_506, %c192_507] : memref<16x640xf32, #tpu.memory_space<vmem>>, vector<16x384xf32>
    %c688_508 = arith.constant 688 : index
    %c0_509 = arith.constant 0 : index
    %318 = vector.load %arg8[%c688_508, %c0_509] : memref<784x384xf32, #tpu.memory_space<vmem>>, vector<16x384xf32>
    tpu.vector_store %arg8[%c688_508, %c0_509], %317 {strides = array<i32>} : memref<784x384xf32, #tpu.memory_space<vmem>>, vector<16x384xf32>,
    %c0_510 = arith.constant 0 : index
    %c193_511 = arith.constant 193 : index
    %319 = vector.load %arg7[%c0_510, %c193_511] : memref<16x640xf32, #tpu.memory_space<vmem>>, vector<16x384xf32>
    %c704_512 = arith.constant 704 : index
    %c0_513 = arith.constant 0 : index
    %320 = vector.load %arg8[%c704_512, %c0_513] : memref<784x384xf32, #tpu.memory_space<vmem>>, vector<16x384xf32>
    tpu.vector_store %arg8[%c704_512, %c0_513], %319 {strides = array<i32>} : memref<784x384xf32, #tpu.memory_space<vmem>>, vector<16x384xf32>,
    %c0_514 = arith.constant 0 : index
    %c194_515 = arith.constant 194 : index
    %321 = vector.load %arg7[%c0_514, %c194_515] : memref<16x640xf32, #tpu.memory_space<vmem>>, vector<16x384xf32>
    %c720_516 = arith.constant 720 : index
    %c0_517 = arith.constant 0 : index
    %322 = vector.load %arg8[%c720_516, %c0_517] : memref<784x384xf32, #tpu.memory_space<vmem>>, vector<16x384xf32>
    tpu.vector_store %arg8[%c720_516, %c0_517], %321 {strides = array<i32>} : memref<784x384xf32, #tpu.memory_space<vmem>>, vector<16x384xf32>,
    %c0_518 = arith.constant 0 : index
    %c195_519 = arith.constant 195 : index
    %323 = vector.load %arg7[%c0_518, %c195_519] : memref<16x640xf32, #tpu.memory_space<vmem>>, vector<16x384xf32>
    %c736_520 = arith.constant 736 : index
    %c0_521 = arith.constant 0 : index
    %324 = vector.load %arg8[%c736_520, %c0_521] : memref<784x384xf32, #tpu.memory_space<vmem>>, vector<16x384xf32>
    tpu.vector_store %arg8[%c736_520, %c0_521], %323 {strides = array<i32>} : memref<784x384xf32, #tpu.memory_space<vmem>>, vector<16x384xf32>,
    %c0_522 = arith.constant 0 : index
    %c196_523 = arith.constant 196 : index
    %325 = vector.load %arg7[%c0_522, %c196_523] : memref<16x640xf32, #tpu.memory_space<vmem>>, vector<16x384xf32>
    %c752_524 = arith.constant 752 : index
    %c0_525 = arith.constant 0 : index
    %326 = vector.load %arg8[%c752_524, %c0_525] : memref<784x384xf32, #tpu.memory_space<vmem>>, vector<16x384xf32>
    tpu.vector_store %arg8[%c752_524, %c0_525], %325 {strides = array<i32>} : memref<784x384xf32, #tpu.memory_space<vmem>>, vector<16x384xf32>,
    %c0_526 = arith.constant 0 : index
    %c197_527 = arith.constant 197 : index
    %327 = vector.load %arg7[%c0_526, %c197_527] : memref<16x640xf32, #tpu.memory_space<vmem>>, vector<16x384xf32>
    %c768_528 = arith.constant 768 : index
    %c0_529 = arith.constant 0 : index
    %328 = vector.load %arg8[%c768_528, %c0_529] : memref<784x384xf32, #tpu.memory_space<vmem>>, vector<16x384xf32>
    tpu.vector_store %arg8[%c768_528, %c0_529], %327 {strides = array<i32>} : memref<784x384xf32, #tpu.memory_space<vmem>>, vector<16x384xf32>,
    %c2 = arith.constant 2 : index
    %c0_530 = arith.constant 0 : index
    %c0_531 = arith.constant 0 : index
    %329 = vector.load %arg3[%c2, %c0_530, %c0_531] : memref<3x16x784xf32, #tpu.memory_space<vmem>>, vector<1x16x784xf32>
    %330 = vector.shape_cast %329 : vector<1x16x784xf32> to vector<16x784xf32>
    %c0_532 = arith.constant 0 : index
    %c0_533 = arith.constant 0 : index
    %331 = vector.load %arg8[%c0_532, %c0_533] : memref<784x384xf32, #tpu.memory_space<vmem>>, vector<784x384xf32>
    %cst_534 = arith.constant dense<0.000000e+00> : vector<16x384xf32>
    %332 = tpu.matmul %330, %331, %cst_534 {dimension_numbers = #tpu.dot_dimension_numbers<[1], [0], [0], [1], [0, 0, 1, 1], [], []>} : vector<16x784xf32>, vector<784x384xf32>, vector<16x384xf32> -> vector<16x384xf32>
    %c2_535 = arith.constant 2 : index
    %c0_536 = arith.constant 0 : index
    %c0_537 = arith.constant 0 : index
    %333 = vector.load %arg4[%c2_535, %c0_536, %c0_537] : memref<3x16x1xf32, #tpu.memory_space<vmem>>, vector<1x16x1xf32>
    %334 = vector.shape_cast %333 : vector<1x16x1xf32> to vector<16x1xf32>
    %335 = vector.broadcast %334 : vector<16x1xf32> to vector<16x384xf32>
    %336 = arith.addf %332, %335 : vector<16x384xf32>
    %337 = vector.broadcast %4 : vector<1x384xf32> to vector<16x384xf32>
    %338 = arith.mulf %336, %337 : vector<16x384xf32>
    %339 = arith.addf %338, %115 : vector<16x384xf32>
    %cst_538 = arith.constant 0.000000e+00 : f32
    %340 = vector.broadcast %cst_538 : f32 to vector<16x384xf32>
    %341 = arith.maximumf %339, %340 : vector<16x384xf32>
    %c0_539 = arith.constant 0 : index
    %c0_540 = arith.constant 0 : index
    %c0_541 = arith.constant 0 : index
    %342 = vector.load %arg6[%c0_539, %c0_540, %c0_541] : memref<1x16x384xf32, #tpu.memory_space<vmem>>, vector<1x16x384xf32>
    %343 = vector.shape_cast %342 : vector<1x16x384xf32> to vector<16x384xf32>
    %344 = vector.shape_cast %341 : vector<16x384xf32> to vector<1x16x384xf32>
    tpu.vector_store %arg6[%c0_539, %c0_540, %c0_541], %344 {strides = array<i32>} : memref<1x16x384xf32, #tpu.memory_space<vmem>>, vector<1x16x384xf32>,
    return
  }
  func.func @transform_0(%arg0: i32) -> (i32, i32, i32) {
    %c0_i32 = arith.constant 0 : i32
    %c0_i32_0 = arith.constant 0 : i32
    %c0_i32_1 = arith.constant 0 : i32
    return %arg0, %c0_i32, %c0_i32_0 : i32, i32, i32
  }
  func.func @transform_1(%arg0: i32) -> (i32, i32, i32) {
    %c0_i32 = arith.constant 0 : i32
    %c0_i32_0 = arith.constant 0 : i32
    %c0_i32_1 = arith.constant 0 : i32
    return %arg0, %c0_i32, %c0_i32_0 : i32, i32, i32
  }
  func.func @transform_2(%arg0: i32) -> (i32, i32, i32) {
    %c0_i32 = arith.constant 0 : i32
    %c0_i32_0 = arith.constant 0 : i32
    %c0_i32_1 = arith.constant 0 : i32
    %c0_i32_2 = arith.constant 0 : i32
    return %c0_i32, %c0_i32_0, %c0_i32_1 : i32, i32, i32
  }
  func.func @transform_3(%arg0: i32) -> (i32, i32, i32) {
    %c0_i32 = arith.constant 0 : i32
    %c0_i32_0 = arith.constant 0 : i32
    %c0_i32_1 = arith.constant 0 : i32
    %c0_i32_2 = arith.constant 0 : i32
    return %c0_i32, %c0_i32_0, %c0_i32_1 : i32, i32, i32
  }
  func.func @transform_4(%arg0: i32) -> (i32, i32) {
    %c0_i32 = arith.constant 0 : i32
    %c0_i32_0 = arith.constant 0 : i32
    %c0_i32_1 = arith.constant 0 : i32
    return %c0_i32, %c0_i32_0 : i32, i32
  }
  func.func @transform_5(%arg0: i32) -> (i32, i32, i32) {
    %c0_i32 = arith.constant 0 : i32
    %c0_i32_0 = arith.constant 0 : i32
    %c0_i32_1 = arith.constant 0 : i32
    return %arg0, %c0_i32, %c0_i32_0 : i32, i32, i32
  }
}

</mosaic_0001>

<bundles_post_ra>
// kernel: fused_forward.1
= control target key start
LH: loop header
LB: loop body
LE: loop exit
PB: predicated region body
PF: predicated region fallthrough
CT: control target
= control target key end

     0   :  { %s14905_s18 = smov 0   ;;  %s19493_s0 = inlined_call_operand.vmem [shape: f32[2,16,384], index: 0, kind: input, shape index: {}]   ;;  %s19494_s1 = inlined_call_operand.vmem [shape: f32[2,16,384], index: 1, kind: input, shape index: {}]   ;;  %s19495_s2 = inlined_call_operand.vmem [shape: f32[3,16,784], index: 2, kind: input, shape index: {}]   ;;  %s19496_s3 = inlined_call_operand.vmem [shape: f32[3,16,1], index: 3, kind: input, shape index: {}]   ;;  %s19497_s4 = inlined_call_operand.vmem [shape: f32[1,384], index: 4, kind: input, shape index: {}]   ;;  %s19498_s5 = inlined_call_operand.vmem [shape: f32[2,16,384], index: 5, kind: output, shape index: {}]  }
   0x1   :  { %19831 = sst [smem:[#allocation80_spill]] %s19493_s0 }
   0x2   :  { %19832 = sst [smem:[#allocation81_spill]] %s19494_s1 }
   0x3   :  { %19833 = sst [smem:[#allocation82_spill]] %s19495_s2 }
   0x4   :  { %19834 = sst [smem:[#allocation83_spill]] %s19496_s3 }
   0x5   :  { %19835 = sst [smem:[#allocation84_spill]] %s19497_s4 }
   0x6   :  { %19836 = sst [smem:[#allocation85_spill]] %s19498_s5 }
   0x7 LB: > { %19837 = sst [smem:[#allocation4_spill]] %s14826_s18  ;;  %s10499_s19 = sadd.s32 4294967295, %s14826_s18   ;;  %s14826_s18 = sphi %s14905_s18, %s15_s18  }
   0x8   : > { %p10503_p0 = scmp.ge.s32.totalorder %s14826_s18, 1  ;;  %p197_p1 = scmp.lt.s32.totalorder %s14826_s18, 3 }
   0xa   : > { %p198_p2 = pnand %p10503_p0, %p197_p1 }
   0xc   : > { %201 = sbr.rel (%p198_p2) target bundleno = 2328 (0x918), region = 40 }
  0x13   : > { %p230_p3 = scmp.lt.s32.totalorder %s10499_s19, 1  ;;  %s19839_s0 = sld [smem:[#allocation80_spill]]  ;;  %v19513_v3 = vmov 0.0   ;;  %vm19625_vm0 = vcmask 564224   ;;  %vm19624_vm1 = vcmask 556032   ;;  %vm19622_vm2 = vcmask 547840  }
  0x14   : > { %s19643_s24 = smov 69   ;;  %s19641_s25 = smov 68   ;;  %vm19617_vm3 = vcmask 539648   ;;  %vm498_vm4 = vcmask 531456   ;;  %vm549_vm5 = vcmask 523264   ;;  %vm600_vm6 = vcmask 515072  }
  0x15   : > { %s20748_s19 = smov (!%p230_p3, %s10499_s19), 1  ;;  %s19639_s26 = smov 67   ;;  %vm19623_vm7 = vcmask 384000   ;;  %vm19533_vm8 = vcmask 375808   ;;  %vm19554_vm9 = vcmask 367616   ;;  %vm19539_vm10 = vcmask 359424  }
  0x16   : > { %s14913_s20 = smul.u32 48, %s20748_s19  ;;  %s19637_s27 = smov 66   ;;  %vm19540_vm11 = vcmask 351232   ;;  %vm19551_vm12 = vcmask 343040   ;;  %vm19541_vm13 = vcmask 334848   ;;  %vm19548_vm14 = vcmask 203776  }
  0x17   : > { %s19659_s28 = smov 65   ;;  %s19656_s29 = smov 64   ;;  %vm19542_vm15 = vcmask 195584  }
  0x18   : > { %19838 = sst [smem:[#allocation5_spill]] %s14913_s20  ;;  %s19652_s30 = smov 63  }
  0x19   : > { %s14919_s23 = scalar_lea.vmem %s19839_s0, %s14913_s20  ;;  %s19635_s6 = smov 47  }
  0x1a   : > { %v14922_v0 = vld [vmem:[%s14919_s23 + $0x18] sm:$0xff]  ;;  %v14925_v1 = vld [vmem:[%s14919_s23] sm:$0xff]  ;;  %v14939_v6 = vld [vmem:[%s14919_s23 + $0x28] sm:$0xff]  ;;  %s19633_s7 = smov 46   ;;  %s19631_s8 = smov 45  }
  0x1b   : > { %v14928_v2 = vld [vmem:[%s14919_s23 + $0x20] sm:$0xff]  ;;  %v14932_v4 = vpack.i.bf16 %v14922_v0, %v19513_v3  ;;  %v14936_v5 = vpack.i.bf16 %v14925_v1, %v19513_v3  ;;  %v14942_v7 = vld [vmem:[%s14919_s23 + $0x8] sm:$0xff]  ;;  %v14945_v8 = vld [vmem:[%s14919_s23 + $0x10] sm:$0xff]  ;;  %s19629_s9 = smov 44   ;;  %s19627_s10 = smov 43  }
  0x1c   : > { %v14953_v9 = vpack.i.bf16 %v14939_v6, %v14928_v2  ;;  %v14957_v10 = vpack.i.bf16 %v14945_v8, %v14942_v7  ;;  %s19620_s11 = smov 42   ;;  %s19618_s12 = smov 41  }
  0x1d   : > { %11931 = vrot.lane.b32.xlu1 %v14932_v4, %s19643_s24  ;;  %11921 = vrot.lane.b32.xlu0 %v14936_v5, %s19643_s24  ;;  %s19615_s13 = smov 25   ;;  %s19613_s14 = smov 24  }
  0x1e   : > { %s19840_s2 = sld [smem:[#allocation82_spill]]  ;;  %s19602_s17 = smov 23  }
  0x1f   : > { %s19594_s19 = smov 22   ;;  %s19536_s21 = smov 21  }
  0x20   : > { %s19531_s22 = smov 20   ;;  %s19499_s15 = smov 19  }
  0x21   : > { %11936 = vrot.lane.b32.xlu1 %v14953_v9, %s19643_s24  ;;  %11926 = vrot.lane.b32.xlu0 %v14957_v10, %s19643_s24  ;;  %s19501_s16 = smov 3   ;;  %s19861_s3 = sld [smem:[#allocation83_spill]] }
  0x22   : > { %s19862_s4 = sld [smem:[#allocation84_spill]]  ;;  %s19977_s0 = smov 65  }
  0x23   : > { %s19995_s18 = smov 63   ;;  %s20004_s5 = smov 62  }
  0x24   : > { %v2720_v25 = vld [vmem:[%s19840_s2 + $0x8] sm:$0xff]  ;;  %s20249_s1 = sld [smem:[#allocation81_spill]] }
  0x25   : > { %11946 = vrot.lane.b32.xlu1 %v14957_v10, %s19641_s25  ;;  %11941 = vrot.lane.b32.xlu0 %v14936_v5, %s19641_s25 }
  0x26   : > { %3110 = vmatprep.mubr.f32.mxu1 %v2720_v25 }
  0x29   : > { %11956 = vrot.lane.b32.xlu1 %v14953_v9, %s19641_s25  ;;  %11951 = vrot.lane.b32.xlu0 %v14932_v4, %s19641_s25 }
  0x2d   : > { %11966 = vrot.lane.b32.xlu1 %v14957_v10, %s19639_s26  ;;  %11961 = vrot.lane.b32.xlu0 %v14936_v5, %s19639_s26 }
  0x31   : > { %11976 = vrot.lane.b32.xlu1 %v14953_v9, %s19639_s26  ;;  %11971 = vrot.lane.b32.xlu0 %v14932_v4, %s19639_s26 }
  0x35   : > { %11986 = vrot.lane.b32.xlu1 %v14957_v10, %s19637_s27  ;;  %11981 = vrot.lane.b32.xlu0 %v14936_v5, %s19637_s27 }
  0x39   : > { %11996 = vrot.lane.b32.xlu1 %v14953_v9, %s19637_s27  ;;  %11991 = vrot.lane.b32.xlu0 %v14932_v4, %s19637_s27 }
  0x3d   : > { %12006 = vrot.lane.b32.xlu1 %v14957_v10, %s19659_s28  ;;  %12001 = vrot.lane.b32.xlu0 %v14936_v5, %s19659_s28 }
  0x41   : > { %12016 = vrot.lane.b32.xlu1 %v14953_v9, %s19659_s28  ;;  %12011 = vrot.lane.b32.xlu0 %v14932_v4, %s19659_s28 }
  0x45   : > { %12026 = vrot.lane.b32.xlu1 %v14957_v10, %s19656_s29  ;;  %12021 = vrot.lane.b32.xlu0 %v14936_v5, %s19656_s29 }
  0x49   : > { %12036 = vrot.lane.b32.xlu1 %v14953_v9, %s19656_s29  ;;  %12031 = vrot.lane.b32.xlu0 %v14932_v4, %s19656_s29 }
  0x4d   : > { %12046 = vrot.lane.b32.xlu1 %v14957_v10, %s19652_s30  ;;  %12041 = vrot.lane.b32.xlu0 %v14936_v5, %s19652_s30 }
  0x51   : > { %12056 = vrot.lane.b32.xlu1 %v14953_v9, %s19652_s30  ;;  %12051 = vrot.lane.b32.xlu0 %v14932_v4, %s19652_s30 }
  0x55   : > { %12066 = vrot.lane.b32.xlu1 %v14957_v10, %s19635_s6  ;;  %12061 = vrot.lane.b32.xlu0 %v14936_v5, %s19635_s6 }
  0x59   : > { %12076 = vrot.lane.b32.xlu1 %v14953_v9, %s19635_s6  ;;  %12071 = vrot.lane.b32.xlu0 %v14932_v4, %s19635_s6 }
  0x5d   : > { %12086 = vrot.lane.b32.xlu1 %v14957_v10, %s19633_s7  ;;  %12081 = vrot.lane.b32.xlu0 %v14936_v5, %s19633_s7 }
  0x61   : > { %12096 = vrot.lane.b32.xlu1 %v14953_v9, %s19633_s7  ;;  %12091 = vrot.lane.b32.xlu0 %v14932_v4, %s19633_s7 }
  0x65   : > { %12106 = vrot.lane.b32.xlu1 %v14957_v10, %s19631_s8  ;;  %12101 = vrot.lane.b32.xlu0 %v14936_v5, %s19631_s8 }
  0x69   : > { %12116 = vrot.lane.b32.xlu1 %v14953_v9, %s19631_s8  ;;  %12111 = vrot.lane.b32.xlu0 %v14932_v4, %s19631_s8 }
  0x6d   : > { %12126 = vrot.lane.b32.xlu1 %v14957_v10, %s19629_s9  ;;  %12121 = vrot.lane.b32.xlu0 %v14936_v5, %s19629_s9 }
  0x71   : > { %12136 = vrot.lane.b32.xlu1 %v14953_v9, %s19629_s9  ;;  %12131 = vrot.lane.b32.xlu0 %v14932_v4, %s19629_s9 }
  0x75   : > { %12146 = vrot.lane.b32.xlu1 %v14957_v10, %s19627_s10  ;;  %12141 = vrot.lane.b32.xlu0 %v14936_v5, %s19627_s10 }
  0x79   : > { %12156 = vrot.lane.b32.xlu1 %v14953_v9, %s19627_s10  ;;  %12151 = vrot.lane.b32.xlu0 %v14932_v4, %s19627_s10 }
  0x7d   : > { %12166 = vrot.lane.b32.xlu1 %v14957_v10, %s19620_s11  ;;  %12161 = vrot.lane.b32.xlu0 %v14936_v5, %s19620_s11 }
  0x81   : > { %12176 = vrot.lane.b32.xlu1 %v14953_v9, %s19620_s11  ;;  %12171 = vrot.lane.b32.xlu0 %v14932_v4, %s19620_s11 }
  0x85   : > { %12186 = vrot.lane.b32.xlu1 %v14957_v10, %s19618_s12  ;;  %12181 = vrot.lane.b32.xlu0 %v14936_v5, %s19618_s12 }
  0x89   : > { %12196 = vrot.lane.b32.xlu1 %v14953_v9, %s19618_s12  ;;  %12191 = vrot.lane.b32.xlu0 %v14932_v4, %s19618_s12 }
  0x8d   : > { %12206 = vrot.lane.b32.xlu1 %v14957_v10, %s19615_s13  ;;  %12201 = vrot.lane.b32.xlu0 %v14936_v5, %s19615_s13 }
  0x8f   : > { %v11932_v11 = vpop.permute.xlu1 %11931  ;;  %v11922_v12 = vpop.permute.xlu0 %11921 }
  0x90   : > { %v11934_v13 = vunpack.i.h.bf16 %v11932_v11  ;;  %v11933_v14 = vunpack.i.l.bf16 %v11932_v11  ;;  %v11924_v15 = vunpack.i.h.bf16 %v11922_v12  ;;  %v11923_v16 = vunpack.i.l.bf16 %v11922_v12 }
  0x91   : > { %12216 = vrot.lane.b32.xlu1 %v14953_v9, %s19615_s13  ;;  %12211 = vrot.lane.b32.xlu0 %v14932_v4, %s19615_s13 }
  0x92   : > { %v295_v23 = vsel %vm19625_vm0, %v11923_v16, %v11924_v15  ;;  %v298_v24 = vsel %vm19625_vm0, %v11933_v14, %v11934_v13 }
  0x93   : > { %v11937_v17 = vpop.permute.xlu1 %11936  ;;  %v11927_v18 = vpop.permute.xlu0 %11926  ;;  %v10930_v37 = vpack.c.bf16 %v298_v24, %v295_v23 }
  0x94   : > { %v11939_v19 = vunpack.i.h.bf16 %v11937_v17  ;;  %v11938_v20 = vunpack.i.l.bf16 %v11937_v17  ;;  %v11929_v21 = vunpack.i.h.bf16 %v11927_v18  ;;  %v11928_v22 = vunpack.i.l.bf16 %v11927_v18 }
  0x95   : > { %12226 = vrot.lane.b32.xlu1 %v14957_v10, %s19613_s14  ;;  %12221 = vrot.lane.b32.xlu0 %v14936_v5, %s19613_s14 }
  0x96   : > { %v15085_v26 = vsel %vm19625_vm0, %v11938_v20, %v11939_v19  ;;  %v15088_v27 = vsel %vm19625_vm0, %v11928_v22, %v11929_v21  ;;  %v296_v28 = vsel %vm19625_vm0, %v11924_v15, %v11928_v22  ;;  %v299_v29 = vsel %vm19625_vm0, %v11934_v13, %v11938_v20 }
  0x97   : > { %v11947_v30 = vpop.permute.xlu1 %11946  ;;  %v11942_v31 = vpop.permute.xlu0 %11941  ;;  %v10928_v32 = vpack.c.bf16 %v299_v29, %v296_v28 }
  0x98   : > { %v11949_v34 = vunpack.i.h.bf16 %v11947_v30  ;;  %v11948_v35 = vunpack.i.l.bf16 %v11947_v30  ;;  %v11944_v36 = vunpack.i.h.bf16 %v11942_v31  ;;  %v11943_v38 = vunpack.i.l.bf16 %v11942_v31 }
  0x99   : > { %12236 = vrot.lane.b32.xlu1 %v14953_v9, %s19613_s14  ;;  %12231 = vrot.lane.b32.xlu0 %v14932_v4, %s19613_s14 }
  0x9a   : > { %10929 = vmatprep.subr.bf16.mxu1 %v10928_v32  ;;  %v15099_v45 = vsel %vm19624_vm1, %v11948_v35, %v11949_v34  ;;  %v347_v46 = vsel %vm19624_vm1, %v11944_v36, %v11948_v35  ;;  %v346_v49 = vsel %vm19624_vm1, %v11943_v38, %v11944_v36 }
  0x9b   : > { %10931 = vmatpush1.bf16.msra.mxu1 %v10930_v37  ;;  %v11957_v39 = vpop.permute.xlu1 %11956  ;;  %v11952_v40 = vpop.permute.xlu0 %11951 }
  0x9c   : > { %v11959_v41 = vunpack.i.h.bf16 %v11957_v39  ;;  %v11958_v42 = vunpack.i.l.bf16 %v11957_v39  ;;  %v11954_v43 = vunpack.i.h.bf16 %v11952_v40  ;;  %v11953_v44 = vunpack.i.l.bf16 %v11952_v40 }
  0x9d   : > { %12246 = vrot.lane.b32.xlu1 %v14957_v10, %s19602_s17  ;;  %12241 = vrot.lane.b32.xlu0 %v14936_v5, %s19602_s17 }
  0x9e   : > { %v15107_v47 = vsel %vm19624_vm1, %v11958_v42, %v11959_v41  ;;  %v350_v48 = vsel %vm19624_vm1, %v11954_v43, %v11958_v42  ;;  %v349_v50 = vsel %vm19624_vm1, %v11953_v44, %v11954_v43 }
  0x9f   : > { %v11967_v51 = vpop.permute.xlu1 %11966  ;;  %v11962_v52 = vpop.permute.xlu0 %11961  ;;  %v10932_v53 = vpack.c.bf16 %v350_v48, %v347_v46  ;;  %v10934_v54 = vpack.c.bf16 %v349_v50, %v346_v49 }
  0xa0   : > { %v11969_v56 = vunpack.i.h.bf16 %v11967_v51  ;;  %v11968_v57 = vunpack.i.l.bf16 %v11967_v51  ;;  %v11964_v58 = vunpack.i.h.bf16 %v11962_v52  ;;  %v11963_v59 = vunpack.i.l.bf16 %v11962_v52 }
  0xa1   : > { %12256 = vrot.lane.b32.xlu1 %v14953_v9, %s19602_s17  ;;  %12251 = vrot.lane.b32.xlu0 %v14932_v4, %s19602_s17 }
  0xa2   : > { %10933 = vmatprep.subr.bf16.mxu1 %v10932_v53  ;;  %v15119_v13 = vsel %vm19622_vm2, %v11968_v57, %v11969_v56  ;;  %v398_v14 = vsel %vm19622_vm2, %v11964_v58, %v11968_v57  ;;  %v397_v17 = vsel %vm19622_vm2, %v11963_v59, %v11964_v58 }
  0xa3   : > { %10935 = vmatpush1.bf16.msra.mxu1 %v10934_v54  ;;  %v11977_v60 = vpop.permute.xlu1 %11976  ;;  %v11972_v61 = vpop.permute.xlu0 %11971 }
  0xa4   : > { %v11979_v62 = vunpack.i.h.bf16 %v11977_v60  ;;  %v11978_v63 = vunpack.i.l.bf16 %v11977_v60  ;;  %v11974_v11 = vunpack.i.h.bf16 %v11972_v61  ;;  %v11973_v12 = vunpack.i.l.bf16 %v11972_v61 }
  0xa5   : > { %12266 = vrot.lane.b32.xlu1 %v14957_v10, %s19594_s19  ;;  %12261 = vrot.lane.b32.xlu0 %v14936_v5, %s19594_s19 }
  0xa6   : > { %v15127_v15 = vsel %vm19622_vm2, %v11978_v63, %v11979_v62  ;;  %v401_v16 = vsel %vm19622_vm2, %v11974_v11, %v11978_v63  ;;  %v400_v18 = vsel %vm19622_vm2, %v11973_v12, %v11974_v11 }
  0xa7   : > { %v11987_v19 = vpop.permute.xlu1 %11986  ;;  %v11982_v20 = vpop.permute.xlu0 %11981  ;;  %v10936_v21 = vpack.c.bf16 %v401_v16, %v398_v14  ;;  %v10938_v22 = vpack.c.bf16 %v400_v18, %v397_v17 }
  0xa8   : > { %v11989_v24 = vunpack.i.h.bf16 %v11987_v19  ;;  %v11988_v25 = vunpack.i.l.bf16 %v11987_v19  ;;  %v11984_v28 = vunpack.i.h.bf16 %v11982_v20  ;;  %v11983_v29 = vunpack.i.l.bf16 %v11982_v20 }
  0xa9   : > { %12276 = vrot.lane.b32.xlu1 %v14953_v9, %s19594_s19  ;;  %12271 = vrot.lane.b32.xlu0 %v14932_v4, %s19594_s19 }
  0xaa   : > { %10937 = vmatprep.subr.bf16.mxu1 %v10936_v21  ;;  %v15139_v37 = vsel %vm19617_vm3, %v11988_v25, %v11989_v24  ;;  %v449_v38 = vsel %vm19617_vm3, %v11984_v28, %v11988_v25  ;;  %v448_v41 = vsel %vm19617_vm3, %v11983_v29, %v11984_v28 }
  0xab   : > { %10939 = vmatpush1.bf16.msra.mxu1 %v10938_v22  ;;  %v11997_v30 = vpop.permute.xlu1 %11996  ;;  %v11992_v31 = vpop.permute.xlu0 %11991 }
  0xac   : > { %v11999_v32 = vunpack.i.h.bf16 %v11997_v30  ;;  %v11998_v34 = vunpack.i.l.bf16 %v11997_v30  ;;  %v11994_v35 = vunpack.i.h.bf16 %v11992_v31  ;;  %v11993_v36 = vunpack.i.l.bf16 %v11992_v31 }
  0xad   : > { %12286 = vrot.lane.b32.xlu1 %v14957_v10, %s19536_s21  ;;  %12281 = vrot.lane.b32.xlu0 %v14936_v5, %s19536_s21 }
  0xae   : > { %v15147_v39 = vsel %vm19617_vm3, %v11998_v34, %v11999_v32  ;;  %v452_v40 = vsel %vm19617_vm3, %v11994_v35, %v11998_v34  ;;  %v451_v42 = vsel %vm19617_vm3, %v11993_v36, %v11994_v35 }
  0xaf   : > { %v12007_v43 = vpop.permute.xlu1 %12006  ;;  %v12002_v44 = vpop.permute.xlu0 %12001  ;;  %v10940_v46 = vpack.c.bf16 %v452_v40, %v449_v38  ;;  %v10942_v48 = vpack.c.bf16 %v451_v42, %v448_v41 }
  0xb0   : > { %v12009_v50 = vunpack.i.h.bf16 %v12007_v43  ;;  %v12008_v51 = vunpack.i.l.bf16 %v12007_v43  ;;  %v12004_v52 = vunpack.i.h.bf16 %v12002_v44  ;;  %v12003_v53 = vunpack.i.l.bf16 %v12002_v44 }
  0xb1   : > { %12296 = vrot.lane.b32.xlu1 %v14953_v9, %s19536_s21  ;;  %12291 = vrot.lane.b32.xlu0 %v14932_v4, %s19536_s21  ;;  %s19543_s21 = smov 87  }
  0xb2   : > { %10941 = vmatprep.subr.bf16.mxu1 %v10940_v46  ;;  %v15159_v61 = vsel %vm498_vm4, %v12008_v51, %v12009_v50  ;;  %v500_v62 = vsel %vm498_vm4, %v12004_v52, %v12008_v51  ;;  %v499_v12 = vsel %vm498_vm4, %v12003_v53, %v12004_v52 }
  0xb3   : > { %10943 = vmatpush1.bf16.msra.mxu1 %v10942_v48  ;;  %v12017_v54 = vpop.permute.xlu1 %12016  ;;  %v12012_v56 = vpop.permute.xlu0 %12011 }
  0xb4   : > { %v12019_v57 = vunpack.i.h.bf16 %v12017_v54  ;;  %v12018_v58 = vunpack.i.l.bf16 %v12017_v54  ;;  %v12014_v59 = vunpack.i.h.bf16 %v12012_v56  ;;  %v12013_v60 = vunpack.i.l.bf16 %v12012_v56 }
  0xb5   : > { %12306 = vrot.lane.b32.xlu1 %v14957_v10, %s19531_s22  ;;  %12301 = vrot.lane.b32.xlu0 %v14936_v5, %s19531_s22 }
  0xb6   : > { %v15167_v63 = vsel %vm498_vm4, %v12018_v58, %v12019_v57  ;;  %v503_v11 = vsel %vm498_vm4, %v12014_v59, %v12018_v58  ;;  %v502_v14 = vsel %vm498_vm4, %v12013_v60, %v12014_v59 }
  0xb7   : > { %v12027_v16 = vpop.permute.xlu1 %12026  ;;  %v12022_v17 = vpop.permute.xlu0 %12021  ;;  %v10944_v18 = vpack.c.bf16 %v503_v11, %v500_v62  ;;  %v10946_v19 = vpack.c.bf16 %v502_v14, %v499_v12 }
  0xb8   : > { %v12029_v21 = vunpack.i.h.bf16 %v12027_v16  ;;  %v12028_v22 = vunpack.i.l.bf16 %v12027_v16  ;;  %v12024_v24 = vunpack.i.h.bf16 %v12022_v17  ;;  %v12023_v25 = vunpack.i.l.bf16 %v12022_v17 }
  0xb9   : > { %12316 = vrot.lane.b32.xlu1 %v14953_v9, %s19531_s22  ;;  %12311 = vrot.lane.b32.xlu0 %v14932_v4, %s19531_s22  ;;  %s19572_s22 = smov 104  }
  0xba   : > { %10945 = vmatprep.subr.bf16.mxu1 %v10944_v18  ;;  %v15179_v35 = vsel %vm549_vm5, %v12028_v22, %v12029_v21  ;;  %v551_v36 = vsel %vm549_vm5, %v12024_v24, %v12028_v22  ;;  %v550_v41 = vsel %vm549_vm5, %v12023_v25, %v12024_v24  ;;  %v15384_v25 = vld [vmem:[%s14919_s23 + $0x10] sm:$0xff] }
  0xbb   : > { %10947 = vmatpush1.bf16.msra.mxu1 %v10946_v19  ;;  %v12037_v28 = vpop.permute.xlu1 %12036  ;;  %v12032_v29 = vpop.permute.xlu0 %12031  ;;  %v15388_v50 = vpack.i.bf16 %v19513_v3, %v15384_v25 }
  0xbc   : > { %v12039_v30 = vunpack.i.h.bf16 %v12037_v28  ;;  %v12038_v31 = vunpack.i.l.bf16 %v12037_v28  ;;  %v12034_v32 = vunpack.i.h.bf16 %v12032_v29  ;;  %v12033_v34 = vunpack.i.l.bf16 %v12032_v29 }
  0xbd   : > { %12326 = vrot.lane.b32.xlu1 %v14957_v10, %s19499_s15  ;;  %12321 = vrot.lane.b32.xlu0 %v14936_v5, %s19499_s15 }
  0xbe   : > { %v15187_v38 = vsel %vm549_vm5, %v12038_v31, %v12039_v30  ;;  %v554_v40 = vsel %vm549_vm5, %v12034_v32, %v12038_v31  ;;  %v553_v42 = vsel %vm549_vm5, %v12033_v34, %v12034_v32 }
  0xbf   : > { %v12047_v43 = vpop.permute.xlu1 %12046  ;;  %v12042_v44 = vpop.permute.xlu0 %12041  ;;  %v10948_v46 = vpack.c.bf16 %v554_v40, %v551_v36  ;;  %v10950_v48 = vpack.c.bf16 %v553_v42, %v550_v41 }
  0xc0   : > { %v12049_v51 = vunpack.i.h.bf16 %v12047_v43  ;;  %v12048_v52 = vunpack.i.l.bf16 %v12047_v43  ;;  %v12044_v53 = vunpack.i.h.bf16 %v12042_v44  ;;  %v12043_v54 = vunpack.i.l.bf16 %v12042_v44 }
  0xc1   : > { %12336 = vrot.lane.b32.xlu1 %v14953_v9, %s19499_s15  ;;  %12331 = vrot.lane.b32.xlu0 %v14932_v4, %s19499_s15  ;;  %s19505_s15 = smov 2  }
  0xc2   : > { %10949 = vmatprep.subr.bf16.mxu1 %v10948_v46  ;;  %v15199_v11 = vsel %vm600_vm6, %v12048_v52, %v12049_v51  ;;  %v602_v12 = vsel %vm600_vm6, %v12044_v53, %v12048_v52  ;;  %v601_v17 = vsel %vm600_vm6, %v12043_v54, %v12044_v53 }
  0xc3   : > { %10951 = vmatpush1.bf16.msra.mxu1 %v10950_v48  ;;  %v12057_v56 = vpop.permute.xlu1 %12056  ;;  %v12052_v57 = vpop.permute.xlu0 %12051 }
  0xc4   : > { %v12059_v58 = vunpack.i.h.bf16 %v12057_v56  ;;  %v12058_v59 = vunpack.i.l.bf16 %v12057_v56  ;;  %v12054_v60 = vunpack.i.h.bf16 %v12052_v57  ;;  %v12053_v62 = vunpack.i.l.bf16 %v12052_v57 }
  0xc5   : > { %12346 = vrot.lane.b32.xlu1 %v14957_v10, %s19501_s16  ;;  %12341 = vrot.lane.b32.xlu0 %v14936_v5, %s19501_s16 }
  0xc6   : > { %v15207_v14 = vsel %vm600_vm6, %v12058_v59, %v12059_v58  ;;  %v605_v16 = vsel %vm600_vm6, %v12054_v60, %v12058_v59  ;;  %v604_v18 = vsel %vm600_vm6, %v12053_v62, %v12054_v60 }
  0xc7   : > { %v12067_v19 = vpop.permute.xlu1 %12066  ;;  %v12062_v21 = vpop.permute.xlu0 %12061  ;;  %v10952_v22 = vpack.c.bf16 %v605_v16, %v602_v12  ;;  %v10954_v24 = vpack.c.bf16 %v604_v18, %v601_v17 }
  0xc8   : > { %v12069_v28 = vunpack.i.h.bf16 %v12067_v19  ;;  %v12068_v29 = vunpack.i.l.bf16 %v12067_v19  ;;  %v12064_v30 = vunpack.i.h.bf16 %v12062_v21  ;;  %v12063_v31 = vunpack.i.l.bf16 %v12062_v21 }
  0xc9   : > { %12356 = vrot.lane.b32.xlu1 %v14953_v9, %s19501_s16  ;;  %12351 = vrot.lane.b32.xlu0 %v14932_v4, %s19501_s16  ;;  %s19503_s16 = smov 1  }
  0xca   : > { %10953 = vmatprep.subr.bf16.mxu1 %v10952_v22  ;;  %v15219_v43 = vsel %vm19623_vm7, %v12068_v29, %v12069_v28  ;;  %v653_v44 = vsel %vm19623_vm7, %v12064_v30, %v12068_v29  ;;  %v652_v51 = vsel %vm19623_vm7, %v12063_v31, %v12064_v30 }
  0xcb   : > { %10955 = vmatpush1.bf16.msra.mxu1 %v10954_v24  ;;  %v12077_v32 = vpop.permute.xlu1 %12076  ;;  %v12072_v34 = vpop.permute.xlu0 %12071 }
  0xcc   : > { %v12079_v36 = vunpack.i.h.bf16 %v12077_v32  ;;  %v12078_v40 = vunpack.i.l.bf16 %v12077_v32  ;;  %v12074_v41 = vunpack.i.h.bf16 %v12072_v34  ;;  %v12073_v42 = vunpack.i.l.bf16 %v12072_v34 }
  0xcd   : > { %12366 = vrot.lane.b32.xlu1 %v14957_v10, %s19505_s15  ;;  %12361 = vrot.lane.b32.xlu0 %v14936_v5, %s19505_s15  ;;  %v15268_v32 = vpack.i.bf16 %v14942_v7, %v14925_v1  ;;  %v12415_v1 = vpack.i.bf16 %v19513_v3, %v14939_v6  ;;  %v12410_v7 = vpack.i.bf16 %v14928_v2, %v14922_v0 }
  0xce   : > { %v15227_v46 = vsel %vm19623_vm7, %v12078_v40, %v12079_v36  ;;  %v656_v48 = vsel %vm19623_vm7, %v12074_v41, %v12078_v40  ;;  %v655_v52 = vsel %vm19623_vm7, %v12073_v42, %v12074_v41 }
  0xcf   : > { %v15232_v53 = vpop.permute.xlu1 %12086  ;;  %v12082_v54 = vpop.permute.xlu0 %12081  ;;  %v10956_v56 = vpack.c.bf16 %v656_v48, %v653_v44  ;;  %v10958_v57 = vpack.c.bf16 %v655_v52, %v652_v51 }
  0xd0   : > { %v12088_v59 = vunpack.i.l.bf16 %v15232_v53  ;;  %v12084_v60 = vunpack.i.h.bf16 %v12082_v54  ;;  %v12083_v62 = vunpack.i.l.bf16 %v12082_v54 }
  0xd1   : > { %12376 = vrot.lane.b32.xlu1 %v14953_v9, %s19505_s15  ;;  %12371 = vrot.lane.b32.xlu0 %v14932_v4, %s19505_s15  ;;  %s19518_s15 = smov 126  }
  0xd2   : > { %10957 = vmatprep.subr.bf16.mxu1 %v10956_v56  ;;  %v704_v21 = vsel %vm19533_vm8, %v12084_v60, %v12088_v59  ;;  %v703_v24 = vsel %vm19533_vm8, %v12083_v62, %v12084_v60 }
  0xd3   : > { %10959 = vmatpush1.bf16.msra.mxu1 %v10958_v57  ;;  %v15241_v12 = vpop.permute.xlu1 %12096  ;;  %v12092_v16 = vpop.permute.xlu0 %12091 }
  0xd4   : > { %v12098_v17 = vunpack.i.l.bf16 %v15241_v12  ;;  %v12094_v18 = vunpack.i.h.bf16 %v12092_v16  ;;  %v12093_v19 = vunpack.i.l.bf16 %v12092_v16 }
  0xd5   : > { %12386 = vrot.lane.b32.xlu1 %v14957_v10, %s19503_s16  ;;  %12381 = vrot.lane.b32.xlu0 %v14936_v5, %s19503_s16  ;;  %v15264_v5 = vpack.i.bf16 %v19513_v3, %v14945_v8 }
  0xd6   : > { %v707_v22 = vsel %vm19533_vm8, %v12094_v18, %v12098_v17  ;;  %v706_v28 = vsel %vm19533_vm8, %v12093_v19, %v12094_v18 }
  0xd7   : > { %v15256_v29 = vpop.permute.xlu1 %12106  ;;  %v12102_v30 = vpop.permute.xlu0 %12101  ;;  %v10960_v31 = vpack.c.bf16 %v707_v22, %v704_v21  ;;  %v10962_v10 = vpack.c.bf16 %v706_v28, %v703_v24 }
  0xd8   : > { %v12108_v34 = vunpack.i.l.bf16 %v15256_v29  ;;  %v12104_v36 = vunpack.i.h.bf16 %v12102_v30  ;;  %v12103_v40 = vunpack.i.l.bf16 %v12102_v30 }
  0xd9   : > { %12396 = vrot.lane.b32.xlu1 %v14953_v9, %s19503_s16  ;;  %12391 = vrot.lane.b32.xlu0 %v14932_v4, %s19503_s16  ;;  %s19507_s16 = smov 127  }
  0xda   : > { %10961 = vmatprep.subr.bf16.mxu1 %v10960_v31  ;;  %v755_v8 = vsel %vm19554_vm9, %v12104_v36, %v12108_v34  ;;  %v754_v51 = vsel %vm19554_vm9, %v12103_v40, %v12104_v36 }
  0xdb   : > { %10963 = vmatpush1.bf16.msra.mxu1 %v10962_v10  ;;  %v15271_v41 = vpop.permute.xlu1 %12116  ;;  %v12112_v9 = vpop.permute.xlu0 %12111 }
  0xdc   : > { %v12118_v4 = vunpack.i.l.bf16 %v15271_v41  ;;  %v12114_v42 = vunpack.i.h.bf16 %v12112_v9  ;;  %v12113_v44 = vunpack.i.l.bf16 %v12112_v9 }
  0xdd   : > { %12406 = vrot.lane.b32.xlu1 %v15264_v5, %s19507_s16  ;;  %12401 = vrot.lane.b32.xlu0 %v15268_v32, %s19507_s16 }
  0xde   : > { %v758_v48 = vsel %vm19554_vm9, %v12114_v42, %v12118_v4  ;;  %v757_v52 = vsel %vm19554_vm9, %v12113_v44, %v12114_v42 }
  0xdf   : > { %v15290_v54 = vpop.permute.xlu1 %12126  ;;  %v12122_v56 = vpop.permute.xlu0 %12121  ;;  %v10964_v57 = vpack.c.bf16 %v758_v48, %v755_v8  ;;  %v10966_v6 = vpack.c.bf16 %v757_v52, %v754_v51 }
  0xe0   : > { %v19527_v0 = vunpack.i.l.bf16 %v15290_v54  ;;  %v12124_v2 = vunpack.i.h.bf16 %v12122_v56  ;;  %v12123_v60 = vunpack.i.l.bf16 %v12122_v56 }
  0xe1   : > { %12416 = vrot.lane.b32.xlu1 %v12415_v1, %s19507_s16  ;;  %12411 = vrot.lane.b32.xlu0 %v12410_v7, %s19507_s16  ;;  %s19509_s16 = smov 125  }
  0xe2   : > { %10965 = vmatprep.subr.bf16.mxu1 %v10964_v57  ;;  %v806_v22 = vsel %vm19539_vm10, %v12124_v2, %v19527_v0  ;;  %v805_v28 = vsel %vm19539_vm10, %v12123_v60, %v12124_v2 }
  0xe3   : > { %10967 = vmatpush1.bf16.msra.mxu1 %v10966_v6  ;;  %v15295_v62 = vpop.permute.xlu1 %12136  ;;  %v12132_v16 = vpop.permute.xlu0 %12131 }
  0xe4   : > { %v19528_v18 = vunpack.i.l.bf16 %v15295_v62  ;;  %v12134_v19 = vunpack.i.h.bf16 %v12132_v16  ;;  %v12133_v21 = vunpack.i.l.bf16 %v12132_v16 }
  0xe5   : > { %12426 = vrot.lane.b32.xlu1 %v15264_v5, %s19518_s15  ;;  %12421 = vrot.lane.b32.xlu0 %v15268_v32, %s19518_s15 }
  0xe6   : > { %v809_v24 = vsel %vm19539_vm10, %v12134_v19, %v19528_v18  ;;  %v808_v30 = vsel %vm19539_vm10, %v12133_v21, %v12134_v19 }
  0xe7   : > { %v15310_v31 = vpop.permute.xlu1 %12146  ;;  %v12142_v10 = vpop.permute.xlu0 %12141  ;;  %v10968_v36 = vpack.c.bf16 %v809_v24, %v806_v22  ;;  %v10970_v40 = vpack.c.bf16 %v808_v30, %v805_v28  ;;  %v15338_v24 = vld [vmem:[%s14919_s23 + $0x8] sm:$0xff] }
  0xe8   : > { %v19521_v9 = vunpack.i.l.bf16 %v15310_v31  ;;  %v12144_v42 = vunpack.i.h.bf16 %v12142_v10  ;;  %v12143_v44 = vunpack.i.l.bf16 %v12142_v10 }
  0xe9   : > { %12436 = vrot.lane.b32.xlu1 %v12415_v1, %s19518_s15  ;;  %12431 = vrot.lane.b32.xlu0 %v12410_v7, %s19518_s15  ;;  %s19529_s15 = smov 107  }
  0xea   : > { %10969 = vmatprep.subr.bf16.mxu1 %v10968_v36  ;;  %v857_v57 = vsel %vm19540_vm11, %v12144_v42, %v19521_v9  ;;  %v856_v2 = vsel %vm19540_vm11, %v12143_v44, %v12144_v42  ;;  %v12099_v9 = vunpack.i.h.bf16 %v15241_v12 }
  0xeb   : > { %10971 = vmatpush1.bf16.msra.mxu1 %v10970_v40  ;;  %v15315_v8 = vpop.permute.xlu1 %12156  ;;  %v12152_v48 = vpop.permute.xlu0 %12151 }
  0xec   : > { %v19526_v51 = vunpack.i.l.bf16 %v15315_v8  ;;  %v12154_v52 = vunpack.i.h.bf16 %v12152_v48  ;;  %v12153_v56 = vunpack.i.l.bf16 %v12152_v48  ;;  %v15353_v48 = vld [vmem:[%s14919_s23 + $0x28] sm:$0xff] }
  0xed   : > { %12446 = vrot.lane.b32.xlu1 %v15264_v5, %s19509_s16  ;;  %12441 = vrot.lane.b32.xlu0 %v15268_v32, %s19509_s16  ;;  %v15335_v32 = vld [vmem:[%s14919_s23] sm:$0xff] }
  0xee   : > { %v860_v6 = vsel %vm19540_vm11, %v12154_v52, %v19526_v51  ;;  %v859_v60 = vsel %vm19540_vm11, %v12153_v56, %v12154_v52  ;;  %v15342_v28 = vpack.i.bf16 %v15338_v24, %v15335_v32  ;;  %v15357_v52 = vpack.i.bf16 %v19513_v3, %v15353_v48  ;;  %v15360_v56 = vld [vmem:[%s14919_s23 + $0x18] sm:$0xff] }
  0xef   : > { %v15330_v16 = vpop.permute.xlu1 %12166  ;;  %v12162_v19 = vpop.permute.xlu0 %12161  ;;  %v10972_v21 = vpack.c.bf16 %v860_v6, %v857_v57  ;;  %v10974_v22 = vpack.c.bf16 %v859_v60, %v856_v2  ;;  %v15363_v57 = vld [vmem:[%s14919_s23 + $0x20] sm:$0xff]  ;;  %v12109_v51 = vunpack.i.h.bf16 %v15256_v29 }
  0xf0   : > { %v19515_v30 = vunpack.i.l.bf16 %v15330_v16  ;;  %v12164_v10 = vunpack.i.h.bf16 %v12162_v19  ;;  %v12163_v36 = vunpack.i.l.bf16 %v12162_v19  ;;  %v15367_v6 = vpack.i.bf16 %v15363_v57, %v15360_v56 }
  0xf1   : > { %12456 = vrot.lane.b32.xlu1 %v12415_v1, %s19509_s16  ;;  %12451 = vrot.lane.b32.xlu0 %v12410_v7, %s19509_s16  ;;  %s19511_s16 = smov 109  }
  0xf2   : > { %10973 = vmatprep.subr.bf16.mxu1 %v10972_v21  ;;  %v907_v60 = vsel %vm19551_vm12, %v12163_v36, %v12164_v10 }
  0xf3   : > { %10975 = vmatpush1.bf16.msra.mxu1 %v10974_v22  ;;  %v15345_v1 = vpop.permute.xlu1 %12176  ;;  %v12172_v7 = vpop.permute.xlu0 %12171 }
  0xf4   : > { %v19517_v40 = vunpack.i.l.bf16 %v15345_v1  ;;  %v12174_v42 = vunpack.i.h.bf16 %v12172_v7  ;;  %v12173_v44 = vunpack.i.l.bf16 %v12172_v7 }
  0xf5   : > { %12466 = vrot.lane.b32.xlu1 %v15264_v5, %s19511_s16  ;;  %12461 = vrot.lane.b32.xlu0 %v15342_v28, %s19511_s16  ;;  %v908_v5 = vsel %vm19551_vm12, %v12164_v10, %v19515_v30 }
  0xf6   : > { %v911_v2 = vsel %vm19551_vm12, %v12174_v42, %v19517_v40  ;;  %v910_v19 = vsel %vm19551_vm12, %v12173_v44, %v12174_v42 }
  0xf7   : > { %v15377_v21 = vpop.permute.xlu1 %12186  ;;  %v12182_v22 = vpop.permute.xlu0 %12181  ;;  %v10976_v7 = vpack.c.bf16 %v911_v2, %v908_v5  ;;  %v10978_v58 = vpack.c.bf16 %v910_v19, %v907_v60 }
  0xf8   : > { %v19516_v10 = vunpack.i.l.bf16 %v15377_v21  ;;  %v12184_v36 = vunpack.i.h.bf16 %v12182_v22  ;;  %v12183_v42 = vunpack.i.l.bf16 %v12182_v22 }
  0xf9   : > { %12476 = vrot.lane.b32.xlu1 %v15357_v52, %s19511_s16  ;;  %12471 = vrot.lane.b32.xlu0 %v15367_v6, %s19511_s16  ;;  %s19524_s16 = smov 108  }
  0xfa   : > { %10977 = vmatprep.subr.bf16.mxu1 %v10976_v7  ;;  %v959_v22 = vsel %vm19541_vm13, %v12184_v36, %v19516_v10  ;;  %v958_v7 = vsel %vm19541_vm13, %v12183_v42, %v12184_v36 }
  0xfb   : > { %10979 = vmatpush1.bf16.msra.mxu1 %v10978_v58  ;;  %v15391_v44 = vpop.permute.xlu1 %12196  ;;  %v12192_v5 = vpop.permute.xlu0 %12191 }
  0xfc   : > { %v19520_v2 = vunpack.i.l.bf16 %v15391_v44  ;;  %v12194_v60 = vunpack.i.h.bf16 %v12192_v5  ;;  %v12193_v19 = vunpack.i.l.bf16 %v12192_v5 }
  0xfd   : > { %12486 = vrot.lane.b32.xlu1 %v15388_v50, %s19524_s16  ;;  %12481 = vrot.lane.b32.xlu0 %v15342_v28, %s19524_s16 }
  0xfe   : > { %v962_v58 = vsel %vm19541_vm13, %v12194_v60, %v19520_v2  ;;  %v961_v3 = vsel %vm19541_vm13, %v12193_v19, %v12194_v60 }
  0xff   : > { %v15406_v5 = vpop.permute.xlu1 %12206  ;;  %v12202_v20 = vpop.permute.xlu0 %12201  ;;  %v10980_v49 = vpack.c.bf16 %v962_v58, %v959_v22  ;;  %v10982_v30 = vpack.c.bf16 %v961_v3, %v958_v7 }
 0x100   : > { %v19522_v10 = vunpack.i.l.bf16 %v15406_v5  ;;  %v12204_v23 = vunpack.i.h.bf16 %v12202_v20  ;;  %v12203_v40 = vunpack.i.l.bf16 %v12202_v20 }
 0x101   : > { %12496 = vrot.lane.b32.xlu1 %v15357_v52, %s19524_s16  ;;  %12491 = vrot.lane.b32.xlu0 %v15367_v6, %s19524_s16  ;;  %s19534_s16 = smov 106  }
 0x102   : > { %10981 = vmatprep.subr.bf16.mxu1 %v10980_v49  ;;  %v1010_v49 = vsel %vm19548_vm14, %v12204_v23, %v19522_v10 }
 0x103   : > { %10983 = vmatpush1.bf16.msra.mxu1 %v10982_v30  ;;  %v15413_v36 = vpop.permute.xlu1 %12216  ;;  %v12212_v42 = vpop.permute.xlu0 %12211  ;;  %v1009_v30 = vsel %vm19548_vm14, %v12203_v40, %v12204_v23 }
 0x104   : > { %v19523_v60 = vunpack.i.l.bf16 %v15413_v36  ;;  %v12214_v19 = vunpack.i.h.bf16 %v12212_v42  ;;  %v12213_v3 = vunpack.i.l.bf16 %v12212_v42 }
 0x105   : > { %12506 = vrot.lane.b32.xlu1 %v15388_v50, %s19529_s15  ;;  %12501 = vrot.lane.b32.xlu0 %v15342_v28, %s19529_s15 }
 0x106   : > { %v1013_v20 = vsel %vm19548_vm14, %v12214_v19, %v19523_v60  ;;  %v1012_v22 = vsel %vm19548_vm14, %v12213_v3, %v12214_v19  ;;  %v12089_v19 = vunpack.i.h.bf16 %v15232_v53 }
 0x107   : > { %v15428_v58 = vpop.permute.xlu1 %12226  ;;  %v12222_v7 = vpop.permute.xlu0 %12221  ;;  %v10984_v42 = vpack.c.bf16 %v1013_v20, %v1010_v49  ;;  %v10986_v2 = vpack.c.bf16 %v1012_v22, %v1009_v30  ;;  %v12119_v30 = vunpack.i.h.bf16 %v15271_v41  ;;  %v12129_v41 = vunpack.i.h.bf16 %v15290_v54 }
 0x108   : > { %v12228_v10 = vunpack.i.l.bf16 %v15428_v58  ;;  %v12224_v60 = vunpack.i.h.bf16 %v12222_v7  ;;  %v12223_v55 = vunpack.i.l.bf16 %v12222_v7 }
 0x109   : > { %12516 = vrot.lane.b32.xlu1 %v15357_v52, %s19529_s15  ;;  %12511 = vrot.lane.b32.xlu0 %v15367_v6, %s19529_s15  ;;  %s19546_s15 = smov 103  }
 0x10a   : > { %10985 = vmatprep.subr.bf16.mxu1 %v10984_v42  ;;  %v1061_v22 = vsel %vm19542_vm15, %v12224_v60, %v12228_v10  ;;  %v1060_v42 = vsel %vm19542_vm15, %v12223_v55, %v12224_v60  ;;  %v15470_v60 = vld [vmem:[%s19840_s2 + $0x18] sm:$0xff] }
 0x10b   : > { %10987 = vmatpush1.bf16.msra.mxu1 %v10986_v2  ;;  %v15436_v23 = vpop.permute.xlu1 %12236  ;;  %v12232_v40 = vpop.permute.xlu0 %12231  ;;  %v708_v2 = vsel %vm19533_vm8, %v12098_v17, %v12099_v9  ;;  %v705_v17 = vsel %vm19533_vm8, %v12088_v59, %v12089_v19  ;;  %v12139_v9 = vunpack.i.h.bf16 %v15295_v62  ;;  %v759_v59 = vsel %vm19554_vm9, %v12118_v4, %v12119_v30  ;;  %3187 = vmatprep.mubr.f32.mxu0 %v15470_v60 }
 0x10c   : > { %v12238_v3 = vunpack.i.l.bf16 %v15436_v23  ;;  %v12234_v49 = vunpack.i.h.bf16 %v12232_v40  ;;  %v12233_v20 = vunpack.i.l.bf16 %v12232_v40  ;;  %v11124_v55 = vpack.c.bf16 %v708_v2, %v705_v17 }
 0x10d   : > { %12526 = vrot.lane.b32.xlu1 %v15388_v50, %s19534_s16  ;;  %12521 = vrot.lane.b32.xlu0 %v15342_v28, %s19534_s16  ;;  %vm19545_vm8 = vcmask 187392  }
 0x10e   : > { %v1064_v7 = vsel %vm19542_vm15, %v12234_v49, %v12238_v3  ;;  %v1063_v40 = vsel %vm19542_vm15, %v12233_v20, %v12234_v49 }
 0x10f   : > { %v15457_v0 = vpop.permute.xlu1 %12246  ;;  %v12242_v33 = vpop.permute.xlu0 %12241  ;;  %v10988_v12 = vpack.c.bf16 %v1064_v7, %v1061_v22  ;;  %v10990_v18 = vpack.c.bf16 %v1063_v40, %v1060_v42  ;;  %v15482_v22 = vld [vmem:[%s19840_s2] sm:$0xff]  ;;  %v12159_v42 = vunpack.i.h.bf16 %v15315_v8 }
 0x110   : > { %v19538_v49 = vunpack.i.l.bf16 %v15457_v0  ;;  %v12244_v20 = vunpack.i.h.bf16 %v12242_v33  ;;  %v12243_v53 = vunpack.i.l.bf16 %v12242_v33  ;;  %v756_v33 = vsel %vm19554_vm9, %v12108_v34, %v12109_v51 }
 0x111   : > { %12536 = vrot.lane.b32.xlu1 %v15357_v52, %s19534_s16  ;;  %12531 = vrot.lane.b32.xlu0 %v15367_v6, %s19534_s16  ;;  %s19574_s16 = smov 105   ;;  %v11128_v29 = vpack.c.bf16 %v759_v59, %v756_v33  ;;  %v19841_v34 = vunpack.i.l.bf16 %v15295_v62  ;;  %v12149_v59 = vunpack.i.h.bf16 %v15310_v31  ;;  %v19842_v62 = vpack.c.bf16 %v15085_v26, %v15088_v27 }
 0x112   : > { %10989 = vmatprep.subr.bf16.mxu1 %v10988_v12  ;;  %v1112_v40 = vsel %vm19545_vm8, %v12244_v20, %v19538_v49  ;;  %v1111_v17 = vsel %vm19545_vm8, %v12243_v53, %v12244_v20  ;;  %v15521_v49 = vld [vmem:[%s19840_s2 + $0x38] sm:$0xff]  ;;  %v19843_v20 = vunpack.i.l.bf16 %v15290_v54  ;;  %v12179_v26 = vunpack.i.h.bf16 %v15345_v1 }
 0x113   : > { %10991 = vmatpush1.bf16.msra.mxu1 %v10990_v18  ;;  %v15477_v19 = vpop.permute.xlu1 %12256  ;;  %v12252_v2 = vpop.permute.xlu0 %12251  ;;  %v15492_v18 = vld [vmem:[%s19840_s2 + $0x40] sm:$0xff]  ;;  %v810_v51 = vsel %vm19539_vm10, %v19841_v34, %v12139_v9  ;;  %vm19557_vm9 = vcmask 1039360  }
 0x114   : > { %v12258_v4 = vunpack.i.l.bf16 %v15477_v19  ;;  %v12254_v30 = vunpack.i.h.bf16 %v12252_v2  ;;  %v12253_v7 = vunpack.i.l.bf16 %v12252_v2  ;;  %11125 = vmatprep.subr.bf16.mxu1 %v11124_v55  ;;  %v807_v53 = vsel %vm19539_vm10, %v19843_v20, %v12129_v41 }
 0x115   : > { %12546 = vrot.lane.b32.xlu1 %v15388_v50, %s19574_s16  ;;  %12541 = vrot.lane.b32.xlu0 %v15342_v28, %s19574_s16  ;;  %v11132_v27 = vpack.c.bf16 %v810_v51, %v807_v53  ;;  %vm1161_vm10 = vcmask 179200   ;;  %v19845_v41 = vpack.c.bf16 %v15107_v47, %v15099_v45  ;;  %v12199_v45 = vunpack.i.h.bf16 %v15391_v44 }
 0x116   : > { %3111 = vmatmul.mubr.f32.vlgmr.msra.gmra.mrb[0].mxu1 %v15482_v22  ;;  %v1115_v12 = vsel %vm19545_vm8, %v12254_v30, %v12258_v4  ;;  %v1114_v55 = vsel %vm19545_vm8, %v12253_v7, %v12254_v30 }
 0x117   : > { %11127 = vmatpush3.bf16.msra.mxu1 %v19842_v62  ;;  %v15515_v9 = vpop.permute.xlu1 %12266  ;;  %v12262_v2 = vpop.permute.xlu0 %12261  ;;  %v10992_v33 = vpack.c.bf16 %v1115_v12, %v1112_v40  ;;  %v10994_v34 = vpack.c.bf16 %v1114_v55, %v1111_v17  ;;  %3116 = vmatprep.mubr.f32.mxu1 %v15492_v18  ;;  %v19846_v17 = vunpack.i.l.bf16 %v15310_v31  ;;  %v12169_v62 = vunpack.i.h.bf16 %v15330_v16 }
 0x118   : > { %11129 = vmatprep.subr.bf16.mxu1 %v11128_v29  ;;  %v12268_v30 = vunpack.i.l.bf16 %v15515_v9  ;;  %v12264_v7 = vunpack.i.h.bf16 %v12262_v2  ;;  %v12263_v40 = vunpack.i.l.bf16 %v12262_v2  ;;  %v19844_v29 = vunpack.i.l.bf16 %v15315_v8 }
 0x119   : > { %12556 = vrot.lane.b32.xlu1 %v15357_v52, %s19574_s16  ;;  %12551 = vrot.lane.b32.xlu0 %v15367_v6, %s19574_s16  ;;  %v858_v55 = vsel %vm19540_vm11, %v19846_v17, %v12149_v59  ;;  %v19847_v31 = vunpack.i.l.bf16 %v15345_v1  ;;  %v19849_v17 = vunpack.i.l.bf16 %v15330_v16  ;;  %s19580_s16 = smov 59  }
 0x11a   : > { %10993 = vmatprep.subr.bf16.mxu0 %v10992_v33  ;;  %v861_v54 = vsel %vm19540_vm11, %v19844_v29, %v12159_v42  ;;  %3117 = vmatmul.mubr.f32.gmra.mrb[2].mxu1 %v15521_v49  ;;  %v14808_v33 = vld [vmem:[%s19840_s2 + $0x8] sm:$0xff]  ;;  %v1162_v53 = vsel %vm1161_vm10, %v12263_v40, %v12264_v7  ;;  %v12189_v29 = vunpack.i.h.bf16 %v15377_v21  ;;  %vm1212_vm11 = vcmask 171008  }
 0x11b   : > { %10995 = vmatpush1.bf16.msra.mxu0 %v10994_v34  ;;  %11131 = vmatpush3.bf16.msra.mxu1 %v19845_v41  ;;  %v15539_v12 = vpop.permute.xlu1 %12276  ;;  %v12272_v51 = vpop.permute.xlu0 %12271  ;;  %v11136_v47 = vpack.c.bf16 %v861_v54, %v858_v55  ;;  %v912_v59 = vsel %vm19551_vm12, %v19847_v31, %v12179_v26  ;;  %v1163_v34 = vsel %vm1161_vm10, %v12264_v7, %v12268_v30  ;;  %v12219_v7 = vunpack.i.h.bf16 %v15413_v36 }
 0x11c   : > { %v12278_v8 = vunpack.i.l.bf16 %v15539_v12  ;;  %v12274_v42 = vunpack.i.h.bf16 %v12272_v51  ;;  %v12273_v2 = vunpack.i.l.bf16 %v12272_v51  ;;  %11133 = vmatprep.subr.bf16.mxu1 %v11132_v27  ;;  %3418 = vmatprep.mubr.f32.mxu1 %v14808_v33  ;;  %v19848_v54 = vpack.c.bf16 %v15127_v15, %v15119_v13 }
 0x11d   : > { %12566 = vrot.lane.b32.xlu1 %v15388_v50, %s19572_s22  ;;  %12561 = vrot.lane.b32.xlu0 %v15342_v28, %s19572_s22  ;;  %v909_v55 = vsel %vm19551_vm12, %v19849_v17, %v12169_v62  ;;  %v19851_v62 = vpack.c.bf16 %v15147_v39, %v15139_v37  ;;  %v19852_v31 = vunpack.i.l.bf16 %v15377_v21  ;;  %v19853_v39 = vunpack.i.l.bf16 %v15413_v36 }
 0x11e   : > { %v1166_v20 = vsel %vm1161_vm10, %v12274_v42, %v12278_v8  ;;  %v1165_v27 = vsel %vm1161_vm10, %v12273_v2, %v12274_v42  ;;  %v11140_v13 = vpack.c.bf16 %v912_v59, %v909_v55  ;;  %v19850_v2 = vunpack.i.l.bf16 %v15391_v44 }
 0x11f   : > { %11135 = vmatpush3.bf16.msra.mxu1 %v19848_v54  ;;  %v15569_v1 = vpop.permute.xlu1 %12286  ;;  %v12282_v26 = vpop.permute.xlu0 %12281  ;;  %v10996_v41 = vpack.c.bf16 %v1166_v20, %v1163_v34  ;;  %v10998_v51 = vpack.c.bf16 %v1165_v27, %v1162_v53  ;;  %v960_v59 = vsel %vm19541_vm13, %v19852_v31, %v12189_v29  ;;  %v12209_v34 = vunpack.i.h.bf16 %v15406_v5 }
 0x120   : > { %11137 = vmatprep.subr.bf16.mxu1 %v11136_v47  ;;  %v12288_v15 = vunpack.i.l.bf16 %v15569_v1  ;;  %v12284_v40 = vunpack.i.h.bf16 %v12282_v26  ;;  %v12283_v42 = vunpack.i.l.bf16 %v12282_v26  ;;  %v963_v16 = vsel %vm19541_vm13, %v19850_v2, %v12199_v45 }
 0x121   : > { %12576 = vrot.lane.b32.xlu1 %v15357_v52, %s19572_s22  ;;  %12571 = vrot.lane.b32.xlu0 %v15367_v6, %s19572_s22  ;;  %v12239_v45 = vunpack.i.h.bf16 %v15436_v23  ;;  %v11144_v37 = vpack.c.bf16 %v963_v16, %v960_v59  ;;  %v1014_v21 = vsel %vm19548_vm14, %v19853_v39, %v12219_v7  ;;  %v12229_v7 = vunpack.i.h.bf16 %v15428_v58  ;;  %s19875_s22 = smov 3  }
 0x122   : > { %10997 = vmatprep.subr.bf16.mxu0 %v10996_v41  ;;  %v1214_v27 = vsel %vm1212_vm11, %v12284_v40, %v12288_v15  ;;  %v1213_v54 = vsel %vm1212_vm11, %v12283_v42, %v12284_v40  ;;  %v19854_v41 = vpack.c.bf16 %v15167_v63, %v15159_v61  ;;  %vm1263_vm13 = vcmask 162816  }
 0x123   : > { %10999 = vmatpush1.bf16.msra.mxu0 %v10998_v51  ;;  %11139 = vmatpush3.bf16.msra.mxu1 %v19851_v62  ;;  %v15586_v33 = vpop.permute.xlu1 %12296  ;;  %v12292_v47 = vpop.permute.xlu0 %12291  ;;  %v1065_v16 = vsel %vm19542_vm15, %v12238_v3, %v12239_v45  ;;  %v1062_v23 = vsel %vm19542_vm15, %v12228_v10, %v12229_v7  ;;  %v12259_v3 = vunpack.i.h.bf16 %v15477_v19  ;;  %vm1314_vm15 = vcmask 154624  }
 0x124   : > { %v12298_v20 = vunpack.i.l.bf16 %v15586_v33  ;;  %v12294_v44 = vunpack.i.h.bf16 %v12292_v47  ;;  %v12293_v53 = vunpack.i.l.bf16 %v12292_v47  ;;  %11141 = vmatprep.subr.bf16.mxu1 %v11140_v13  ;;  %v19855_v13 = vunpack.i.l.bf16 %v15406_v5 }
 0x125   : > { %12586 = vrot.lane.b32.xlu1 %v15388_v50, %s19546_s15  ;;  %12581 = vrot.lane.b32.xlu0 %v15342_v28, %s19546_s15  ;;  %v19856_v5 = vpack.c.bf16 %v15187_v38, %v15179_v35  ;;  %v11152_v35 = vpack.c.bf16 %v1065_v16, %v1062_v23  ;;  %vm19579_vm12 = vcmask 7168  }
 0x126   : > { %v1217_v29 = vsel %vm1212_vm11, %v12294_v44, %v12298_v20  ;;  %v1216_v26 = vsel %vm1212_vm11, %v12293_v53, %v12294_v44  ;;  %v1011_v2 = vsel %vm19548_vm14, %v19855_v13, %v12209_v34  ;;  %v19857_v53 = vpack.c.bf16 %v15207_v14, %v15199_v11 }
 0x127   : > { %11143 = vmatpush3.bf16.msra.mxu1 %v19854_v41  ;;  %v15612_v51 = vpop.permute.xlu1 %12306  ;;  %v12302_v36 = vpop.permute.xlu0 %12301  ;;  %v11000_v17 = vpack.c.bf16 %v1217_v29, %v1214_v27  ;;  %v11002_v55 = vpack.c.bf16 %v1216_v26, %v1213_v54  ;;  %v11148_v61 = vpack.c.bf16 %v1014_v21, %v1011_v2  ;;  %v12249_v27 = vunpack.i.h.bf16 %v15457_v0 }
 0x128   : > { %11145 = vmatprep.subr.bf16.mxu1 %v11144_v37  ;;  %v12308_v63 = vunpack.i.l.bf16 %v15612_v51  ;;  %v12304_v40 = vunpack.i.h.bf16 %v12302_v36  ;;  %v12303_v42 = vunpack.i.l.bf16 %v12302_v36  ;;  %v11156_v29 = vpack.c.bf16 %v15353_v48, %v15384_v25 }
 0x129   : > { %12596 = vrot.lane.b32.xlu1 %v15357_v52, %s19546_s15  ;;  %12591 = vrot.lane.b32.xlu0 %v15367_v6, %s19546_s15  ;;  %v1116_v11 = vsel %vm19545_vm8, %v12258_v4, %v12259_v3  ;;  %v19858_v25 = vpack.c.bf16 %v15227_v46, %v15219_v43  ;;  %v19859_v36 = vunpack.i.l.bf16 %v15457_v0  ;;  %s19552_s15 = smov 85   ;;  %vm1416_vm14 = vcmask 15360  }
 0x12a   : > { %11001 = vmatprep.subr.bf16.mxu0 %v11000_v17  ;;  %v1265_v38 = vsel %vm1263_vm13, %v12304_v40, %v12308_v63  ;;  %v1264_v10 = vsel %vm1263_vm13, %v12303_v42, %v12304_v40 }
 0x12b   : > { %11003 = vmatpush1.bf16.msra.mxu0 %v11002_v55  ;;  %11147 = vmatpush3.bf16.msra.mxu1 %v19856_v5  ;;  %v15629_v62 = vpop.permute.xlu1 %12316  ;;  %v12312_v47 = vpop.permute.xlu0 %12311  ;;  %v1113_v19 = vsel %vm19545_vm8, %v19859_v36, %v12249_v27  ;;  %vm1365_vm8 = vcmask 23552  }
 0x12c   : > { %v12318_v31 = vunpack.i.l.bf16 %v15629_v62  ;;  %v12314_v59 = vunpack.i.h.bf16 %v12312_v47  ;;  %v12313_v34 = vunpack.i.l.bf16 %v12312_v47  ;;  %11149 = vmatprep.subr.bf16.mxu1 %v11148_v61  ;;  %v11158_v43 = vpack.c.bf16 %v1116_v11, %v1113_v19 }
 0x12d   : > { %12606 = vrot.lane.b32.xlu1 %v15388_v50, %s19543_s21  ;;  %12601 = vrot.lane.b32.xlu0 %v15342_v28, %s19543_s21 }
 0x12e   : > { %v1268_v58 = vsel %vm1263_vm13, %v12314_v59, %v12318_v31  ;;  %v1267_v44 = vsel %vm1263_vm13, %v12313_v34, %v12314_v59 }
 0x12f   : > { %11151 = vmatpush3.bf16.msra.mxu1 %v19857_v53  ;;  %v15651_v45 = vpop.permute.xlu1 %12326  ;;  %v12322_v37 = vpop.permute.xlu0 %12321  ;;  %v11004_v39 = vpack.c.bf16 %v1268_v58, %v1265_v38  ;;  %v11006_v21 = vpack.c.bf16 %v1267_v44, %v1264_v10 }
 0x130   : > { %11153 = vmatprep.subr.bf16.mxu1 %v11152_v35  ;;  %v12328_v14 = vunpack.i.l.bf16 %v15651_v45  ;;  %v12324_v54 = vunpack.i.h.bf16 %v12322_v37  ;;  %v12323_v26 = vunpack.i.l.bf16 %v12322_v37 }
 0x131   : > { %12616 = vrot.lane.b32.xlu1 %v15357_v52, %s19543_s21  ;;  %12611 = vrot.lane.b32.xlu0 %v15367_v6, %s19543_s21  ;;  %s19549_s21 = smov 86  }
 0x132   : > { %11005 = vmatprep.subr.bf16.mxu0 %v11004_v39  ;;  %v1316_v46 = vsel %vm1314_vm15, %v12324_v54, %v12328_v14  ;;  %v1315_v7 = vsel %vm1314_vm15, %v12323_v26, %v12324_v54 }
 0x133   : > { %11007 = vmatpush1.bf16.msra.mxu0 %v11006_v21  ;;  %11155 = vmatpush3.bf16.msra.mxu1 %v19858_v25  ;;  %v15667_v48 = vpop.permute.xlu1 %12336  ;;  %v12332_v41 = vpop.permute.xlu0 %12331 }
 0x134   : > { %v12338_v4 = vunpack.i.l.bf16 %v15667_v48  ;;  %v12334_v17 = vunpack.i.h.bf16 %v12332_v41  ;;  %v12333_v55 = vunpack.i.l.bf16 %v12332_v41  ;;  %11157 = vmatprep.subr.bf16.mxu1 %v11156_v29 }
 0x135   : > { %12626 = vrot.lane.b32.xlu1 %v15388_v50, %s19549_s21  ;;  %12621 = vrot.lane.b32.xlu0 %v15342_v28, %s19549_s21 }
 0x136   : > { %3419 = vmatmul.mubr.f32.vlgmr.msra.gmra.mrb[4].mxu1 %v15482_v22  ;;  %v1319_v0 = vsel %vm1314_vm15, %v12334_v17, %v12338_v4  ;;  %v1318_v13 = vsel %vm1314_vm15, %v12333_v55, %v12334_v17 }
 0x137   : > { %11159 = vmatpush3.bf16.msra.mxu1 %v11158_v43  ;;  %v15686_v2 = vpop.permute.xlu1 %12346  ;;  %v12342_v61 = vpop.permute.xlu0 %12341  ;;  %v11008_v40 = vpack.c.bf16 %v1319_v0, %v1316_v46  ;;  %v11010_v42 = vpack.c.bf16 %v1318_v13, %v1315_v7  ;;  %3423 = vmatprep.mubr.f32.mxu1 %v15492_v18 }
 0x138   : > { %v12348_v22 = vunpack.i.l.bf16 %v15686_v2  ;;  %v12344_v16 = vunpack.i.h.bf16 %v12342_v61  ;;  %v12343_v5 = vunpack.i.l.bf16 %v12342_v61 }
 0x139   : > { %12636 = vrot.lane.b32.xlu1 %v15357_v52, %s19549_s21  ;;  %12631 = vrot.lane.b32.xlu0 %v15367_v6, %s19549_s21  ;;  %s19558_s21 = smov 84  }
 0x13a   : > { %11009 = vmatprep.subr.bf16.mxu0 %v11008_v40  ;;  %3424 = vmatmul.mubr.f32.gmra.mrb[6].mxu1 %v15521_v49  ;;  %v1367_v49 = vsel %vm1365_vm8, %v12344_v16, %v12348_v22 }
 0x13b   : > { %11011 = vmatpush1.bf16.msra.mxu0 %v11010_v42  ;;  %v15695_v47 = vpop.permute.xlu1 %12356  ;;  %v12352_v59 = vpop.permute.xlu0 %12351  ;;  %3493 = vmatprep.mubr.f32.mxu1 %v15470_v60  ;;  %v1366_v60 = vsel %vm1365_vm8, %v12343_v5, %v12344_v16 }
 0x13c   : > { %v12358_v18 = vunpack.i.l.bf16 %v15695_v47  ;;  %v12354_v34 = vunpack.i.h.bf16 %v12352_v59  ;;  %v12353_v23 = vunpack.i.l.bf16 %v12352_v59 }
 0x13d   : > { %12646 = vrot.lane.b32.xlu1 %v15388_v50, %s19552_s15  ;;  %12641 = vrot.lane.b32.xlu0 %v15342_v28, %s19552_s15 }
 0x13e   : > { %v1370_v3 = vsel %vm1365_vm8, %v12354_v34, %v12358_v18  ;;  %v1369_v35 = vsel %vm1365_vm8, %v12353_v23, %v12354_v34 }
 0x13f   : > { %v15711_v38 = vpop.permute.xlu1 %12366  ;;  %v12362_v58 = vpop.permute.xlu0 %12361  ;;  %v11012_v10 = vpack.c.bf16 %v1370_v3, %v1367_v49  ;;  %v11014_v44 = vpack.c.bf16 %v1369_v35, %v1366_v60 }
 0x140   : > { %v12368_v53 = vunpack.i.l.bf16 %v15711_v38  ;;  %v12364_v37 = vunpack.i.h.bf16 %v12362_v58  ;;  %v12363_v39 = vunpack.i.l.bf16 %v12362_v58  ;;  %v11024_v58 = vpack.c.bf16 %v15363_v57, %v15338_v24 }
 0x141   : > { %12656 = vrot.lane.b32.xlu1 %v15357_v52, %s19552_s15  ;;  %12651 = vrot.lane.b32.xlu0 %v15367_v6, %s19552_s15  ;;  %s19555_s15 = smov 83   ;;  %v11026_v24 = vpack.c.bf16 %v15360_v56, %v15335_v32 }
 0x142   : > { %11013 = vmatprep.subr.bf16.mxu0 %v11012_v10  ;;  %v1418_v26 = vsel %vm1416_vm14, %v12364_v37, %v12368_v53  ;;  %v1417_v41 = vsel %vm1416_vm14, %v12363_v39, %v12364_v37  ;;  %v12279_v10 = vunpack.i.h.bf16 %v15539_v12 }
 0x143   : > { %11015 = vmatpush1.bf16.msra.mxu0 %v11014_v44  ;;  %v15718_v21 = vpop.permute.xlu1 %12376  ;;  %v12372_v27 = vpop.permute.xlu0 %12371 }
 0x144   : > { %v12378_v29 = vunpack.i.l.bf16 %v15718_v21  ;;  %v12374_v11 = vunpack.i.h.bf16 %v12372_v27  ;;  %v12373_v54 = vunpack.i.l.bf16 %v12372_v27 }
 0x145   : > { %12666 = vrot.lane.b32.xlu1 %v15388_v50, %s19558_s21  ;;  %12661 = vrot.lane.b32.xlu0 %v15342_v28, %s19558_s21 }
 0x146   : > { %v1421_v25 = vsel %vm1416_vm14, %v12374_v11, %v12378_v29  ;;  %v1420_v36 = vsel %vm1416_vm14, %v12373_v54, %v12374_v11  ;;  %v12269_v11 = vunpack.i.h.bf16 %v15515_v9 }
 0x147   : > { %v15733_v19 = vpop.permute.xlu1 %12386  ;;  %v12382_v17 = vpop.permute.xlu0 %12381  ;;  %v11016_v55 = vpack.c.bf16 %v1421_v25, %v1418_v26  ;;  %v11018_v43 = vpack.c.bf16 %v1420_v36, %v1417_v41 }
 0x148   : > { %v12388_v46 = vunpack.i.l.bf16 %v15733_v19  ;;  %v12384_v0 = vunpack.i.h.bf16 %v12382_v17  ;;  %v12383_v7 = vunpack.i.l.bf16 %v12382_v17  ;;  %v1167_v17 = vsel %vm1161_vm10, %v12278_v8, %v12279_v10 }
 0x149   : > { %12676 = vrot.lane.b32.xlu1 %v15357_v52, %s19558_s21  ;;  %12671 = vrot.lane.b32.xlu0 %v15367_v6, %s19558_s21  ;;  %v1164_v8 = vsel %vm1161_vm10, %v12268_v30, %v12269_v11  ;;  %v12289_v30 = vunpack.i.h.bf16 %v15569_v1  ;;  %s19565_s21 = smov 81  }
 0x14a   : > { %11017 = vmatprep.subr.bf16.mxu0 %v11016_v55  ;;  %v1469_v5 = vsel %vm19579_vm12, %v12384_v0, %v12388_v46  ;;  %v1468_v34 = vsel %vm19579_vm12, %v12383_v7, %v12384_v0 }
 0x14b   : > { %11019 = vmatpush1.bf16.msra.mxu0 %v11018_v43  ;;  %v15740_v13 = vpop.permute.xlu1 %12396  ;;  %v12392_v61 = vpop.permute.xlu0 %12391 }
 0x14c   : > { %v12398_v40 = vunpack.i.l.bf16 %v15740_v13  ;;  %v12394_v42 = vunpack.i.h.bf16 %v12392_v61  ;;  %v12393_v16 = vunpack.i.l.bf16 %v12392_v61 }
 0x14d   : > { %12686 = vrot.lane.b32.xlu1 %v15388_v50, %s19555_s15  ;;  %12681 = vrot.lane.b32.xlu0 %v15342_v28, %s19555_s15 }
 0x14e   : > { %v1472_v59 = vsel %vm19579_vm12, %v12394_v42, %v12398_v40  ;;  %v1471_v23 = vsel %vm19579_vm12, %v12393_v16, %v12394_v42 }
 0x14f   : > { %v12407_v49 = vpop.permute.xlu1 %12406  ;;  %v12402_v3 = vpop.permute.xlu0 %12401  ;;  %v11020_v60 = vpack.c.bf16 %v1472_v59, %v1469_v5  ;;  %v11022_v35 = vpack.c.bf16 %v1471_v23, %v1468_v34  ;;  %v11162_v59 = vpack.c.bf16 %v1167_v17, %v1164_v8  ;;  %v12299_v34 = vunpack.i.h.bf16 %v15586_v33 }
 0x150   : > { %v12409_v44 = vunpack.i.h.bf16 %v12407_v49  ;;  %v12408_v37 = vunpack.i.l.bf16 %v12407_v49  ;;  %v12404_v39 = vunpack.i.h.bf16 %v12402_v3  ;;  %v12403_v27 = vunpack.i.l.bf16 %v12402_v3 }
 0x151   : > { %12696 = vrot.lane.b32.xlu1 %v15357_v52, %s19555_s15  ;;  %12691 = vrot.lane.b32.xlu0 %v15367_v6, %s19555_s15  ;;  %s19570_s15 = smov 82  }
 0x152   : > { %11021 = vmatprep.subr.bf16.mxu0 %v11020_v60  ;;  %v1532_v55 = vsel %vm19557_vm9, %v12404_v39, %v12408_v37  ;;  %v1533_v32 = vsel %vm19557_vm9, %v12408_v37, %v12409_v44  ;;  %v1531_v0 = vsel %vm19557_vm9, %v12403_v27, %v12404_v39  ;;  %v1218_v39 = vsel %vm1212_vm11, %v12298_v20, %v12299_v34 }
 0x153   : > { %11023 = vmatpush1.bf16.msra.mxu0 %v11022_v35  ;;  %v12417_v54 = vpop.permute.xlu1 %12416  ;;  %v12412_v26 = vpop.permute.xlu0 %12411  ;;  %v1215_v20 = vsel %vm1212_vm11, %v12288_v15, %v12289_v30  ;;  %v12309_v15 = vunpack.i.h.bf16 %v15612_v51 }
 0x154   : > { %v12419_v57 = vunpack.i.h.bf16 %v12417_v54  ;;  %v12418_v25 = vunpack.i.l.bf16 %v12417_v54  ;;  %v12414_v41 = vunpack.i.h.bf16 %v12412_v26  ;;  %v12413_v36 = vunpack.i.l.bf16 %v12412_v26  ;;  %11025 = vmatprep.subr.bf16.mxu0 %v11024_v58 }
 0x155   : > { %12706 = vrot.lane.b32.xlu1 %v15388_v50, %s19570_s15  ;;  %12701 = vrot.lane.b32.xlu0 %v15342_v28, %s19570_s15 }
 0x156   : > { %v1535_v56 = vsel %vm19557_vm9, %v12414_v41, %v12418_v25  ;;  %v1536_v43 = vsel %vm19557_vm9, %v12418_v25, %v12419_v57  ;;  %v1534_v12 = vsel %vm19557_vm9, %v12413_v36, %v12414_v41  ;;  %vm19560_vm9 = vcmask 1031168  }
 0x157   : > { %11027 = vmatpush1.bf16.msra.mxu0 %v11026_v24  ;;  %v12427_v7 = vpop.permute.xlu1 %12426  ;;  %v12422_v61 = vpop.permute.xlu0 %12421  ;;  %v11028_v42 = vpack.c.bf16 %v1535_v56, %v1532_v55  ;;  %v11160_v16 = vpack.c.bf16 %v1536_v43, %v1533_v32  ;;  %v11030_v5 = vpack.c.bf16 %v1534_v12, %v1531_v0  ;;  %v11166_v55 = vpack.c.bf16 %v1218_v39, %v1215_v20 }
 0x158   : > { %v12429_v23 = vunpack.i.h.bf16 %v12427_v7  ;;  %v12428_v49 = vunpack.i.l.bf16 %v12427_v7  ;;  %v12424_v3 = vunpack.i.h.bf16 %v12422_v61  ;;  %v12423_v9 = vunpack.i.l.bf16 %v12422_v61 }
 0x159   : > { %12716 = vrot.lane.b32.xlu1 %v15357_v52, %s19570_s15  ;;  %12711 = vrot.lane.b32.xlu0 %v15367_v6, %s19570_s15  ;;  %v12319_v32 = vunpack.i.h.bf16 %v15629_v62  ;;  %v12339_v39 = vunpack.i.h.bf16 %v15667_v48  ;;  %v19860_v20 = vmov 0.0   ;;  %s19872_s15 = smov 21  }
 0x15a   : > { %11029 = vmatprep.subr.bf16.mxu0 %v11028_v42  ;;  %11161 = vmatprep.subr.bf16.mxu1 %v11160_v16  ;;  %v1583_v27 = vsel %vm19560_vm9, %v12424_v3, %v12428_v49  ;;  %v1584_v11 = vsel %vm19560_vm9, %v12428_v49, %v12429_v23  ;;  %v1582_v24 = vsel %vm19560_vm9, %v12423_v9, %v12424_v3 }
 0x15b   : > { %11031 = vmatpush1.bf16.msra.mxu0 %v11030_v5  ;;  %11163 = vmatpush3.bf16.msra.mxu1 %v11162_v59  ;;  %v12437_v60 = vpop.permute.xlu1 %12436  ;;  %v12432_v35 = vpop.permute.xlu0 %12431  ;;  %v1269_v5 = vsel %vm1263_vm13, %v12318_v31, %v12319_v32  ;;  %v1266_v3 = vsel %vm1263_vm13, %v12308_v63, %v12309_v15  ;;  %v1320_v32 = vsel %vm1314_vm15, %v12338_v4, %v12339_v39 }
 0x15c   : > { %v12439_v58 = vunpack.i.h.bf16 %v12437_v60  ;;  %v12438_v10 = vunpack.i.l.bf16 %v12437_v60  ;;  %v12434_v44 = vunpack.i.h.bf16 %v12432_v35  ;;  %v12433_v37 = vunpack.i.l.bf16 %v12432_v35 }
 0x15d   : > { %12726 = vrot.lane.b32.xlu1 %v15388_v50, %s19565_s21  ;;  %12721 = vrot.lane.b32.xlu0 %v15342_v28, %s19565_s21 }
 0x15e   : > { %v1586_v54 = vsel %vm19560_vm9, %v12434_v44, %v12438_v10  ;;  %v1587_v26 = vsel %vm19560_vm9, %v12438_v10, %v12439_v58  ;;  %v1585_v33 = vsel %vm19560_vm9, %v12433_v37, %v12434_v44  ;;  %vm19561_vm9 = vcmask 1022976   ;;  %v14809_v10 = vld [vmem:[%s14919_s23] sm:$0xff]  ;;  %v14810_v44 = vld [vmem:[%s14919_s23 + $0x8] sm:$0xff] }
 0x15f   : > { %v12447_v57 = vpop.permute.xlu1 %12446  ;;  %v12442_v25 = vpop.permute.xlu0 %12441  ;;  %v11032_v41 = vpack.c.bf16 %v1586_v54, %v1583_v27  ;;  %v11164_v36 = vpack.c.bf16 %v1587_v26, %v1584_v11  ;;  %v11034_v17 = vpack.c.bf16 %v1585_v33, %v1582_v24  ;;  %v11170_v58 = vpack.c.bf16 %v1269_v5, %v1266_v3  ;;  %v14811_v33 = vld [vmem:[%s14919_s23 + $0x28] sm:$0xff] }
 0x160   : > { %v12449_v56 = vunpack.i.h.bf16 %v12447_v57  ;;  %v12448_v43 = vunpack.i.l.bf16 %v12447_v57  ;;  %v12444_v0 = vunpack.i.h.bf16 %v12442_v25  ;;  %v12443_v1 = vunpack.i.l.bf16 %v12442_v25  ;;  %v14812_v25 = vld [vmem:[%s14919_s23 + $0x18] sm:$0xff] }
 0x161   : > { %12736 = vrot.lane.b32.xlu1 %v15357_v52, %s19565_s21  ;;  %12731 = vrot.lane.b32.xlu0 %v15367_v6, %s19565_s21  ;;  %v15827_v37 = vpack.i.bf16 %v14810_v44, %v14809_v10  ;;  %v12329_v54 = vunpack.i.h.bf16 %v15651_v45  ;;  %v15837_v57 = vpack.i.bf16 %v19860_v20, %v14811_v33  ;;  %s19576_s21 = smov 61  }
 0x162   : > { %11033 = vmatprep.subr.bf16.mxu0 %v11032_v41  ;;  %11165 = vmatprep.subr.bf16.mxu1 %v11164_v36  ;;  %v1634_v59 = vsel %vm19561_vm9, %v12444_v0, %v12448_v43  ;;  %v1635_v34 = vsel %vm19561_vm9, %v12448_v43, %v12449_v56  ;;  %v1633_v62 = vsel %vm19561_vm9, %v12443_v1, %v12444_v0  ;;  %v14813_v41 = vld [vmem:[%s14919_s23 + $0x20] sm:$0xff] }
 0x163   : > { %11035 = vmatpush1.bf16.msra.mxu0 %v11034_v17  ;;  %11167 = vmatpush3.bf16.msra.mxu1 %v11166_v55  ;;  %v12457_v12 = vpop.permute.xlu1 %12456  ;;  %v12452_v8 = vpop.permute.xlu0 %12451  ;;  %v1317_v4 = vsel %vm1314_vm15, %v12328_v14, %v12329_v54  ;;  %v12349_v14 = vunpack.i.h.bf16 %v15686_v2 }
 0x164   : > { %v12459_v7 = vunpack.i.h.bf16 %v12457_v12  ;;  %v12458_v61 = vunpack.i.l.bf16 %v12457_v12  ;;  %v12454_v42 = vunpack.i.h.bf16 %v12452_v8  ;;  %v12453_v16 = vunpack.i.l.bf16 %v12452_v8 }
 0x165   : > { %12746 = vrot.lane.b32.xlu1 %v15388_v50, %s19659_s28  ;;  %12741 = vrot.lane.b32.xlu0 %v15342_v28, %s19659_s28 }
 0x166   : > { %v1637_v23 = vsel %vm19561_vm9, %v12454_v42, %v12458_v61  ;;  %v1638_v49 = vsel %vm19561_vm9, %v12458_v61, %v12459_v7  ;;  %v1636_v31 = vsel %vm19561_vm9, %v12453_v16, %v12454_v42  ;;  %vm19562_vm9 = vcmask 891904   ;;  %v14814_v16 = vld [vmem:[%s14919_s23 + $0x10] sm:$0xff]  ;;  %s19568_s23 = smov 62  }
 0x167   : > { %v12467_v9 = vpop.permute.xlu1 %12466  ;;  %v12462_v30 = vpop.permute.xlu0 %12461  ;;  %v11036_v60 = vpack.c.bf16 %v1637_v23, %v1634_v59  ;;  %v11168_v28 = vpack.c.bf16 %v1638_v49, %v1635_v34  ;;  %v11038_v35 = vpack.c.bf16 %v1636_v31, %v1633_v62  ;;  %v11174_v42 = vpack.c.bf16 %v1320_v32, %v1317_v4 }
 0x168   : > { %v12469_v27 = vunpack.i.h.bf16 %v12467_v9  ;;  %v12468_v11 = vunpack.i.l.bf16 %v12467_v9  ;;  %v12464_v51 = vunpack.i.h.bf16 %v12462_v30  ;;  %v12463_v63 = vunpack.i.l.bf16 %v12462_v30 }
 0x169   : > { %12756 = vrot.lane.b32.xlu1 %v15357_v52, %s19659_s28  ;;  %12751 = vrot.lane.b32.xlu0 %v15367_v6, %s19659_s28  ;;  %v15841_v52 = vpack.i.bf16 %v14813_v41, %v14812_v25  ;;  %v15861_v5 = vpack.i.bf16 %v19860_v20, %v14814_v16  ;;  %v12359_v59 = vunpack.i.h.bf16 %v15695_v47  ;;  %v12399_v16 = vunpack.i.h.bf16 %v15740_v13 }
 0x16a   : > { %11037 = vmatprep.subr.bf16.mxu0 %v11036_v60  ;;  %11169 = vmatprep.subr.bf16.mxu1 %v11168_v28  ;;  %v1685_v56 = vsel %vm19562_vm9, %v12464_v51, %v12468_v11  ;;  %v1686_v43 = vsel %vm19562_vm9, %v12468_v11, %v12469_v27  ;;  %v1684_v15 = vsel %vm19562_vm9, %v12463_v63, %v12464_v51 }
 0x16b   : > { %11039 = vmatpush1.bf16.msra.mxu0 %v11038_v35  ;;  %11171 = vmatpush3.bf16.msra.mxu1 %v11170_v58  ;;  %v12477_v26 = vpop.permute.xlu1 %12476  ;;  %v12472_v24 = vpop.permute.xlu0 %12471  ;;  %v1371_v28 = vsel %vm1365_vm8, %v12358_v18, %v12359_v59  ;;  %v1368_v18 = vsel %vm1365_vm8, %v12348_v22, %v12349_v14  ;;  %v12369_v22 = vunpack.i.h.bf16 %v15711_v38 }
 0x16c   : > { %v12479_v36 = vunpack.i.h.bf16 %v12477_v26  ;;  %v12478_v6 = vunpack.i.l.bf16 %v12477_v26  ;;  %v12474_v17 = vunpack.i.h.bf16 %v12472_v24  ;;  %v12473_v55 = vunpack.i.l.bf16 %v12472_v24 }
 0x16d   : > { %12766 = vrot.lane.b32.xlu1 %v15388_v50, %s19656_s29  ;;  %12761 = vrot.lane.b32.xlu0 %v15827_v37, %s19656_s29  ;;  %v11178_v26 = vpack.c.bf16 %v1371_v28, %v1368_v18  ;;  %v12379_v24 = vunpack.i.h.bf16 %v15718_v21 }
 0x16e   : > { %v1688_v0 = vsel %vm19562_vm9, %v12474_v17, %v12478_v6  ;;  %v1689_v1 = vsel %vm19562_vm9, %v12478_v6, %v12479_v36  ;;  %v1687_v48 = vsel %vm19562_vm9, %v12473_v55, %v12474_v17  ;;  %vm19563_vm9 = vcmask 883712  }
 0x16f   : > { %v12487_v50 = vpop.permute.xlu1 %12486  ;;  %v12482_v12 = vpop.permute.xlu0 %12481  ;;  %v11040_v8 = vpack.c.bf16 %v1688_v0, %v1685_v56  ;;  %v11172_v7 = vpack.c.bf16 %v1689_v1, %v1686_v43  ;;  %v11042_v61 = vpack.c.bf16 %v1687_v48, %v1684_v15  ;;  %v1422_v43 = vsel %vm1416_vm14, %v12378_v29, %v12379_v24 }
 0x170   : > { %v12489_v34 = vunpack.i.h.bf16 %v12487_v50  ;;  %v12488_v23 = vunpack.i.l.bf16 %v12487_v50  ;;  %v12484_v49 = vunpack.i.h.bf16 %v12482_v12  ;;  %v12483_v45 = vunpack.i.l.bf16 %v12482_v12 }
 0x171   : > { %12776 = vrot.lane.b32.xlu1 %v15837_v57, %s19656_s29  ;;  %12771 = vrot.lane.b32.xlu0 %v15841_v52, %s19656_s29  ;;  %v1419_v29 = vsel %vm1416_vm14, %v12368_v53, %v12369_v22  ;;  %v12389_v53 = vunpack.i.h.bf16 %v15733_v19 }
 0x172   : > { %11041 = vmatprep.subr.bf16.mxu0 %v11040_v8  ;;  %11173 = vmatprep.subr.bf16.mxu1 %v11172_v7  ;;  %v1736_v35 = vsel %vm19563_vm9, %v12484_v49, %v12488_v23  ;;  %v1737_v58 = vsel %vm19563_vm9, %v12488_v23, %v12489_v34  ;;  %v1735_v39 = vsel %vm19563_vm9, %v12483_v45, %v12484_v49 }
 0x173   : > { %11043 = vmatpush1.bf16.msra.mxu0 %v11042_v61  ;;  %11175 = vmatpush3.bf16.msra.mxu1 %v11174_v42  ;;  %v12497_v62 = vpop.permute.xlu1 %12496  ;;  %v12492_v31 = vpop.permute.xlu0 %12491  ;;  %v11182_v42 = vpack.c.bf16 %v1422_v43, %v1419_v29 }
 0x174   : > { %v12499_v3 = vunpack.i.h.bf16 %v12497_v62  ;;  %v12498_v9 = vunpack.i.l.bf16 %v12497_v62  ;;  %v12494_v30 = vunpack.i.h.bf16 %v12492_v31  ;;  %v12493_v60 = vunpack.i.l.bf16 %v12492_v31 }
 0x175   : > { %12786 = vrot.lane.b32.xlu1 %v15861_v5, %s19652_s30  ;;  %12781 = vrot.lane.b32.xlu0 %v15827_v37, %s19652_s30 }
 0x176   : > { %v1739_v10 = vsel %vm19563_vm9, %v12494_v30, %v12498_v9  ;;  %v1740_v44 = vsel %vm19563_vm9, %v12498_v9, %v12499_v3  ;;  %v1738_v47 = vsel %vm19563_vm9, %v12493_v60, %v12494_v30  ;;  %vm19564_vm9 = vcmask 875520  }
 0x177   : > { %v12507_v27 = vpop.permute.xlu1 %12506  ;;  %v12502_v11 = vpop.permute.xlu0 %12501  ;;  %v11044_v51 = vpack.c.bf16 %v1739_v10, %v1736_v35  ;;  %v11176_v63 = vpack.c.bf16 %v1740_v44, %v1737_v58  ;;  %v11046_v54 = vpack.c.bf16 %v1738_v47, %v1735_v39  ;;  %v1473_v9 = vsel %vm19579_vm12, %v12398_v40, %v12399_v16 }
 0x178   : > { %v12509_v33 = vunpack.i.h.bf16 %v12507_v27  ;;  %v12508_v25 = vunpack.i.l.bf16 %v12507_v27  ;;  %v12504_v41 = vunpack.i.h.bf16 %v12502_v11  ;;  %v12503_v2 = vunpack.i.l.bf16 %v12502_v11 }
 0x179   : > { %12796 = vrot.lane.b32.xlu1 %v15837_v57, %s19652_s30  ;;  %12791 = vrot.lane.b32.xlu0 %v15841_v52, %s19652_s30  ;;  %v1470_v40 = vsel %vm19579_vm12, %v12388_v46, %v12389_v53  ;;  %vm19583_vm12 = vcmask 842752  }
 0x17a   : > { %11045 = vmatprep.subr.bf16.mxu0 %v11044_v51  ;;  %11177 = vmatprep.subr.bf16.mxu1 %v11176_v63  ;;  %v1787_v0 = vsel %vm19564_vm9, %v12504_v41, %v12508_v25  ;;  %v1788_v1 = vsel %vm19564_vm9, %v12508_v25, %v12509_v33  ;;  %v1786_v4 = vsel %vm19564_vm9, %v12503_v2, %v12504_v41  ;;  %v2729_v2 = vld [vmem:[%s19840_s2 + $0x50] sm:$0xff] }
 0x17b   : > { %11047 = vmatpush1.bf16.msra.mxu0 %v11046_v54  ;;  %11179 = vmatpush3.bf16.msra.mxu1 %v11178_v26  ;;  %v12517_v36 = vpop.permute.xlu1 %12516  ;;  %v12512_v6 = vpop.permute.xlu0 %12511  ;;  %v11186_v27 = vpack.c.bf16 %v1473_v9, %v1470_v40  ;;  %v2721_v26 = vld [vmem:[%s19840_s2 + $0x10] sm:$0xff] }
 0x17c   : > { %v12519_v17 = vunpack.i.h.bf16 %v12517_v36  ;;  %v12518_v55 = vunpack.i.l.bf16 %v12517_v36  ;;  %v12514_v32 = vunpack.i.h.bf16 %v12512_v6  ;;  %v12513_v56 = vunpack.i.l.bf16 %v12512_v6 }
 0x17d   : > { %12806 = vrot.lane.b32.xlu1 %v15861_v5, %s19568_s23  ;;  %12801 = vrot.lane.b32.xlu0 %v15827_v37, %s19568_s23 }
 0x17e   : > { %v1790_v15 = vsel %vm19564_vm9, %v12514_v32, %v12518_v55  ;;  %v1791_v48 = vsel %vm19564_vm9, %v12518_v55, %v12519_v17  ;;  %v1789_v21 = vsel %vm19564_vm9, %v12513_v56, %v12514_v32  ;;  %vm19567_vm9 = vcmask 867328  }
 0x17f   : > { %v12527_v50 = vpop.permute.xlu1 %12526  ;;  %v12522_v12 = vpop.permute.xlu0 %12521  ;;  %v11048_v8 = vpack.c.bf16 %v1790_v15, %v1787_v0  ;;  %v11180_v7 = vpack.c.bf16 %v1791_v48, %v1788_v1  ;;  %v11050_v61 = vpack.c.bf16 %v1789_v21, %v1786_v4  ;;  %v2728_v48 = vld [vmem:[%s19840_s2 + $0x48] sm:$0xff]  ;;  %v14873_v21 = vmov 0  }
 0x180   : > { %v12529_v59 = vunpack.i.h.bf16 %v12527_v50  ;;  %v12528_v34 = vunpack.i.l.bf16 %v12527_v50  ;;  %v12524_v23 = vunpack.i.h.bf16 %v12522_v12  ;;  %v12523_v38 = vunpack.i.l.bf16 %v12522_v12  ;;  %v2724_v4 = vld [vmem:[%s19840_s2 + $0x28] sm:$0xff]  ;;  %12880 = vset.pattern.permute.xlu0 %v14873_v21  ;;  %12881 = vset.pattern.permute.xlu1 %v14873_v21 }
 0x181   : > { %12816 = vrot.lane.b32.xlu1 %v15837_v57, %s19568_s23  ;;  %12811 = vrot.lane.b32.xlu0 %v15841_v52, %s19568_s23  ;;  %s19873_s23 = smov 20  }
 0x182   : > { %11049 = vmatprep.subr.bf16.mxu0 %v11048_v8  ;;  %11181 = vmatprep.subr.bf16.mxu1 %v11180_v7  ;;  %v1838_v30 = vsel %vm19567_vm9, %v12524_v23, %v12528_v34  ;;  %v1839_v60 = vsel %vm19567_vm9, %v12528_v34, %v12529_v59  ;;  %v1837_v58 = vsel %vm19567_vm9, %v12523_v38, %v12524_v23 }
 0x183   : > { %11051 = vmatpush1.bf16.msra.mxu0 %v11050_v61  ;;  %11183 = vmatpush3.bf16.msra.mxu1 %v11182_v42  ;;  %v12537_v49 = vpop.permute.xlu1 %12536  ;;  %v12532_v45 = vpop.permute.xlu0 %12531 }
 0x184   : > { %v12539_v14 = vunpack.i.h.bf16 %v12537_v49  ;;  %v12538_v62 = vunpack.i.l.bf16 %v12537_v49  ;;  %v12534_v31 = vunpack.i.h.bf16 %v12532_v45  ;;  %v12533_v3 = vunpack.i.l.bf16 %v12532_v45 }
 0x185   : > { %12826 = vrot.lane.b32.xlu1 %v15861_v5, %s19576_s21  ;;  %12821 = vrot.lane.b32.xlu0 %v15827_v37, %s19576_s21 }
 0x186   : > { %v1841_v28 = vsel %vm19567_vm9, %v12534_v31, %v12538_v62  ;;  %v1842_v35 = vsel %vm19567_vm9, %v12538_v62, %v12539_v14  ;;  %v1840_v13 = vsel %vm19567_vm9, %v12533_v3, %v12534_v31  ;;  %vm19578_vm9 = vcmask 859136  }
 0x187   : > { %v12547_v10 = vpop.permute.xlu1 %12546  ;;  %v12542_v44 = vpop.permute.xlu0 %12541  ;;  %v11052_v39 = vpack.c.bf16 %v1841_v28, %v1838_v30  ;;  %v11184_v47 = vpack.c.bf16 %v1842_v35, %v1839_v60  ;;  %v11054_v18 = vpack.c.bf16 %v1840_v13, %v1837_v58  ;;  %v3027_v35 = vld [vmem:[%s19861_s3] sm:$0xff] }
 0x188   : > { %v12549_v11 = vunpack.i.h.bf16 %v12547_v10  ;;  %v12548_v51 = vunpack.i.l.bf16 %v12547_v10  ;;  %v12544_v63 = vunpack.i.h.bf16 %v12542_v44  ;;  %v12543_v54 = vunpack.i.l.bf16 %v12542_v44 }
 0x189   : > { %12836 = vrot.lane.b32.xlu1 %v15837_v57, %s19576_s21  ;;  %12831 = vrot.lane.b32.xlu0 %v15841_v52, %s19576_s21  ;;  %s19648_s21 = smov 60  }
 0x18a   : > { %11053 = vmatprep.subr.bf16.mxu0 %v11052_v39  ;;  %11185 = vmatprep.subr.bf16.mxu1 %v11184_v47  ;;  %v15940_v22 = vsel %vm19578_vm9, %v12548_v51, %v12549_v11  ;;  %v1888_v36 = vsel %vm19578_vm9, %v12543_v54, %v12544_v63  ;;  %v1889_v6 = vsel %vm19578_vm9, %v12544_v63, %v12548_v51 }
 0x18b   : > { %11055 = vmatpush1.bf16.msra.mxu0 %v11054_v18  ;;  %11187 = vmatpush3.bf16.msra.mxu1 %v11186_v27  ;;  %v12557_v19 = vpop.permute.xlu1 %12556  ;;  %v12552_v46 = vpop.permute.xlu0 %12551 }
 0x18c   : > { %v12559_v24 = vunpack.i.h.bf16 %v12557_v19  ;;  %v12558_v33 = vunpack.i.l.bf16 %v12557_v19  ;;  %v12554_v25 = vunpack.i.h.bf16 %v12552_v46  ;;  %v12553_v41 = vunpack.i.l.bf16 %v12552_v46 }
 0x18d   : > { %12846 = vrot.lane.b32.xlu1 %v15861_v5, %s19648_s21  ;;  %12841 = vrot.lane.b32.xlu0 %v15827_v37, %s19648_s21 }
 0x18e   : > { %v15949_v17 = vsel %vm19578_vm9, %v12558_v33, %v12559_v24  ;;  %v1891_v55 = vsel %vm19578_vm9, %v12553_v41, %v12554_v25  ;;  %v1892_v32 = vsel %vm19578_vm9, %v12554_v25, %v12558_v33  ;;  %3188 = vmatmul.mubr.f32.vlgmr.msra.gmra.mrb[0].mxu0 %v2721_v26  ;;  %3494 = vmatmul.mubr.f32.vlgmr.msra.gmra.mrb[8].mxu1 %v2721_v26  ;;  %vm19582_vm9 = vcmask 850944  }
 0x18f   : > { %v12567_v56 = vpop.permute.xlu1 %12566  ;;  %v12562_v43 = vpop.permute.xlu0 %12561  ;;  %v11056_v0 = vpack.c.bf16 %v1892_v32, %v1889_v6  ;;  %v11058_v1 = vpack.c.bf16 %v1891_v55, %v1888_v36  ;;  %v11190_v15 = vpack.c.bf16 %v15949_v17, %v15940_v22  ;;  %3498 = vmatprep.mubr.f32.mxu1 %v2729_v2  ;;  %3193 = vmatprep.mubr.f32.mxu0 %v2729_v2 }
 0x190   : > { %v12569_v29 = vunpack.i.h.bf16 %v12567_v56  ;;  %v12568_v50 = vunpack.i.l.bf16 %v12567_v56  ;;  %v12564_v12 = vunpack.i.h.bf16 %v12562_v43  ;;  %v12563_v8 = vunpack.i.l.bf16 %v12562_v43 }
 0x191   : > { %12856 = vrot.lane.b32.xlu1 %v15837_v57, %s19648_s21  ;;  %12851 = vrot.lane.b32.xlu0 %v15841_v52, %s19648_s21  ;;  %s19953_s21 = smov 84  }
 0x192   : > { %11057 = vmatprep.subr.bf16.mxu0 %v11056_v0  ;;  %3499 = vmatmul.mubr.f32.gmra.mrb[10].mxu1 %v2728_v48  ;;  %v15966_v23 = vsel %vm19582_vm9, %v12568_v50, %v12569_v29  ;;  %v1939_v38 = vsel %vm19582_vm9, %v12563_v8, %v12564_v12  ;;  %v1940_v45 = vsel %vm19582_vm9, %v12564_v12, %v12568_v50 }
 0x193   : > { %11059 = vmatpush1.bf16.msra.mxu0 %v11058_v1  ;;  %v12577_v7 = vpop.permute.xlu1 %12576  ;;  %v12572_v61 = vpop.permute.xlu0 %12571  ;;  %3568 = vmatprep.mubr.f32.mxu1 %v2724_v4 }
 0x194   : > { %v12579_v42 = vunpack.i.h.bf16 %v12577_v7  ;;  %v12578_v16 = vunpack.i.l.bf16 %v12577_v7  ;;  %v12574_v59 = vunpack.i.h.bf16 %v12572_v61  ;;  %v12573_v34 = vunpack.i.l.bf16 %v12572_v61  ;;  %3194 = vmatmul.mubr.f32.gmra.mrb[2].mxu0 %v2728_v48 }
 0x195   : > { %12866 = vrot.lane.b32.xlu1 %v15861_v5, %s19580_s16  ;;  %12861 = vrot.lane.b32.xlu0 %v15827_v37, %s19580_s16 }
 0x196   : > { %v15974_v53 = vsel %vm19582_vm9, %v12578_v16, %v12579_v42  ;;  %v1942_v49 = vsel %vm19582_vm9, %v12573_v34, %v12574_v59  ;;  %v1943_v14 = vsel %vm19582_vm9, %v12574_v59, %v12578_v16  ;;  %3264 = vmatprep.mubr.f32.mxu0 %v2724_v4  ;;  %vm19584_vm9 = vcmask 711680  }
 0x197   : > { %v12587_v62 = vpop.permute.xlu1 %12586  ;;  %v12582_v31 = vpop.permute.xlu0 %12581  ;;  %v11060_v3 = vpack.c.bf16 %v1943_v14, %v1940_v45  ;;  %v11062_v9 = vpack.c.bf16 %v1942_v49, %v1939_v38  ;;  %v11194_v5 = vpack.c.bf16 %v15974_v53, %v15966_v23 }
 0x198   : > { %v12589_v30 = vunpack.i.h.bf16 %v12587_v62  ;;  %v12588_v60 = vunpack.i.l.bf16 %v12587_v62  ;;  %v12584_v37 = vunpack.i.h.bf16 %v12582_v31  ;;  %v12583_v28 = vunpack.i.l.bf16 %v12582_v31 }
 0x199   : > { %12876 = vrot.lane.b32.xlu1 %v15837_v57, %s19580_s16  ;;  %12871 = vrot.lane.b32.xlu0 %v15841_v52, %s19580_s16  ;;  %v3028_v52 = vld [vmem:[%s19861_s3 + $0x8] sm:$0xff]  ;;  %s19874_s16 = smov 19  }
 0x19a   : > { %11061 = vmatprep.subr.bf16.mxu0 %v11060_v3  ;;  %v15989_v47 = vsel %vm19583_vm12, %v12588_v60, %v12589_v30  ;;  %v1990_v57 = vsel %vm19583_vm12, %v12583_v28, %v12584_v37  ;;  %v1991_v11 = vsel %vm19583_vm12, %v12584_v37, %v12588_v60 }
 0x19b   : > { %11063 = vmatpush1.bf16.msra.mxu0 %v11062_v9  ;;  %v12597_v58 = vpop.permute.xlu1 %12596  ;;  %v12592_v13 = vpop.permute.xlu0 %12591 }
 0x19c   : > { %v12599_v40 = vunpack.i.h.bf16 %v12597_v58  ;;  %v12598_v10 = vunpack.i.l.bf16 %v12597_v58  ;;  %v12594_v44 = vunpack.i.h.bf16 %v12592_v13  ;;  %v12593_v39 = vunpack.i.l.bf16 %v12592_v13 }
 0x19d   : > { %3031 = vperm.xlu0 %12880, %v3027_v35   ;;  %3036 = vperm.xlu1 %12881, %v3028_v52  }
 0x19e   : > { %v15996_v18 = vsel %vm19583_vm12, %v12598_v10, %v12599_v40  ;;  %v1993_v27 = vsel %vm19583_vm12, %v12593_v39, %v12594_v44  ;;  %v1994_v51 = vsel %vm19583_vm12, %v12594_v44, %v12598_v10  ;;  %vm19585_vm12 = vcmask 703488  }
 0x19f   : > { %v12607_v63 = vpop.permute.xlu1 %12606  ;;  %v12602_v54 = vpop.permute.xlu0 %12601  ;;  %v11064_v19 = vpack.c.bf16 %v1994_v51, %v1991_v11  ;;  %v11066_v46 = vpack.c.bf16 %v1993_v27, %v1990_v57  ;;  %v11198_v26 = vpack.c.bf16 %v15996_v18, %v15989_v47 }
 0x1a0   : > { %v12609_v24 = vunpack.i.h.bf16 %v12607_v63  ;;  %v12608_v33 = vunpack.i.l.bf16 %v12607_v63  ;;  %v12604_v25 = vunpack.i.h.bf16 %v12602_v54  ;;  %v12603_v41 = vunpack.i.l.bf16 %v12602_v54 }
 0x1a1   : > { %11065 = vmatprep.subr.bf16.mxu0 %v11064_v19 }
 0x1a2   : > { %11067 = vmatpush1.bf16.msra.mxu0 %v11066_v46  ;;  %v16004_v43 = vsel %vm19584_vm9, %v12608_v33, %v12609_v24  ;;  %v2041_v0 = vsel %vm19584_vm9, %v12603_v41, %v12604_v25  ;;  %v2042_v4 = vsel %vm19584_vm9, %v12604_v25, %v12608_v33 }
 0x1a3   : > { %v12617_v2 = vpop.permute.xlu1 %12616  ;;  %v12612_v36 = vpop.permute.xlu0 %12611 }
 0x1a4   : > { %v12619_v6 = vunpack.i.h.bf16 %v12617_v2  ;;  %v12618_v55 = vunpack.i.l.bf16 %v12617_v2  ;;  %v12614_v32 = vunpack.i.h.bf16 %v12612_v36  ;;  %v12613_v56 = vunpack.i.l.bf16 %v12612_v36 }
 0x1a6   : > { %v16008_v1 = vsel %vm19584_vm9, %v12618_v55, %v12619_v6  ;;  %v2044_v48 = vsel %vm19584_vm9, %v12613_v56, %v12614_v32  ;;  %v2045_v21 = vsel %vm19584_vm9, %v12614_v32, %v12618_v55  ;;  %vm19586_vm9 = vcmask 695296  }
 0x1a7   : > { %v12627_v29 = vpop.permute.xlu1 %12626  ;;  %v12622_v50 = vpop.permute.xlu0 %12621  ;;  %v11068_v12 = vpack.c.bf16 %v2045_v21, %v2042_v4  ;;  %v11070_v8 = vpack.c.bf16 %v2044_v48, %v2041_v0  ;;  %v11202_v7 = vpack.c.bf16 %v16008_v1, %v16004_v43 }
 0x1a8   : > { %v12629_v61 = vunpack.i.h.bf16 %v12627_v29  ;;  %v12628_v42 = vunpack.i.l.bf16 %v12627_v29  ;;  %v12624_v16 = vunpack.i.h.bf16 %v12622_v50  ;;  %v12623_v59 = vunpack.i.l.bf16 %v12622_v50 }
 0x1a9   : > { %11069 = vmatprep.subr.bf16.mxu0 %v11068_v12 }
 0x1aa   : > { %11071 = vmatpush1.bf16.msra.mxu0 %v11070_v8  ;;  %v16016_v31 = vsel %vm19585_vm12, %v12628_v42, %v12629_v61  ;;  %v2092_v3 = vsel %vm19585_vm12, %v12623_v59, %v12624_v16  ;;  %v2093_v60 = vsel %vm19585_vm12, %v12624_v16, %v12628_v42 }
 0x1ab   : > { %v12637_v34 = vpop.permute.xlu1 %12636  ;;  %v12632_v38 = vpop.permute.xlu0 %12631 }
 0x1ac   : > { %v12639_v49 = vunpack.i.h.bf16 %v12637_v34  ;;  %v12638_v45 = vunpack.i.l.bf16 %v12637_v34  ;;  %v12634_v14 = vunpack.i.h.bf16 %v12632_v38  ;;  %v12633_v62 = vunpack.i.l.bf16 %v12632_v38 }
 0x1ae   : > { %v16020_v9 = vsel %vm19585_vm12, %v12638_v45, %v12639_v49  ;;  %v2095_v30 = vsel %vm19585_vm12, %v12633_v62, %v12634_v14  ;;  %v2096_v37 = vsel %vm19585_vm12, %v12634_v14, %v12638_v45  ;;  %vm19587_vm12 = vcmask 687104  }
 0x1af   : > { %v12647_v28 = vpop.permute.xlu1 %12646  ;;  %v12642_v35 = vpop.permute.xlu0 %12641  ;;  %v11072_v58 = vpack.c.bf16 %v2096_v37, %v2093_v60  ;;  %v11074_v13 = vpack.c.bf16 %v2095_v30, %v2092_v3  ;;  %v11206_v40 = vpack.c.bf16 %v16020_v9, %v16016_v31 }
 0x1b0   : > { %v12649_v10 = vunpack.i.h.bf16 %v12647_v28  ;;  %v12648_v44 = vunpack.i.l.bf16 %v12647_v28  ;;  %v12644_v39 = vunpack.i.h.bf16 %v12642_v35  ;;  %v12643_v57 = vunpack.i.l.bf16 %v12642_v35 }
 0x1b1   : > { %11073 = vmatprep.subr.bf16.mxu0 %v11072_v58 }
 0x1b2   : > { %11075 = vmatpush1.bf16.msra.mxu0 %v11074_v13  ;;  %v16028_v19 = vsel %vm19586_vm9, %v12648_v44, %v12649_v10  ;;  %v2143_v46 = vsel %vm19586_vm9, %v12643_v57, %v12644_v39  ;;  %v2144_v25 = vsel %vm19586_vm9, %v12644_v39, %v12648_v44 }
 0x1b3   : > { %v12657_v52 = vpop.permute.xlu1 %12656  ;;  %v12652_v27 = vpop.permute.xlu0 %12651 }
 0x1b4   : > { %v12659_v11 = vunpack.i.h.bf16 %v12657_v52  ;;  %v12658_v51 = vunpack.i.l.bf16 %v12657_v52  ;;  %v12654_v63 = vunpack.i.h.bf16 %v12652_v27  ;;  %v12653_v54 = vunpack.i.l.bf16 %v12652_v27 }
 0x1b6   : > { %v16032_v24 = vsel %vm19586_vm9, %v12658_v51, %v12659_v11  ;;  %v2146_v33 = vsel %vm19586_vm9, %v12653_v54, %v12654_v63  ;;  %v2147_v41 = vsel %vm19586_vm9, %v12654_v63, %v12658_v51  ;;  %vm19588_vm9 = vcmask 678912  }
 0x1b7   : > { %v12667_v2 = vpop.permute.xlu1 %12666  ;;  %v12662_v36 = vpop.permute.xlu0 %12661  ;;  %v11076_v6 = vpack.c.bf16 %v2147_v41, %v2144_v25  ;;  %v11078_v55 = vpack.c.bf16 %v2146_v33, %v2143_v46  ;;  %v11210_v32 = vpack.c.bf16 %v16032_v24, %v16028_v19 }
 0x1b8   : > { %v12669_v56 = vunpack.i.h.bf16 %v12667_v2  ;;  %v12668_v0 = vunpack.i.l.bf16 %v12667_v2  ;;  %v12664_v48 = vunpack.i.h.bf16 %v12662_v36  ;;  %v12663_v4 = vunpack.i.l.bf16 %v12662_v36 }
 0x1b9   : > { %11077 = vmatprep.subr.bf16.mxu0 %v11076_v6 }
 0x1ba   : > { %11079 = vmatpush1.bf16.msra.mxu0 %v11078_v55  ;;  %v16040_v42 = vsel %vm19587_vm12, %v12668_v0, %v12669_v56  ;;  %v2194_v16 = vsel %vm19587_vm12, %v12663_v4, %v12664_v48  ;;  %v2195_v38 = vsel %vm19587_vm12, %v12664_v48, %v12668_v0 }
 0x1bb   : > { %v12677_v21 = vpop.permute.xlu1 %12676  ;;  %v12672_v29 = vpop.permute.xlu0 %12671 }
 0x1bc   : > { %v12679_v50 = vunpack.i.h.bf16 %v12677_v21  ;;  %v12678_v12 = vunpack.i.l.bf16 %v12677_v21  ;;  %v12674_v8 = vunpack.i.h.bf16 %v12672_v29  ;;  %v12673_v61 = vunpack.i.l.bf16 %v12672_v29 }
 0x1be   : > { %v16044_v59 = vsel %vm19587_vm12, %v12678_v12, %v12679_v50  ;;  %v2197_v34 = vsel %vm19587_vm12, %v12673_v61, %v12674_v8  ;;  %v2198_v49 = vsel %vm19587_vm12, %v12674_v8, %v12678_v12  ;;  %vm19590_vm12 = vcmask 670720  }
 0x1bf   : > { %v12687_v45 = vpop.permute.xlu1 %12686  ;;  %v12682_v14 = vpop.permute.xlu0 %12681  ;;  %v11080_v62 = vpack.c.bf16 %v2198_v49, %v2195_v38  ;;  %v11082_v3 = vpack.c.bf16 %v2197_v34, %v2194_v16  ;;  %v11214_v30 = vpack.c.bf16 %v16044_v59, %v16040_v42 }
 0x1c0   : > { %v12689_v60 = vunpack.i.h.bf16 %v12687_v45  ;;  %v12688_v37 = vunpack.i.l.bf16 %v12687_v45  ;;  %v12684_v28 = vunpack.i.h.bf16 %v12682_v14  ;;  %v12683_v35 = vunpack.i.l.bf16 %v12682_v14 }
 0x1c1   : > { %11081 = vmatprep.subr.bf16.mxu0 %v11080_v62 }
 0x1c2   : > { %11083 = vmatpush1.bf16.msra.mxu0 %v11082_v3  ;;  %v16052_v52 = vsel %vm19588_vm9, %v12688_v37, %v12689_v60  ;;  %v2245_v27 = vsel %vm19588_vm9, %v12683_v35, %v12684_v28  ;;  %v2246_v63 = vsel %vm19588_vm9, %v12684_v28, %v12688_v37 }
 0x1c3   : > { %v12697_v58 = vpop.permute.xlu1 %12696  ;;  %v12692_v13 = vpop.permute.xlu0 %12691 }
 0x1c4   : > { %v12699_v10 = vunpack.i.h.bf16 %v12697_v58  ;;  %v12698_v44 = vunpack.i.l.bf16 %v12697_v58  ;;  %v12694_v39 = vunpack.i.h.bf16 %v12692_v13  ;;  %v12693_v57 = vunpack.i.l.bf16 %v12692_v13 }
 0x1c6   : > { %v16056_v11 = vsel %vm19588_vm9, %v12698_v44, %v12699_v10  ;;  %v2248_v51 = vsel %vm19588_vm9, %v12693_v57, %v12694_v39  ;;  %v2249_v54 = vsel %vm19588_vm9, %v12694_v39, %v12698_v44  ;;  %vm19589_vm9 = vcmask 662528  }
 0x1c7   : > { %v12707_v46 = vpop.permute.xlu1 %12706  ;;  %v12702_v33 = vpop.permute.xlu0 %12701  ;;  %v11084_v25 = vpack.c.bf16 %v2249_v54, %v2246_v63  ;;  %v11086_v41 = vpack.c.bf16 %v2248_v51, %v2245_v27  ;;  %v11218_v2 = vpack.c.bf16 %v16056_v11, %v16052_v52 }
 0x1c8   : > { %v12708_v36 = vunpack.i.l.bf16 %v12707_v46  ;;  %v12704_v6 = vunpack.i.h.bf16 %v12702_v33  ;;  %v12703_v55 = vunpack.i.l.bf16 %v12702_v33  ;;  %v12709_v56 = vunpack.i.h.bf16 %v12707_v46 }
 0x1c9   : > { %11085 = vmatprep.subr.bf16.mxu0 %v11084_v25 }
 0x1ca   : > { %11087 = vmatpush1.bf16.msra.mxu0 %v11086_v41  ;;  %v2296_v12 = vsel %vm19590_vm12, %v12703_v55, %v12704_v6  ;;  %v2297_v8 = vsel %vm19590_vm12, %v12704_v6, %v12708_v36  ;;  %v2298_v34 = vsel %vm19590_vm12, %v12708_v36, %v12709_v56 }
 0x1cb   : > { %v12717_v0 = vpop.permute.xlu1 %12716  ;;  %v12712_v48 = vpop.permute.xlu0 %12711 }
 0x1cc   : > { %v12719_v4 = vunpack.i.h.bf16 %v12717_v0  ;;  %v12718_v21 = vunpack.i.l.bf16 %v12717_v0  ;;  %v12714_v29 = vunpack.i.h.bf16 %v12712_v48  ;;  %v12713_v50 = vunpack.i.l.bf16 %v12712_v48 }
 0x1ce   : > { %v2299_v61 = vsel %vm19590_vm12, %v12713_v50, %v12714_v29  ;;  %v2300_v16 = vsel %vm19590_vm12, %v12714_v29, %v12718_v21  ;;  %v2301_v38 = vsel %vm19590_vm12, %v12718_v21, %v12719_v4  ;;  %vm19592_vm12 = vcmask 498688  }
 0x1cf   : > { %v12727_v49 = vpop.permute.xlu1 %12726  ;;  %v12722_v45 = vpop.permute.xlu0 %12721  ;;  %v11088_v14 = vpack.c.bf16 %v2300_v16, %v2297_v8  ;;  %v11188_v62 = vpack.c.bf16 %v2301_v38, %v2298_v34  ;;  %v11090_v3 = vpack.c.bf16 %v2299_v61, %v2296_v12 }
 0x1d0   : > { %v12728_v60 = vunpack.i.l.bf16 %v12727_v49  ;;  %v12724_v37 = vunpack.i.h.bf16 %v12722_v45  ;;  %v12723_v28 = vunpack.i.l.bf16 %v12722_v45  ;;  %v12729_v35 = vunpack.i.h.bf16 %v12727_v49 }
 0x1d1   : > { %11089 = vmatprep.subr.bf16.mxu0 %v11088_v14  ;;  %11189 = vmatprep.subr.bf16.mxu1 %v11188_v62 }
 0x1d2   : > { %11091 = vmatpush1.bf16.msra.mxu0 %v11090_v3  ;;  %11191 = vmatpush3.bf16.msra.mxu1 %v11190_v15  ;;  %v2347_v27 = vsel %vm19589_vm9, %v12723_v28, %v12724_v37  ;;  %v2348_v51 = vsel %vm19589_vm9, %v12724_v37, %v12728_v60  ;;  %v2349_v46 = vsel %vm19589_vm9, %v12728_v60, %v12729_v35 }
 0x1d3   : > { %v12737_v58 = vpop.permute.xlu1 %12736  ;;  %v12732_v13 = vpop.permute.xlu0 %12731 }
 0x1d4   : > { %v12739_v10 = vunpack.i.h.bf16 %v12737_v58  ;;  %v12738_v44 = vunpack.i.l.bf16 %v12737_v58  ;;  %v12734_v39 = vunpack.i.h.bf16 %v12732_v13  ;;  %v12733_v57 = vunpack.i.l.bf16 %v12732_v13 }
 0x1d6   : > { %v2350_v63 = vsel %vm19589_vm9, %v12733_v57, %v12734_v39  ;;  %v2351_v54 = vsel %vm19589_vm9, %v12734_v39, %v12738_v44  ;;  %v2352_v33 = vsel %vm19589_vm9, %v12738_v44, %v12739_v10  ;;  %vm19591_vm9 = vcmask 506880  }
 0x1d7   : > { %v12747_v22 = vpop.permute.xlu1 %12746  ;;  %v12742_v17 = vpop.permute.xlu0 %12741  ;;  %v11092_v15 = vpack.c.bf16 %v2351_v54, %v2348_v51  ;;  %v11192_v25 = vpack.c.bf16 %v2352_v33, %v2349_v46  ;;  %v11094_v41 = vpack.c.bf16 %v2350_v63, %v2347_v27 }
 0x1d8   : > { %v12748_v36 = vunpack.i.l.bf16 %v12747_v22  ;;  %v12744_v6 = vunpack.i.h.bf16 %v12742_v17  ;;  %v12743_v55 = vunpack.i.l.bf16 %v12742_v17  ;;  %v12749_v56 = vunpack.i.h.bf16 %v12747_v22 }
 0x1d9   : > { %11093 = vmatprep.subr.bf16.mxu0 %v11092_v15  ;;  %11193 = vmatprep.subr.bf16.mxu1 %v11192_v25 }
 0x1da   : > { %11095 = vmatpush1.bf16.msra.mxu0 %v11094_v41  ;;  %11195 = vmatpush3.bf16.msra.mxu1 %v11194_v5  ;;  %v2397_v12 = vsel %vm498_vm4, %v12743_v55, %v12744_v6  ;;  %v2398_v8 = vsel %vm498_vm4, %v12744_v6, %v12748_v36  ;;  %v2399_v34 = vsel %vm498_vm4, %v12748_v36, %v12749_v56 }
 0x1db   : > { %v12757_v0 = vpop.permute.xlu1 %12756  ;;  %v12752_v48 = vpop.permute.xlu0 %12751 }
 0x1dc   : > { %v12759_v4 = vunpack.i.h.bf16 %v12757_v0  ;;  %v12758_v21 = vunpack.i.l.bf16 %v12757_v0  ;;  %v12754_v29 = vunpack.i.h.bf16 %v12752_v48  ;;  %v12753_v50 = vunpack.i.l.bf16 %v12752_v48 }
 0x1de   : > { %v2400_v61 = vsel %vm498_vm4, %v12753_v50, %v12754_v29  ;;  %v2401_v16 = vsel %vm498_vm4, %v12754_v29, %v12758_v21  ;;  %v2402_v38 = vsel %vm498_vm4, %v12758_v21, %v12759_v4 }
 0x1df   : > { %v12767_v23 = vpop.permute.xlu1 %12766  ;;  %v12762_v53 = vpop.permute.xlu0 %12761  ;;  %v11096_v5 = vpack.c.bf16 %v2401_v16, %v2398_v8  ;;  %v11196_v49 = vpack.c.bf16 %v2402_v38, %v2399_v34  ;;  %v11098_v45 = vpack.c.bf16 %v2400_v61, %v2397_v12 }
 0x1e0   : > { %v12768_v14 = vunpack.i.l.bf16 %v12767_v23  ;;  %v12764_v62 = vunpack.i.h.bf16 %v12762_v53  ;;  %v12763_v3 = vunpack.i.l.bf16 %v12762_v53  ;;  %v12769_v60 = vunpack.i.h.bf16 %v12767_v23 }
 0x1e1   : > { %11097 = vmatprep.subr.bf16.mxu0 %v11096_v5  ;;  %11197 = vmatprep.subr.bf16.mxu1 %v11196_v49 }
 0x1e2   : > { %11099 = vmatpush1.bf16.msra.mxu0 %v11098_v45  ;;  %11199 = vmatpush3.bf16.msra.mxu1 %v11198_v26  ;;  %v2447_v44 = vsel %vm549_vm5, %v12763_v3, %v12764_v62  ;;  %v2448_v39 = vsel %vm549_vm5, %v12764_v62, %v12768_v14  ;;  %v2449_v51 = vsel %vm549_vm5, %v12768_v14, %v12769_v60 }
 0x1e3   : > { %v12777_v37 = vpop.permute.xlu1 %12776  ;;  %v12772_v28 = vpop.permute.xlu0 %12771 }
 0x1e4   : > { %v12779_v35 = vunpack.i.h.bf16 %v12777_v37  ;;  %v12778_v58 = vunpack.i.l.bf16 %v12777_v37  ;;  %v12774_v13 = vunpack.i.h.bf16 %v12772_v28  ;;  %v12773_v10 = vunpack.i.l.bf16 %v12772_v28 }
 0x1e6   : > { %v2450_v57 = vsel %vm549_vm5, %v12773_v10, %v12774_v13  ;;  %v2451_v27 = vsel %vm549_vm5, %v12774_v13, %v12778_v58  ;;  %v2452_v63 = vsel %vm549_vm5, %v12778_v58, %v12779_v35 }
 0x1e7   : > { %v12787_v47 = vpop.permute.xlu1 %12786  ;;  %v12782_v18 = vpop.permute.xlu0 %12781  ;;  %v11100_v26 = vpack.c.bf16 %v2451_v27, %v2448_v39  ;;  %v11200_v54 = vpack.c.bf16 %v2452_v63, %v2449_v51  ;;  %v11102_v46 = vpack.c.bf16 %v2450_v57, %v2447_v44 }
 0x1e8   : > { %v12788_v33 = vunpack.i.l.bf16 %v12787_v47  ;;  %v12784_v22 = vunpack.i.h.bf16 %v12782_v18  ;;  %v12783_v17 = vunpack.i.l.bf16 %v12782_v18  ;;  %v12789_v25 = vunpack.i.h.bf16 %v12787_v47 }
 0x1e9   : > { %11101 = vmatprep.subr.bf16.mxu0 %v11100_v26  ;;  %11201 = vmatprep.subr.bf16.mxu1 %v11200_v54  ;;  %v16096_v15 = vpop.f32.mrb[0].mxu1 }
 0x1ea   : > { %11103 = vmatpush1.bf16.msra.mxu0 %v11102_v46  ;;  %11203 = vmatpush3.bf16.msra.mxu1 %v11202_v7  ;;  %v16101_v41 = vpop.f32.mrb[1].mxu1  ;;  %v2497_v4 = vsel %vm600_vm6, %v12783_v17, %v12784_v22  ;;  %v2498_v21 = vsel %vm600_vm6, %v12784_v22, %v12788_v33  ;;  %v2499_v43 = vsel %vm600_vm6, %v12788_v33, %v12789_v25 }
 0x1eb   : > { %v12797_v36 = vpop.permute.xlu1 %12796  ;;  %v12792_v6 = vpop.permute.xlu0 %12791 }
 0x1ec   : > { %v12799_v55 = vunpack.i.h.bf16 %v12797_v36  ;;  %v12798_v56 = vunpack.i.l.bf16 %v12797_v36  ;;  %v12794_v0 = vunpack.i.h.bf16 %v12792_v6  ;;  %v12793_v48 = vunpack.i.l.bf16 %v12792_v6 }
 0x1ed   : > { %v16105_v29 = vpop.f32.mrb[2].mxu1 }
 0x1ee   : > { %v2500_v50 = vsel %vm600_vm6, %v12793_v48, %v12794_v0  ;;  %v2501_v12 = vsel %vm600_vm6, %v12794_v0, %v12798_v56  ;;  %v2502_v1 = vsel %vm600_vm6, %v12798_v56, %v12799_v55  ;;  %v16111_v7 = vpop.f32.mrb[3].mxu1 }
 0x1ef   : > { %v12807_v8 = vpop.permute.xlu1 %12806  ;;  %v12802_v61 = vpop.permute.xlu0 %12801  ;;  %v11104_v16 = vpack.c.bf16 %v2501_v12, %v2498_v21  ;;  %v11204_v34 = vpack.c.bf16 %v2502_v1, %v2499_v43  ;;  %v11106_v38 = vpack.c.bf16 %v2500_v50, %v2497_v4 }
 0x1f0   : > { %v12808_v23 = vunpack.i.l.bf16 %v12807_v8  ;;  %v12804_v53 = vunpack.i.h.bf16 %v12802_v61  ;;  %v12803_v5 = vunpack.i.l.bf16 %v12802_v61  ;;  %v12809_v49 = vunpack.i.h.bf16 %v12807_v8 }
 0x1f1   : > { %11105 = vmatprep.subr.bf16.mxu0 %v11104_v16  ;;  %11205 = vmatprep.subr.bf16.mxu1 %v11204_v34 }
 0x1f2   : > { %11107 = vmatpush1.bf16.msra.mxu0 %v11106_v38  ;;  %11207 = vmatpush3.bf16.msra.mxu1 %v11206_v40  ;;  %v2548_v28 = vsel %vm19591_vm9, %v12803_v5, %v12804_v53  ;;  %v2549_v35 = vsel %vm19591_vm9, %v12804_v53, %v12808_v23  ;;  %v2550_v10 = vsel %vm19591_vm9, %v12808_v23, %v12809_v49 }
 0x1f3   : > { %v12817_v45 = vpop.permute.xlu1 %12816  ;;  %v12812_v14 = vpop.permute.xlu0 %12811 }
 0x1f4   : > { %v12819_v62 = vunpack.i.h.bf16 %v12817_v45  ;;  %v12818_v3 = vunpack.i.l.bf16 %v12817_v45  ;;  %v12814_v60 = vunpack.i.h.bf16 %v12812_v14  ;;  %v12813_v37 = vunpack.i.l.bf16 %v12812_v14 }
 0x1f6   : > { %v2551_v58 = vsel %vm19591_vm9, %v12813_v37, %v12814_v60  ;;  %v2552_v13 = vsel %vm19591_vm9, %v12814_v60, %v12818_v3  ;;  %v2553_v44 = vsel %vm19591_vm9, %v12818_v3, %v12819_v62  ;;  %vm19593_vm9 = vcmask 490496  }
 0x1f7   : > { %v12827_v31 = vpop.permute.xlu1 %12826  ;;  %v12822_v9 = vpop.permute.xlu0 %12821  ;;  %v11108_v40 = vpack.c.bf16 %v2552_v13, %v2549_v35  ;;  %v11208_v39 = vpack.c.bf16 %v2553_v44, %v2550_v10  ;;  %v11110_v57 = vpack.c.bf16 %v2551_v58, %v2548_v28  ;;  %v2723_v35 = vld [vmem:[%s19840_s2 + $0x20] sm:$0xff] }
 0x1f8   : > { %v12828_v27 = vunpack.i.l.bf16 %v12827_v31  ;;  %v12824_v51 = vunpack.i.h.bf16 %v12822_v9  ;;  %v12823_v63 = vunpack.i.l.bf16 %v12822_v9  ;;  %v12829_v47 = vunpack.i.h.bf16 %v12827_v31  ;;  %v2731_v31 = vld [vmem:[%s19840_s2 + $0x60] sm:$0xff] }
 0x1f9   : > { %11109 = vmatprep.subr.bf16.mxu0 %v11108_v40  ;;  %11209 = vmatprep.subr.bf16.mxu1 %v11208_v39 }
 0x1fa   : > { %11111 = vmatpush1.bf16.msra.mxu0 %v11110_v57  ;;  %11211 = vmatpush3.bf16.msra.mxu1 %v11210_v32  ;;  %v2599_v17 = vsel %vm19592_vm12, %v12823_v63, %v12824_v51  ;;  %v2600_v25 = vsel %vm19592_vm12, %v12824_v51, %v12828_v27  ;;  %v2601_v55 = vsel %vm19592_vm12, %v12828_v27, %v12829_v47  ;;  %v2730_v63 = vld [vmem:[%s19840_s2 + $0x58] sm:$0xff] }
 0x1fb   : > { %v12837_v18 = vpop.permute.xlu1 %12836  ;;  %v12832_v26 = vpop.permute.xlu0 %12831 }
 0x1fc   : > { %v12839_v54 = vunpack.i.h.bf16 %v12837_v18  ;;  %v12838_v46 = vunpack.i.l.bf16 %v12837_v18  ;;  %v12834_v33 = vunpack.i.h.bf16 %v12832_v26  ;;  %v12833_v22 = vunpack.i.l.bf16 %v12832_v26 }
 0x1fe   : > { %v2602_v36 = vsel %vm19592_vm12, %v12833_v22, %v12834_v33  ;;  %v2603_v6 = vsel %vm19592_vm12, %v12834_v33, %v12838_v46  ;;  %v2604_v56 = vsel %vm19592_vm12, %v12838_v46, %v12839_v54  ;;  %vm2700_vm12 = vcmask 482304  }
 0x1ff   : > { %v12847_v19 = vpop.permute.xlu1 %12846  ;;  %v12842_v24 = vpop.permute.xlu0 %12841  ;;  %v11112_v32 = vpack.c.bf16 %v2603_v6, %v2600_v25  ;;  %v11212_v0 = vpack.c.bf16 %v2604_v56, %v2601_v55  ;;  %v11114_v48 = vpack.c.bf16 %v2602_v36, %v2599_v17  ;;  %v2725_v25 = vld [vmem:[%s19840_s2 + $0x30] sm:$0xff]  ;;  %v2732_v36 = vld [vmem:[%s19840_s2 + $0x68] sm:$0xff] }
 0x200   : > { %v12848_v4 = vunpack.i.l.bf16 %v12847_v19  ;;  %v12844_v21 = vunpack.i.h.bf16 %v12842_v24  ;;  %v12843_v50 = vunpack.i.l.bf16 %v12842_v24  ;;  %v12849_v12 = vunpack.i.h.bf16 %v12847_v19 }
 0x201   : > { %11113 = vmatprep.subr.bf16.mxu0 %v11112_v32  ;;  %11213 = vmatprep.subr.bf16.mxu1 %v11212_v0 }
 0x202   : > { %11115 = vmatpush1.bf16.msra.mxu0 %v11114_v48  ;;  %11215 = vmatpush3.bf16.msra.mxu1 %v11214_v30  ;;  %v2650_v38 = vsel %vm19593_vm9, %v12843_v50, %v12844_v21  ;;  %v2651_v23 = vsel %vm19593_vm9, %v12844_v21, %v12848_v4  ;;  %v2652_v49 = vsel %vm19593_vm9, %v12848_v4, %v12849_v12 }
 0x203   : > { %v12857_v43 = vpop.permute.xlu1 %12856  ;;  %v12852_v1 = vpop.permute.xlu0 %12851 }
 0x204   : > { %v12859_v8 = vunpack.i.h.bf16 %v12857_v43  ;;  %v12858_v61 = vunpack.i.l.bf16 %v12857_v43  ;;  %v12854_v16 = vunpack.i.h.bf16 %v12852_v1  ;;  %v12853_v34 = vunpack.i.l.bf16 %v12852_v1 }
 0x205   : > { %v3655_v43 = vlaneseq }
 0x206   : > { %v2653_v53 = vsel %vm19593_vm9, %v12853_v34, %v12854_v16  ;;  %v2654_v5 = vsel %vm19593_vm9, %v12854_v16, %v12858_v61  ;;  %v2655_v45 = vsel %vm19593_vm9, %v12858_v61, %v12859_v8  ;;  %vm19626_vm9 = vcmask 130048  }
 0x207   : > { %v12867_v42 = vpop.permute.xlu1 %12866  ;;  %v12862_v59 = vpop.permute.xlu0 %12861  ;;  %v11116_v30 = vpack.c.bf16 %v2654_v5, %v2651_v23  ;;  %v11216_v14 = vpack.c.bf16 %v2655_v45, %v2652_v49  ;;  %v11118_v62 = vpack.c.bf16 %v2653_v53, %v2650_v38  ;;  %v3656_v1 = vshrl.u32 %v3655_v43, 7  ;;  %v249_v38 = vld [vmem:[%s19862_s4] sm:$0x7]  ;;  %s19986_s4 = smov 64  }
 0x208   : > { %v12868_v3 = vunpack.i.l.bf16 %v12867_v42  ;;  %v12864_v60 = vunpack.i.h.bf16 %v12862_v59  ;;  %v12863_v37 = vunpack.i.l.bf16 %v12862_v59  ;;  %v12869_v13 = vunpack.i.h.bf16 %v12867_v42 }
 0x209   : > { %11117 = vmatprep.subr.bf16.mxu0 %v11116_v30  ;;  %11217 = vmatprep.subr.bf16.mxu1 %v11216_v14  ;;  %v10585_v28 = vpop.f32.mrb[4].mxu1  ;;  %v3657_v34 = vsub.s32 0, %v3656_v1 }
 0x20a   : > { %11119 = vmatpush1.bf16.msra.mxu0 %v11118_v62  ;;  %11219 = vmatpush3.bf16.msra.mxu1 %v11218_v2  ;;  %v10586_v58 = vpop.f32.mrb[5].mxu1  ;;  %v2701_v52 = vsel %vm2700_vm12, %v12863_v37, %v12864_v60  ;;  %v2702_v11 = vsel %vm2700_vm12, %v12864_v60, %v12868_v3  ;;  %v2703_v22 = vsel %vm2700_vm12, %v12868_v3, %v12869_v13 }
 0x20b   : > { %v12877_v10 = vpop.permute.xlu1 %12876  ;;  %v12872_v44 = vpop.permute.xlu0 %12871  ;;  %v10587_v9 = vadd.f32 %v10586_v58, %v10585_v28  ;;  %v16175_v42 = vrot.slane %v249_v38, %v3657_v34  ;;  %v3661_v58 = vsub.s32 1, %v3656_v1 }
 0x20c   : > { %v12879_v40 = vunpack.i.h.bf16 %v12877_v10  ;;  %v12878_v39 = vunpack.i.l.bf16 %v12877_v10  ;;  %v12874_v57 = vunpack.i.h.bf16 %v12872_v44  ;;  %v12873_v27 = vunpack.i.l.bf16 %v12872_v44 }
 0x20d   : > { %3265 = vmatmul.mubr.f32.vlgmr.msra.gmra.mrb[0].mxu0 %v2723_v35  ;;  %3569 = vmatmul.mubr.f32.vlgmr.msra.gmra.mrb[12].mxu1 %v2723_v35  ;;  %v10588_v2 = vpop.f32.mrb[6].mxu1  ;;  %19863 = vst [vmem:[#allocation6_spill] sm:$0xff] %v16175_v42  ;;  %v3665_v10 = vsub.s32 2, %v3656_v1 }
 0x20e   : > { %v2704_v51 = vsel %vm2700_vm12, %v12873_v27, %v12874_v57  ;;  %3270 = vmatprep.mubr.f32.mxu0 %v2731_v31  ;;  %3573 = vmatprep.mubr.f32.mxu1 %v2731_v31  ;;  %v2705_v47 = vsel %vm2700_vm12, %v12874_v57, %v12878_v39  ;;  %v2706_v18 = vsel %vm2700_vm12, %v12878_v39, %v12879_v40  ;;  %v10589_v26 = vpop.f32.mrb[7].mxu1 }
 0x20f   : > { %v11120_v54 = vpack.c.bf16 %v2705_v47, %v2702_v11  ;;  %v11122_v46 = vpack.c.bf16 %v2704_v51, %v2701_v52  ;;  %v10590_v33 = vadd.f32 %v10589_v26, %v10588_v2  ;;  %v11220_v17 = vpack.c.bf16 %v2706_v18, %v2703_v22 }
 0x210   : > { %v16191_v39 = vrot.slane %v249_v38, %v3665_v10 }
 0x211   : > { %3271 = vmatmul.mubr.f32.gmra.mrb[2].mxu0 %v2730_v63  ;;  %11121 = vmatprep.subr.bf16.mxu0 %v11120_v54 }
 0x212   : > { %3574 = vmatmul.mubr.f32.gmra.mrb[14].mxu1 %v2730_v63  ;;  %11123 = vmatpush1.bf16.msra.mxu0 %v11122_v46  ;;  %19866 = vst [vmem:[#allocation9_spill] sm:$0xff] %v16191_v39 }
 0x213   : > { %11221 = vmatprep.subr.bf16.mxu0 %v11220_v17  ;;  %3341 = vmatprep.mubr.f32.mxu0 %v19860_v20 }
 0x215   : > { %10507 = vmatmul.mubr.msk.f32.vlgmr.msra.gmra.mrb[0].mxu0 %vm19626_vm9, %v2725_v25 }
 0x216   : > { %11223 = vmatpush3.bf16.msra.mxu0 %v11220_v17  ;;  %3347 = vmatprep.mubr.f32.mxu0 %v19860_v20 }
 0x219   : > { %10508 = vmatmul.mubr.msk.f32.gmra.mrb[2].mxu0 %vm19626_vm9, %v2732_v36 }
 0x21a   : > { %10911 = vmatprep.mubr.msk.f32.mxu0 %vm19626_vm9, %v2725_v25 }
 0x21c   : > { %v3032_v6 = vpop.permute.xlu0 %3031  ;;  %v3037_v32 = vpop.permute.xlu1 %3036 }
 0x21d   : > { %10912 = vmatmul.mubr.msk.f32.vlgmr.msra.gmra.mrb[4].mxu0 %vm19626_vm9, %v2732_v36  ;;  %v3421_v55 = vadd.f32 %v10587_v9, %v3032_v6  ;;  %v3426_v0 = vadd.f32 %v10590_v33, %v3037_v32  ;;  %v3113_v45 = vadd.f32 %v16096_v15, %v3032_v6  ;;  %v3115_v59 = vadd.f32 %v16101_v41, %v3032_v6 }
 0x21e   : > { %6717 = vmatprep.mubr.f32.mxu0 %v19860_v20  ;;  %v3119_v28 = vadd.f32 %v16105_v29, %v3037_v32  ;;  %v3121_v35 = vadd.f32 %v16111_v7, %v3037_v32  ;;  %v16189_v9 = vrot.slane %v249_v38, %v3661_v58  ;;  %vm19893_vm9 = vcmask 367616  }
 0x220   : > { %19865 = vst [vmem:[#allocation8_spill] sm:$0xff] %v16189_v9 }
 0x261   : > { %v10623_v56 = vpop.f32.mrb[8].mxu1 }
 0x262   : > { %v10624_v19 = vpop.f32.mrb[9].mxu1 }
 0x263   : > { %v10625_v24 = vadd.f32 %v10624_v19, %v10623_v56 }
 0x265   : > { %v3496_v48 = vadd.f32 %v10625_v24, %v3421_v55  ;;  %v10626_v4 = vpop.f32.mrb[10].mxu1  ;;  %v10512_v55 = vld [vmem:[%s19840_s2 + $0x78] sm:$0xff] }
 0x266   : > { %v10627_v21 = vpop.f32.mrb[11].mxu1  ;;  %6486 = vmatprep.mubr.f32.mxu1 %v10512_v55 }
 0x267   : > { %v10628_v50 = vadd.f32 %v10627_v21, %v10626_v4 }
 0x269   : > { %v3501_v12 = vadd.f32 %v10628_v50, %v3426_v0 }
 0x2e0   : > { %v10661_v8 = vpop.f32.mrb[12].mxu1 }
 0x2e1   : > { %v10662_v61 = vpop.f32.mrb[13].mxu1 }
 0x2e2   : > { %v10663_v16 = vadd.f32 %v10662_v61, %v10661_v8 }
 0x2e4   : > { %v3571_v23 = vadd.f32 %v10663_v16, %v3496_v48 }
 0x2e5   : > { %v10664_v53 = vpop.f32.mrb[14].mxu1 }
 0x2e6   : > { %v10665_v5 = vpop.f32.mrb[15].mxu1 }
 0x2e7   : > { %v10666_v49 = vadd.f32 %v10665_v5, %v10664_v53 }
 0x2e8   : > { %v3343_v30 = vpop.f32.mrb[0].mxu0 }
 0x2e9   : > { %v11817_v14 = vadd.f32 %v3343_v30, %v3113_v45  ;;  %v3345_v62 = vpop.f32.mrb[1].mxu0  ;;  %v3576_v3 = vadd.f32 %v10666_v49, %v3501_v12 }
 0x2ea   : > { %v11819_v60 = vadd.f32 %v3345_v62, %v3115_v59 }
 0x2eb   : > { %v16179_v37 = vmul.f32 %v11817_v14, %v16175_v42 }
 0x2ec   : > { %v3349_v13 = vpop.f32.mrb[2].mxu0  ;;  %v16196_v27 = vmul.f32 %v11819_v60, %v16189_v9 }
 0x2ed   : > { %19864 = vst [vmem:[#allocation7_spill] sm:$0xff] %v16179_v37  ;;  %v11821_v15 = vadd.f32 %v3349_v13, %v3119_v28  ;;  %v3351_v44 = vpop.f32.mrb[3].mxu0  ;;  %v16185_v41 = vpack.i.bf16 %v16179_v37, %v19860_v20 }
 0x2ee   : > { %v11823_v31 = vadd.f32 %v3351_v44, %v3121_v35  ;;  %19867 = vst [vmem:[#allocation10_spill] sm:$0xff] %v16196_v27  ;;  %v16447_v5 = vpack.i.bf16 %v16196_v27, %v16179_v37 }
 0x2ef   : > { %12883 = vrot.lane.b32.xlu1 %v16185_v41, %s19643_s24  ;;  %v16242_v2 = vmul.f32 %v11821_v15, %v16175_v42 }
 0x2f0   : > { %v10913_v40 = vpop.f32.mrb[4].mxu0  ;;  %v16274_v47 = vmul.f32 %v11823_v31, %v16189_v9 }
 0x2f1   : > { %v3651_v29 = vadd.f32 %v10913_v40, %v3576_v3  ;;  %v3645_v7 = vpop.f32.mrb[5].mxu0  ;;  %19869 = vst [vmem:[#allocation12_spill] sm:$0xff] %v16242_v2  ;;  %v16250_v51 = vpack.i.bf16 %v16242_v2, %v19860_v20 }
 0x2f2   : > { %v3646_v57 = vadd.f32 %v3645_v7, %v3571_v23  ;;  %19871 = vst [vmem:[#allocation14_spill] sm:$0xff] %v16274_v47  ;;  %v16453_v49 = vpack.i.bf16 %v16274_v47, %v16242_v2 }
 0x2f3   : > { %12888 = vrot.lane.b32.xlu1 %v16185_v41, %s19641_s25  ;;  %v16269_v63 = vmul.f32 %v16191_v39, %v3651_v29 }
 0x2f4   : > { %v16199_v52 = vmul.f32 %v16191_v39, %v3646_v57 }
 0x2f5   : > { %19870 = vst [vmem:[#allocation13_spill] sm:$0xff] %v16269_v63  ;;  %v16280_v18 = vpack.i.bf16 %v16269_v63, %v16274_v47  ;;  %v16463_v30 = vpack.i.bf16 %v19860_v20, %v16269_v63 }
 0x2f6   : > { %19868 = vst [vmem:[#allocation11_spill] sm:$0xff] %v16199_v52  ;;  %v16203_v11 = vpack.i.bf16 %v16199_v52, %v16196_v27  ;;  %v16459_v59 = vpack.i.bf16 %v19860_v20, %v16199_v52 }
 0x2f7   : > { %12893 = vrot.lane.b32.xlu1 %v16185_v41, %s19639_s26 }
 0x2f8   : > { %13038 = vrot.lane.b32.xlu0 %v16203_v11, %s19643_s24 }
 0x2fb   : > { %12898 = vrot.lane.b32.xlu1 %v16185_v41, %s19637_s27 }
 0x2fc   : > { %13043 = vrot.lane.b32.xlu0 %v16203_v11, %s19641_s25 }
 0x2ff   : > { %12903 = vrot.lane.b32.xlu1 %v16185_v41, %s19659_s28 }
 0x300   : > { %13048 = vrot.lane.b32.xlu0 %v16203_v11, %s19639_s26 }
 0x303   : > { %12908 = vrot.lane.b32.xlu1 %v16185_v41, %s19656_s29 }
 0x304   : > { %13053 = vrot.lane.b32.xlu0 %v16203_v11, %s19637_s27 }
 0x307   : > { %12913 = vrot.lane.b32.xlu1 %v16185_v41, %s19652_s30 }
 0x308   : > { %13058 = vrot.lane.b32.xlu0 %v16203_v11, %s19659_s28 }
 0x30b   : > { %12918 = vrot.lane.b32.xlu1 %v16185_v41, %s19635_s6 }
 0x30c   : > { %13063 = vrot.lane.b32.xlu0 %v16203_v11, %s19656_s29 }
 0x30f   : > { %12923 = vrot.lane.b32.xlu1 %v16185_v41, %s19633_s7 }
 0x310   : > { %13068 = vrot.lane.b32.xlu0 %v16203_v11, %s19652_s30 }
 0x313   : > { %12928 = vrot.lane.b32.xlu1 %v16185_v41, %s19631_s8 }
 0x314   : > { %13073 = vrot.lane.b32.xlu0 %v16203_v11, %s19635_s6 }
 0x317   : > { %12933 = vrot.lane.b32.xlu1 %v16185_v41, %s19629_s9 }
 0x318   : > { %13078 = vrot.lane.b32.xlu0 %v16203_v11, %s19633_s7 }
 0x31b   : > { %12938 = vrot.lane.b32.xlu1 %v16185_v41, %s19627_s10 }
 0x31c   : > { %13083 = vrot.lane.b32.xlu0 %v16203_v11, %s19631_s8 }
 0x31f   : > { %12943 = vrot.lane.b32.xlu1 %v16250_v51, %s19643_s24 }
 0x320   : > { %13088 = vrot.lane.b32.xlu0 %v16203_v11, %s19629_s9 }
 0x323   : > { %12948 = vrot.lane.b32.xlu1 %v16250_v51, %s19641_s25 }
 0x324   : > { %13093 = vrot.lane.b32.xlu0 %v16203_v11, %s19627_s10 }
 0x327   : > { %12953 = vrot.lane.b32.xlu1 %v16250_v51, %s19639_s26 }
 0x328   : > { %13098 = vrot.lane.b32.xlu0 %v16203_v11, %s19620_s11 }
 0x32b   : > { %12958 = vrot.lane.b32.xlu1 %v16250_v51, %s19637_s27 }
 0x32c   : > { %13103 = vrot.lane.b32.xlu0 %v16203_v11, %s19618_s12 }
 0x32f   : > { %12963 = vrot.lane.b32.xlu1 %v16250_v51, %s19659_s28 }
 0x330   : > { %13108 = vrot.lane.b32.xlu0 %v16203_v11, %s19615_s13 }
 0x333   : > { %12968 = vrot.lane.b32.xlu1 %v16250_v51, %s19656_s29 }
 0x334   : > { %13113 = vrot.lane.b32.xlu0 %v16280_v18, %s19643_s24  ;;  %s19936_s24 = smov 104  }
 0x337   : > { %12973 = vrot.lane.b32.xlu1 %v16250_v51, %s19652_s30 }
 0x338   : > { %13118 = vrot.lane.b32.xlu0 %v16280_v18, %s19641_s25  ;;  %s19943_s25 = smov 103  }
 0x33b   : > { %12978 = vrot.lane.b32.xlu1 %v16250_v51, %s19635_s6 }
 0x33c   : > { %13123 = vrot.lane.b32.xlu0 %v16280_v18, %s19639_s26  ;;  %s19944_s26 = smov 87  }
 0x33f   : > { %12983 = vrot.lane.b32.xlu1 %v16250_v51, %s19633_s7 }
 0x340   : > { %13128 = vrot.lane.b32.xlu0 %v16280_v18, %s19637_s27  ;;  %s19947_s27 = smov 86  }
 0x343   : > { %12988 = vrot.lane.b32.xlu1 %v16250_v51, %s19631_s8 }
 0x344   : > { %13133 = vrot.lane.b32.xlu0 %v16280_v18, %s19659_s28  ;;  %s19968_s28 = smov 81  }
 0x347   : > { %12993 = vrot.lane.b32.xlu1 %v16250_v51, %s19629_s9 }
 0x348   : > { %13138 = vrot.lane.b32.xlu0 %v16280_v18, %s19656_s29  ;;  %s19959_s29 = smov 82  }
 0x34b   : > { %12998 = vrot.lane.b32.xlu1 %v16250_v51, %s19627_s10 }
 0x34c   : > { %13143 = vrot.lane.b32.xlu0 %v16280_v18, %s19652_s30  ;;  %s19956_s30 = smov 83  }
 0x34f   : > { %13003 = vrot.lane.b32.xlu1 %v16185_v41, %s19620_s11 }
 0x350   : > { %13148 = vrot.lane.b32.xlu0 %v16280_v18, %s19635_s6  ;;  %s19950_s6 = smov 85  }
 0x353   : > { %13008 = vrot.lane.b32.xlu1 %v16250_v51, %s19620_s11 }
 0x354   : > { %13153 = vrot.lane.b32.xlu0 %v16280_v18, %s19633_s7  ;;  %s19929_s7 = smov 105  }
 0x357   : > { %13013 = vrot.lane.b32.xlu1 %v16185_v41, %s19618_s12 }
 0x358   : > { %13158 = vrot.lane.b32.xlu0 %v16280_v18, %s19631_s8  ;;  %s19922_s8 = smov 106  }
 0x35b   : > { %13018 = vrot.lane.b32.xlu1 %v16250_v51, %s19618_s12 }
 0x35c   : > { %13163 = vrot.lane.b32.xlu0 %v16280_v18, %s19629_s9  ;;  %s19910_s9 = smov 107  }
 0x35f   : > { %13023 = vrot.lane.b32.xlu1 %v16185_v41, %s19615_s13 }
 0x360   : > { %13168 = vrot.lane.b32.xlu0 %v16280_v18, %s19627_s10  ;;  %s19898_s10 = smov 108  }
 0x361   : > { %v16330_v26 = vpop.permute.xlu1 %12883 }
 0x362   : > { %v12886_v62 = vunpack.i.h.bf16 %v16330_v26  ;;  %v12885_v3 = vunpack.i.l.bf16 %v16330_v26 }
 0x363   : > { %13028 = vrot.lane.b32.xlu1 %v16250_v51, %s19615_s13 }
 0x364   : > { %13173 = vrot.lane.b32.xlu0 %v16280_v18, %s19620_s11  ;;  %v3714_v57 = vsel %vm19625_vm0, %v12885_v3, %v12886_v62  ;;  %s19887_s11 = smov 109  }
 0x365   : > { %v16336_v54 = vpop.permute.xlu1 %12888 }
 0x366   : > { %v12891_v60 = vunpack.i.h.bf16 %v16336_v54  ;;  %v12890_v28 = vunpack.i.l.bf16 %v16336_v54 }
 0x367   : > { %13033 = vrot.lane.b32.xlu1 %v16185_v41, %s19613_s14 }
 0x368   : > { %13178 = vrot.lane.b32.xlu0 %v16280_v18, %s19618_s12  ;;  %v16491_v26 = vsel %vm19624_vm1, %v12890_v28, %v12891_v60  ;;  %s19885_s12 = smov 125  }
 0x369   : > { %v16342_v46 = vpop.permute.xlu1 %12893 }
 0x36a   : > { %v16344_v33 = vpop.permute.xlu0 %13038  ;;  %v12896_v35 = vunpack.i.h.bf16 %v16342_v46  ;;  %v12895_v58 = vunpack.i.l.bf16 %v16342_v46 }
 0x36b   : > { %13193 = vrot.lane.b32.xlu1 %v16250_v51, %s19613_s14  ;;  %v13041_v10 = vunpack.i.h.bf16 %v16344_v33  ;;  %v13040_v15 = vunpack.i.l.bf16 %v16344_v33 }
 0x36c   : > { %13183 = vrot.lane.b32.xlu0 %v16280_v18, %s19615_s13  ;;  %v16494_v54 = vsel %vm19622_vm2, %v12895_v58, %v12896_v35  ;;  %s19882_s13 = smov 126  }
 0x36d   : > { %v16350_v22 = vpop.permute.xlu1 %12898  ;;  %v16499_v33 = vsel %vm19625_vm0, %v13040_v15, %v13041_v10  ;;  %v3715_v39 = vsel %vm19625_vm0, %v12886_v62, %v13040_v15 }
 0x36e   : > { %v16352_v17 = vpop.permute.xlu0 %13043  ;;  %v12900_v40 = vunpack.i.l.bf16 %v16350_v22  ;;  %v19877_v3 = vunpack.i.h.bf16 %v16350_v22 }
 0x36f   : > { %13203 = vrot.lane.b32.xlu1 %v16185_v41, %s19602_s17  ;;  %v13046_v55 = vunpack.i.h.bf16 %v16352_v17 }
 0x370   : > { %13188 = vrot.lane.b32.xlu0 %v16203_v11, %s19613_s14  ;;  %v16507_v28 = vsel %vm19617_vm3, %v12900_v40, %v19877_v3 }
 0x371   : > { %v16358_v25 = vpop.permute.xlu1 %12903 }
 0x372   : > { %v16360_v36 = vpop.permute.xlu0 %13048  ;;  %v12905_v10 = vunpack.i.l.bf16 %v16358_v25 }
 0x373   : > { %13213 = vrot.lane.b32.xlu1 %v16250_v51, %s19602_s17  ;;  %v13051_v15 = vunpack.i.h.bf16 %v16360_v36  ;;  %v13050_v40 = vunpack.i.l.bf16 %v16360_v36 }
 0x374   : > { %13198 = vrot.lane.b32.xlu0 %v16280_v18, %s19613_s14  ;;  %s19880_s14 = smov 127  }
 0x375   : > { %v16366_v6 = vpop.permute.xlu1 %12908 }
 0x376   : > { %v16371_v56 = vpop.permute.xlu0 %13053  ;;  %v12911_v2 = vunpack.i.h.bf16 %v16366_v6 }
 0x377   : > { %13223 = vrot.lane.b32.xlu1 %v16185_v41, %s19594_s19 }
 0x378   : > { %13208 = vrot.lane.b32.xlu0 %v16203_v11, %s19602_s17 }
 0x379   : > { %v16377_v19 = vpop.permute.xlu1 %12913 }
 0x37a   : > { %v16379_v24 = vpop.permute.xlu0 %13058 }
 0x37b   : > { %13233 = vrot.lane.b32.xlu1 %v16250_v51, %s19594_s19 }
 0x37c   : > { %13218 = vrot.lane.b32.xlu0 %v16280_v18, %s19602_s17  ;;  %s19878_s17 = smov 1  }
 0x37d   : > { %v16385_v32 = vpop.permute.xlu1 %12918 }
 0x37e   : > { %v16387_v0 = vpop.permute.xlu0 %13063 }
 0x37f   : > { %13243 = vrot.lane.b32.xlu1 %v16185_v41, %s19872_s15 }
 0x380   : > { %13228 = vrot.lane.b32.xlu0 %v16203_v11, %s19594_s19 }
 0x381   : > { %v16393_v48 = vpop.permute.xlu1 %12923 }
 0x382   : > { %v16395_v4 = vpop.permute.xlu0 %13068 }
 0x383   : > { %13253 = vrot.lane.b32.xlu1 %v16250_v51, %s19872_s15 }
 0x384   : > { %13238 = vrot.lane.b32.xlu0 %v16280_v18, %s19594_s19  ;;  %s19876_s19 = smov 2  }
 0x385   : > { %v16401_v21 = vpop.permute.xlu1 %12928 }
 0x386   : > { %v16403_v50 = vpop.permute.xlu0 %13073 }
 0x387   : > { %13263 = vrot.lane.b32.xlu1 %v16185_v41, %s19873_s23 }
 0x388   : > { %13248 = vrot.lane.b32.xlu0 %v16203_v11, %s19872_s15 }
 0x389   : > { %v16409_v12 = vpop.permute.xlu1 %12933 }
 0x38a   : > { %v16411_v43 = vpop.permute.xlu0 %13078 }
 0x38b   : > { %13273 = vrot.lane.b32.xlu1 %v16250_v51, %s19873_s23 }
 0x38c   : > { %13258 = vrot.lane.b32.xlu0 %v16280_v18, %s19872_s15 }
 0x38d   : > { %v16417_v1 = vpop.permute.xlu1 %12938 }
 0x38e   : > { %v16419_v8 = vpop.permute.xlu0 %13083 }
 0x38f   : > { %13283 = vrot.lane.b32.xlu1 %v16185_v41, %s19874_s16 }
 0x390   : > { %13268 = vrot.lane.b32.xlu0 %v16203_v11, %s19873_s23 }
 0x391   : > { %v12944_v61 = vpop.permute.xlu1 %12943 }
 0x392   : > { %v16425_v16 = vpop.permute.xlu0 %13088  ;;  %v12946_v29 = vunpack.i.h.bf16 %v12944_v61  ;;  %v12945_v7 = vunpack.i.l.bf16 %v12944_v61  ;;  %v13045_v61 = vunpack.i.l.bf16 %v16352_v17 }
 0x393   : > { %13293 = vrot.lane.b32.xlu1 %v16250_v51, %s19874_s16 }
 0x394   : > { %13278 = vrot.lane.b32.xlu0 %v16280_v18, %s19873_s23  ;;  %v3717_v63 = vsel %vm19625_vm0, %v12945_v7, %v12946_v29  ;;  %v16527_v7 = vsel %vm19624_vm1, %v13045_v61, %v13046_v55 }
 0x395   : > { %v16431_v34 = vpop.permute.xlu1 %12948 }
 0x396   : > { %v16433_v38 = vpop.permute.xlu0 %13093  ;;  %v12951_v17 = vunpack.i.h.bf16 %v16431_v34  ;;  %v12950_v62 = vunpack.i.l.bf16 %v16431_v34  ;;  %v3765_v34 = vsel %vm19624_vm1, %v12891_v60, %v13045_v61  ;;  %v19879_v60 = vunpack.i.h.bf16 %v16358_v25 }
 0x397   : > { %13303 = vrot.lane.b32.xlu1 %v16185_v41, %s19875_s22 }
 0x398   : > { %13288 = vrot.lane.b32.xlu0 %v16203_v11, %s19874_s16  ;;  %v16544_v61 = vsel %vm498_vm4, %v12905_v10, %v19879_v60 }
 0x399   : > { %v16439_v23 = vpop.permute.xlu1 %12953 }
 0x39a   : > { %v16441_v53 = vpop.permute.xlu0 %13098  ;;  %v12956_v55 = vunpack.i.h.bf16 %v16439_v23 }
 0x39b   : > { %13313 = vrot.lane.b32.xlu1 %v16250_v51, %s19875_s22 }
 0x39c   : > { %13298 = vrot.lane.b32.xlu0 %v16280_v18, %s19874_s16 }
 0x39d   : > { %v16455_v45 = vpop.permute.xlu1 %12958 }
 0x39e   : > { %v16465_v14 = vpop.permute.xlu0 %13103 }
 0x39f   : > { %13323 = vrot.lane.b32.xlu1 %v16185_v41, %s19876_s19 }
 0x3a0   : > { %13308 = vrot.lane.b32.xlu0 %v16203_v11, %s19875_s22 }
 0x3a1   : > { %v16477_v13 = vpop.permute.xlu1 %12963 }
 0x3a2   : > { %v16481_v44 = vpop.permute.xlu0 %13108 }
 0x3a3   : > { %13333 = vrot.lane.b32.xlu1 %v16250_v51, %s19876_s19 }
 0x3a4   : > { %13318 = vrot.lane.b32.xlu0 %v16280_v18, %s19875_s22 }
 0x3a5   : > { %v16496_v46 = vpop.permute.xlu1 %12968 }
 0x3a6   : > { %v13114_v31 = vpop.permute.xlu0 %13113 }
 0x3a7   : > { %v13116_v9 = vunpack.i.h.bf16 %v13114_v31  ;;  %v13115_v42 = vunpack.i.l.bf16 %v13114_v31  ;;  %13343 = vrot.lane.b32.xlu1 %v16185_v41, %s19878_s17 }
 0x3a8   : > { %13328 = vrot.lane.b32.xlu0 %v16203_v11, %s19876_s19 }
 0x3a9   : > { %v16521_v31 = vsel %vm19625_vm0, %v13115_v42, %v13116_v9  ;;  %v16523_v3 = vpop.permute.xlu1 %12973  ;;  %v3718_v41 = vsel %vm19625_vm0, %v12946_v29, %v13115_v42  ;;  %v11226_v9 = vpack.c.bf16 %v3717_v63, %v3714_v57  ;;  %v12910_v42 = vunpack.i.l.bf16 %v16366_v6 }
 0x3aa   : > { %v13119_v58 = vpop.permute.xlu0 %13118  ;;  %v11224_v52 = vpack.c.bf16 %v3718_v41, %v3715_v39  ;;  %v3767_v29 = vsel %vm19624_vm1, %v12950_v62, %v12951_v17  ;;  %v12955_v39 = vunpack.i.l.bf16 %v16439_v23  ;;  %v3815_v41 = vsel %vm19622_vm2, %v12896_v35, %v13050_v40 }
 0x3ab   : > { %v13121_v36 = vunpack.i.h.bf16 %v13119_v58  ;;  %v13120_v37 = vunpack.i.l.bf16 %v13119_v58  ;;  %13353 = vrot.lane.b32.xlu1 %v16250_v51, %s19878_s17  ;;  %v16547_v51 = vsel %vm19622_vm2, %v13050_v40, %v13051_v15  ;;  %v13056_v58 = vunpack.i.h.bf16 %v16371_v56 }
 0x3ac   : > { %13338 = vrot.lane.b32.xlu0 %v16280_v18, %s19876_s19  ;;  %11225 = vmatprep.subr.bf16.mxu1 %v11224_v52  ;;  %v13055_v15 = vunpack.i.l.bf16 %v16371_v56  ;;  %v12961_v35 = vunpack.i.h.bf16 %v16455_v45  ;;  %v12960_v40 = vunpack.i.l.bf16 %v16455_v45  ;;  %v12916_v56 = vunpack.i.h.bf16 %v16377_v19 }
 0x3ad   : > { %v16550_v63 = vsel %vm19624_vm1, %v13120_v37, %v13121_v36  ;;  %v16552_v57 = vpop.permute.xlu1 %12978  ;;  %11227 = vmatpush1.bf16.msra.mxu1 %v11226_v9  ;;  %v3768_v23 = vsel %vm19624_vm1, %v12951_v17, %v13120_v37  ;;  %v11230_v36 = vpack.c.bf16 %v3767_v29, %v16491_v26  ;;  %v16566_v37 = vsel %vm549_vm5, %v12910_v42, %v12911_v2 }
 0x3ae   : > { %v13124_v62 = vpop.permute.xlu0 %13123  ;;  %v11228_v52 = vpack.c.bf16 %v3768_v23, %v3765_v34  ;;  %v3817_v17 = vsel %vm19622_vm2, %v12955_v39, %v12956_v55  ;;  %v12915_v34 = vunpack.i.l.bf16 %v16377_v19  ;;  %v13061_v29 = vunpack.i.h.bf16 %v16379_v24 }
 0x3af   : > { %v13126_v60 = vunpack.i.h.bf16 %v13124_v62  ;;  %v13125_v20 = vunpack.i.l.bf16 %v13124_v62  ;;  %13363 = vrot.lane.b32.xlu1 %v16447_v5, %s19880_s14  ;;  %v13060_v45 = vunpack.i.l.bf16 %v16379_v24  ;;  %v16586_v62 = vsel %vm19617_vm3, %v13055_v15, %v13056_v58 }
 0x3b0   : > { %13348 = vrot.lane.b32.xlu0 %v16203_v11, %s19878_s17  ;;  %11229 = vmatprep.subr.bf16.mxu1 %v11228_v52  ;;  %v12965_v24 = vunpack.i.l.bf16 %v16477_v13  ;;  %v19881_v58 = vunpack.i.h.bf16 %v16350_v22  ;;  %vm19892_vm0 = vcmask 359424  }
 0x3b1   : > { %v16576_v26 = vsel %vm19622_vm2, %v13125_v20, %v13126_v60  ;;  %v16578_v9 = vpop.permute.xlu1 %12983  ;;  %11231 = vmatpush1.bf16.msra.mxu1 %v11230_v36  ;;  %v3818_v42 = vsel %vm19622_vm2, %v12956_v55, %v13125_v20  ;;  %v11234_v36 = vpack.c.bf16 %v3817_v17, %v16494_v54  ;;  %v3867_v20 = vsel %vm19617_vm3, %v12960_v40, %v12961_v35 }
 0x3b2   : > { %v13129_v39 = vpop.permute.xlu0 %13128  ;;  %v11232_v23 = vpack.c.bf16 %v3818_v42, %v3815_v41  ;;  %v12966_v55 = vunpack.i.h.bf16 %v16477_v13  ;;  %v3865_v41 = vsel %vm19617_vm3, %v19881_v58, %v13055_v15  ;;  %v12921_v42 = vunpack.i.h.bf16 %v16385_v32 }
 0x3b3   : > { %v13131_v52 = vunpack.i.h.bf16 %v13129_v39  ;;  %v13130_v60 = vunpack.i.l.bf16 %v13129_v39  ;;  %13373 = vrot.lane.b32.xlu1 %v16453_v49, %s19880_s14  ;;  %v12920_v39 = vunpack.i.l.bf16 %v16385_v32  ;;  %v16613_v22 = vsel %vm498_vm4, %v13060_v45, %v13061_v29 }
 0x3b4   : > { %13358 = vrot.lane.b32.xlu0 %v16280_v18, %s19878_s17  ;;  %11233 = vmatprep.subr.bf16.mxu1 %v11232_v23  ;;  %v16610_v18 = vsel %vm600_vm6, %v12915_v34, %v12916_v56  ;;  %v3917_v29 = vsel %vm498_vm4, %v12965_v24, %v12966_v55  ;;  %v13071_v23 = vunpack.i.h.bf16 %v16395_v4  ;;  %vm19888_vm2 = vcmask 375808  }
 0x3b5   : > { %v16602_v54 = vsel %vm19617_vm3, %v13130_v60, %v13131_v52  ;;  %v16604_v17 = vpop.permute.xlu1 %12988  ;;  %11235 = vmatpush1.bf16.msra.mxu1 %v11234_v36  ;;  %v3868_v13 = vsel %vm19617_vm3, %v12961_v35, %v13130_v60  ;;  %v11238_v35 = vpack.c.bf16 %v3867_v20, %v16507_v28  ;;  %v19883_v60 = vunpack.i.h.bf16 %v16358_v25  ;;  %vm19891_vm1 = vmmov %vm19888_vm2 }
 0x3b6   : > { %v13134_v15 = vpop.permute.xlu0 %13133  ;;  %v11236_v40 = vpack.c.bf16 %v3868_v13, %v3865_v41  ;;  %v13066_v36 = vunpack.i.h.bf16 %v16387_v0  ;;  %v12971_v41 = vunpack.i.h.bf16 %v16496_v46  ;;  %v12970_v13 = vunpack.i.l.bf16 %v16496_v46 }
 0x3b7   : > { %v13136_v52 = vunpack.i.h.bf16 %v13134_v15  ;;  %v13135_v58 = vunpack.i.l.bf16 %v13134_v15  ;;  %13383 = vrot.lane.b32.xlu1 %v16447_v5, %s19882_s13  ;;  %v3915_v34 = vsel %vm498_vm4, %v19883_v60, %v13060_v45  ;;  %v16632_v28 = vsel %vm19623_vm7, %v12920_v39, %v12921_v42 }
 0x3b8   : > { %13368 = vrot.lane.b32.xlu0 %v16459_v59, %s19880_s14  ;;  %11237 = vmatprep.subr.bf16.mxu1 %v11236_v40  ;;  %v13065_v25 = vunpack.i.l.bf16 %v16387_v0  ;;  %v12926_v46 = vunpack.i.h.bf16 %v16393_v48  ;;  %v12925_v15 = vunpack.i.l.bf16 %v16393_v48  ;;  %vm19884_vm3 = vcmask 375808  }
 0x3b9   : > { %v16636_v45 = vsel %vm498_vm4, %v13135_v58, %v13136_v52  ;;  %v16638_v20 = vpop.permute.xlu1 %12993  ;;  %11239 = vmatpush1.bf16.msra.mxu1 %v11238_v35  ;;  %v3918_v24 = vsel %vm498_vm4, %v12966_v55, %v13135_v58  ;;  %v11242_v52 = vpack.c.bf16 %v3917_v29, %v16544_v61  ;;  %v13070_v55 = vunpack.i.l.bf16 %v16395_v4 }
 0x3ba   : > { %v13139_v40 = vpop.permute.xlu0 %13138  ;;  %v11240_v60 = vpack.c.bf16 %v3918_v24, %v3915_v34  ;;  %v3967_v58 = vsel %vm549_vm5, %v12970_v13, %v12971_v41  ;;  %v12976_v35 = vunpack.i.h.bf16 %v16523_v3  ;;  %v12975_v34 = vunpack.i.l.bf16 %v16523_v3 }
 0x3bb   : > { %v13141_v0 = vunpack.i.h.bf16 %v13139_v40  ;;  %v13140_v11 = vunpack.i.l.bf16 %v13139_v40  ;;  %13393 = vrot.lane.b32.xlu1 %v16453_v49, %s19882_s13  ;;  %v16656_v24 = vsel %vm549_vm5, %v13065_v25, %v13066_v36  ;;  %v3965_v4 = vsel %vm549_vm5, %v12911_v2, %v13065_v25 }
 0x3bc   : > { %13378 = vrot.lane.b32.xlu0 %v16463_v30, %s19880_s14  ;;  %11241 = vmatprep.subr.bf16.mxu1 %v11240_v60  ;;  %v13076_v3 = vunpack.i.h.bf16 %v16403_v50  ;;  %v13075_v29 = vunpack.i.l.bf16 %v16403_v50  ;;  %v11246_v2 = vpack.c.bf16 %v3967_v58, %v16566_v37  ;;  %v4017_v50 = vsel %vm600_vm6, %v12975_v34, %v12976_v35 }
 0x3bd   : > { %v16659_v40 = vsel %vm549_vm5, %v13140_v11, %v13141_v0  ;;  %v16661_v39 = vpop.permute.xlu1 %12998  ;;  %11243 = vmatpush1.bf16.msra.mxu1 %v11242_v52  ;;  %v3968_v61 = vsel %vm549_vm5, %v12971_v41, %v13140_v11  ;;  %v16674_v0 = vsel %vm19884_vm3, %v12925_v15, %v12926_v46  ;;  %v16680_v11 = vsel %vm600_vm6, %v13070_v55, %v13071_v23 }
 0x3be   : > { %v13144_v13 = vpop.permute.xlu0 %13143  ;;  %v11244_v60 = vpack.c.bf16 %v3968_v61, %v3965_v4  ;;  %v12981_v41 = vunpack.i.h.bf16 %v16552_v57  ;;  %v12980_v25 = vunpack.i.l.bf16 %v16552_v57  ;;  %v12931_v15 = vunpack.i.h.bf16 %v16401_v21 }
 0x3bf   : > { %v13146_v52 = vunpack.i.h.bf16 %v13144_v13  ;;  %v13145_v6 = vunpack.i.l.bf16 %v13144_v13  ;;  %13403 = vrot.lane.b32.xlu1 %v16447_v5, %s19885_s12  ;;  %v4015_v37 = vsel %vm600_vm6, %v12916_v56, %v13070_v55  ;;  %v12930_v57 = vunpack.i.l.bf16 %v16401_v21 }
 0x3c0   : > { %13388 = vrot.lane.b32.xlu0 %v16459_v59, %s19882_s13  ;;  %11245 = vmatprep.subr.bf16.mxu1 %v11244_v60  ;;  %v16699_v58 = vsel %vm19623_vm7, %v13075_v29, %v13076_v3  ;;  %v11250_v19 = vpack.c.bf16 %v4017_v50, %v16610_v18  ;;  %v4065_v56 = vsel %vm19623_vm7, %v12921_v42, %v13075_v29  ;;  %v13080_v21 = vunpack.i.l.bf16 %v16411_v43 }
 0x3c1   : > { %v16689_v4 = vsel %vm600_vm6, %v13145_v6, %v13146_v52  ;;  %v16691_v61 = vpop.permute.xlu1 %13003  ;;  %11247 = vmatpush1.bf16.msra.mxu1 %v11246_v2  ;;  %v4018_v23 = vsel %vm600_vm6, %v12976_v35, %v13145_v6  ;;  %v4067_v55 = vsel %vm19623_vm7, %v12980_v25, %v12981_v41  ;;  %v12986_v35 = vunpack.i.h.bf16 %v16578_v9 }
 0x3c2   : > { %v13149_v34 = vpop.permute.xlu0 %13148  ;;  %v11248_v13 = vpack.c.bf16 %v4018_v23, %v4015_v37  ;;  %v12985_v3 = vunpack.i.l.bf16 %v16578_v9  ;;  %v12936_v6 = vunpack.i.h.bf16 %v16409_v12  ;;  %v13081_v18 = vunpack.i.h.bf16 %v16411_v43 }
 0x3c3   : > { %v13151_v52 = vunpack.i.h.bf16 %v13149_v34  ;;  %v13150_v36 = vunpack.i.l.bf16 %v13149_v34  ;;  %13413 = vrot.lane.b32.xlu1 %v16453_v49, %s19885_s12  ;;  %v12935_v2 = vunpack.i.l.bf16 %v16409_v12  ;;  %v13085_v9 = vunpack.i.l.bf16 %v16419_v8 }
 0x3c4   : > { %13398 = vrot.lane.b32.xlu0 %v16463_v30, %s19882_s13  ;;  %11249 = vmatprep.subr.bf16.mxu1 %v11248_v13  ;;  %vm19886_vm3 = vcmask 367616   ;;  %v11254_v13 = vpack.c.bf16 %v4067_v55, %v16632_v28  ;;  %v12991_v12 = vunpack.i.h.bf16 %v16604_v17 }
 0x3c5   : > { %v16718_v32 = vsel %vm19623_vm7, %v13150_v36, %v13151_v52  ;;  %v16720_v42 = vpop.permute.xlu1 %13008  ;;  %11251 = vmatpush1.bf16.msra.mxu1 %v11250_v19  ;;  %v4068_v29 = vsel %vm19623_vm7, %v12981_v41, %v13150_v36  ;;  %v4164_v23 = vsel %vm19886_vm3, %v12930_v57, %v12931_v15  ;;  %v4117_v36 = vsel %vm19888_vm2, %v12985_v3, %v12986_v35  ;;  %vm19889_vm3 = vmmov %vm19888_vm2 }
 0x3c6   : > { %v13154_v50 = vpop.permute.xlu0 %13153  ;;  %v11252_v25 = vpack.c.bf16 %v4068_v29, %v4065_v56  ;;  %v12990_v41 = vunpack.i.l.bf16 %v16604_v17  ;;  %v4115_v57 = vsel %vm19889_vm3, %v12926_v46, %v13080_v21  ;;  %v13086_v52 = vunpack.i.h.bf16 %v16419_v8  ;;  %vm19890_vm7 = vmmov %vm19888_vm2 }
 0x3c7   : > { %v13156_v43 = vunpack.i.h.bf16 %v13154_v50  ;;  %v13155_v34 = vunpack.i.l.bf16 %v13154_v50  ;;  %13423 = vrot.lane.b32.xlu1 %v16447_v5, %s19887_s11  ;;  %v16744_v56 = vsel %vm19888_vm2, %v13080_v21, %v13081_v18  ;;  %v4214_v55 = vsel %vm19892_vm0, %v12935_v2, %v12936_v6 }
 0x3c8   : > { %13408 = vrot.lane.b32.xlu0 %v16459_v59, %s19885_s12  ;;  %11253 = vmatprep.subr.bf16.mxu1 %v11252_v25  ;;  %v4165_v48 = vsel %vm19893_vm9, %v12931_v15, %v13085_v9  ;;  %v13090_v46 = vunpack.i.l.bf16 %v16425_v16  ;;  %v11258_v21 = vpack.c.bf16 %v4117_v36, %v16674_v0  ;;  %v12996_v2 = vunpack.i.h.bf16 %v16638_v20 }
 0x3c9   : > { %v16740_v19 = vpop.permute.xlu1 %13013  ;;  %11255 = vmatpush1.bf16.msra.mxu1 %v11254_v13  ;;  %v4118_v28 = vsel %vm19890_vm7, %v12986_v35, %v13155_v34  ;;  %v16747_v17 = vsel %vm19891_vm1, %v13155_v34, %v13156_v43  ;;  %v13091_v35 = vunpack.i.h.bf16 %v16425_v16  ;;  %vm19894_vm1 = vmmov %vm19893_vm9  ;;  %v12995_v15 = vunpack.i.l.bf16 %v16638_v20 }
 0x3ca   : > { %v13159_v3 = vpop.permute.xlu0 %13158  ;;  %v11256_v29 = vpack.c.bf16 %v4118_v28, %v4115_v57  ;;  %v4167_v18 = vsel %vm19894_vm1, %v12990_v41, %v12991_v12  ;;  %v13095_v43 = vunpack.i.l.bf16 %v16433_v38  ;;  %vm19895_vm0 = vmmov %vm19894_vm1  ;;  %v12941_v36 = vunpack.i.h.bf16 %v16417_v1 }
 0x3cb   : > { %v13161_v50 = vunpack.i.h.bf16 %v13159_v3  ;;  %v13160_v25 = vunpack.i.l.bf16 %v13159_v3  ;;  %13433 = vrot.lane.b32.xlu1 %v16453_v49, %s19887_s11  ;;  %vm19896_vm7 = vmmov %vm19895_vm0  ;;  %v12940_v20 = vunpack.i.l.bf16 %v16417_v1  ;;  %vm19899_vm3 = vcmask 359424  }
 0x3cc   : > { %13418 = vrot.lane.b32.xlu0 %v16463_v30, %s19885_s12  ;;  %11257 = vmatprep.subr.bf16.mxu1 %v11256_v29  ;;  %v16768_v0 = vsel %vm19896_vm7, %v13085_v9, %v13086_v52  ;;  %vm19897_vm9 = vmmov %vm19895_vm0  ;;  %v4215_v9 = vsel %vm19899_vm3, %v12936_v6, %v13090_v46  ;;  %vm19903_vm7 = vcmask 351232  }
 0x3cd   : > { %v16764_v34 = vpop.permute.xlu1 %13018  ;;  %11259 = vmatpush1.bf16.msra.mxu1 %v11258_v21  ;;  %v4168_v13 = vsel %vm19895_vm0, %v12991_v12, %v13160_v25  ;;  %v16771_v16 = vsel %vm19897_vm9, %v13160_v25, %v13161_v50  ;;  %v11262_v12 = vpack.c.bf16 %v4167_v18, %v4164_v23  ;;  %vm19900_vm2 = vmmov %vm19899_vm3  ;;  %v13001_v50 = vunpack.i.h.bf16 %v16661_v39 }
 0x3ce   : > { %v13164_v41 = vpop.permute.xlu0 %13163  ;;  %v11260_v57 = vpack.c.bf16 %v4168_v13, %v4165_v48  ;;  %v4217_v52 = vsel %vm19900_vm2, %v12995_v15, %v12996_v2  ;;  %v13000_v25 = vunpack.i.l.bf16 %v16661_v39  ;;  %vm19901_vm1 = vmmov %vm19900_vm2  ;;  %v13096_v48 = vunpack.i.h.bf16 %v16433_v38 }
 0x3cf   : > { %v13166_v3 = vunpack.i.h.bf16 %v13164_v41  ;;  %v13165_v29 = vunpack.i.l.bf16 %v13164_v41  ;;  %13443 = vrot.lane.b32.xlu1 %v16447_v5, %s19898_s10  ;;  %v16786_v1 = vsel %vm19901_vm1, %v13090_v46, %v13091_v35  ;;  %vm19902_vm0 = vmmov %vm19901_vm1  ;;  %v4265_v23 = vsel %vm19903_vm7, %v12941_v36, %v13095_v43 }
 0x3d0   : > { %13428 = vrot.lane.b32.xlu0 %v16459_v59, %s19887_s11  ;;  %11261 = vmatprep.subr.bf16.mxu1 %v11260_v57  ;;  %vm19904_vm9 = vmmov %vm19902_vm0  ;;  %v13101_v39 = vunpack.i.h.bf16 %v16441_v53  ;;  %v13100_v15 = vunpack.i.l.bf16 %v16441_v53  ;;  %v13106_v38 = vunpack.i.h.bf16 %v16465_v14  ;;  %v13010_v53 = vunpack.i.l.bf16 %v16720_v42 }
 0x3d1   : > { %v16789_v21 = vpop.permute.xlu1 %13023  ;;  %11263 = vmatpush1.bf16.msra.mxu1 %v11262_v12  ;;  %v4218_v6 = vsel %vm19902_vm0, %v12996_v2, %v13165_v29  ;;  %v16794_v18 = vsel %vm19904_vm9, %v13165_v29, %v13166_v3  ;;  %v11266_v2 = vpack.c.bf16 %v4217_v52, %v4214_v55  ;;  %v13105_v3 = vunpack.i.l.bf16 %v16465_v14  ;;  %vm19905_vm3 = vmmov %vm19903_vm7 }
 0x3d2   : > { %v13169_v13 = vpop.permute.xlu0 %13168  ;;  %v11264_v41 = vpack.c.bf16 %v4218_v6, %v4215_v9  ;;  %v4267_v29 = vsel %vm19905_vm3, %v13000_v25, %v13001_v50  ;;  %v13011_v12 = vunpack.i.h.bf16 %v16720_v42  ;;  %v13006_v9 = vunpack.i.h.bf16 %v16691_v61  ;;  %vm19906_vm2 = vmmov %vm19905_vm3 }
 0x3d3   : > { %v13171_v35 = vunpack.i.h.bf16 %v13169_v13  ;;  %v13170_v57 = vunpack.i.l.bf16 %v13169_v13  ;;  %13453 = vrot.lane.b32.xlu1 %v16453_v49, %s19898_s10  ;;  %vm19907_vm1 = vmmov %vm19906_vm2  ;;  %v13005_v42 = vunpack.i.l.bf16 %v16691_v61  ;;  %vm19911_vm9 = vcmask 343040  }
 0x3d4   : > { %13438 = vrot.lane.b32.xlu0 %v16463_v30, %s19887_s11  ;;  %11265 = vmatprep.subr.bf16.mxu1 %v11264_v41  ;;  %v16814_v55 = vsel %vm19907_vm1, %v13095_v43, %v13096_v48  ;;  %vm19908_vm0 = vmmov %vm19907_vm1  ;;  %v16826_v43 = vsel %vm19911_vm9, %v13100_v15, %v13101_v39  ;;  %v13020_v61 = vunpack.i.l.bf16 %v16764_v34  ;;  %s20266_s11 = smov 22  }
 0x3d5   : > { %v16810_v6 = vpop.permute.xlu1 %13028  ;;  %11267 = vmatpush1.bf16.msra.mxu1 %v11266_v2  ;;  %v4268_v13 = vsel %vm19906_vm2, %v13001_v50, %v13170_v57  ;;  %v16817_v14 = vsel %vm19908_vm0, %v13170_v57, %v13171_v35  ;;  %vm19909_vm7 = vmmov %vm19908_vm0  ;;  %vm19913_vm2 = vcmask 334848  }
 0x3d6   : > { %v4264_v52 = vsel %vm19909_vm7, %v12940_v20, %v12941_v36  ;;  %v13174_v25 = vpop.permute.xlu0 %13173  ;;  %v11268_v37 = vpack.c.bf16 %v4268_v13, %v4265_v23  ;;  %vm19912_vm3 = vmmov %vm19911_vm9  ;;  %v13021_v36 = vunpack.i.h.bf16 %v16764_v34  ;;  %v16834_v20 = vsel %vm19913_vm2, %v13105_v3, %v13106_v38 }
 0x3d7   : > { %v13176_v60 = vunpack.i.h.bf16 %v13174_v25  ;;  %v13175_v46 = vunpack.i.l.bf16 %v13174_v25  ;;  %13463 = vrot.lane.b32.xlu1 %v16447_v5, %s19910_s9  ;;  %v11270_v50 = vpack.c.bf16 %v4267_v29, %v4264_v52  ;;  %v4317_v48 = vsel %vm19912_vm3, %v13010_v53, %v13011_v12  ;;  %vm19914_vm1 = vmmov %vm19912_vm3 }
 0x3d8   : > { %13448 = vrot.lane.b32.xlu0 %v16459_v59, %s19898_s10  ;;  %11269 = vmatprep.subr.bf16.mxu1 %v11268_v37  ;;  %v13016_v23 = vunpack.i.h.bf16 %v16740_v19  ;;  %v4315_v39 = vsel %vm19914_vm1, %v13006_v9, %v13100_v15  ;;  %vm19915_vm0 = vmmov %vm19914_vm1  ;;  %v13015_v29 = vunpack.i.l.bf16 %v16740_v19  ;;  %v13111_v13 = vunpack.i.h.bf16 %v16481_v44 }
 0x3d9   : > { %v16837_v35 = vpop.permute.xlu1 %13033  ;;  %11271 = vmatpush1.bf16.msra.mxu1 %v11270_v50  ;;  %v4318_v57 = vsel %vm19915_vm0, %v13011_v12, %v13175_v46  ;;  %vm19916_vm7 = vmmov %vm19915_vm0  ;;  %v13031_v12 = vunpack.i.h.bf16 %v16810_v6  ;;  %v13030_v19 = vunpack.i.l.bf16 %v16810_v6 }
 0x3da   : > { %v16842_v2 = vsel %vm19916_vm7, %v13175_v46, %v13176_v60  ;;  %vm19917_vm9 = vmmov %vm19915_vm0  ;;  %v13179_v37 = vpop.permute.xlu0 %13178  ;;  %v11272_v53 = vpack.c.bf16 %v4318_v57, %v4315_v39  ;;  %v13110_v60 = vunpack.i.l.bf16 %v16481_v44  ;;  %v4365_v50 = vsel %vm19913_vm2, %v13016_v23, %v13105_v3 }
 0x3db   : > { %v4314_v34 = vsel %vm19917_vm9, %v13005_v42, %v13006_v9  ;;  %v13181_v52 = vunpack.i.h.bf16 %v13179_v37  ;;  %v13180_v25 = vunpack.i.l.bf16 %v13179_v37  ;;  %13473 = vrot.lane.b32.xlu1 %v16453_v49, %s19910_s9  ;;  %vm19918_vm3 = vmmov %vm19913_vm2  ;;  %v13026_v9 = vunpack.i.h.bf16 %v16789_v21 }
 0x3dc   : > { %v11274_v15 = vpack.c.bf16 %v4317_v48, %v4314_v34  ;;  %v4367_v46 = vsel %vm19918_vm3, %v13020_v61, %v13021_v36  ;;  %13458 = vrot.lane.b32.xlu0 %v16463_v30, %s19898_s10  ;;  %11273 = vmatprep.subr.bf16.mxu1 %v11272_v53  ;;  %vm19919_vm1 = vmmov %vm19913_vm2  ;;  %v13025_v39 = vunpack.i.l.bf16 %v16789_v21  ;;  %vm19923_vm9 = vcmask 203776  }
 0x3dd   : > { %v13194_v42 = vpop.permute.xlu1 %13193  ;;  %v4368_v48 = vsel %vm19919_vm1, %v13021_v36, %v13180_v25  ;;  %vm19920_vm0 = vmmov %vm19919_vm1  ;;  %v4417_v36 = vsel %vm19923_vm9, %v13030_v19, %v13031_v12 }
 0x3de   : > { %11275 = vmatpush1.bf16.msra.mxu1 %v11274_v15  ;;  %v16861_v44 = vsel %vm19920_vm0, %v13180_v25, %v13181_v52  ;;  %vm19921_vm7 = vmmov %vm19920_vm0  ;;  %v13184_v6 = vpop.permute.xlu0 %13183  ;;  %v11276_v57 = vpack.c.bf16 %v4368_v48, %v4365_v50 }
 0x3df   : > { %v4364_v61 = vsel %vm19921_vm7, %v13015_v29, %v13016_v23  ;;  %v13186_v37 = vunpack.i.h.bf16 %v13184_v6  ;;  %v13185_v53 = vunpack.i.l.bf16 %v13184_v6  ;;  %13483 = vrot.lane.b32.xlu1 %v16447_v5, %s19922_s8  ;;  %vm19924_vm3 = vmmov %vm19923_vm9  ;;  %v13195_v6 = vunpack.i.l.bf16 %v13194_v42 }
 0x3e0   : > { %v11278_v3 = vpack.c.bf16 %v4367_v46, %v4364_v61  ;;  %13468 = vrot.lane.b32.xlu0 %v16459_v59, %s19910_s9  ;;  %11277 = vmatprep.subr.bf16.mxu1 %v11276_v57  ;;  %v4415_v21 = vsel %vm19924_vm3, %v13026_v9, %v13110_v60  ;;  %vm19925_vm2 = vmmov %vm19924_vm3  ;;  %v13196_v61 = vunpack.i.h.bf16 %v13194_v42  ;;  %vm19930_vm9 = vcmask 195584  }
 0x3e1   : > { %v16872_v23 = vpop.permute.xlu1 %13203  ;;  %v4418_v29 = vsel %vm19925_vm2, %v13031_v12, %v13185_v53  ;;  %vm19926_vm1 = vmmov %vm19925_vm2 }
 0x3e2   : > { %11279 = vmatpush1.bf16.msra.mxu1 %v11278_v3  ;;  %v16877_v52 = vsel %vm19926_vm1, %v13110_v60, %v13111_v13  ;;  %vm19927_vm0 = vmmov %vm19926_vm1  ;;  %v13189_v46 = vpop.permute.xlu0 %13188  ;;  %v11280_v19 = vpack.c.bf16 %v4418_v29, %v4415_v21  ;;  %v4467_v42 = vsel %vm19930_vm9, %v13195_v6, %v13196_v61 }
 0x3e3   : > { %v16880_v25 = vsel %vm19927_vm0, %v13185_v53, %v13186_v37  ;;  %vm19928_vm7 = vmmov %vm19927_vm0  ;;  %13493 = vrot.lane.b32.xlu1 %v16453_v49, %s19922_s8  ;;  %v13191_v13 = vunpack.i.h.bf16 %v13189_v46  ;;  %v13190_v60 = vunpack.i.l.bf16 %v13189_v46 }
 0x3e4   : > { %v4414_v15 = vsel %vm19928_vm7, %v13025_v39, %v13026_v9  ;;  %13478 = vrot.lane.b32.xlu0 %v16463_v30, %s19910_s9  ;;  %11281 = vmatprep.subr.bf16.mxu1 %v11280_v19  ;;  %v13036_v9 = vunpack.i.h.bf16 %v16837_v35  ;;  %v13035_v39 = vunpack.i.l.bf16 %v16837_v35  ;;  %vm19931_vm3 = vmmov %vm19930_vm9  ;;  %vm19937_vm9 = vcmask 187392   ;;  %s20265_s9 = smov 23  }
 0x3e5   : > { %v11282_v48 = vpack.c.bf16 %v4417_v36, %v4414_v15  ;;  %v13214_v12 = vpop.permute.xlu1 %13213  ;;  %vm19932_vm2 = vmmov %vm19931_vm3 }
 0x3e6   : > { %v13199_v57 = vpop.permute.xlu0 %13198  ;;  %v4465_v36 = vsel %vm19931_vm3, %v13036_v9, %v13190_v60  ;;  %vm19933_vm1 = vmmov %vm19932_vm2  ;;  %v13215_v50 = vunpack.i.l.bf16 %v13214_v12 }
 0x3e7   : > { %11283 = vmatpush1.bf16.msra.mxu1 %v11282_v48  ;;  %v13201_v37 = vunpack.i.h.bf16 %v13199_v57  ;;  %v13200_v53 = vunpack.i.l.bf16 %v13199_v57  ;;  %13503 = vrot.lane.b32.xlu1 %v16447_v5, %s19929_s7  ;;  %v16901_v29 = vsel %vm19933_vm1, %v13190_v60, %v13191_v13  ;;  %vm19934_vm0 = vmmov %vm19933_vm1  ;;  %v13216_v57 = vunpack.i.h.bf16 %v13214_v12  ;;  %v10519_v12 = vld [vmem:[%s19840_s2 + $0xb0] sm:$0xff] }
 0x3e8   : > { %13488 = vrot.lane.b32.xlu0 %v16459_v59, %s19922_s8  ;;  %vm19935_vm7 = vmmov %vm19934_vm0 }
 0x3e9   : > { %v16896_v3 = vpop.permute.xlu1 %13223  ;;  %v4468_v21 = vsel %vm19932_vm2, %v13196_v61, %v13200_v53  ;;  %v16904_v35 = vsel %vm19934_vm0, %v13200_v53, %v13201_v37  ;;  %v4464_v15 = vsel %vm19935_vm7, %v13035_v39, %v13036_v9  ;;  %v10511_v9 = vld [vmem:[%s19840_s2 + $0x70] sm:$0xff]  ;;  %v13206_v39 = vunpack.i.h.bf16 %v16872_v23  ;;  %vm19938_vm3 = vmmov %vm19937_vm9 }
 0x3ea   : > { %v13209_v46 = vpop.permute.xlu0 %13208  ;;  %v11284_v19 = vpack.c.bf16 %v4468_v21, %v4465_v36  ;;  %v11286_v6 = vpack.c.bf16 %v4467_v42, %v4464_v15  ;;  %v13205_v37 = vunpack.i.l.bf16 %v16872_v23  ;;  %v4517_v21 = vsel %vm19937_vm9, %v13215_v50, %v13216_v57  ;;  %vm19939_vm2 = vmmov %vm19938_vm3 }
 0x3eb   : > { %13513 = vrot.lane.b32.xlu1 %v16453_v49, %s19929_s7  ;;  %v13211_v61 = vunpack.i.h.bf16 %v13209_v46  ;;  %v13210_v13 = vunpack.i.l.bf16 %v13209_v46  ;;  %vm19940_vm1 = vmmov %vm19939_vm2  ;;  %vm19960_vm9 = vcmask 7168  }
 0x3ec   : > { %13498 = vrot.lane.b32.xlu0 %v16463_v30, %s19922_s8  ;;  %11285 = vmatprep.subr.bf16.mxu1 %v11284_v19  ;;  %vm19941_vm0 = vmmov %vm19940_vm1 }
 0x3ed   : > { %v13234_v60 = vpop.permute.xlu1 %13233  ;;  %11287 = vmatpush1.bf16.msra.mxu1 %v11286_v6  ;;  %v16927_v15 = vsel %vm19938_vm3, %v13210_v13, %v13211_v61  ;;  %v4515_v19 = vsel %vm19940_vm1, %v13206_v39, %v13210_v13  ;;  %vm19942_vm7 = vmmov %vm19941_vm0 }
 0x3ee   : > { %v13219_v53 = vpop.permute.xlu0 %13218  ;;  %v13236_v34 = vunpack.i.h.bf16 %v13234_v60  ;;  %v13235_v13 = vunpack.i.l.bf16 %v13234_v60  ;;  %vm19961_vm3 = vmmov %vm19960_vm9 }
 0x3ef   : > { %v13221_v42 = vunpack.i.h.bf16 %v13219_v53  ;;  %v13220_v36 = vunpack.i.l.bf16 %v13219_v53  ;;  %13523 = vrot.lane.b32.xlu1 %v16447_v5, %s19936_s24  ;;  %v4514_v53 = vsel %vm19942_vm7, %v13205_v37, %v13206_v39 }
 0x3f0   : > { %13508 = vrot.lane.b32.xlu0 %v16459_v59, %s19929_s7  ;;  %6487 = vmatmul.mubr.f32.vlgmr.msra.gmra.mrb[16].mxu1 %v10511_v9  ;;  %v11290_v61 = vpack.c.bf16 %v4517_v21, %v4514_v53  ;;  %v13225_v21 = vunpack.i.l.bf16 %v16896_v3 }
 0x3f1   : > { %v16930_v23 = vsel %vm19939_vm2, %v13220_v36, %v13221_v42  ;;  %v16932_v46 = vpop.permute.xlu1 %13243  ;;  %v4518_v6 = vsel %vm19941_vm0, %v13216_v57, %v13220_v36  ;;  %6492 = vmatprep.mubr.f32.mxu1 %v10519_v12  ;;  %v10518_v42 = vld [vmem:[%s19840_s2 + $0xa8] sm:$0xff]  ;;  %v13226_v36 = vunpack.i.h.bf16 %v16896_v3  ;;  %vm19963_vm2 = vmmov %vm19961_vm3 }
 0x3f2   : > { %v13229_v50 = vpop.permute.xlu0 %13228  ;;  %v11288_v48 = vpack.c.bf16 %v4518_v6, %v4515_v19  ;;  %v10514_v57 = vld [vmem:[%s19840_s2 + $0x88] sm:$0xff]  ;;  %vm19965_vm1 = vmmov %vm19963_vm2 }
 0x3f3   : > { %13533 = vrot.lane.b32.xlu1 %v16453_v49, %s19936_s24  ;;  %v13231_v39 = vunpack.i.h.bf16 %v13229_v50  ;;  %v13230_v37 = vunpack.i.l.bf16 %v13229_v50  ;;  %vm19966_vm0 = vmmov %vm19965_vm1 }
 0x3f4   : > { %13518 = vrot.lane.b32.xlu0 %v16463_v30, %s19929_s7  ;;  %11289 = vmatprep.subr.bf16.mxu1 %v11288_v48  ;;  %v4567_v48 = vsel %vm1161_vm10, %v13235_v13, %v13236_v34  ;;  %vm19967_vm7 = vmmov %vm19966_vm0  ;;  %s20264_s7 = smov 24  }
 0x3f5   : > { %v13254_v12 = vpop.permute.xlu1 %13253  ;;  %11291 = vmatpush1.bf16.msra.mxu1 %v11290_v61  ;;  %v16957_v53 = vsel %vm1161_vm10, %v13230_v37, %v13231_v39  ;;  %v4565_v61 = vsel %vm1161_vm10, %v13226_v36, %v13230_v37 }
 0x3f6   : > { %v13239_v19 = vpop.permute.xlu0 %13238  ;;  %6493 = vmatmul.mubr.f32.gmra.mrb[18].mxu1 %v10518_v42  ;;  %v13256_v38 = vunpack.i.h.bf16 %v13254_v12  ;;  %v13255_v41 = vunpack.i.l.bf16 %v13254_v12 }
 0x3f7   : > { %v13241_v6 = vunpack.i.h.bf16 %v13239_v19  ;;  %v13240_v60 = vunpack.i.l.bf16 %v13239_v19  ;;  %13543 = vrot.lane.b32.xlu1 %v16447_v5, %s19943_s25  ;;  %6563 = vmatprep.mubr.f32.mxu1 %v10514_v57  ;;  %v4564_v19 = vsel %vm1161_vm10, %v13225_v21, %v13226_v36  ;;  %v13246_v36 = vunpack.i.h.bf16 %v16932_v46 }
 0x3f8   : > { %13528 = vrot.lane.b32.xlu0 %v16459_v59, %s19936_s24  ;;  %v11294_v39 = vpack.c.bf16 %v4567_v48, %v4564_v19  ;;  %v13245_v21 = vunpack.i.l.bf16 %v16932_v46  ;;  %v4617_v12 = vsel %vm1212_vm11, %v13255_v41, %v13256_v38 }
 0x3f9   : > { %v16960_v50 = vsel %vm1161_vm10, %v13240_v60, %v13241_v6  ;;  %v13264_v3 = vpop.permute.xlu1 %13263  ;;  %v4568_v42 = vsel %vm1161_vm10, %v13236_v34, %v13240_v60 }
 0x3fa   : > { %v13249_v9 = vpop.permute.xlu0 %13248  ;;  %v11292_v57 = vpack.c.bf16 %v4568_v42, %v4565_v61 }
 0x3fb   : > { %13553 = vrot.lane.b32.xlu1 %v16453_v49, %s19943_s25  ;;  %v13251_v37 = vunpack.i.h.bf16 %v13249_v9  ;;  %v13250_v6 = vunpack.i.l.bf16 %v13249_v9 }
 0x3fc   : > { %13538 = vrot.lane.b32.xlu0 %v16463_v30, %s19936_s24  ;;  %11293 = vmatprep.subr.bf16.mxu1 %v11292_v57 }
 0x3fd   : > { %v13274_v34 = vpop.permute.xlu1 %13273  ;;  %11295 = vmatpush1.bf16.msra.mxu1 %v11294_v39  ;;  %v16979_v48 = vsel %vm1212_vm11, %v13250_v6, %v13251_v37  ;;  %v4615_v46 = vsel %vm1212_vm11, %v13246_v36, %v13250_v6  ;;  %v4614_v39 = vsel %vm1212_vm11, %v13245_v21, %v13246_v36  ;;  %v13266_v36 = vunpack.i.h.bf16 %v13264_v3 }
 0x3fe   : > { %v13259_v60 = vpop.permute.xlu0 %13258  ;;  %19945 = vst [vmem:[#allocation15_spill] sm:$0xff] %v16979_v48  ;;  %v11298_v37 = vpack.c.bf16 %v4617_v12, %v4614_v39  ;;  %v13276_v10 = vunpack.i.h.bf16 %v13274_v34  ;;  %v13275_v28 = vunpack.i.l.bf16 %v13274_v34  ;;  %v13265_v21 = vunpack.i.l.bf16 %v13264_v3 }
 0x3ff   : > { %v13261_v61 = vunpack.i.h.bf16 %v13259_v60  ;;  %v13260_v42 = vunpack.i.l.bf16 %v13259_v60  ;;  %13563 = vrot.lane.b32.xlu1 %v16447_v5, %s19944_s26 }
 0x400   : > { %13548 = vrot.lane.b32.xlu0 %v16459_v59, %s19943_s25  ;;  %v4667_v12 = vsel %vm1263_vm13, %v13275_v28, %v13276_v10 }
 0x401   : > { %v16982_v9 = vsel %vm1212_vm11, %v13260_v42, %v13261_v61  ;;  %v13284_v19 = vpop.permute.xlu1 %13283  ;;  %v4618_v57 = vsel %vm1212_vm11, %v13256_v38, %v13260_v42 }
 0x402   : > { %19946 = vst [vmem:[#allocation16_spill] sm:$0xff] %v16982_v9  ;;  %v13269_v60 = vpop.permute.xlu0 %13268  ;;  %v11296_v13 = vpack.c.bf16 %v4618_v57, %v4615_v46 }
 0x403   : > { %13573 = vrot.lane.b32.xlu1 %v16453_v49, %s19944_s26  ;;  %v13271_v6 = vunpack.i.h.bf16 %v13269_v60  ;;  %v13270_v61 = vunpack.i.l.bf16 %v13269_v60 }
 0x404   : > { %13558 = vrot.lane.b32.xlu0 %v16463_v30, %s19943_s25  ;;  %11297 = vmatprep.subr.bf16.mxu1 %v11296_v13  ;;  %s20263_s25 = smov 25  }
 0x405   : > { %v13294_v38 = vpop.permute.xlu1 %13293  ;;  %11299 = vmatpush1.bf16.msra.mxu1 %v11298_v37  ;;  %v16999_v34 = vsel %vm1263_vm13, %v13270_v61, %v13271_v6  ;;  %v4665_v3 = vsel %vm1263_vm13, %v13266_v36, %v13270_v61  ;;  %v4664_v37 = vsel %vm1263_vm13, %v13265_v21, %v13266_v36  ;;  %v13286_v36 = vunpack.i.h.bf16 %v13284_v19 }
 0x406   : > { %v13279_v42 = vpop.permute.xlu0 %13278  ;;  %19948 = vst [vmem:[#allocation17_spill] sm:$0xff] %v16999_v34  ;;  %v11302_v6 = vpack.c.bf16 %v4667_v12, %v4664_v37  ;;  %v13296_v8 = vunpack.i.h.bf16 %v13294_v38  ;;  %v13295_v48 = vunpack.i.l.bf16 %v13294_v38  ;;  %v13285_v21 = vunpack.i.l.bf16 %v13284_v19 }
 0x407   : > { %v13281_v46 = vunpack.i.h.bf16 %v13279_v42  ;;  %v13280_v57 = vunpack.i.l.bf16 %v13279_v42  ;;  %13583 = vrot.lane.b32.xlu1 %v16447_v5, %s19947_s27 }
 0x408   : > { %13568 = vrot.lane.b32.xlu0 %v16459_v59, %s19944_s26  ;;  %v4717_v12 = vsel %vm1314_vm15, %v13295_v48, %v13296_v8 }
 0x409   : > { %v17002_v13 = vsel %vm1263_vm13, %v13280_v57, %v13281_v46  ;;  %v13304_v39 = vpop.permute.xlu1 %13303  ;;  %v4668_v60 = vsel %vm1263_vm13, %v13276_v10, %v13280_v57 }
 0x40a   : > { %19949 = vst [vmem:[#allocation18_spill] sm:$0xff] %v17002_v13  ;;  %v13289_v42 = vpop.permute.xlu0 %13288  ;;  %v11300_v41 = vpack.c.bf16 %v4668_v60, %v4665_v3 }
 0x40b   : > { %13593 = vrot.lane.b32.xlu1 %v16453_v49, %s19947_s27  ;;  %v13291_v61 = vunpack.i.h.bf16 %v13289_v42  ;;  %v13290_v46 = vunpack.i.l.bf16 %v13289_v42 }
 0x40c   : > { %13578 = vrot.lane.b32.xlu0 %v16463_v30, %s19944_s26  ;;  %11301 = vmatprep.subr.bf16.mxu1 %v11300_v41  ;;  %s17707_s26 = scalar_lea.vmem %s20249_s1, %s14913_s20  ;;  %s20257_s1 = smov 46  }
 0x40d   : > { %v13314_v10 = vpop.permute.xlu1 %13313  ;;  %11303 = vmatpush1.bf16.msra.mxu1 %v11302_v6  ;;  %v17019_v38 = vsel %vm1314_vm15, %v13290_v46, %v13291_v61  ;;  %v4715_v19 = vsel %vm1314_vm15, %v13286_v36, %v13290_v46  ;;  %v4714_v6 = vsel %vm1314_vm15, %v13285_v21, %v13286_v36  ;;  %v13306_v36 = vunpack.i.h.bf16 %v13304_v39  ;;  %s20258_s20 = smov 45  }
 0x40e   : > { %v13299_v57 = vpop.permute.xlu0 %13298  ;;  %19951 = vst [vmem:[#allocation19_spill] sm:$0xff] %v17019_v38  ;;  %v11306_v61 = vpack.c.bf16 %v4717_v12, %v4714_v6  ;;  %v13316_v34 = vunpack.i.h.bf16 %v13314_v10  ;;  %v13315_v13 = vunpack.i.l.bf16 %v13314_v10  ;;  %v13305_v21 = vunpack.i.l.bf16 %v13304_v39 }
 0x40f   : > { %v13301_v3 = vunpack.i.h.bf16 %v13299_v57  ;;  %v13300_v60 = vunpack.i.l.bf16 %v13299_v57  ;;  %13603 = vrot.lane.b32.xlu1 %v16447_v5, %s19950_s6 }
 0x410   : > { %13588 = vrot.lane.b32.xlu0 %v16459_v59, %s19947_s27  ;;  %v4767_v12 = vsel %vm1365_vm8, %v13315_v13, %v13316_v34 }
 0x411   : > { %v17022_v41 = vsel %vm1314_vm15, %v13300_v60, %v13301_v3  ;;  %v13324_v37 = vpop.permute.xlu1 %13323  ;;  %v4718_v42 = vsel %vm1314_vm15, %v13296_v8, %v13300_v60 }
 0x412   : > { %19952 = vst [vmem:[#allocation20_spill] sm:$0xff] %v17022_v41  ;;  %v13309_v57 = vpop.permute.xlu0 %13308  ;;  %v11304_v28 = vpack.c.bf16 %v4718_v42, %v4715_v19 }
 0x413   : > { %13613 = vrot.lane.b32.xlu1 %v16453_v49, %s19950_s6  ;;  %v13311_v46 = vunpack.i.h.bf16 %v13309_v57  ;;  %v13310_v3 = vunpack.i.l.bf16 %v13309_v57 }
 0x414   : > { %13598 = vrot.lane.b32.xlu0 %v16463_v30, %s19947_s27  ;;  %11305 = vmatprep.subr.bf16.mxu1 %v11304_v28  ;;  %s20252_s27 = smov 69  }
 0x415   : > { %v13334_v8 = vpop.permute.xlu1 %13333  ;;  %11307 = vmatpush1.bf16.msra.mxu1 %v11306_v61  ;;  %v17039_v10 = vsel %vm1365_vm8, %v13310_v3, %v13311_v46  ;;  %v4765_v39 = vsel %vm1365_vm8, %v13306_v36, %v13310_v3  ;;  %v4764_v61 = vsel %vm1365_vm8, %v13305_v21, %v13306_v36  ;;  %v13326_v36 = vunpack.i.h.bf16 %v13324_v37 }
 0x416   : > { %v13319_v60 = vpop.permute.xlu0 %13318  ;;  %19954 = vst [vmem:[#allocation21_spill] sm:$0xff] %v17039_v10  ;;  %v11310_v46 = vpack.c.bf16 %v4767_v12, %v4764_v61  ;;  %v13336_v38 = vunpack.i.h.bf16 %v13334_v8  ;;  %v13335_v41 = vunpack.i.l.bf16 %v13334_v8  ;;  %v13325_v21 = vunpack.i.l.bf16 %v13324_v37 }
 0x417   : > { %v13321_v19 = vunpack.i.h.bf16 %v13319_v60  ;;  %v13320_v42 = vunpack.i.l.bf16 %v13319_v60  ;;  %13623 = vrot.lane.b32.xlu1 %v16447_v5, %s19953_s21 }
 0x418   : > { %13608 = vrot.lane.b32.xlu0 %v16459_v59, %s19950_s6  ;;  %v4817_v12 = vsel %vm1416_vm14, %v13335_v41, %v13336_v38 }
 0x419   : > { %v17042_v28 = vsel %vm1365_vm8, %v13320_v42, %v13321_v19  ;;  %v13344_v6 = vpop.permute.xlu1 %13343  ;;  %v4768_v57 = vsel %vm1365_vm8, %v13316_v34, %v13320_v42 }
 0x41a   : > { %19955 = vst [vmem:[#allocation22_spill] sm:$0xff] %v17042_v28  ;;  %v13329_v60 = vpop.permute.xlu0 %13328  ;;  %v11308_v48 = vpack.c.bf16 %v4768_v57, %v4765_v39 }
 0x41b   : > { %13633 = vrot.lane.b32.xlu1 %v16453_v49, %s19953_s21  ;;  %v13331_v3 = vunpack.i.h.bf16 %v13329_v60  ;;  %v13330_v19 = vunpack.i.l.bf16 %v13329_v60 }
 0x41c   : > { %13618 = vrot.lane.b32.xlu0 %v16463_v30, %s19950_s6  ;;  %11309 = vmatprep.subr.bf16.mxu1 %v11308_v48  ;;  %s20256_s6 = smov 47  }
 0x41d   : > { %v13354_v34 = vpop.permute.xlu1 %13353  ;;  %11311 = vmatpush1.bf16.msra.mxu1 %v11310_v46  ;;  %v17059_v8 = vsel %vm1416_vm14, %v13330_v19, %v13331_v3  ;;  %v4815_v37 = vsel %vm1416_vm14, %v13326_v36, %v13330_v19  ;;  %v4814_v46 = vsel %vm1416_vm14, %v13325_v21, %v13326_v36  ;;  %v13346_v36 = vunpack.i.h.bf16 %v13344_v6 }
 0x41e   : > { %v13339_v42 = vpop.permute.xlu0 %13338  ;;  %19957 = vst [vmem:[#allocation23_spill] sm:$0xff] %v17059_v8  ;;  %v11314_v3 = vpack.c.bf16 %v4817_v12, %v4814_v46  ;;  %v13356_v10 = vunpack.i.h.bf16 %v13354_v34  ;;  %v13345_v21 = vunpack.i.l.bf16 %v13344_v6 }
 0x41f   : > { %v13341_v39 = vunpack.i.h.bf16 %v13339_v42  ;;  %v13340_v57 = vunpack.i.l.bf16 %v13339_v42  ;;  %13643 = vrot.lane.b32.xlu1 %v16447_v5, %s19956_s30 }
 0x420   : > { %13628 = vrot.lane.b32.xlu0 %v16459_v59, %s19953_s21 }
 0x421   : > { %v17062_v48 = vsel %vm1416_vm14, %v13340_v57, %v13341_v39  ;;  %v17064_v61 = vpop.permute.xlu1 %13363  ;;  %v4818_v60 = vsel %vm1416_vm14, %v13336_v38, %v13340_v57  ;;  %v13355_v39 = vunpack.i.l.bf16 %v13354_v34 }
 0x422   : > { %19958 = vst [vmem:[#allocation24_spill] sm:$0xff] %v17062_v48  ;;  %v13349_v42 = vpop.permute.xlu0 %13348  ;;  %v11312_v13 = vpack.c.bf16 %v4818_v60, %v4815_v37 }
 0x423   : > { %13653 = vrot.lane.b32.xlu1 %v16453_v49, %s19956_s30  ;;  %v13351_v19 = vunpack.i.h.bf16 %v13349_v42  ;;  %v13350_v28 = vunpack.i.l.bf16 %v13349_v42  ;;  %v4867_v12 = vsel %vm19960_vm9, %v13355_v39, %v13356_v10  ;;  %vm19971_vm9 = vcmask 1039360  }
 0x424   : > { %13638 = vrot.lane.b32.xlu0 %v16463_v30, %s19953_s21  ;;  %11313 = vmatprep.subr.bf16.mxu1 %v11312_v13  ;;  %s20255_s21 = smov 66  }
 0x425   : > { %v13374_v38 = vpop.permute.xlu1 %13373  ;;  %11315 = vmatpush1.bf16.msra.mxu1 %v11314_v3  ;;  %v17081_v34 = vsel %vm19961_vm3, %v13350_v28, %v13351_v19  ;;  %v4865_v6 = vsel %vm19965_vm1, %v13346_v36, %v13350_v28  ;;  %v4864_v3 = vsel %vm19967_vm7, %v13345_v21, %v13346_v36  ;;  %vm19972_vm3 = vmmov %vm19971_vm9 }
 0x426   : > { %v13359_v57 = vpop.permute.xlu0 %13358  ;;  %19962 = vst [vmem:[#allocation25_spill] sm:$0xff] %v17081_v34  ;;  %v11318_v19 = vpack.c.bf16 %v4867_v12, %v4864_v3  ;;  %v13376_v8 = vunpack.i.h.bf16 %v13374_v38 }
 0x427   : > { %v13361_v37 = vunpack.i.h.bf16 %v13359_v57  ;;  %v13360_v60 = vunpack.i.l.bf16 %v13359_v57  ;;  %13663 = vrot.lane.b32.xlu1 %v16447_v5, %s19959_s29 }
 0x428   : > { %13648 = vrot.lane.b32.xlu0 %v16459_v59, %s19956_s30 }
 0x429   : > { %v17084_v13 = vsel %vm19963_vm2, %v13360_v60, %v13361_v37  ;;  %v17086_v46 = vpop.permute.xlu1 %13383  ;;  %v4868_v42 = vsel %vm19966_vm0, %v13356_v10, %v13360_v60  ;;  %v13375_v37 = vunpack.i.l.bf16 %v13374_v38  ;;  %v11320_v10 = vpack.c.bf16 %v16274_v47, %v16196_v27  ;;  %v19969_v38 = vld [vmem:[#allocation7_spill] sm:$0xff]  ;;  %vm19973_vm2 = vmmov %vm19972_vm3 }
 0x42a   : > { %19964 = vst [vmem:[#allocation26_spill] sm:$0xff] %v17084_v13  ;;  %v13369_v57 = vpop.permute.xlu0 %13368  ;;  %v11316_v41 = vpack.c.bf16 %v4868_v42, %v4865_v6  ;;  %v13366_v60 = vunpack.i.h.bf16 %v17064_v61  ;;  %v13365_v6 = vunpack.i.l.bf16 %v17064_v61  ;;  %vm19974_vm1 = vmmov %vm19973_vm2 }
 0x42b   : > { %13673 = vrot.lane.b32.xlu1 %v16453_v49, %s19959_s29  ;;  %v13371_v28 = vunpack.i.h.bf16 %v13369_v57  ;;  %v13370_v36 = vunpack.i.l.bf16 %v13369_v57  ;;  %v4929_v47 = vsel %vm19971_vm9, %v13375_v37, %v13376_v8  ;;  %vm19975_vm0 = vmmov %vm19974_vm1  ;;  %vm19978_vm9 = vcmask 1031168  }
 0x42c   : > { %13658 = vrot.lane.b32.xlu0 %v16463_v30, %s19956_s30  ;;  %11317 = vmatprep.subr.bf16.mxu1 %v11316_v41  ;;  %v19970_v41 = vld [vmem:[#allocation12_spill] sm:$0xff]  ;;  %vm19976_vm7 = vmmov %vm19975_vm0  ;;  %s20254_s30 = smov 67  }
 0x42d   : > { %v13394_v21 = vpop.permute.xlu1 %13393  ;;  %11319 = vmatpush1.bf16.msra.mxu1 %v11318_v19  ;;  %v11322_v39 = vpack.c.bf16 %v19970_v41, %v19969_v38  ;;  %v4927_v19 = vsel %vm19972_vm3, %v13366_v60, %v13370_v36  ;;  %v4926_v27 = vsel %vm19976_vm7, %v13365_v6, %v13366_v60  ;;  %v13386_v60 = vunpack.i.h.bf16 %v17086_v46  ;;  %vm19979_vm3 = vmmov %vm19978_vm9 }
 0x42e   : > { %v13379_v42 = vpop.permute.xlu0 %13378  ;;  %11321 = vmatprep.subr.bf16.mxu1 %v11320_v10  ;;  %v17111_v10 = vsel %vm19974_vm1, %v13370_v36, %v13371_v28  ;;  %v13396_v34 = vunpack.i.h.bf16 %v13394_v21  ;;  %v13395_v13 = vunpack.i.l.bf16 %v13394_v21  ;;  %v13385_v6 = vunpack.i.l.bf16 %v17086_v46 }
 0x42f   : > { %v13381_v12 = vunpack.i.h.bf16 %v13379_v42  ;;  %v13380_v3 = vunpack.i.l.bf16 %v13379_v42  ;;  %13683 = vrot.lane.b32.xlu1 %v16447_v5, %s19968_s28 }
 0x430   : > { %13668 = vrot.lane.b32.xlu0 %v16459_v59, %s19959_s29 }
 0x431   : > { %v13404_v57 = vpop.permute.xlu1 %13403  ;;  %11323 = vmatpush1.bf16.msra.mxu1 %v11322_v39  ;;  %v4930_v61 = vsel %vm19973_vm2, %v13376_v8, %v13380_v3  ;;  %v17114_v42 = vsel %vm19975_vm0, %v13380_v3, %v13381_v12  ;;  %v11326_v39 = vpack.c.bf16 %v4929_v47, %v4926_v27  ;;  %v4979_v27 = vsel %vm19978_vm9, %v13395_v13, %v13396_v34  ;;  %vm19980_vm2 = vmmov %vm19979_vm3 }
 0x432   : > { %v13389_v41 = vpop.permute.xlu0 %13388  ;;  %v11324_v38 = vpack.c.bf16 %v4930_v61, %v4927_v19  ;;  %vm19981_vm1 = vmmov %vm19980_vm2  ;;  %vm19987_vm9 = vcmask 1022976  }
 0x433   : > { %13693 = vrot.lane.b32.xlu1 %v16453_v49, %s19968_s28  ;;  %v13391_v8 = vunpack.i.h.bf16 %v13389_v41  ;;  %v13390_v28 = vunpack.i.l.bf16 %v13389_v41  ;;  %vm19983_vm0 = vmmov %vm19981_vm1 }
 0x434   : > { %13678 = vrot.lane.b32.xlu0 %v16463_v30, %s19959_s29  ;;  %11325 = vmatprep.subr.bf16.mxu1 %v11324_v38  ;;  %vm19985_vm7 = vmmov %vm19983_vm0  ;;  %s20022_s29 = smov 60  }
 0x435   : > { %v13414_v36 = vpop.permute.xlu1 %13413  ;;  %11327 = vmatpush1.bf16.msra.mxu1 %v11326_v39  ;;  %v4977_v21 = vsel %vm19979_vm3, %v13386_v60, %v13390_v28  ;;  %v17133_v41 = vsel %vm19981_vm1, %v13390_v28, %v13391_v8  ;;  %v4976_v61 = vsel %vm19985_vm7, %v13385_v6, %v13386_v60  ;;  %v13406_v60 = vunpack.i.h.bf16 %v13404_v57  ;;  %vm19988_vm3 = vmmov %vm19987_vm9 }
 0x436   : > { %v13399_v12 = vpop.permute.xlu0 %13398  ;;  %19982 = vst [vmem:[#allocation27_spill] sm:$0xff] %v17133_v41  ;;  %v11330_v37 = vpack.c.bf16 %v4979_v27, %v4976_v61  ;;  %v13416_v48 = vunpack.i.h.bf16 %v13414_v36  ;;  %v13415_v9 = vunpack.i.l.bf16 %v13414_v36  ;;  %v13405_v6 = vunpack.i.l.bf16 %v13404_v57 }
 0x437   : > { %v13401_v3 = vunpack.i.h.bf16 %v13399_v12  ;;  %v13400_v19 = vunpack.i.l.bf16 %v13399_v12  ;;  %13703 = vrot.lane.b32.xlu1 %v16447_v5, %s19977_s0 }
 0x438   : > { %13688 = vrot.lane.b32.xlu0 %v16459_v59, %s19968_s28  ;;  %v5029_v27 = vsel %vm19987_vm9, %v13415_v9, %v13416_v48  ;;  %vm19996_vm9 = vcmask 891904  }
 0x439   : > { %v13424_v47 = vpop.permute.xlu1 %13423  ;;  %v4980_v38 = vsel %vm19980_vm2, %v13396_v34, %v13400_v19  ;;  %v17136_v46 = vsel %vm19983_vm0, %v13400_v19, %v13401_v3  ;;  %vm19989_vm2 = vmmov %vm19988_vm3 }
 0x43a   : > { %19984 = vst [vmem:[#allocation28_spill] sm:$0xff] %v17136_v46  ;;  %v13409_v39 = vpop.permute.xlu0 %13408  ;;  %v11328_v12 = vpack.c.bf16 %v4980_v38, %v4977_v21  ;;  %vm19990_vm1 = vmmov %vm19989_vm2 }
 0x43b   : > { %13713 = vrot.lane.b32.xlu1 %v16453_v49, %s19977_s0  ;;  %v13411_v34 = vunpack.i.h.bf16 %v13409_v39  ;;  %v13410_v8 = vunpack.i.l.bf16 %v13409_v39  ;;  %vm19992_vm0 = vmmov %vm19990_vm1 }
 0x43c   : > { %13698 = vrot.lane.b32.xlu0 %v16463_v30, %s19968_s28  ;;  %11329 = vmatprep.subr.bf16.mxu1 %v11328_v12  ;;  %vm19994_vm7 = vmmov %vm19992_vm0  ;;  %s20013_s28 = smov 61  }
 0x43d   : > { %v13434_v28 = vpop.permute.xlu1 %13433  ;;  %11331 = vmatpush1.bf16.msra.mxu1 %v11330_v37  ;;  %v5027_v38 = vsel %vm19988_vm3, %v13406_v60, %v13410_v8  ;;  %v17153_v37 = vsel %vm19990_vm1, %v13410_v8, %v13411_v34  ;;  %v5026_v39 = vsel %vm19994_vm7, %v13405_v6, %v13406_v60  ;;  %v13426_v60 = vunpack.i.h.bf16 %v13424_v47  ;;  %vm19997_vm3 = vmmov %vm19996_vm9 }
 0x43e   : > { %v13419_v3 = vpop.permute.xlu0 %13418  ;;  %19991 = vst [vmem:[#allocation29_spill] sm:$0xff] %v17153_v37  ;;  %v11334_v13 = vpack.c.bf16 %v5029_v27, %v5026_v39  ;;  %v13436_v41 = vunpack.i.h.bf16 %v13434_v28  ;;  %v13435_v46 = vunpack.i.l.bf16 %v13434_v28  ;;  %v13425_v6 = vunpack.i.l.bf16 %v13424_v47 }
 0x43f   : > { %v13421_v19 = vunpack.i.h.bf16 %v13419_v3  ;;  %v13420_v21 = vunpack.i.l.bf16 %v13419_v3  ;;  %13723 = vrot.lane.b32.xlu1 %v16447_v5, %s19986_s4 }
 0x440   : > { %13708 = vrot.lane.b32.xlu0 %v16459_v59, %s19977_s0  ;;  %v5079_v27 = vsel %vm19996_vm9, %v13435_v46, %v13436_v41  ;;  %vm20005_vm9 = vcmask 883712  }
 0x441   : > { %v13444_v36 = vpop.permute.xlu1 %13443  ;;  %v5030_v61 = vsel %vm19989_vm2, %v13416_v48, %v13420_v21  ;;  %v17156_v57 = vsel %vm19992_vm0, %v13420_v21, %v13421_v19  ;;  %vm19998_vm2 = vmmov %vm19997_vm3 }
 0x442   : > { %19993 = vst [vmem:[#allocation30_spill] sm:$0xff] %v17156_v57  ;;  %v13429_v12 = vpop.permute.xlu0 %13428  ;;  %v11332_v3 = vpack.c.bf16 %v5030_v61, %v5027_v38  ;;  %vm19999_vm1 = vmmov %vm19998_vm2 }
 0x443   : > { %13733 = vrot.lane.b32.xlu1 %v16453_v49, %s19986_s4  ;;  %v13431_v48 = vunpack.i.h.bf16 %v13429_v12  ;;  %v13430_v34 = vunpack.i.l.bf16 %v13429_v12  ;;  %vm20001_vm0 = vmmov %vm19999_vm1 }
 0x444   : > { %13718 = vrot.lane.b32.xlu0 %v16463_v30, %s19977_s0  ;;  %11333 = vmatprep.subr.bf16.mxu1 %v11332_v3  ;;  %vm20003_vm7 = vmmov %vm20001_vm0 }
 0x445   : > { %v13454_v8 = vpop.permute.xlu1 %13453  ;;  %11335 = vmatpush1.bf16.msra.mxu1 %v11334_v13  ;;  %v5077_v61 = vsel %vm19997_vm3, %v13426_v60, %v13430_v34  ;;  %v17173_v13 = vsel %vm19999_vm1, %v13430_v34, %v13431_v48  ;;  %v5076_v12 = vsel %vm20003_vm7, %v13425_v6, %v13426_v60  ;;  %v13446_v60 = vunpack.i.h.bf16 %v13444_v36  ;;  %vm20006_vm3 = vmmov %vm20005_vm9 }
 0x446   : > { %v13439_v19 = vpop.permute.xlu0 %13438  ;;  %20000 = vst [vmem:[#allocation31_spill] sm:$0xff] %v17173_v13  ;;  %v11338_v9 = vpack.c.bf16 %v5079_v27, %v5076_v12  ;;  %v13456_v37 = vunpack.i.h.bf16 %v13454_v8  ;;  %v13455_v57 = vunpack.i.l.bf16 %v13454_v8  ;;  %v13445_v6 = vunpack.i.l.bf16 %v13444_v36 }
 0x447   : > { %v13441_v21 = vunpack.i.h.bf16 %v13439_v19  ;;  %v13440_v38 = vunpack.i.l.bf16 %v13439_v19  ;;  %13743 = vrot.lane.b32.xlu1 %v16447_v5, %s19995_s18 }
 0x448   : > { %13728 = vrot.lane.b32.xlu0 %v16459_v59, %s19986_s4  ;;  %v5129_v27 = vsel %vm20005_vm9, %v13455_v57, %v13456_v37  ;;  %vm20014_vm9 = vcmask 875520  }
 0x449   : > { %v13464_v28 = vpop.permute.xlu1 %13463  ;;  %v5080_v39 = vsel %vm19998_vm2, %v13436_v41, %v13440_v38  ;;  %v17176_v47 = vsel %vm20001_vm0, %v13440_v38, %v13441_v21  ;;  %vm20007_vm2 = vmmov %vm20006_vm3 }
 0x44a   : > { %20002 = vst [vmem:[#allocation32_spill] sm:$0xff] %v17176_v47  ;;  %v13449_v3 = vpop.permute.xlu0 %13448  ;;  %v11336_v19 = vpack.c.bf16 %v5080_v39, %v5077_v61  ;;  %vm20008_vm1 = vmmov %vm20007_vm2 }
 0x44b   : > { %13753 = vrot.lane.b32.xlu1 %v16453_v49, %s19995_s18  ;;  %v13451_v41 = vunpack.i.h.bf16 %v13449_v3  ;;  %v13450_v48 = vunpack.i.l.bf16 %v13449_v3  ;;  %vm20010_vm0 = vmmov %vm20008_vm1 }
 0x44c   : > { %13738 = vrot.lane.b32.xlu0 %v16463_v30, %s19986_s4  ;;  %11337 = vmatprep.subr.bf16.mxu1 %v11336_v19  ;;  %vm20012_vm7 = vmmov %vm20010_vm0 }
 0x44d   : > { %v13474_v34 = vpop.permute.xlu1 %13473  ;;  %11339 = vmatpush1.bf16.msra.mxu1 %v11338_v9  ;;  %v5127_v39 = vsel %vm20006_vm3, %v13446_v60, %v13450_v48  ;;  %v17193_v9 = vsel %vm20008_vm1, %v13450_v48, %v13451_v41  ;;  %v5126_v3 = vsel %vm20012_vm7, %v13445_v6, %v13446_v60  ;;  %v13466_v60 = vunpack.i.h.bf16 %v13464_v28  ;;  %vm20015_vm3 = vmmov %vm20014_vm9 }
 0x44e   : > { %v13459_v21 = vpop.permute.xlu0 %13458  ;;  %20009 = vst [vmem:[#allocation33_spill] sm:$0xff] %v17193_v9  ;;  %v11342_v46 = vpack.c.bf16 %v5129_v27, %v5126_v3  ;;  %v13476_v13 = vunpack.i.h.bf16 %v13474_v34  ;;  %v13475_v47 = vunpack.i.l.bf16 %v13474_v34  ;;  %v13465_v6 = vunpack.i.l.bf16 %v13464_v28 }
 0x44f   : > { %v13461_v38 = vunpack.i.h.bf16 %v13459_v21  ;;  %v13460_v61 = vunpack.i.l.bf16 %v13459_v21  ;;  %13763 = vrot.lane.b32.xlu1 %v16447_v5, %s20004_s5 }
 0x450   : > { %13748 = vrot.lane.b32.xlu0 %v16459_v59, %s19995_s18  ;;  %v5179_v27 = vsel %vm20014_vm9, %v13475_v47, %v13476_v13  ;;  %vm20023_vm9 = vcmask 867328  }
 0x451   : > { %v13484_v8 = vpop.permute.xlu1 %13483  ;;  %v5130_v12 = vsel %vm20007_vm2, %v13456_v37, %v13460_v61  ;;  %v17196_v36 = vsel %vm20010_vm0, %v13460_v61, %v13461_v38  ;;  %vm20016_vm2 = vmmov %vm20015_vm3 }
 0x452   : > { %20011 = vst [vmem:[#allocation34_spill] sm:$0xff] %v17196_v36  ;;  %v13469_v19 = vpop.permute.xlu0 %13468  ;;  %v11340_v21 = vpack.c.bf16 %v5130_v12, %v5127_v39  ;;  %vm20017_vm1 = vmmov %vm20016_vm2 }
 0x453   : > { %13773 = vrot.lane.b32.xlu1 %v16453_v49, %s20004_s5  ;;  %v13471_v37 = vunpack.i.h.bf16 %v13469_v19  ;;  %v13470_v41 = vunpack.i.l.bf16 %v13469_v19  ;;  %vm20019_vm0 = vmmov %vm20017_vm1 }
 0x454   : > { %13758 = vrot.lane.b32.xlu0 %v16463_v30, %s19995_s18  ;;  %11341 = vmatprep.subr.bf16.mxu1 %v11340_v21  ;;  %vm20021_vm7 = vmmov %vm20019_vm0 }
 0x455   : > { %v13494_v48 = vpop.permute.xlu1 %13493  ;;  %11343 = vmatpush1.bf16.msra.mxu1 %v11342_v46  ;;  %v5177_v12 = vsel %vm20015_vm3, %v13466_v60, %v13470_v41  ;;  %v17215_v46 = vsel %vm20017_vm1, %v13470_v41, %v13471_v37  ;;  %v5176_v19 = vsel %vm20021_vm7, %v13465_v6, %v13466_v60  ;;  %v13486_v60 = vunpack.i.h.bf16 %v13484_v8  ;;  %vm20024_vm3 = vmmov %vm20023_vm9 }
 0x456   : > { %v13479_v38 = vpop.permute.xlu0 %13478  ;;  %20018 = vst [vmem:[#allocation35_spill] sm:$0xff] %v17215_v46  ;;  %v11346_v57 = vpack.c.bf16 %v5179_v27, %v5176_v19  ;;  %v13496_v9 = vunpack.i.h.bf16 %v13494_v48  ;;  %v13495_v36 = vunpack.i.l.bf16 %v13494_v48  ;;  %v13485_v6 = vunpack.i.l.bf16 %v13484_v8 }
 0x457   : > { %v13481_v61 = vunpack.i.h.bf16 %v13479_v38  ;;  %v13480_v39 = vunpack.i.l.bf16 %v13479_v38  ;;  %13783 = vrot.lane.b32.xlu1 %v16447_v5, %s20013_s28 }
 0x458   : > { %13768 = vrot.lane.b32.xlu0 %v16459_v59, %s20004_s5  ;;  %v5229_v27 = vsel %vm20023_vm9, %v13495_v36, %v13496_v9  ;;  %vm20034_vm9 = vcmask 859136  }
 0x459   : > { %v17210_v34 = vpop.permute.xlu1 %13503  ;;  %v5180_v3 = vsel %vm20016_vm2, %v13476_v13, %v13480_v39  ;;  %v17218_v28 = vsel %vm20019_vm0, %v13480_v39, %v13481_v61  ;;  %vm20025_vm2 = vmmov %vm20024_vm3 }
 0x45a   : > { %20020 = vst [vmem:[#allocation36_spill] sm:$0xff] %v17218_v28  ;;  %v13489_v21 = vpop.permute.xlu0 %13488  ;;  %v11344_v38 = vpack.c.bf16 %v5180_v3, %v5177_v12  ;;  %vm20026_vm1 = vmmov %vm20025_vm2 }
 0x45b   : > { %13793 = vrot.lane.b32.xlu1 %v16453_v49, %s20013_s28  ;;  %v13491_v13 = vunpack.i.h.bf16 %v13489_v21  ;;  %v13490_v37 = vunpack.i.l.bf16 %v13489_v21  ;;  %vm20028_vm0 = vmmov %vm20026_vm1 }
 0x45c   : > { %13778 = vrot.lane.b32.xlu0 %v16463_v30, %s20004_s5  ;;  %11345 = vmatprep.subr.bf16.mxu1 %v11344_v38  ;;  %vm20030_vm7 = vmmov %vm20028_vm0  ;;  %s20253_s5 = smov 68  }
 0x45d   : > { %v13514_v41 = vpop.permute.xlu1 %13513  ;;  %11347 = vmatpush1.bf16.msra.mxu1 %v11346_v57  ;;  %v5227_v3 = vsel %vm20024_vm3, %v13486_v60, %v13490_v37  ;;  %v17237_v57 = vsel %vm20026_vm1, %v13490_v37, %v13491_v13  ;;  %v5226_v21 = vsel %vm20030_vm7, %v13485_v6, %v13486_v60  ;;  %v17252_v60 = vld [vmem:[%s19840_s2 + $0x80] sm:$0xff]  ;;  %v13506_v6 = vunpack.i.h.bf16 %v17210_v34  ;;  %vm20035_vm3 = vmmov %vm20034_vm9 }
 0x45e   : > { %v13499_v61 = vpop.permute.xlu0 %13498  ;;  %20027 = vst [vmem:[#allocation37_spill] sm:$0xff] %v17237_v57  ;;  %v11350_v47 = vpack.c.bf16 %v5229_v27, %v5226_v21  ;;  %v13516_v46 = vunpack.i.h.bf16 %v13514_v41  ;;  %v13515_v28 = vunpack.i.l.bf16 %v13514_v41  ;;  %20031 = vst [vmem:[#allocation39_spill] sm:$0xff] %v17252_v60  ;;  %v17259_v41 = vld [vmem:[%s19840_s2 + $0xc0] sm:$0xff] }
 0x45f   : > { %v13501_v39 = vunpack.i.h.bf16 %v13499_v61  ;;  %v13500_v12 = vunpack.i.l.bf16 %v13499_v61  ;;  %13803 = vrot.lane.b32.xlu1 %v16447_v5, %s20022_s29  ;;  %20032 = vst [vmem:[#allocation40_spill] sm:$0xff] %v17259_v41 }
 0x460   : > { %13788 = vrot.lane.b32.xlu0 %v16459_v59, %s20013_s28 }
 0x461   : > { %v17232_v48 = vpop.permute.xlu1 %13523  ;;  %v5230_v19 = vsel %vm20025_vm2, %v13496_v9, %v13500_v12  ;;  %v17240_v8 = vsel %vm20028_vm0, %v13500_v12, %v13501_v39  ;;  %v13505_v39 = vunpack.i.l.bf16 %v17210_v34  ;;  %vm20037_vm2 = vmmov %vm20035_vm3 }
 0x462   : > { %20029 = vst [vmem:[#allocation38_spill] sm:$0xff] %v17240_v8  ;;  %v13509_v38 = vpop.permute.xlu0 %13508  ;;  %v11348_v61 = vpack.c.bf16 %v5230_v19, %v5227_v3  ;;  %vm20039_vm1 = vmmov %vm20037_vm2 }
 0x463   : > { %13813 = vrot.lane.b32.xlu1 %v16453_v49, %s20022_s29  ;;  %v13511_v9 = vunpack.i.h.bf16 %v13509_v38  ;;  %v13510_v13 = vunpack.i.l.bf16 %v13509_v38  ;;  %vm20040_vm0 = vmmov %vm20039_vm1 }
 0x464   : > { %13798 = vrot.lane.b32.xlu0 %v16463_v30, %s20013_s28  ;;  %11349 = vmatprep.subr.bf16.mxu1 %v11348_v61  ;;  %s20033_s28 = smov 59   ;;  %vm20041_vm7 = vmmov %vm20040_vm0 }
 0x465   : > { %v13534_v37 = vpop.permute.xlu1 %13533  ;;  %11351 = vmatpush1.bf16.msra.mxu1 %v11350_v47  ;;  %v5279_v47 = vsel %vm20034_vm9, %v13515_v28, %v13516_v46  ;;  %v17268_v34 = vsel %vm20035_vm3, %v13510_v13, %v13511_v9  ;;  %v5277_v38 = vsel %vm20039_vm1, %v13506_v6, %v13510_v13  ;;  %vm20044_vm9 = vcmask 850944  }
 0x466   : > { %v13519_v12 = vpop.permute.xlu0 %13518  ;;  %20036 = vst [vmem:[#allocation41_spill] sm:$0xff] %v17268_v34  ;;  %v13536_v13 = vunpack.i.h.bf16 %v13534_v37  ;;  %vm20045_vm3 = vmmov %vm20044_vm9 }
 0x467   : > { %v13521_v27 = vunpack.i.h.bf16 %v13519_v12  ;;  %v13520_v3 = vunpack.i.l.bf16 %v13519_v12  ;;  %13823 = vrot.lane.b32.xlu1 %v16447_v5, %s20033_s28  ;;  %v5276_v5 = vsel %vm20041_vm7, %v13505_v39, %v13506_v6  ;;  %v10525_v6 = vld [vmem:[%s19861_s3 + $0x10] sm:$0xff] }
 0x468   : > { %13808 = vrot.lane.b32.xlu0 %v16459_v59, %s20022_s29  ;;  %6564 = vmatmul.mubr.f32.vlgmr.msra.gmra.mrb[16].mxu1 %v17252_v60  ;;  %v11354_v9 = vpack.c.bf16 %v5279_v47, %v5276_v5 }
 0x469   : > { %v17271_v19 = vsel %vm20037_vm2, %v13520_v3, %v13521_v27  ;;  %v17273_v21 = vpop.permute.xlu1 %13543  ;;  %v5280_v61 = vsel %vm20040_vm0, %v13516_v46, %v13520_v3  ;;  %6569 = vmatprep.mubr.f32.mxu1 %v17259_v41  ;;  %v17286_v27 = vld [vmem:[%s19840_s2 + $0xb8] sm:$0xff]  ;;  %v13535_v46 = vunpack.i.l.bf16 %v13534_v37  ;;  %v13525_v37 = vunpack.i.l.bf16 %v17232_v48  ;;  %vm20047_vm2 = vmmov %vm20045_vm3 }
 0x46a   : > { %20038 = vst [vmem:[#allocation42_spill] sm:$0xff] %v17271_v19  ;;  %v13529_v28 = vpop.permute.xlu0 %13528  ;;  %v11352_v12 = vpack.c.bf16 %v5280_v61, %v5277_v38  ;;  %20042 = vst [vmem:[#allocation43_spill] sm:$0xff] %v17286_v27  ;;  %v13526_v38 = vunpack.i.h.bf16 %v17232_v48 }
 0x46b   : > { %13833 = vrot.lane.b32.xlu1 %v16453_v49, %s20033_s28  ;;  %v17296_v49 = vld [vmem:[%s19840_s2 + $0x98] sm:$0xff]  ;;  %v13531_v39 = vunpack.i.h.bf16 %v13529_v28  ;;  %v13530_v3 = vunpack.i.l.bf16 %v13529_v28  ;;  %v5329_v36 = vsel %vm20044_vm9, %v13535_v46, %v13536_v13  ;;  %vm20049_vm1 = vmmov %vm20047_vm2  ;;  %vm20052_vm9 = vcmask 842752  }
 0x46c   : > { %13818 = vrot.lane.b32.xlu0 %v16463_v30, %s20022_s29  ;;  %11353 = vmatprep.subr.bf16.mxu1 %v11352_v12  ;;  %20043 = vst [vmem:[#allocation44_spill] sm:$0xff] %v17296_v49  ;;  %vm20050_vm0 = vmmov %vm20049_vm1  ;;  %s20261_s29 = smov 42  }
 0x46d   : > { %v13554_v47 = vpop.permute.xlu1 %13553  ;;  %11355 = vmatpush1.bf16.msra.mxu1 %v11354_v9  ;;  %v17306_v28 = vsel %vm20045_vm3, %v13530_v3, %v13531_v39  ;;  %v5327_v41 = vsel %vm20049_vm1, %v13526_v38, %v13530_v3  ;;  %vm20051_vm7 = vmmov %vm20050_vm0 }
 0x46e   : > { %v13539_v61 = vpop.permute.xlu0 %13538  ;;  %6570 = vmatmul.mubr.f32.gmra.mrb[18].mxu1 %v17286_v27  ;;  %20046 = vst [vmem:[#allocation45_spill] sm:$0xff] %v17306_v28  ;;  %v13555_v19 = vunpack.i.l.bf16 %v13554_v47  ;;  %vm20053_vm3 = vmmov %vm20052_vm9 }
 0x46f   : > { %v13541_v5 = vunpack.i.h.bf16 %v13539_v61  ;;  %v13540_v12 = vunpack.i.l.bf16 %v13539_v61  ;;  %6408 = vperm.xlu1 %12881, %v10525_v6   ;;  %6640 = vmatprep.mubr.f32.mxu1 %v17296_v49  ;;  %v5326_v6 = vsel %vm20051_vm7, %v13525_v37, %v13526_v38 }
 0x470   : > { %13828 = vrot.lane.b32.xlu0 %v16459_v59, %s20033_s28  ;;  %v11358_v34 = vpack.c.bf16 %v5329_v36, %v5326_v6  ;;  %v13556_v59 = vunpack.i.h.bf16 %v13554_v47 }
 0x471   : > { %v17309_v9 = vsel %vm20047_vm2, %v13540_v12, %v13541_v5  ;;  %v13564_v48 = vpop.permute.xlu1 %13563  ;;  %v5330_v27 = vsel %vm20050_vm0, %v13536_v13, %v13540_v12  ;;  %v10526_v13 = vld [vmem:[%s19861_s3 + $0x18] sm:$0xff]  ;;  %vm20055_vm2 = vmmov %vm20053_vm3  ;;  %s20259_s3 = smov 44  }
 0x472   : > { %20048 = vst [vmem:[#allocation46_spill] sm:$0xff] %v17309_v9  ;;  %v13549_v61 = vpop.permute.xlu0 %13548  ;;  %v11356_v49 = vpack.c.bf16 %v5330_v27, %v5327_v41  ;;  %v13546_v41 = vunpack.i.h.bf16 %v17273_v21  ;;  %v13545_v27 = vunpack.i.l.bf16 %v17273_v21  ;;  %v5379_v47 = vsel %vm20052_vm9, %v13555_v19, %v13556_v59  ;;  %vm20057_vm1 = vmmov %vm20055_vm2 }
 0x473   : > { %v13551_v39 = vunpack.i.h.bf16 %v13549_v61  ;;  %v13550_v5 = vunpack.i.l.bf16 %v13549_v61  ;;  %vm20058_vm0 = vmmov %vm20057_vm1  ;;  %v13566_v9 = vunpack.i.h.bf16 %v13564_v48  ;;  %v13565_v57 = vunpack.i.l.bf16 %v13564_v48 }
 0x474   : > { %13838 = vrot.lane.b32.xlu0 %v16463_v30, %s20033_s28  ;;  %11357 = vmatprep.subr.bf16.mxu1 %v11356_v49  ;;  %vm20059_vm7 = vmmov %vm20058_vm0  ;;  %vm20060_vm9 = vcmask 711680   ;;  %s20260_s28 = smov 43  }
 0x475   : > { %v13574_v60 = vpop.permute.xlu1 %13573  ;;  %11359 = vmatpush1.bf16.msra.mxu1 %v11358_v34  ;;  %v17325_v30 = vsel %vm20053_vm3, %v13550_v5, %v13551_v39  ;;  %v5377_v37 = vsel %vm20057_vm1, %v13546_v41, %v13550_v5  ;;  %v5376_v6 = vsel %vm20059_vm7, %v13545_v27, %v13546_v41  ;;  %vm20061_vm3 = vmmov %vm20060_vm9 }
 0x476   : > { %v13559_v3 = vpop.permute.xlu0 %13558  ;;  %20054 = vst [vmem:[#allocation47_spill] sm:$0xff] %v17325_v30  ;;  %v11362_v19 = vpack.c.bf16 %v5379_v47, %v5376_v6  ;;  %v13575_v46 = vunpack.i.l.bf16 %v13574_v60 }
 0x477   : > { %v13561_v36 = vunpack.i.h.bf16 %v13559_v3  ;;  %v13560_v38 = vunpack.i.l.bf16 %v13559_v3 }
 0x478   : > { %6413 = vperm.xlu0 %12880, %v10526_v13   ;;  %v13576_v13 = vunpack.i.h.bf16 %v13574_v60 }
 0x479   : > { %v17328_v49 = vsel %vm20055_vm2, %v13560_v38, %v13561_v36  ;;  %v13584_v34 = vpop.permute.xlu1 %13583  ;;  %v5380_v12 = vsel %vm20058_vm0, %v13556_v59, %v13560_v38  ;;  %vm20063_vm2 = vmmov %vm20061_vm3 }
 0x47a   : > { %20056 = vst [vmem:[#allocation48_spill] sm:$0xff] %v17328_v49  ;;  %v13569_v21 = vpop.permute.xlu0 %13568  ;;  %v11360_v61 = vpack.c.bf16 %v5380_v12, %v5377_v37  ;;  %v5429_v41 = vsel %vm20060_vm9, %v13575_v46, %v13576_v13  ;;  %vm20065_vm1 = vmmov %vm20063_vm2  ;;  %v13586_v3 = vunpack.i.h.bf16 %v13584_v34  ;;  %v13585_v30 = vunpack.i.l.bf16 %v13584_v34 }
 0x47b   : > { %v13571_v39 = vunpack.i.h.bf16 %v13569_v21  ;;  %v13570_v28 = vunpack.i.l.bf16 %v13569_v21  ;;  %vm20066_vm0 = vmmov %vm20065_vm1  ;;  %vm20068_vm9 = vcmask 703488  }
 0x47c   : > { %11361 = vmatprep.subr.bf16.mxu1 %v11360_v61  ;;  %vm20067_vm7 = vmmov %vm20066_vm0 }
 0x47d   : > { %v13594_v36 = vpop.permute.xlu1 %13593  ;;  %11363 = vmatpush1.bf16.msra.mxu1 %v11362_v19  ;;  %v17337_v27 = vsel %vm20061_vm3, %v13570_v28, %v13571_v39  ;;  %v5427_v60 = vsel %vm20065_vm1, %v13566_v9, %v13570_v28  ;;  %v5426_v12 = vsel %vm20067_vm7, %v13565_v57, %v13566_v9  ;;  %vm20069_vm3 = vmmov %vm20068_vm9 }
 0x47e   : > { %v13579_v5 = vpop.permute.xlu0 %13578  ;;  %20062 = vst [vmem:[#allocation49_spill] sm:$0xff] %v17337_v27  ;;  %v11366_v61 = vpack.c.bf16 %v5429_v41, %v5426_v12  ;;  %v13596_v46 = vunpack.i.h.bf16 %v13594_v36  ;;  %v13595_v19 = vunpack.i.l.bf16 %v13594_v36 }
 0x47f   : > { %v13581_v8 = vunpack.i.h.bf16 %v13579_v5  ;;  %v13580_v59 = vunpack.i.l.bf16 %v13579_v5 }
 0x480   : > { %v5479_v57 = vsel %vm20068_vm9, %v13595_v19, %v13596_v46  ;;  %vm20076_vm9 = vcmask 695296  }
 0x481   : > { %v17340_v38 = vsel %vm20063_vm2, %v13580_v59, %v13581_v8  ;;  %v13604_v47 = vpop.permute.xlu1 %13603  ;;  %v5430_v37 = vsel %vm20066_vm0, %v13576_v13, %v13580_v59  ;;  %vm20071_vm2 = vmmov %vm20069_vm3 }
 0x482   : > { %20064 = vst [vmem:[#allocation50_spill] sm:$0xff] %v17340_v38  ;;  %v13589_v6 = vpop.permute.xlu0 %13588  ;;  %v11364_v48 = vpack.c.bf16 %v5430_v37, %v5427_v60  ;;  %vm20073_vm1 = vmmov %vm20071_vm2  ;;  %v13606_v21 = vunpack.i.h.bf16 %v13604_v47  ;;  %v13605_v27 = vunpack.i.l.bf16 %v13604_v47 }
 0x483   : > { %v13591_v39 = vunpack.i.h.bf16 %v13589_v6  ;;  %v13590_v5 = vunpack.i.l.bf16 %v13589_v6  ;;  %vm20074_vm0 = vmmov %vm20073_vm1 }
 0x484   : > { %11365 = vmatprep.subr.bf16.mxu1 %v11364_v48  ;;  %vm20075_vm7 = vmmov %vm20074_vm0 }
 0x485   : > { %v13614_v8 = vpop.permute.xlu1 %13613  ;;  %11367 = vmatpush1.bf16.msra.mxu1 %v11366_v61  ;;  %v17349_v9 = vsel %vm20069_vm3, %v13590_v5, %v13591_v39  ;;  %v5477_v36 = vsel %vm20073_vm1, %v13586_v3, %v13590_v5  ;;  %v5476_v37 = vsel %vm20075_vm7, %v13585_v30, %v13586_v3  ;;  %vm20077_vm3 = vmmov %vm20076_vm9 }
 0x486   : > { %v13599_v28 = vpop.permute.xlu0 %13598  ;;  %20070 = vst [vmem:[#allocation51_spill] sm:$0xff] %v17349_v9  ;;  %v11370_v48 = vpack.c.bf16 %v5479_v57, %v5476_v37  ;;  %v13616_v61 = vunpack.i.h.bf16 %v13614_v8  ;;  %v13615_v19 = vunpack.i.l.bf16 %v13614_v8 }
 0x487   : > { %v13601_v49 = vunpack.i.h.bf16 %v13599_v28  ;;  %v13600_v13 = vunpack.i.l.bf16 %v13599_v28 }
 0x488   : > { %v5529_v30 = vsel %vm20076_vm9, %v13615_v19, %v13616_v61  ;;  %vm20084_vm9 = vcmask 687104  }
 0x489   : > { %v17352_v59 = vsel %vm20071_vm2, %v13600_v13, %v13601_v49  ;;  %v13624_v41 = vpop.permute.xlu1 %13623  ;;  %v5480_v60 = vsel %vm20074_vm0, %v13596_v46, %v13600_v13  ;;  %vm20079_vm2 = vmmov %vm20077_vm3 }
 0x48a   : > { %20072 = vst [vmem:[#allocation52_spill] sm:$0xff] %v17352_v59  ;;  %v13609_v12 = vpop.permute.xlu0 %13608  ;;  %v11368_v34 = vpack.c.bf16 %v5480_v60, %v5477_v36  ;;  %vm20081_vm1 = vmmov %vm20079_vm2  ;;  %v13626_v6 = vunpack.i.h.bf16 %v13624_v41  ;;  %v13625_v9 = vunpack.i.l.bf16 %v13624_v41 }
 0x48b   : > { %v13611_v39 = vunpack.i.h.bf16 %v13609_v12  ;;  %v13610_v28 = vunpack.i.l.bf16 %v13609_v12  ;;  %vm20082_vm0 = vmmov %vm20081_vm1 }
 0x48c   : > { %11369 = vmatprep.subr.bf16.mxu1 %v11368_v34  ;;  %vm20083_vm7 = vmmov %vm20082_vm0 }
 0x48d   : > { %v13634_v49 = vpop.permute.xlu1 %13633  ;;  %11371 = vmatpush1.bf16.msra.mxu1 %v11370_v48  ;;  %v17361_v3 = vsel %vm20077_vm3, %v13610_v28, %v13611_v39  ;;  %v5527_v8 = vsel %vm20081_vm1, %v13606_v21, %v13610_v28  ;;  %v5526_v60 = vsel %vm20083_vm7, %v13605_v27, %v13606_v21  ;;  %vm20085_vm3 = vmmov %vm20084_vm9 }
 0x48e   : > { %v13619_v5 = vpop.permute.xlu0 %13618  ;;  %20078 = vst [vmem:[#allocation53_spill] sm:$0xff] %v17361_v3  ;;  %v11374_v34 = vpack.c.bf16 %v5529_v30, %v5526_v60  ;;  %v13636_v48 = vunpack.i.h.bf16 %v13634_v49  ;;  %v13635_v19 = vunpack.i.l.bf16 %v13634_v49 }
 0x48f   : > { %v13621_v38 = vunpack.i.h.bf16 %v13619_v5  ;;  %v13620_v46 = vunpack.i.l.bf16 %v13619_v5 }
 0x490   : > { %v5579_v27 = vsel %vm20084_vm9, %v13635_v19, %v13636_v48  ;;  %vm20092_vm9 = vcmask 678912  }
 0x491   : > { %v17364_v13 = vsel %vm20079_vm2, %v13620_v46, %v13621_v38  ;;  %v13644_v57 = vpop.permute.xlu1 %13643  ;;  %v5530_v36 = vsel %vm20082_vm0, %v13616_v61, %v13620_v46  ;;  %vm20087_vm2 = vmmov %vm20085_vm3 }
 0x492   : > { %20080 = vst [vmem:[#allocation54_spill] sm:$0xff] %v17364_v13  ;;  %v13629_v37 = vpop.permute.xlu0 %13628  ;;  %v11372_v47 = vpack.c.bf16 %v5530_v36, %v5527_v8  ;;  %vm20089_vm1 = vmmov %vm20087_vm2  ;;  %v13646_v12 = vunpack.i.h.bf16 %v13644_v57  ;;  %v13645_v3 = vunpack.i.l.bf16 %v13644_v57 }
 0x493   : > { %v13631_v39 = vunpack.i.h.bf16 %v13629_v37  ;;  %v13630_v5 = vunpack.i.l.bf16 %v13629_v37  ;;  %vm20090_vm0 = vmmov %vm20089_vm1 }
 0x494   : > { %11373 = vmatprep.subr.bf16.mxu1 %v11372_v47  ;;  %vm20091_vm7 = vmmov %vm20090_vm0 }
 0x495   : > { %v13654_v38 = vpop.permute.xlu1 %13653  ;;  %11375 = vmatpush1.bf16.msra.mxu1 %v11374_v34  ;;  %v17373_v21 = vsel %vm20085_vm3, %v13630_v5, %v13631_v39  ;;  %v5577_v49 = vsel %vm20089_vm1, %v13626_v6, %v13630_v5  ;;  %v5576_v36 = vsel %vm20091_vm7, %v13625_v9, %v13626_v6  ;;  %vm20093_vm3 = vmmov %vm20092_vm9 }
 0x496   : > { %v13639_v28 = vpop.permute.xlu0 %13638  ;;  %20086 = vst [vmem:[#allocation55_spill] sm:$0xff] %v17373_v21  ;;  %v11378_v47 = vpack.c.bf16 %v5579_v27, %v5576_v36  ;;  %v13656_v34 = vunpack.i.h.bf16 %v13654_v38  ;;  %v13655_v19 = vunpack.i.l.bf16 %v13654_v38 }
 0x497   : > { %v13641_v59 = vunpack.i.h.bf16 %v13639_v28  ;;  %v13640_v61 = vunpack.i.l.bf16 %v13639_v28 }
 0x498   : > { %v5629_v9 = vsel %vm20092_vm9, %v13655_v19, %v13656_v34  ;;  %vm20100_vm9 = vcmask 670720  }
 0x499   : > { %v17376_v46 = vsel %vm20087_vm2, %v13640_v61, %v13641_v59  ;;  %v13664_v30 = vpop.permute.xlu1 %13663  ;;  %v5580_v8 = vsel %vm20090_vm0, %v13636_v48, %v13640_v61  ;;  %vm20095_vm2 = vmmov %vm20093_vm3 }
 0x49a   : > { %20088 = vst [vmem:[#allocation56_spill] sm:$0xff] %v17376_v46  ;;  %v13649_v60 = vpop.permute.xlu0 %13648  ;;  %v11376_v41 = vpack.c.bf16 %v5580_v8, %v5577_v49  ;;  %vm20097_vm1 = vmmov %vm20095_vm2  ;;  %v13666_v37 = vunpack.i.h.bf16 %v13664_v30  ;;  %v13665_v21 = vunpack.i.l.bf16 %v13664_v30 }
 0x49b   : > { %v13651_v39 = vunpack.i.h.bf16 %v13649_v60  ;;  %v13650_v28 = vunpack.i.l.bf16 %v13649_v60  ;;  %vm20098_vm0 = vmmov %vm20097_vm1 }
 0x49c   : > { %11377 = vmatprep.subr.bf16.mxu1 %v11376_v41  ;;  %vm20099_vm7 = vmmov %vm20098_vm0 }
 0x49d   : > { %v13674_v59 = vpop.permute.xlu1 %13673  ;;  %11379 = vmatpush1.bf16.msra.mxu1 %v11378_v47  ;;  %v17385_v6 = vsel %vm20093_vm3, %v13650_v28, %v13651_v39  ;;  %v5627_v38 = vsel %vm20097_vm1, %v13646_v12, %v13650_v28  ;;  %v5626_v8 = vsel %vm20099_vm7, %v13645_v3, %v13646_v12  ;;  %vm20101_vm3 = vmmov %vm20100_vm9 }
 0x49e   : > { %v13659_v5 = vpop.permute.xlu0 %13658  ;;  %20094 = vst [vmem:[#allocation57_spill] sm:$0xff] %v17385_v6  ;;  %v11382_v41 = vpack.c.bf16 %v5629_v9, %v5626_v8  ;;  %v13676_v47 = vunpack.i.h.bf16 %v13674_v59  ;;  %v13675_v19 = vunpack.i.l.bf16 %v13674_v59 }
 0x49f   : > { %v13661_v13 = vunpack.i.h.bf16 %v13659_v5  ;;  %v13660_v48 = vunpack.i.l.bf16 %v13659_v5 }
 0x4a0   : > { %v5679_v3 = vsel %vm20100_vm9, %v13675_v19, %v13676_v47  ;;  %vm20107_vm9 = vcmask 662528  }
 0x4a1   : > { %v17388_v61 = vsel %vm20095_vm2, %v13660_v48, %v13661_v13  ;;  %v13684_v27 = vpop.permute.xlu1 %13683  ;;  %v5630_v49 = vsel %vm20098_vm0, %v13656_v34, %v13660_v48  ;;  %vm20102_vm2 = vmmov %vm20101_vm3 }
 0x4a2   : > { %20096 = vst [vmem:[#allocation58_spill] sm:$0xff] %v17388_v61  ;;  %v13669_v36 = vpop.permute.xlu0 %13668  ;;  %v11380_v57 = vpack.c.bf16 %v5630_v49, %v5627_v38  ;;  %vm20103_vm1 = vmmov %vm20102_vm2 }
 0x4a3   : > { %v13671_v39 = vunpack.i.h.bf16 %v13669_v36  ;;  %v13670_v5 = vunpack.i.l.bf16 %v13669_v36  ;;  %vm20105_vm0 = vmmov %vm20103_vm1 }
 0x4a4   : > { %11381 = vmatprep.subr.bf16.mxu1 %v11380_v57  ;;  %vm20106_vm7 = vmmov %vm20105_vm0 }
 0x4a5   : > { %v13694_v13 = vpop.permute.xlu1 %13693  ;;  %11383 = vmatpush1.bf16.msra.mxu1 %v11382_v41  ;;  %v5677_v48 = vsel %vm20101_vm3, %v13666_v37, %v13670_v5  ;;  %v17399_v9 = vsel %vm20103_vm1, %v13670_v5, %v13671_v39  ;;  %v5676_v49 = vsel %vm20106_vm7, %v13665_v21, %v13666_v37  ;;  %v13686_v39 = vunpack.i.h.bf16 %v13684_v27  ;;  %vm20108_vm3 = vmmov %vm20107_vm9 }
 0x4a6   : > { %v13679_v28 = vpop.permute.xlu0 %13678  ;;  %20104 = vst [vmem:[#allocation59_spill] sm:$0xff] %v17399_v9  ;;  %v11386_v57 = vpack.c.bf16 %v5679_v3, %v5676_v49  ;;  %v13696_v41 = vunpack.i.h.bf16 %v13694_v13  ;;  %v13695_v19 = vunpack.i.l.bf16 %v13694_v13  ;;  %v13685_v5 = vunpack.i.l.bf16 %v13684_v27 }
 0x4a7   : > { %v13681_v46 = vunpack.i.h.bf16 %v13679_v28  ;;  %v13680_v34 = vunpack.i.l.bf16 %v13679_v28 }
 0x4a8   : > { %v5729_v21 = vsel %vm20107_vm9, %v13695_v19, %v13696_v41  ;;  %vm20121_vm9 = vcmask 506880  }
 0x4a9   : > { %v13704_v12 = vpop.permute.xlu1 %13703  ;;  %v5680_v38 = vsel %vm20102_vm2, %v13676_v47, %v13680_v34  ;;  %v17402_v59 = vsel %vm20105_vm0, %v13680_v34, %v13681_v46  ;;  %vm20109_vm2 = vmmov %vm20108_vm3 }
 0x4aa   : > { %v13689_v8 = vpop.permute.xlu0 %13688  ;;  %v11384_v30 = vpack.c.bf16 %v5680_v38, %v5677_v48  ;;  %vm20110_vm1 = vmmov %vm20109_vm2 }
 0x4ab   : > { %v13691_v28 = vunpack.i.h.bf16 %v13689_v8  ;;  %v13690_v60 = vunpack.i.l.bf16 %v13689_v8  ;;  %vm20112_vm0 = vmmov %vm20110_vm1 }
 0x4ac   : > { %11385 = vmatprep.subr.bf16.mxu1 %v11384_v30  ;;  %vm20114_vm7 = vmmov %vm20112_vm0 }
 0x4ad   : > { %v13714_v47 = vpop.permute.xlu1 %13713  ;;  %11387 = vmatpush1.bf16.msra.mxu1 %v11386_v57  ;;  %v5727_v48 = vsel %vm20108_vm3, %v13686_v39, %v13690_v60  ;;  %v17411_v3 = vsel %vm20110_vm1, %v13690_v60, %v13691_v28  ;;  %v5726_v49 = vsel %vm20114_vm7, %v13685_v5, %v13686_v39  ;;  %v13706_v60 = vunpack.i.h.bf16 %v13704_v12  ;;  %vm20122_vm3 = vmmov %vm20121_vm9 }
 0x4ae   : > { %v13699_v6 = vpop.permute.xlu0 %13698  ;;  %20111 = vst [vmem:[#allocation60_spill] sm:$0xff] %v17411_v3  ;;  %v11390_v30 = vpack.c.bf16 %v5729_v21, %v5726_v49  ;;  %v13716_v57 = vunpack.i.h.bf16 %v13714_v47  ;;  %v13715_v19 = vunpack.i.l.bf16 %v13714_v47  ;;  %v13705_v28 = vunpack.i.l.bf16 %v13704_v12 }
 0x4af   : > { %v13701_v46 = vunpack.i.h.bf16 %v13699_v6  ;;  %v13700_v34 = vunpack.i.l.bf16 %v13699_v6 }
 0x4b0   : > { %v5779_v39 = vsel %vm498_vm4, %v13715_v19, %v13716_v57  ;;  %v5776_v49 = vsel %vm498_vm4, %v13705_v28, %v13706_v60 }
 0x4b1   : > { %v13724_v37 = vpop.permute.xlu1 %13723  ;;  %v5730_v38 = vsel %vm20109_vm2, %v13696_v41, %v13700_v34  ;;  %v17414_v13 = vsel %vm20112_vm0, %v13700_v34, %v13701_v46  ;;  %vm20123_vm2 = vmmov %vm20122_vm3 }
 0x4b2   : > { %20113 = vst [vmem:[#allocation61_spill] sm:$0xff] %v17414_v13  ;;  %v13709_v8 = vpop.permute.xlu0 %13708  ;;  %v11388_v27 = vpack.c.bf16 %v5730_v38, %v5727_v48  ;;  %vm20124_vm1 = vmmov %vm20123_vm2 }
 0x4b3   : > { %v13711_v36 = vunpack.i.h.bf16 %v13709_v8  ;;  %v13710_v61 = vunpack.i.l.bf16 %v13709_v8  ;;  %vm20126_vm0 = vmmov %vm20124_vm1 }
 0x4b4   : > { %11389 = vmatprep.subr.bf16.mxu1 %v11388_v27  ;;  %v11394_v27 = vpack.c.bf16 %v5779_v39, %v5776_v49  ;;  %vm20127_vm7 = vmmov %vm20126_vm0 }
 0x4b5   : > { %v13734_v41 = vpop.permute.xlu1 %13733  ;;  %11391 = vmatpush1.bf16.msra.mxu1 %v11390_v30  ;;  %v5777_v48 = vsel %vm498_vm4, %v13706_v60, %v13710_v61  ;;  %v17423_v21 = vsel %vm498_vm4, %v13710_v61, %v13711_v36  ;;  %v13726_v61 = vunpack.i.h.bf16 %v13724_v37  ;;  %v13725_v36 = vunpack.i.l.bf16 %v13724_v37 }
 0x4b6   : > { %v13719_v9 = vpop.permute.xlu0 %13718  ;;  %20115 = vst [vmem:[#allocation62_spill] sm:$0xff] %v17423_v21  ;;  %v13736_v30 = vunpack.i.h.bf16 %v13734_v41  ;;  %v13735_v19 = vunpack.i.l.bf16 %v13734_v41 }
 0x4b7   : > { %v13721_v46 = vunpack.i.h.bf16 %v13719_v9  ;;  %v13720_v34 = vunpack.i.l.bf16 %v13719_v9  ;;  %v5826_v49 = vsel %vm549_vm5, %v13725_v36, %v13726_v61 }
 0x4b8   : > { %v5829_v60 = vsel %vm549_vm5, %v13735_v19, %v13736_v30 }
 0x4b9   : > { %v13744_v5 = vpop.permute.xlu1 %13743  ;;  %v5780_v38 = vsel %vm498_vm4, %v13716_v57, %v13720_v34  ;;  %v17426_v47 = vsel %vm498_vm4, %v13720_v34, %v13721_v46 }
 0x4ba   : > { %20116 = vst [vmem:[#allocation63_spill] sm:$0xff] %v17426_v47  ;;  %v13729_v8 = vpop.permute.xlu0 %13728  ;;  %v11392_v12 = vpack.c.bf16 %v5780_v38, %v5777_v48 }
 0x4bb   : > { %v13731_v6 = vunpack.i.h.bf16 %v13729_v8  ;;  %v13730_v3 = vunpack.i.l.bf16 %v13729_v8 }
 0x4bc   : > { %11393 = vmatprep.subr.bf16.mxu1 %v11392_v12  ;;  %v11398_v12 = vpack.c.bf16 %v5829_v60, %v5826_v49 }
 0x4bd   : > { %v13754_v57 = vpop.permute.xlu1 %13753  ;;  %11395 = vmatpush1.bf16.msra.mxu1 %v11394_v27  ;;  %v5827_v48 = vsel %vm549_vm5, %v13726_v61, %v13730_v3  ;;  %v17435_v39 = vsel %vm549_vm5, %v13730_v3, %v13731_v6  ;;  %v13746_v3 = vunpack.i.h.bf16 %v13744_v5  ;;  %v13745_v6 = vunpack.i.l.bf16 %v13744_v5 }
 0x4be   : > { %v13739_v13 = vpop.permute.xlu0 %13738  ;;  %20117 = vst [vmem:[#allocation64_spill] sm:$0xff] %v17435_v39  ;;  %v13756_v27 = vunpack.i.h.bf16 %v13754_v57  ;;  %v13755_v19 = vunpack.i.l.bf16 %v13754_v57 }
 0x4bf   : > { %v13741_v46 = vunpack.i.h.bf16 %v13739_v13  ;;  %v13740_v34 = vunpack.i.l.bf16 %v13739_v13  ;;  %v5876_v49 = vsel %vm600_vm6, %v13745_v6, %v13746_v3 }
 0x4c0   : > { %v5879_v61 = vsel %vm600_vm6, %v13755_v19, %v13756_v27 }
 0x4c1   : > { %v13764_v28 = vpop.permute.xlu1 %13763  ;;  %v5830_v38 = vsel %vm549_vm5, %v13736_v30, %v13740_v34  ;;  %v17438_v41 = vsel %vm549_vm5, %v13740_v34, %v13741_v46 }
 0x4c2   : > { %20118 = vst [vmem:[#allocation65_spill] sm:$0xff] %v17438_v41  ;;  %v13749_v8 = vpop.permute.xlu0 %13748  ;;  %v11396_v37 = vpack.c.bf16 %v5830_v38, %v5827_v48 }
 0x4c3   : > { %v13751_v9 = vunpack.i.h.bf16 %v13749_v8  ;;  %v13750_v21 = vunpack.i.l.bf16 %v13749_v8 }
 0x4c4   : > { %11397 = vmatprep.subr.bf16.mxu1 %v11396_v37  ;;  %v11402_v37 = vpack.c.bf16 %v5879_v61, %v5876_v49 }
 0x4c5   : > { %v13774_v30 = vpop.permute.xlu1 %13773  ;;  %11399 = vmatpush1.bf16.msra.mxu1 %v11398_v12  ;;  %v5877_v48 = vsel %vm600_vm6, %v13746_v3, %v13750_v21  ;;  %v17447_v60 = vsel %vm600_vm6, %v13750_v21, %v13751_v9  ;;  %v13766_v21 = vunpack.i.h.bf16 %v13764_v28  ;;  %v13765_v9 = vunpack.i.l.bf16 %v13764_v28 }
 0x4c6   : > { %v13759_v47 = vpop.permute.xlu0 %13758  ;;  %20119 = vst [vmem:[#allocation66_spill] sm:$0xff] %v17447_v60  ;;  %v13776_v12 = vunpack.i.h.bf16 %v13774_v30  ;;  %v13775_v19 = vunpack.i.l.bf16 %v13774_v30 }
 0x4c7   : > { %v13761_v46 = vunpack.i.h.bf16 %v13759_v47  ;;  %v13760_v34 = vunpack.i.l.bf16 %v13759_v47  ;;  %v5926_v49 = vsel %vm20127_vm7, %v13765_v9, %v13766_v21 }
 0x4c8   : > { %v5929_v3 = vsel %vm20121_vm9, %v13775_v19, %v13776_v12  ;;  %vm20128_vm9 = vcmask 498688  }
 0x4c9   : > { %v13784_v36 = vpop.permute.xlu1 %13783  ;;  %v5880_v38 = vsel %vm600_vm6, %v13756_v27, %v13760_v34  ;;  %v17450_v57 = vsel %vm600_vm6, %v13760_v34, %v13761_v46 }
 0x4ca   : > { %20120 = vst [vmem:[#allocation67_spill] sm:$0xff] %v17450_v57  ;;  %v13769_v8 = vpop.permute.xlu0 %13768  ;;  %v11400_v5 = vpack.c.bf16 %v5880_v38, %v5877_v48 }
 0x4cb   : > { %v13771_v13 = vunpack.i.h.bf16 %v13769_v8  ;;  %v13770_v39 = vunpack.i.l.bf16 %v13769_v8 }
 0x4cc   : > { %11401 = vmatprep.subr.bf16.mxu1 %v11400_v5  ;;  %v11406_v5 = vpack.c.bf16 %v5929_v3, %v5926_v49 }
 0x4cd   : > { %v13794_v27 = vpop.permute.xlu1 %13793  ;;  %11403 = vmatpush1.bf16.msra.mxu1 %v11402_v37  ;;  %v5927_v48 = vsel %vm20122_vm3, %v13766_v21, %v13770_v39  ;;  %v17459_v61 = vsel %vm20124_vm1, %v13770_v39, %v13771_v13  ;;  %v13786_v39 = vunpack.i.h.bf16 %v13784_v36  ;;  %v13785_v13 = vunpack.i.l.bf16 %v13784_v36  ;;  %vm20129_vm3 = vmmov %vm20128_vm9 }
 0x4ce   : > { %v13779_v41 = vpop.permute.xlu0 %13778  ;;  %20125 = vst [vmem:[#allocation68_spill] sm:$0xff] %v17459_v61  ;;  %v13796_v37 = vunpack.i.h.bf16 %v13794_v27  ;;  %v13795_v19 = vunpack.i.l.bf16 %v13794_v27 }
 0x4cf   : > { %v13781_v46 = vunpack.i.h.bf16 %v13779_v41  ;;  %v13780_v34 = vunpack.i.l.bf16 %v13779_v41 }
 0x4d0   : > { %v5979_v21 = vsel %vm20128_vm9, %v13795_v19, %v13796_v37  ;;  %vm20135_vm9 = vcmask 490496  }
 0x4d1   : > { %v13804_v6 = vpop.permute.xlu1 %13803  ;;  %v5930_v38 = vsel %vm20123_vm2, %v13776_v12, %v13780_v34  ;;  %v17462_v30 = vsel %vm20126_vm0, %v13780_v34, %v13781_v46  ;;  %vm20130_vm2 = vmmov %vm20129_vm3 }
 0x4d2   : > { %v13789_v8 = vpop.permute.xlu0 %13788  ;;  %v11404_v28 = vpack.c.bf16 %v5930_v38, %v5927_v48  ;;  %vm20131_vm1 = vmmov %vm20130_vm2 }
 0x4d3   : > { %v13791_v47 = vunpack.i.h.bf16 %v13789_v8  ;;  %v13790_v60 = vunpack.i.l.bf16 %v13789_v8  ;;  %vm20133_vm0 = vmmov %vm20131_vm1 }
 0x4d4   : > { %11405 = vmatprep.subr.bf16.mxu1 %v11404_v28  ;;  %vm20134_vm7 = vmmov %vm20133_vm0 }
 0x4d5   : > { %v13814_v12 = vpop.permute.xlu1 %13813  ;;  %11407 = vmatpush1.bf16.msra.mxu1 %v11406_v5  ;;  %v5977_v9 = vsel %vm20129_vm3, %v13786_v39, %v13790_v60  ;;  %v17471_v3 = vsel %vm20131_vm1, %v13790_v60, %v13791_v47  ;;  %v5976_v38 = vsel %vm20134_vm7, %v13785_v13, %v13786_v39  ;;  %v13806_v60 = vunpack.i.h.bf16 %v13804_v6  ;;  %vm20136_vm3 = vmmov %vm20135_vm9 }
 0x4d6   : > { %v13799_v57 = vpop.permute.xlu0 %13798  ;;  %20132 = vst [vmem:[#allocation69_spill] sm:$0xff] %v17471_v3  ;;  %v11410_v28 = vpack.c.bf16 %v5979_v21, %v5976_v38  ;;  %v13816_v5 = vunpack.i.h.bf16 %v13814_v12  ;;  %v13815_v19 = vunpack.i.l.bf16 %v13814_v12  ;;  %v13805_v47 = vunpack.i.l.bf16 %v13804_v6 }
 0x4d7   : > { %v13801_v46 = vunpack.i.h.bf16 %v13799_v57  ;;  %v13800_v34 = vunpack.i.l.bf16 %v13799_v57 }
 0x4d8   : > { %v6029_v39 = vsel %vm20135_vm9, %v13815_v19, %v13816_v5  ;;  %vm20142_vm9 = vcmask 130048  }
 0x4d9   : > { %v5980_v48 = vsel %vm20130_vm2, %v13796_v37, %v13800_v34  ;;  %v17474_v27 = vsel %vm20133_vm0, %v13800_v34, %v13801_v46  ;;  %v13824_v57 = vpop.permute.xlu1 %13823  ;;  %vm20137_vm2 = vmmov %vm20136_vm3 }
 0x4da   : > { %v13809_v49 = vpop.permute.xlu0 %13808  ;;  %v11408_v8 = vpack.c.bf16 %v5980_v48, %v5977_v9  ;;  %vm20138_vm1 = vmmov %vm20137_vm2 }
 0x4db   : > { %v13811_v41 = vunpack.i.h.bf16 %v13809_v49  ;;  %v13810_v37 = vunpack.i.l.bf16 %v13809_v49  ;;  %vm20139_vm0 = vmmov %vm20138_vm1 }
 0x4dc   : > { %11409 = vmatprep.subr.bf16.mxu1 %v11408_v8  ;;  %vm20140_vm7 = vmmov %vm20139_vm0 }
 0x4dd   : > { %11411 = vmatpush1.bf16.msra.mxu1 %v11410_v28  ;;  %v13834_v13 = vpop.permute.xlu1 %13833  ;;  %v6027_v9 = vsel %vm20136_vm3, %v13806_v60, %v13810_v37  ;;  %v17483_v21 = vsel %vm20138_vm1, %v13810_v37, %v13811_v41  ;;  %v6026_v38 = vsel %vm20140_vm7, %v13805_v47, %v13806_v60  ;;  %v17494_v41 = vld [vmem:[%s19840_s2 + $0x90] sm:$0xff]  ;;  %v13825_v37 = vunpack.i.l.bf16 %v13824_v57  ;;  %vm20146_vm3 = vmmov %vm20142_vm9 }
 0x4de   : > { %v13819_v61 = vpop.permute.xlu0 %13818  ;;  %v11414_v8 = vpack.c.bf16 %v6029_v39, %v6026_v38  ;;  %v13836_v28 = vunpack.i.h.bf16 %v13834_v13  ;;  %v13835_v19 = vunpack.i.l.bf16 %v13834_v13  ;;  %v17499_v47 = vld [vmem:[%s19840_s2 + $0xd0] sm:$0xff]  ;;  %v17507_v13 = vld [vmem:[%s19840_s2 + $0xc8] sm:$0xff]  ;;  %vm20335_vm7 = vcmask 556032  }
 0x4df   : > { %v13821_v46 = vunpack.i.h.bf16 %v13819_v61  ;;  %v13820_v34 = vunpack.i.l.bf16 %v13819_v61 }
 0x4e0   : > { %v6079_v39 = vsel %vm2700_vm12, %v13835_v19, %v13836_v28 }
 0x4e1   : > { %v6030_v48 = vsel %vm20137_vm2, %v13816_v5, %v13820_v34  ;;  %v17486_v12 = vsel %vm20139_vm0, %v13820_v34, %v13821_v46  ;;  %v13826_v5 = vunpack.i.h.bf16 %v13824_v57  ;;  %vm20247_vm2 = vmmov %vm20146_vm3  ;;  %vm20334_vm0 = vcmask 564224  }
 0x4e2   : > { %v13829_v49 = vpop.permute.xlu0 %13828  ;;  %v11412_v6 = vpack.c.bf16 %v6030_v48, %v6027_v9  ;;  %v11512_v61 = vpack.c.bf16 %v17486_v12, %v17483_v21  ;;  %vm20248_vm1 = vmmov %vm20247_vm2 }
 0x4e3   : > { %v13831_v36 = vunpack.i.h.bf16 %v13829_v49  ;;  %v13830_v3 = vunpack.i.l.bf16 %v13829_v49  ;;  %v6076_v49 = vsel %vm2700_vm12, %v13825_v37, %v13826_v5  ;;  %v20145_v37 = vpack.c.bf16 %v16771_v16, %v16768_v0 }
 0x4e4   : > { %11413 = vmatprep.subr.bf16.mxu1 %v11412_v6  ;;  %v11418_v19 = vpack.c.bf16 %v6079_v39, %v6076_v49  ;;  %v20150_v0 = vpack.c.bf16 %v16817_v14, %v16814_v55  ;;  %v20153_v16 = vpack.c.bf16 %v16636_v45, %v16613_v22  ;;  %v20158_v22 = vpack.c.bf16 %v16904_v35, %v16901_v29  ;;  %v20159_v45 = vld [vmem:[#allocation11_spill] sm:$0xff]  ;;  %v20171_v29 = vld [vmem:[#allocation30_spill] sm:$0xff]  ;;  %v20172_v35 = vld [vmem:[#allocation29_spill] sm:$0xff] }
 0x4e5   : > { %11415 = vmatpush1.bf16.msra.mxu1 %v11414_v8  ;;  %v6077_v57 = vsel %vm2700_vm12, %v13826_v5, %v13830_v3  ;;  %v6078_v48 = vsel %vm2700_vm12, %v13830_v3, %v13831_v36  ;;  %v20141_v3 = vpack.c.bf16 %v16747_v17, %v16744_v56  ;;  %v20143_v36 = vpack.c.bf16 %v16521_v31, %v16499_v33  ;;  %v17534_v5 = vld [vmem:[%s19840_s2 + $0xd8] sm:$0xff]  ;;  %v14819_v14 = vld [vmem:[%s19840_s2 + $0x88] sm:$0xff]  ;;  %v20186_v49 = vld [vmem:[#allocation22_spill] sm:$0xff] }
 0x4e6   : > { %v13839_v60 = vpop.permute.xlu0 %13838  ;;  %v20147_v56 = vpack.c.bf16 %v16550_v63, %v16527_v7  ;;  %v14815_v33 = vld [vmem:[%s19840_s2 + $0x78] sm:$0xff]  ;;  %v20148_v31 = vpack.c.bf16 %v16794_v18, %v16786_v1  ;;  %v20149_v17 = vpack.c.bf16 %v16576_v26, %v16547_v51  ;;  %v20151_v7 = vpack.c.bf16 %v16602_v54, %v16586_v62  ;;  %v20181_v39 = vld [vmem:[#allocation19_spill] sm:$0xff] }
 0x4e7   : > { %v13841_v46 = vunpack.i.h.bf16 %v13839_v60  ;;  %v13840_v34 = vunpack.i.l.bf16 %v13839_v60  ;;  %v17520_v60 = vld [vmem:[%s19840_s2 + $0xa0] sm:$0xff]  ;;  %v20152_v63 = vpack.c.bf16 %v16842_v2, %v16826_v43  ;;  %v20154_v51 = vpack.c.bf16 %v16861_v44, %v16834_v20  ;;  %v20160_v1 = vld [vmem:[#allocation13_spill] sm:$0xff]  ;;  %v20165_v43 = vld [vmem:[#allocation28_spill] sm:$0xff] }
 0x4e8   : > { %6641 = vmatmul.mubr.f32.vlgmr.msra.gmra.mrb[16].mxu1 %v17494_v41  ;;  %v20155_v26 = vpack.c.bf16 %v16659_v40, %v16656_v24  ;;  %v20156_v62 = vpack.c.bf16 %v16880_v25, %v16877_v52  ;;  %v20157_v54 = vpack.c.bf16 %v16689_v4, %v16680_v11  ;;  %v11452_v18 = vpack.c.bf16 %v20160_v1, %v20159_v45  ;;  %v14816_v24 = vld [vmem:[%s19840_s2 + $0x70] sm:$0xff]  ;;  %v20166_v20 = vld [vmem:[#allocation27_spill] sm:$0xff] }
 0x4e9   : > { %6646 = vmatprep.mubr.f32.mxu1 %v17499_v47  ;;  %v6080_v9 = vsel %vm2700_vm12, %v13836_v28, %v13840_v34  ;;  %v6081_v38 = vsel %vm2700_vm12, %v13840_v34, %v13841_v46  ;;  %v20144_v28 = vmov 0.0   ;;  %v20161_v55 = vpack.c.bf16 %v16718_v32, %v16699_v58  ;;  %v14817_v11 = vld [vmem:[%s19840_s2 + $0xb0] sm:$0xff]  ;;  %v14818_v58 = vld [vmem:[%s19840_s2 + $0xa8] sm:$0xff]  ;;  %s20262_s2 = smov 41  }
 0x4ea   : > { %v11416_v6 = vpack.c.bf16 %v6080_v9, %v6077_v57  ;;  %v17514_v8 = vpack.c.bf16 %v6081_v38, %v6078_v48  ;;  %v20162_v40 = vpack.c.bf16 %v16930_v23, %v16927_v15  ;;  %v20163_v4 = vpack.c.bf16 %v17114_v42, %v17111_v10  ;;  %v20168_v44 = vld [vmem:[#allocation16_spill] sm:$0xff]  ;;  %v20169_v52 = vld [vmem:[#allocation15_spill] sm:$0xff]  ;;  %v20174_v23 = vld [vmem:[#allocation18_spill] sm:$0xff] }
 0x4eb   : > { %v20164_v32 = vpack.c.bf16 %v16960_v50, %v16957_v53  ;;  %v20167_v2 = vpack.c.bf16 %v20165_v43, %v20166_v20  ;;  %v20170_v25 = vpack.c.bf16 %v20168_v44, %v20169_v52  ;;  %v20173_v15 = vpack.c.bf16 %v20171_v29, %v20172_v35  ;;  %v20175_v53 = vld [vmem:[#allocation17_spill] sm:$0xff]  ;;  %v20177_v10 = vld [vmem:[#allocation32_spill] sm:$0xff]  ;;  %v20178_v42 = vld [vmem:[#allocation31_spill] sm:$0xff] }
 0x4ec   : > { %6647 = vmatmul.mubr.f32.gmra.mrb[18].mxu1 %v17507_v13  ;;  %11417 = vmatprep.subr.bf16.mxu0 %v11416_v6  ;;  %v20176_v50 = vpack.c.bf16 %v20174_v23, %v20175_v53  ;;  %v20179_v46 = vpack.c.bf16 %v20177_v10, %v20178_v42  ;;  %v20180_v34 = vld [vmem:[#allocation20_spill] sm:$0xff]  ;;  %v20183_v9 = vld [vmem:[#allocation34_spill] sm:$0xff]  ;;  %v20184_v48 = vld [vmem:[#allocation33_spill] sm:$0xff] }
 0x4ed   : > { %11419 = vmatpush1.bf16.msra.mxu0 %v11418_v19  ;;  %v20182_v57 = vpack.c.bf16 %v20180_v34, %v20181_v39  ;;  %v20185_v38 = vpack.c.bf16 %v20183_v9, %v20184_v48  ;;  %v20187_v6 = vld [vmem:[#allocation21_spill] sm:$0xff]  ;;  %v20216_v20 = vld [vmem:[#allocation63_spill] sm:$0xff]  ;;  %v20219_v52 = vld [vmem:[#allocation48_spill] sm:$0xff] }
 0x4ee   : > { %11421 = vmatprep.subr.bf16.mxu0 %v20141_v3  ;;  %v20188_v19 = vpack.c.bf16 %v20186_v49, %v20187_v6  ;;  %v20189_v3 = vld [vmem:[#allocation36_spill] sm:$0xff]  ;;  %v20222_v35 = vld [vmem:[#allocation65_spill] sm:$0xff]  ;;  %v20225_v53 = vld [vmem:[#allocation50_spill] sm:$0xff] }
 0x4ef   : > { %v20228_v42 = vld [vmem:[#allocation67_spill] sm:$0xff]  ;;  %v20231_v39 = vld [vmem:[#allocation52_spill] sm:$0xff]  ;;  %v20236_v49 = vld [vmem:[#allocation54_spill] sm:$0xff] }
 0x4f0   : > { %10527 = vmatmul.mubr.msk.f32.vlgmr.msra.gmra.mrb[6].mxu0 %vm20142_vm9, %v17520_v60  ;;  %v20234_v48 = vld [vmem:[#allocation68_spill] sm:$0xff]  ;;  %v20237_v6 = vld [vmem:[#allocation53_spill] sm:$0xff]  ;;  %vm20336_vm9 = vcmask 547840  }
 0x4f1   : > { %11423 = vmatpush3.bf16.msra.mxu0 %v20143_v36  ;;  %6723 = vmatprep.mubr.f32.mxu0 %v20144_v28  ;;  %v20190_v36 = vld [vmem:[#allocation35_spill] sm:$0xff] }
 0x4f2   : > { %11425 = vmatprep.subr.bf16.mxu0 %v20145_v37  ;;  %v20191_v37 = vpack.c.bf16 %v20189_v3, %v20190_v36  ;;  %v20239_v3 = vld [vmem:[#allocation69_spill] sm:$0xff] }
 0x4f3   : > { %v20240_v36 = vpack.c.bf16 %v17474_v27, %v20239_v3 }
 0x4f4   : > { %10528 = vmatmul.mubr.msk.f32.gmra.mrb[8].mxu0 %vm20146_vm3, %v17534_v5  ;;  %vm20341_vm3 = vcmask 539648  }
 0x4f5   : > { %11427 = vmatpush3.bf16.msra.mxu0 %v20147_v56  ;;  %6794 = vmatprep.mubr.f32.mxu0 %v14815_v33  ;;  %v20192_v56 = vld [vmem:[#allocation24_spill] sm:$0xff]  ;;  %v20193_v33 = vld [vmem:[#allocation23_spill] sm:$0xff] }
 0x4f6   : > { %11429 = vmatprep.subr.bf16.mxu0 %v20148_v31  ;;  %v20194_v31 = vpack.c.bf16 %v20192_v56, %v20193_v33  ;;  %v20242_v56 = vld [vmem:[#allocation55_spill] sm:$0xff] }
 0x4f9   : > { %11431 = vmatpush3.bf16.msra.mxu0 %v20149_v17  ;;  %v20195_v17 = vld [vmem:[#allocation38_spill] sm:$0xff] }
 0x4fa   : > { %11433 = vmatprep.subr.bf16.mxu0 %v20150_v0  ;;  %v20196_v0 = vld [vmem:[#allocation37_spill] sm:$0xff] }
 0x4fd   : > { %11435 = vmatpush3.bf16.msra.mxu0 %v20151_v7  ;;  %v20197_v7 = vpack.c.bf16 %v20195_v17, %v20196_v0  ;;  %v6409_v0 = vpop.permute.xlu1 %6408 }
 0x4fe   : > { %11437 = vmatprep.subr.bf16.mxu0 %v20152_v63  ;;  %v20198_v63 = vld [vmem:[#allocation26_spill] sm:$0xff] }
 0x501   : > { %11439 = vmatpush3.bf16.msra.mxu0 %v20153_v16  ;;  %v20199_v16 = vld [vmem:[#allocation25_spill] sm:$0xff] }
 0x502   : > { %11441 = vmatprep.subr.bf16.mxu0 %v20154_v51  ;;  %v20200_v51 = vpack.c.bf16 %v20198_v63, %v20199_v16  ;;  %v7036_v63 = vld [vmem:[%s17707_s26] sm:$0xff] }
 0x505   : > { %11443 = vmatpush3.bf16.msra.mxu0 %v20155_v26  ;;  %v20201_v26 = vld [vmem:[#allocation59_spill] sm:$0xff] }
 0x506   : > { %11445 = vmatprep.subr.bf16.mxu0 %v20156_v62  ;;  %v20202_v62 = vpack.c.bf16 %v17402_v59, %v20201_v26  ;;  %v20215_v59 = vld [vmem:[#allocation44_spill] sm:$0xff] }
 0x509   : > { %11447 = vmatpush3.bf16.msra.mxu0 %v20157_v54  ;;  %v20203_v54 = vld [vmem:[#allocation39_spill] sm:$0xff] }
 0x50a   : > { %11449 = vmatprep.subr.bf16.mxu0 %v20158_v22  ;;  %v20204_v22 = vld [vmem:[#allocation42_spill] sm:$0xff] }
 0x50d   : > { %11451 = vmatpush3.bf16.msra.mxu0 %v20161_v55 }
 0x50e   : > { %11453 = vmatprep.subr.bf16.mxu0 %v11452_v18  ;;  %v20205_v18 = vld [vmem:[#allocation41_spill] sm:$0xff] }
 0x50f   : > { %v20206_v55 = vpack.c.bf16 %v20204_v22, %v20205_v18 }
 0x510   : > { %6795 = vmatmul.mubr.f32.vlgmr.msra.gmra.mrb[10].mxu0 %v14816_v24  ;;  %v20207_v24 = vld [vmem:[#allocation40_spill] sm:$0xff] }
 0x511   : > { %11455 = vmatpush3.bf16.msra.mxu0 %v20162_v40  ;;  %6799 = vmatprep.mubr.f32.mxu0 %v14817_v11  ;;  %v20208_v40 = vld [vmem:[#allocation61_spill] sm:$0xff]  ;;  %v20209_v11 = vld [vmem:[#allocation60_spill] sm:$0xff] }
 0x512   : > { %11457 = vmatprep.subr.bf16.mxu0 %v20163_v4  ;;  %v20210_v4 = vpack.c.bf16 %v20208_v40, %v20209_v11 }
 0x514   : > { %6800 = vmatmul.mubr.f32.gmra.mrb[12].mxu0 %v14818_v58  ;;  %v20211_v58 = vld [vmem:[#allocation43_spill] sm:$0xff] }
 0x515   : > { %11459 = vmatpush3.bf16.msra.mxu0 %v20164_v32  ;;  %6869 = vmatprep.mubr.f32.mxu0 %v14819_v14  ;;  %v20212_v32 = vld [vmem:[#allocation46_spill] sm:$0xff]  ;;  %v20213_v14 = vld [vmem:[#allocation45_spill] sm:$0xff] }
 0x516   : > { %11461 = vmatprep.subr.bf16.mxu0 %v20167_v2  ;;  %v20214_v43 = vpack.c.bf16 %v20212_v32, %v20213_v14  ;;  %v20217_v2 = vld [vmem:[#allocation62_spill] sm:$0xff] }
 0x517   : > { %v20218_v44 = vpack.c.bf16 %v20216_v20, %v20217_v2 }
 0x519   : > { %11463 = vmatpush3.bf16.msra.mxu0 %v20170_v25  ;;  %v20220_v25 = vld [vmem:[#allocation47_spill] sm:$0xff] }
 0x51a   : > { %11465 = vmatprep.subr.bf16.mxu0 %v20173_v15  ;;  %v20221_v29 = vpack.c.bf16 %v20219_v52, %v20220_v25  ;;  %v20223_v15 = vld [vmem:[#allocation64_spill] sm:$0xff] }
 0x51b   : > { %v20224_v23 = vpack.c.bf16 %v20222_v35, %v20223_v15 }
 0x51d   : > { %11467 = vmatpush3.bf16.msra.mxu0 %v20176_v50  ;;  %v20226_v50 = vld [vmem:[#allocation49_spill] sm:$0xff] }
 0x51e   : > { %11469 = vmatprep.subr.bf16.mxu0 %v20179_v46  ;;  %v20227_v10 = vpack.c.bf16 %v20225_v53, %v20226_v50  ;;  %v20229_v46 = vld [vmem:[#allocation66_spill] sm:$0xff]  ;;  %v20267_v50 = vld [vmem:[#allocation8_spill] sm:$0xff] }
 0x51f   : > { %v20230_v34 = vpack.c.bf16 %v20228_v42, %v20229_v46  ;;  %v7037_v42 = vld [vmem:[%s17707_s26 + $0x8] sm:$0xff] }
 0x521   : > { %11471 = vmatpush3.bf16.msra.mxu0 %v20182_v57  ;;  %v20232_v57 = vld [vmem:[#allocation51_spill] sm:$0xff] }
 0x522   : > { %11473 = vmatprep.subr.bf16.mxu0 %v20185_v38  ;;  %v20233_v9 = vpack.c.bf16 %v20231_v39, %v20232_v57  ;;  %v20235_v38 = vpack.c.bf16 %v17462_v30, %v20234_v48  ;;  %v20245_v30 = vld [vmem:[#allocation57_spill] sm:$0xff] }
 0x525   : > { %11475 = vmatpush3.bf16.msra.mxu0 %v20188_v19  ;;  %v20238_v19 = vpack.c.bf16 %v20236_v49, %v20237_v6 }
 0x526   : > { %11477 = vmatprep.subr.bf16.mxu0 %v20191_v37  ;;  %v20241_v37 = vld [vmem:[#allocation56_spill] sm:$0xff] }
 0x527   : > { %v20243_v33 = vpack.c.bf16 %v20241_v37, %v20242_v56 }
 0x529   : > { %11479 = vmatpush3.bf16.msra.mxu0 %v20194_v31  ;;  %v20244_v31 = vld [vmem:[#allocation58_spill] sm:$0xff] }
 0x52a   : > { %11481 = vmatprep.subr.bf16.mxu0 %v20197_v7  ;;  %v20246_v17 = vpack.c.bf16 %v20244_v31, %v20245_v30  ;;  %v7038_v31 = vld [vmem:[%s17707_s26 + $0x10] sm:$0xff]  ;;  %v20269_v30 = vld [vmem:[#allocation9_spill] sm:$0xff] }
 0x52d   : > { %11483 = vmatpush3.bf16.msra.mxu0 %v20200_v51  ;;  %v20250_v51 = vld [vmem:[#allocation6_spill] sm:$0xff] }
 0x52e   : > { %11485 = vmatprep.subr.bf16.mxu0 %v20202_v62 }
 0x530   : > { %6870 = vmatmul.mubr.f32.vlgmr.msra.gmra.mrb[14].mxu0 %v20203_v54 }
 0x531   : > { %11487 = vmatpush3.bf16.msra.mxu0 %v20206_v55  ;;  %6874 = vmatprep.mubr.f32.mxu0 %v20207_v24 }
 0x532   : > { %11489 = vmatprep.subr.bf16.mxu0 %v20210_v4 }
 0x534   : > { %6875 = vmatmul.mubr.f32.gmra.mrb[16].mxu0 %v20211_v58 }
 0x535   : > { %11491 = vmatpush3.bf16.msra.mxu0 %v20214_v43  ;;  %6944 = vmatprep.mubr.f32.mxu0 %v20215_v59 }
 0x536   : > { %11493 = vmatprep.subr.bf16.mxu0 %v20218_v44 }
 0x539   : > { %11495 = vmatpush3.bf16.msra.mxu0 %v20221_v29 }
 0x53a   : > { %11497 = vmatprep.subr.bf16.mxu0 %v20224_v23 }
 0x53d   : > { %11499 = vmatpush3.bf16.msra.mxu0 %v20227_v10 }
 0x53e   : > { %11501 = vmatprep.subr.bf16.mxu0 %v20230_v34 }
 0x541   : > { %11503 = vmatpush3.bf16.msra.mxu0 %v20233_v9 }
 0x542   : > { %11505 = vmatprep.subr.bf16.mxu0 %v20235_v38 }
 0x545   : > { %11507 = vmatpush3.bf16.msra.mxu0 %v20238_v19 }
 0x546   : > { %11509 = vmatprep.subr.bf16.mxu0 %v20240_v36 }
 0x549   : > { %11511 = vmatpush3.bf16.msra.mxu0 %v20243_v33 }
 0x54a   : > { %11513 = vmatprep.subr.bf16.mxu0 %v11512_v61 }
 0x54d   : > { %11515 = vmatpush3.bf16.msra.mxu0 %v20246_v17 }
 0x54e   : > { %11517 = vmatprep.subr.bf16.mxu0 %v17514_v8 }
 0x550   : > { %6945 = vmatmul.mubr.f32.vlgmr.msra.gmra.mrb[18].mxu0 %v17494_v41 }
 0x551   : > { %11519 = vmatpush3.bf16.msra.mxu0 %v17514_v8  ;;  %6949 = vmatprep.mubr.f32.mxu0 %v17499_v47 }
 0x554   : > { %6950 = vmatmul.mubr.f32.gmra.mrb[20].mxu0 %v17507_v13 }
 0x555   : > { %10918 = vmatprep.mubr.msk.f32.mxu0 %vm20247_vm2, %v17520_v60  ;;  %v6414_v60 = vpop.permute.xlu0 %6413  ;;  %vm20348_vm2 = vcmask 384000  }
 0x558   : > { %10919 = vmatmul.mubr.msk.f32.vlgmr.msra.gmra.mrb[22].mxu0 %vm20248_vm1, %v17534_v5  ;;  %vm20352_vm1 = vcmask 375808  }
 0x5bb   : > { %v6642_v27 = vpop.f32.mrb[16].mxu1 }
 0x5bc   : > { %v6644_v21 = vpop.f32.mrb[17].mxu1  ;;  %v11824_v7 = vadd.f32 %v6642_v27, %v6409_v0 }
 0x5bd   : > { %v11826_v41 = vadd.f32 %v6644_v21, %v6409_v0 }
 0x5bf   : > { %v6648_v12 = vpop.f32.mrb[18].mxu1 }
 0x5c0   : > { %v6650_v61 = vpop.f32.mrb[19].mxu1  ;;  %v11828_v5 = vadd.f32 %v6648_v12, %v6414_v60 }
 0x5c1   : > { %v11830_v62 = vadd.f32 %v6650_v61, %v6414_v60 }
 0x5c3   : > { %v6719_v47 = vpop.f32.mrb[6].mxu0 }
 0x5c4   : > { %v11825_v13 = vadd.f32 %v11824_v7, %v6719_v47  ;;  %v6721_v8 = vpop.f32.mrb[7].mxu0 }
 0x5c5   : > { %v11827_v16 = vadd.f32 %v11826_v41, %v6721_v8 }
 0x5c6   : > { %v7030_v26 = vmul.f32 %v11825_v13, %v20250_v51 }
 0x5c7   : > { %v6725_v54 = vpop.f32.mrb[8].mxu0  ;;  %v7031_v10 = vmul.f32 %v11827_v16, %v20267_v50 }
 0x5c8   : > { %v7042_v22 = vadd.f32 %v7036_v63, %v7030_v26  ;;  %v17711_v18 = vadd.f32 %v11828_v5, %v6725_v54  ;;  %v6727_v55 = vpop.f32.mrb[9].mxu0 }
 0x5c9   : > { %v17713_v24 = vadd.f32 %v11830_v62, %v6727_v55  ;;  %v7043_v34 = vadd.f32 %v7037_v42, %v7031_v10 }
 0x5ca   : > { %v17715_v40 = vmax.f32 %v7042_v22, 0.0  ;;  %v7033_v61 = vmul.f32 %v17711_v18, %v20250_v51 }
 0x5cb   : > { %v17744_v38 = vmax.f32 %v7043_v34, 0.0 }
 0x5cc   : > { %20251 = vst [vmem:[#allocation28_spill] sm:$0xff] %v17715_v40  ;;  %v13842_v11 = vpack.i.bf16 %v17715_v40, %v20144_v28 }
 0x5cd   : > { %20268 = vst [vmem:[#allocation27_spill] sm:$0xff] %v17744_v38  ;;  %v14082_v37 = vpack.i.bf16 %v17744_v38, %v17715_v40 }
 0x5ce   : > { %13843 = vrot.lane.b32.xlu1 %v13842_v11, %s20252_s27 }
 0x5d2   : > { %13848 = vrot.lane.b32.xlu1 %v13842_v11, %s20253_s5 }
 0x5d6   : > { %13853 = vrot.lane.b32.xlu1 %v13842_v11, %s20254_s30 }
 0x5da   : > { %13858 = vrot.lane.b32.xlu1 %v13842_v11, %s20255_s21 }
 0x5de   : > { %13863 = vrot.lane.b32.xlu1 %v13842_v11, %s19977_s0 }
 0x5e2   : > { %13868 = vrot.lane.b32.xlu1 %v13842_v11, %s19986_s4 }
 0x5e3   : > { %v10703_v4 = vpop.f32.mrb[10].mxu0 }
 0x5e4   : > { %v10704_v58 = vpop.f32.mrb[11].mxu0 }
 0x5e5   : > { %v10705_v32 = vadd.f32 %v10704_v58, %v10703_v4 }
 0x5e6   : > { %13873 = vrot.lane.b32.xlu1 %v13842_v11, %s19995_s18 }
 0x5e7   : > { %v10706_v14 = vpop.f32.mrb[12].mxu0  ;;  %v6797_v44 = vadd.f32 %v10705_v32, %v6409_v0  ;;  %v7039_v0 = vld [vmem:[%s17707_s26 + $0x18] sm:$0xff] }
 0x5e8   : > { %v10707_v43 = vpop.f32.mrb[13].mxu0  ;;  %v7045_v7 = vadd.f32 %v7039_v0, %v7033_v61 }
 0x5e9   : > { %v10708_v59 = vadd.f32 %v10707_v43, %v10706_v14 }
 0x5ea   : > { %13878 = vrot.lane.b32.xlu1 %v13842_v11, %s20256_s6  ;;  %v17775_v47 = vmax.f32 %v7045_v7, 0.0 }
 0x5eb   : > { %v6802_v15 = vadd.f32 %v10708_v59, %v6414_v60  ;;  %v7041_v60 = vld [vmem:[%s17707_s26 + $0x28] sm:$0xff] }
 0x5ec   : > { %20271 = vst [vmem:[#allocation15_spill] sm:$0xff] %v17775_v47  ;;  %v17787_v63 = vpack.i.bf16 %v17775_v47, %v20144_v28  ;;  %v17937_v42 = vpack.i.bf16 %v17775_v47, %v17715_v40 }
 0x5ee   : > { %13883 = vrot.lane.b32.xlu1 %v13842_v11, %s20257_s1 }
 0x5f2   : > { %13888 = vrot.lane.b32.xlu1 %v13842_v11, %s20258_s20 }
 0x5f6   : > { %13893 = vrot.lane.b32.xlu1 %v13842_v11, %s20259_s3 }
 0x5fa   : > { %13898 = vrot.lane.b32.xlu1 %v13842_v11, %s20260_s28 }
 0x5fe   : > { %13903 = vrot.lane.b32.xlu1 %v13842_v11, %s20261_s29 }
 0x602   : > { %13908 = vrot.lane.b32.xlu1 %v13842_v11, %s20262_s2 }
 0x603   : > { %v10741_v20 = vpop.f32.mrb[14].mxu0 }
 0x604   : > { %v10742_v2 = vpop.f32.mrb[15].mxu0 }
 0x605   : > { %v10743_v52 = vadd.f32 %v10742_v2, %v10741_v20 }
 0x606   : > { %13913 = vrot.lane.b32.xlu1 %v13842_v11, %s20263_s25 }
 0x607   : > { %v6872_v25 = vadd.f32 %v10743_v52, %v6797_v44  ;;  %v10744_v29 = vpop.f32.mrb[16].mxu0 }
 0x608   : > { %v10745_v35 = vpop.f32.mrb[17].mxu0 }
 0x609   : > { %v10746_v23 = vadd.f32 %v10745_v35, %v10744_v29 }
 0x60a   : > { %13918 = vrot.lane.b32.xlu1 %v13842_v11, %s20264_s7 }
 0x60b   : > { %v6877_v53 = vadd.f32 %v10746_v23, %v6802_v15 }
 0x60e   : > { %13923 = vrot.lane.b32.xlu1 %v13842_v11, %s20265_s9 }
 0x612   : > { %13928 = vrot.lane.b32.xlu1 %v13842_v11, %s20266_s11 }
 0x616   : > { %13933 = vrot.lane.b32.xlu1 %v13842_v11, %s19872_s15 }
 0x61a   : > { %13938 = vrot.lane.b32.xlu1 %v13842_v11, %s19873_s23 }
 0x61e   : > { %13943 = vrot.lane.b32.xlu1 %v13842_v11, %s19874_s16 }
 0x622   : > { %13948 = vrot.lane.b32.xlu1 %v13842_v11, %s19875_s22 }
 0x623   : > { %v10779_v46 = vpop.f32.mrb[18].mxu0 }
 0x624   : > { %v10780_v39 = vpop.f32.mrb[19].mxu0 }
 0x625   : > { %v10781_v57 = vadd.f32 %v10780_v39, %v10779_v46 }
 0x626   : > { %13953 = vrot.lane.b32.xlu1 %v13842_v11, %s19876_s19 }
 0x627   : > { %v10782_v9 = vpop.f32.mrb[20].mxu0  ;;  %v6947_v48 = vadd.f32 %v10781_v57, %v6872_v25  ;;  %v7034_v57 = vmul.f32 %v17713_v24, %v20267_v50 }
 0x628   : > { %v10783_v49 = vpop.f32.mrb[21].mxu0 }
 0x629   : > { %v10784_v6 = vadd.f32 %v10783_v49, %v10782_v9  ;;  %v7040_v9 = vld [vmem:[%s17707_s26 + $0x20] sm:$0xff]  ;;  %s20289_s26 = smov 103  }
 0x62a   : > { %13958 = vrot.lane.b32.xlu1 %v13842_v11, %s19878_s17 }
 0x62b   : > { %v6952_v19 = vadd.f32 %v10784_v6, %v6877_v53  ;;  %v10920_v3 = vpop.f32.mrb[22].mxu0  ;;  %v7046_v6 = vadd.f32 %v7040_v9, %v7034_v57 }
 0x62c   : > { %v7021_v36 = vpop.f32.mrb[23].mxu0 }
 0x62d   : > { %v7027_v56 = vadd.f32 %v10920_v3, %v6952_v19  ;;  %v7022_v33 = vadd.f32 %v7021_v36, %v6947_v48  ;;  %v17967_v3 = vmax.f32 %v7046_v6, 0.0 }
 0x62e   : > { %14083 = vrot.lane.b32.xlu1 %v14082_v37, %s19880_s14 }
 0x62f   : > { %v7032_v17 = vmul.f32 %v7022_v33, %v20269_v30  ;;  %v7035_v13 = vmul.f32 %v7027_v56, %v20269_v30  ;;  %20287 = vst [vmem:[#allocation36_spill] sm:$0xff] %v17967_v3 }
 0x631   : > { %v7044_v27 = vadd.f32 %v7038_v31, %v7032_v17  ;;  %v7047_v16 = vadd.f32 %v7041_v60, %v7035_v13 }
 0x633   : > { %v17752_v21 = vmax.f32 %v7044_v27, 0.0  ;;  %v17799_v26 = vmax.f32 %v7047_v16, 0.0 }
 0x635   : > { %20270 = vst [vmem:[#allocation16_spill] sm:$0xff] %v17752_v21  ;;  %v17756_v12 = vpack.i.bf16 %v17752_v21, %v17744_v38  ;;  %20272 = vst [vmem:[#allocation30_spill] sm:$0xff] %v17799_v26  ;;  %v14247_v46 = vpack.i.bf16 %v17775_v47, %v17799_v26  ;;  %v17979_v56 = vpack.i.bf16 %v17799_v26, %v17967_v3 }
 0x637   : > { %14093 = vrot.lane.b32.xlu1 %v17756_v12, %s19885_s12  ;;  %13963 = vrot.lane.b32.xlu0 %v17756_v12, %s20252_s27 }
 0x63b   : > { %14103 = vrot.lane.b32.xlu1 %v17756_v12, %s19898_s10  ;;  %13968 = vrot.lane.b32.xlu0 %v17756_v12, %s20253_s5 }
 0x63f   : > { %14113 = vrot.lane.b32.xlu1 %v17756_v12, %s19922_s8  ;;  %13973 = vrot.lane.b32.xlu0 %v17756_v12, %s20254_s30 }
 0x640   : > { %v17773_v41 = vpop.permute.xlu1 %13843 }
 0x643   : > { %14123 = vrot.lane.b32.xlu1 %v17756_v12, %s19936_s24  ;;  %13978 = vrot.lane.b32.xlu0 %v17756_v12, %s20255_s21 }
 0x644   : > { %v17782_v8 = vpop.permute.xlu1 %13848 }
 0x647   : > { %13983 = vrot.lane.b32.xlu0 %v17756_v12, %s19977_s0  ;;  %14128 = vrot.lane.b32.xlu1 %v17787_v63, %s20252_s27 }
 0x648   : > { %v17793_v5 = vpop.permute.xlu1 %13853 }
 0x64b   : > { %13988 = vrot.lane.b32.xlu0 %v17756_v12, %s19986_s4  ;;  %14133 = vrot.lane.b32.xlu1 %v17787_v63, %s20253_s5 }
 0x64c   : > { %v17801_v62 = vpop.permute.xlu1 %13858 }
 0x64f   : > { %13993 = vrot.lane.b32.xlu0 %v17756_v12, %s19995_s18  ;;  %14138 = vrot.lane.b32.xlu1 %v17787_v63, %s20254_s30 }
 0x650   : > { %v17807_v54 = vpop.permute.xlu1 %13863 }
 0x653   : > { %13998 = vrot.lane.b32.xlu0 %v17756_v12, %s20256_s6  ;;  %14143 = vrot.lane.b32.xlu1 %v17787_v63, %s20255_s21 }
 0x654   : > { %v17815_v18 = vpop.permute.xlu1 %13868 }
 0x657   : > { %14003 = vrot.lane.b32.xlu0 %v17756_v12, %s20257_s1  ;;  %14148 = vrot.lane.b32.xlu1 %v17787_v63, %s19977_s0 }
 0x658   : > { %v17821_v55 = vpop.permute.xlu1 %13873 }
 0x65b   : > { %14008 = vrot.lane.b32.xlu0 %v17756_v12, %s20258_s20  ;;  %14153 = vrot.lane.b32.xlu1 %v17787_v63, %s19986_s4 }
 0x65c   : > { %v17827_v11 = vpop.permute.xlu1 %13878 }
 0x65f   : > { %14013 = vrot.lane.b32.xlu0 %v17756_v12, %s20259_s3  ;;  %14158 = vrot.lane.b32.xlu1 %v17787_v63, %s19995_s18 }
 0x660   : > { %v17833_v4 = vpop.permute.xlu1 %13883 }
 0x663   : > { %14018 = vrot.lane.b32.xlu0 %v17756_v12, %s20260_s28  ;;  %14163 = vrot.lane.b32.xlu1 %v17787_v63, %s20256_s6 }
 0x664   : > { %v17839_v58 = vpop.permute.xlu1 %13888 }
 0x667   : > { %14023 = vrot.lane.b32.xlu0 %v17756_v12, %s20261_s29  ;;  %14168 = vrot.lane.b32.xlu1 %v17787_v63, %s20257_s1 }
 0x668   : > { %v17845_v32 = vpop.permute.xlu1 %13893 }
 0x66b   : > { %14028 = vrot.lane.b32.xlu0 %v17756_v12, %s20262_s2  ;;  %14173 = vrot.lane.b32.xlu1 %v17787_v63, %s20258_s20 }
 0x66c   : > { %v17851_v14 = vpop.permute.xlu1 %13898 }
 0x66f   : > { %14033 = vrot.lane.b32.xlu0 %v17756_v12, %s20263_s25  ;;  %14178 = vrot.lane.b32.xlu1 %v17787_v63, %s20259_s3 }
 0x670   : > { %v17857_v43 = vpop.permute.xlu1 %13903 }
 0x673   : > { %14038 = vrot.lane.b32.xlu0 %v17756_v12, %s20264_s7  ;;  %14183 = vrot.lane.b32.xlu1 %v17787_v63, %s20260_s28 }
 0x674   : > { %v17863_v59 = vpop.permute.xlu1 %13908 }
 0x677   : > { %14043 = vrot.lane.b32.xlu0 %v17756_v12, %s20265_s9  ;;  %14188 = vrot.lane.b32.xlu1 %v17787_v63, %s20261_s29 }
 0x678   : > { %v17869_v20 = vpop.permute.xlu1 %13913 }
 0x67b   : > { %14048 = vrot.lane.b32.xlu0 %v17756_v12, %s20266_s11  ;;  %14193 = vrot.lane.b32.xlu1 %v17787_v63, %s20262_s2 }
 0x67c   : > { %v17875_v2 = vpop.permute.xlu1 %13918 }
 0x67f   : > { %14053 = vrot.lane.b32.xlu0 %v17756_v12, %s19872_s15  ;;  %14198 = vrot.lane.b32.xlu1 %v17787_v63, %s20263_s25 }
 0x680   : > { %v17881_v44 = vpop.permute.xlu1 %13923 }
 0x683   : > { %14058 = vrot.lane.b32.xlu0 %v17756_v12, %s19873_s23  ;;  %14203 = vrot.lane.b32.xlu1 %v17787_v63, %s20264_s7 }
 0x684   : > { %v17887_v52 = vpop.permute.xlu1 %13928 }
 0x685   : > { %20273 = vst [vmem:[#allocation29_spill] sm:$0xff] %v17887_v52 }
 0x687   : > { %14063 = vrot.lane.b32.xlu0 %v17756_v12, %s19874_s16  ;;  %14208 = vrot.lane.b32.xlu1 %v17787_v63, %s20265_s9 }
 0x688   : > { %v17893_v25 = vpop.permute.xlu1 %13933 }
 0x689   : > { %20274 = vst [vmem:[#allocation18_spill] sm:$0xff] %v17893_v25 }
 0x68b   : > { %14068 = vrot.lane.b32.xlu0 %v17756_v12, %s19875_s22  ;;  %14213 = vrot.lane.b32.xlu1 %v17787_v63, %s20266_s11  ;;  %s20279_s11 = smov 109  }
 0x68c   : > { %v17899_v29 = vpop.permute.xlu1 %13938 }
 0x68d   : > { %20275 = vst [vmem:[#allocation17_spill] sm:$0xff] %v17899_v29 }
 0x68f   : > { %14073 = vrot.lane.b32.xlu0 %v17756_v12, %s19876_s19  ;;  %14218 = vrot.lane.b32.xlu1 %v17787_v63, %s19872_s15  ;;  %s20282_s15 = smov 105  }
 0x690   : > { %v17905_v35 = vpop.permute.xlu1 %13943 }
 0x691   : > { %20276 = vst [vmem:[#allocation32_spill] sm:$0xff] %v17905_v35 }
 0x693   : > { %14078 = vrot.lane.b32.xlu0 %v17756_v12, %s19878_s17  ;;  %14223 = vrot.lane.b32.xlu1 %v17787_v63, %s19873_s23  ;;  %s20281_s23 = smov 107  }
 0x694   : > { %v17911_v15 = vpop.permute.xlu1 %13948 }
 0x695   : > { %20277 = vst [vmem:[#allocation31_spill] sm:$0xff] %v17911_v15 }
 0x697   : > { %14088 = vrot.lane.b32.xlu0 %v17756_v12, %s19882_s13  ;;  %14228 = vrot.lane.b32.xlu1 %v17787_v63, %s19874_s16 }
 0x698   : > { %v17917_v23 = vpop.permute.xlu1 %13953 }
 0x699   : > { %20278 = vst [vmem:[#allocation20_spill] sm:$0xff] %v17917_v23 }
 0x69b   : > { %14098 = vrot.lane.b32.xlu0 %v17756_v12, %s20279_s11  ;;  %14233 = vrot.lane.b32.xlu1 %v17787_v63, %s19875_s22 }
 0x69c   : > { %v17923_v53 = vpop.permute.xlu1 %13958 }
 0x69d   : > { %20280 = vst [vmem:[#allocation19_spill] sm:$0xff] %v17923_v53 }
 0x69f   : > { %14108 = vrot.lane.b32.xlu0 %v17756_v12, %s20281_s23  ;;  %14238 = vrot.lane.b32.xlu1 %v17787_v63, %s19876_s19 }
 0x6a0   : > { %v17933_v10 = vpop.permute.xlu1 %14083 }
 0x6a1   : > { %20283 = vst [vmem:[#allocation34_spill] sm:$0xff] %v17933_v10 }
 0x6a3   : > { %14118 = vrot.lane.b32.xlu0 %v17756_v12, %s20282_s15  ;;  %14243 = vrot.lane.b32.xlu1 %v17787_v63, %s19878_s17 }
 0x6a7   : > { %14253 = vrot.lane.b32.xlu0 %v17937_v42, %s19882_s13  ;;  %14248 = vrot.lane.b32.xlu1 %v14247_v46, %s19880_s14 }
 0x6a9   : > { %v17944_v34 = vpop.permute.xlu1 %14093  ;;  %v17946_v39 = vpop.permute.xlu0 %13963 }
 0x6aa   : > { %20284 = vst [vmem:[#allocation33_spill] sm:$0xff] %v17944_v34 }
 0x6ab   : > { %14263 = vrot.lane.b32.xlu0 %v17937_v42, %s20279_s11  ;;  %14258 = vrot.lane.b32.xlu1 %v17937_v42, %s19885_s12 }
 0x6ad   : > { %v17955_v48 = vpop.permute.xlu1 %14103  ;;  %v17957_v49 = vpop.permute.xlu0 %13968 }
 0x6ae   : > { %20285 = vst [vmem:[#allocation22_spill] sm:$0xff] %v17955_v48 }
 0x6af   : > { %14273 = vrot.lane.b32.xlu0 %v17937_v42, %s20281_s23  ;;  %14268 = vrot.lane.b32.xlu1 %v17937_v42, %s19898_s10 }
 0x6b1   : > { %v17963_v19 = vpop.permute.xlu1 %14113  ;;  %v17965_v24 = vpop.permute.xlu0 %13973 }
 0x6b2   : > { %20286 = vst [vmem:[#allocation21_spill] sm:$0xff] %v17963_v19 }
 0x6b3   : > { %14283 = vrot.lane.b32.xlu0 %v17937_v42, %s20282_s15  ;;  %14278 = vrot.lane.b32.xlu1 %v17937_v42, %s19922_s8 }
 0x6b5   : > { %v17973_v36 = vpop.permute.xlu1 %14123  ;;  %v17975_v37 = vpop.permute.xlu0 %13978 }
 0x6b6   : > { %20288 = vst [vmem:[#allocation35_spill] sm:$0xff] %v17973_v36 }
 0x6b7   : > { %14288 = vrot.lane.b32.xlu1 %v17937_v42, %s19936_s24  ;;  %14293 = vrot.lane.b32.xlu0 %v17979_v56, %s20252_s27  ;;  %s20290_s27 = smov 87  }
 0x6b9   : > { %v17985_v33 = vpop.permute.xlu0 %13983  ;;  %v17987_v31 = vpop.permute.xlu1 %14128 }
 0x6bb   : > { %14418 = vrot.lane.b32.xlu1 %v17979_v56, %s19882_s13  ;;  %14298 = vrot.lane.b32.xlu0 %v17979_v56, %s20253_s5  ;;  %s20292_s5 = smov 86  }
 0x6bd   : > { %v17993_v17 = vpop.permute.xlu0 %13988  ;;  %v17995_v27 = vpop.permute.xlu1 %14133 }
 0x6bf   : > { %14428 = vrot.lane.b32.xlu1 %v17979_v56, %s20279_s11  ;;  %14303 = vrot.lane.b32.xlu0 %v17979_v56, %s20254_s30  ;;  %s20314_s30 = smov 22  }
 0x6c1   : > { %v18001_v61 = vpop.permute.xlu0 %13993  ;;  %v18003_v0 = vpop.permute.xlu1 %14138 }
 0x6c3   : > { %14438 = vrot.lane.b32.xlu1 %v17979_v56, %s20281_s23  ;;  %14308 = vrot.lane.b32.xlu0 %v17979_v56, %s20255_s21  ;;  %s20321_s21 = smov 20  }
 0x6c5   : > { %v18009_v7 = vpop.permute.xlu0 %13998  ;;  %v18011_v13 = vpop.permute.xlu1 %14143 }
 0x6c7   : > { %14448 = vrot.lane.b32.xlu1 %v17979_v56, %s20282_s15  ;;  %14313 = vrot.lane.b32.xlu0 %v17979_v56, %s19977_s0 }
 0x6c9   : > { %v18017_v60 = vpop.permute.xlu0 %14003  ;;  %v18019_v63 = vpop.permute.xlu1 %14148 }
 0x6cb   : > { %14463 = vrot.lane.b32.xlu1 %v17756_v12, %s20289_s26  ;;  %14318 = vrot.lane.b32.xlu0 %v17979_v56, %s19986_s4 }
 0x6cd   : > { %v18025_v16 = vpop.permute.xlu0 %14008  ;;  %v18027_v46 = vpop.permute.xlu1 %14153 }
 0x6cf   : > { %14473 = vrot.lane.b32.xlu1 %v17937_v42, %s20289_s26  ;;  %14323 = vrot.lane.b32.xlu0 %v17979_v56, %s19995_s18 }
 0x6d1   : > { %v18033_v57 = vpop.permute.xlu0 %14013  ;;  %v18035_v9 = vpop.permute.xlu1 %14158 }
 0x6d3   : > { %14483 = vrot.lane.b32.xlu1 %v17756_v12, %s20290_s27  ;;  %14328 = vrot.lane.b32.xlu0 %v17979_v56, %s20256_s6 }
 0x6d5   : > { %v18041_v6 = vpop.permute.xlu0 %14018  ;;  %v18043_v22 = vpop.permute.xlu1 %14163 }
 0x6d7   : > { %14493 = vrot.lane.b32.xlu1 %v17937_v42, %s20290_s27  ;;  %14333 = vrot.lane.b32.xlu0 %v17979_v56, %s20257_s1  ;;  %s20297_s1 = smov 85  }
 0x6d9   : > { %v18049_v45 = vpop.permute.xlu0 %14023  ;;  %v18051_v1 = vpop.permute.xlu1 %14168 }
 0x6da   : > { %20291 = vst [vmem:[#allocation24_spill] sm:$0xff] %v18049_v45 }
 0x6db   : > { %14503 = vrot.lane.b32.xlu1 %v17756_v12, %s20292_s5  ;;  %14338 = vrot.lane.b32.xlu0 %v17979_v56, %s20258_s20 }
 0x6dd   : > { %v18057_v30 = vpop.permute.xlu0 %14028  ;;  %v18059_v50 = vpop.permute.xlu1 %14173 }
 0x6de   : > { %20293 = vst [vmem:[#allocation23_spill] sm:$0xff] %v18057_v30  ;;  %20294 = vst [vmem:[#allocation38_spill] sm:$0xff] %v18059_v50 }
 0x6df   : > { %14513 = vrot.lane.b32.xlu1 %v17937_v42, %s20292_s5  ;;  %14343 = vrot.lane.b32.xlu0 %v17979_v56, %s20259_s3  ;;  %s20302_s3 = smov 84  }
 0x6e1   : > { %v18065_v51 = vpop.permute.xlu0 %14033  ;;  %v18067_v36 = vpop.permute.xlu1 %14178 }
 0x6e2   : > { %20295 = vst [vmem:[#allocation37_spill] sm:$0xff] %v18065_v51  ;;  %20296 = vst [vmem:[#allocation26_spill] sm:$0xff] %v18067_v36  ;;  %v14131_v51 = vunpack.i.h.bf16 %v17987_v31 }
 0x6e3   : > { %14523 = vrot.lane.b32.xlu1 %v17756_v12, %s20297_s1  ;;  %14348 = vrot.lane.b32.xlu0 %v17979_v56, %s20260_s28 }
 0x6e5   : > { %v18073_v19 = vpop.permute.xlu0 %14038  ;;  %v18075_v48 = vpop.permute.xlu1 %14183 }
 0x6e6   : > { %20298 = vst [vmem:[#allocation25_spill] sm:$0xff] %v18073_v19  ;;  %20299 = vst [vmem:[#allocation59_spill] sm:$0xff] %v18075_v48  ;;  %v20340_v19 = vunpack.i.h.bf16 %v17801_v62  ;;  %v20347_v48 = vunpack.i.h.bf16 %v17827_v11 }
 0x6e7   : > { %14533 = vrot.lane.b32.xlu1 %v17937_v42, %s20297_s1  ;;  %14353 = vrot.lane.b32.xlu0 %v17979_v56, %s20261_s29  ;;  %s20307_s29 = sld [smem:[#allocation82_spill]] }
 0x6e9   : > { %v18081_v34 = vpop.permute.xlu0 %14043  ;;  %v18083_v47 = vpop.permute.xlu1 %14188 }
 0x6ea   : > { %20300 = vst [vmem:[#allocation39_spill] sm:$0xff] %v18081_v34  ;;  %20301 = vst [vmem:[#allocation42_spill] sm:$0xff] %v18083_v47  ;;  %v13865_v34 = vunpack.i.l.bf16 %v17807_v54 }
 0x6eb   : > { %14543 = vrot.lane.b32.xlu1 %v17756_v12, %s20302_s3  ;;  %14358 = vrot.lane.b32.xlu0 %v17979_v56, %s20262_s2  ;;  %s20308_s2 = smov 83  }
 0x6ed   : > { %v18089_v40 = vpop.permute.xlu0 %14048  ;;  %v18091_v10 = vpop.permute.xlu1 %14193  ;;  %v10532_v23 = vld [vmem:[%s20307_s29 + $0xe8] sm:$0xff] }
 0x6ee   : > { %20303 = vst [vmem:[#allocation41_spill] sm:$0xff] %v18089_v40  ;;  %20304 = vst [vmem:[#allocation40_spill] sm:$0xff] %v18091_v10  ;;  %10172 = vmatprep.mubr.f32.mxu1 %v10532_v23  ;;  %9864 = vmatprep.mubr.f32.mxu0 %v10532_v23  ;;  %v19774_v40 = vunpack.i.h.bf16 %v17782_v8  ;;  %v14130_v10 = vunpack.i.l.bf16 %v17987_v31  ;;  %v13895_v31 = vunpack.i.l.bf16 %v17845_v32 }
 0x6ef   : > { %14553 = vrot.lane.b32.xlu1 %v17937_v42, %s20302_s3  ;;  %14363 = vrot.lane.b32.xlu0 %v17979_v56, %s20263_s25  ;;  %s20313_s25 = smov 82  }
 0x6f1   : > { %v18097_v38 = vpop.permute.xlu0 %14053  ;;  %v18099_v53 = vpop.permute.xlu1 %14198 }
 0x6f2   : > { %20305 = vst [vmem:[#allocation61_spill] sm:$0xff] %v18097_v38  ;;  %20306 = vst [vmem:[#allocation60_spill] sm:$0xff] %v18099_v53 }
 0x6f3   : > { %14563 = vrot.lane.b32.xlu1 %v17756_v12, %s20308_s2  ;;  %14368 = vrot.lane.b32.xlu0 %v17979_v56, %s20264_s7  ;;  %s20317_s7 = smov 21  }
 0x6f5   : > { %v18108_v15 = vpop.permute.xlu0 %14058  ;;  %v18110_v35 = vpop.permute.xlu1 %14203 }
 0x6f6   : > { %20309 = vst [vmem:[#allocation43_spill] sm:$0xff] %v18108_v15  ;;  %20310 = vst [vmem:[#allocation46_spill] sm:$0xff] %v18110_v35  ;;  %v13880_v35 = vunpack.i.l.bf16 %v17827_v11 }
 0x6f7   : > { %14573 = vrot.lane.b32.xlu1 %v17937_v42, %s20308_s2  ;;  %14373 = vrot.lane.b32.xlu0 %v17979_v56, %s20265_s9  ;;  %s20320_s9 = smov 81  }
 0x6f8   : > { %v18266_v30 = vsel %vm20348_vm2, %v13880_v35, %v20347_v48  ;;  %v20355_v48 = vunpack.i.l.bf16 %v17946_v39  ;;  %v13900_v35 = vunpack.i.l.bf16 %v17851_v14  ;;  %vm20363_vm2 = vcmask 359424  }
 0x6f9   : > { %v18116_v29 = vpop.permute.xlu0 %14063  ;;  %v18118_v25 = vpop.permute.xlu1 %14208  ;;  %20349 = vst [vmem:[#allocation71_spill] sm:$0xff] %v18266_v30  ;;  %v13905_v30 = vunpack.i.l.bf16 %v17857_v43 }
 0x6fa   : > { %20311 = vst [vmem:[#allocation45_spill] sm:$0xff] %v18116_v29  ;;  %20312 = vst [vmem:[#allocation44_spill] sm:$0xff] %v18118_v25 }
 0x6fb   : > { %14583 = vrot.lane.b32.xlu1 %v17756_v12, %s20313_s25  ;;  %14378 = vrot.lane.b32.xlu0 %v17979_v56, %s20314_s30 }
 0x6fd   : > { %v18124_v23 = vpop.permute.xlu0 %14068  ;;  %v18126_v15 = vpop.permute.xlu1 %14213 }
 0x6fe   : > { %20315 = vst [vmem:[#allocation63_spill] sm:$0xff] %v18124_v23  ;;  %20316 = vst [vmem:[#allocation62_spill] sm:$0xff] %v18126_v15  ;;  %v13845_v15 = vunpack.i.l.bf16 %v17773_v41 }
 0x6ff   : > { %14593 = vrot.lane.b32.xlu1 %v17937_v42, %s20313_s25  ;;  %14383 = vrot.lane.b32.xlu0 %v17979_v56, %s20317_s7 }
 0x701   : > { %v18132_v38 = vpop.permute.xlu0 %14073  ;;  %v18134_v29 = vpop.permute.xlu1 %14218 }
 0x702   : > { %20318 = vst [vmem:[#allocation48_spill] sm:$0xff] %v18132_v38  ;;  %20319 = vst [vmem:[#allocation47_spill] sm:$0xff] %v18134_v29 }
 0x703   : > { %14603 = vrot.lane.b32.xlu1 %v17756_v12, %s20320_s9  ;;  %14388 = vrot.lane.b32.xlu0 %v17979_v56, %s20321_s21 }
 0x705   : > { %v18140_v26 = vpop.permute.xlu0 %14078  ;;  %v18142_v23 = vpop.permute.xlu1 %14223 }
 0x706   : > { %20322 = vst [vmem:[#allocation65_spill] sm:$0xff] %v18140_v26  ;;  %20323 = vst [vmem:[#allocation64_spill] sm:$0xff] %v18142_v23 }
 0x707   : > { %14613 = vrot.lane.b32.xlu1 %v20144_v28, %s20282_s15  ;;  %14393 = vrot.lane.b32.xlu0 %v17979_v56, %s19874_s16 }
 0x709   : > { %v18148_v52 = vpop.permute.xlu0 %14088  ;;  %v18150_v38 = vpop.permute.xlu1 %14228 }
 0x70a   : > { %20324 = vst [vmem:[#allocation50_spill] sm:$0xff] %v18148_v52  ;;  %20325 = vst [vmem:[#allocation49_spill] sm:$0xff] %v18150_v38 }
 0x70b   : > { %14623 = vrot.lane.b32.xlu1 %v20144_v28, %s20320_s9  ;;  %14398 = vrot.lane.b32.xlu0 %v17979_v56, %s19875_s22 }
 0x70d   : > { %v18156_v29 = vpop.permute.xlu0 %14098  ;;  %v18158_v26 = vpop.permute.xlu1 %14233 }
 0x70e   : > { %20326 = vst [vmem:[#allocation67_spill] sm:$0xff] %v18156_v29  ;;  %20327 = vst [vmem:[#allocation66_spill] sm:$0xff] %v18158_v26  ;;  %v14412_v29 = vpack.i.bf16 %v17967_v3, %v17752_v21  ;;  %v13875_v21 = vunpack.i.l.bf16 %v17821_v55 }
 0x70f   : > { %14633 = vrot.lane.b32.xlu1 %v17979_v56, %s19977_s0  ;;  %14403 = vrot.lane.b32.xlu0 %v17979_v56, %s19876_s19  ;;  %s20437_s19 = sld [smem:[#allocation83_spill]] }
 0x711   : > { %v18164_v23 = vpop.permute.xlu0 %14108  ;;  %v18170_v52 = vpop.permute.xlu1 %14238 }
 0x712   : > { %20328 = vst [vmem:[#allocation52_spill] sm:$0xff] %v18164_v23  ;;  %20329 = vst [vmem:[#allocation51_spill] sm:$0xff] %v18170_v52  ;;  %v13846_v23 = vunpack.i.h.bf16 %v17773_v41  ;;  %v13850_v52 = vunpack.i.l.bf16 %v17782_v8 }
 0x713   : > { %14643 = vrot.lane.b32.xlu1 %v17937_v42, %s19977_s0  ;;  %14408 = vrot.lane.b32.xlu0 %v17979_v56, %s19878_s17  ;;  %s20354_s17 = smov 62  }
 0x714   : > { %v18196_v41 = vsel %vm20334_vm0, %v13845_v15, %v13846_v23  ;;  %v18201_v3 = vsel %vm20335_vm7, %v13850_v52, %v19774_v40  ;;  %v13860_v52 = vunpack.i.l.bf16 %v17801_v62  ;;  %vm20356_vm7 = vmmov %vm20334_vm0 }
 0x715   : > { %v18172_v38 = vpop.permute.xlu0 %14118  ;;  %v18185_v25 = vpop.permute.xlu1 %14243  ;;  %v7095_v36 = vsel %vm20356_vm7, %v14130_v10, %v14131_v51  ;;  %v20360_v10 = vunpack.i.h.bf16 %v17839_v58 }
 0x716   : > { %20330 = vst [vmem:[#allocation68_spill] sm:$0xff] %v18172_v38  ;;  %20332 = vst [vmem:[#allocation53_spill] sm:$0xff] %v18185_v25  ;;  %v13855_v38 = vunpack.i.l.bf16 %v17793_v5  ;;  %v18235_v40 = vsel %vm20341_vm3, %v13860_v52, %v20340_v19  ;;  %v20344_v19 = vunpack.i.h.bf16 %v17815_v18  ;;  %vm20361_vm3 = vcmask 367616  }
 0x717   : > { %14653 = vrot.lane.b32.xlu1 %v17756_v12, %s19986_s4  ;;  %14413 = vrot.lane.b32.xlu0 %v14412_v29, %s19880_s14  ;;  %v19776_v29 = vunpack.i.h.bf16 %v17793_v5 }
 0x719   : > { %v18179_v26 = vpop.permute.xlu0 %14253  ;;  %v18210_v25 = vsel %vm20336_vm9, %v13855_v38, %v19776_v29  ;;  %v13870_v29 = vunpack.i.l.bf16 %v17815_v18  ;;  %v13885_v38 = vunpack.i.l.bf16 %v17833_v4  ;;  %vm20358_vm9 = vmmov %vm20334_vm0 }
 0x71a   : > { %20331 = vst [vmem:[#allocation54_spill] sm:$0xff] %v18179_v26 }
 0x71b   : > { %14663 = vrot.lane.b32.xlu1 %v20144_v28, %s20289_s26  ;;  %14423 = vrot.lane.b32.xlu0 %v17979_v56, %s19885_s12  ;;  %v18254_v52 = vsel %vm549_vm5, %v13870_v29, %v20344_v19  ;;  %v7093_v19 = vsel %vm20334_vm0, %v13846_v23, %v20355_v48 }
 0x71d   : > { %v18193_v26 = vpop.permute.xlu0 %14263 }
 0x71e   : > { %20333 = vst [vmem:[#allocation69_spill] sm:$0xff] %v18193_v26  ;;  %v18212_v26 = vpop.permute.xlu1 %14248 }
 0x71f   : > { %14673 = vrot.lane.b32.xlu1 %v20144_v28, %s19986_s4  ;;  %14433 = vrot.lane.b32.xlu0 %v17979_v56, %s19898_s10  ;;  %20337 = vst [vmem:[#allocation56_spill] sm:$0xff] %v18212_v26  ;;  %v20343_v26 = vunpack.i.h.bf16 %v17807_v54 }
 0x721   : > { %v18214_v15 = vpop.permute.xlu0 %14273 }
 0x722   : > { %20338 = vst [vmem:[#allocation55_spill] sm:$0xff] %v18214_v15  ;;  %v18240_v15 = vpop.permute.xlu1 %14258 }
 0x723   : > { %14683 = vrot.lane.b32.xlu1 %v17979_v56, %s19995_s18  ;;  %14443 = vrot.lane.b32.xlu0 %v17979_v56, %s19922_s8  ;;  %20342 = vst [vmem:[#allocation57_spill] sm:$0xff] %v18240_v15  ;;  %v20345_v15 = vunpack.i.h.bf16 %v17821_v55 }
 0x725   : > { %v18230_v53 = vpop.permute.xlu0 %14283  ;;  %v18261_v47 = vsel %vm600_vm6, %v13875_v21, %v20345_v15  ;;  %v20351_v15 = vunpack.i.h.bf16 %v17833_v4  ;;  %v14135_v21 = vunpack.i.l.bf16 %v17995_v27 }
 0x726   : > { %20339 = vst [vmem:[#allocation58_spill] sm:$0xff] %v18230_v53  ;;  %v18249_v53 = vsel %vm498_vm4, %v13865_v34, %v20343_v26  ;;  %20346 = vst [vmem:[#allocation70_spill] sm:$0xff] %v18261_v47  ;;  %v13890_v34 = vunpack.i.l.bf16 %v17839_v58  ;;  %v14136_v26 = vunpack.i.h.bf16 %v17995_v27  ;;  %v18298_v50 = vpop.permute.xlu1 %14268  ;;  %v20362_v27 = vunpack.i.h.bf16 %v17845_v32 }
 0x727   : > { %14693 = vrot.lane.b32.xlu1 %v17937_v42, %s19995_s18  ;;  %14453 = vrot.lane.b32.xlu0 %v17979_v56, %s19936_s24  ;;  %v18279_v45 = vsel %vm20352_vm1, %v13885_v38, %v20351_v15  ;;  %20359 = vst [vmem:[#allocation74_spill] sm:$0xff] %v18298_v50  ;;  %vm20366_vm1 = vcmask 556032  }
 0x728   : > { %20353 = vst [vmem:[#allocation73_spill] sm:$0xff] %v18279_v45  ;;  %v18305_v48 = vsel %vm20361_vm3, %v13890_v34, %v20360_v10  ;;  %v20364_v45 = vunpack.i.l.bf16 %v17957_v49  ;;  %v11522_v34 = vpack.c.bf16 %v7095_v36, %v18196_v41  ;;  %vm20367_vm0 = vmmov %vm20366_vm1  ;;  %v14140_v10 = vunpack.i.l.bf16 %v18003_v0 }
 0x729   : > { %v18270_v29 = vpop.permute.xlu0 %14293  ;;  %vm20368_vm7 = vmmov %vm20367_vm0  ;;  %vm20373_vm3 = vcmask 343040   ;;  %v14145_v41 = vunpack.i.l.bf16 %v18011_v13 }
 0x72a   : > { %20350 = vst [vmem:[#allocation72_spill] sm:$0xff] %v18270_v29  ;;  %v20357_v38 = vunpack.i.l.bf16 %v18270_v29  ;;  %v20365_v29 = vunpack.i.h.bf16 %v17782_v8  ;;  %v20369_v8 = vunpack.i.h.bf16 %v17851_v14 }
 0x72b   : > { %14703 = vrot.lane.b32.xlu1 %v17756_v12, %s20354_s17  ;;  %14458 = vrot.lane.b32.xlu0 %v20144_v28, %s19880_s14 }
 0x72c   : > { %v7096_v15 = vsel %vm20358_vm9, %v14131_v51, %v20357_v38  ;;  %v18310_v51 = vsel %vm20363_vm2, %v13895_v31, %v20362_v27  ;;  %v7143_v50 = vsel %vm20366_vm1, %v20365_v29, %v20364_v45  ;;  %v7145_v31 = vsel %vm20367_vm0, %v14135_v21, %v14136_v26 }
 0x72d   : > { %v18300_v47 = vpop.permute.xlu0 %14298  ;;  %v11520_v23 = vpack.c.bf16 %v7096_v15, %v7093_v19  ;;  %v14141_v15 = vunpack.i.h.bf16 %v18003_v0  ;;  %vm20370_vm9 = vcmask 351232   ;;  %v20372_v27 = vunpack.i.h.bf16 %v17857_v43 }
 0x72e   : > { %v19795_v38 = vunpack.i.l.bf16 %v18300_v47  ;;  %v18333_v29 = vsel %vm20370_vm9, %v13900_v35, %v20369_v8  ;;  %v13980_v19 = vunpack.i.l.bf16 %v17975_v37  ;;  %vm20378_vm2 = vcmask 547840  }
 0x72f   : > { %14713 = vrot.lane.b32.xlu1 %v20144_v28, %s20292_s5  ;;  %14468 = vrot.lane.b32.xlu0 %v17979_v56, %s20289_s26  ;;  %20371 = vst [vmem:[#allocation75_spill] sm:$0xff] %v18333_v29  ;;  %v18338_v36 = vsel %vm20373_vm3, %v13905_v30, %v20372_v27  ;;  %v18349_v30 = vpop.permute.xlu1 %14278  ;;  %vm20379_vm1 = vmmov %vm20378_vm2  ;;  %vm20385_vm9 = vcmask 203776   ;;  %v13985_v29 = vunpack.i.l.bf16 %v17985_v33  ;;  %vm20389_vm3 = vcmask 539648  }
 0x730   : > { %11521 = vmatprep.subr.bf16.mxu0 %v11520_v23  ;;  %v7146_v45 = vsel %vm20368_vm7, %v14136_v26, %v19795_v38  ;;  %20374 = vst [vmem:[#allocation76_spill] sm:$0xff] %v18338_v36  ;;  %v13910_v23 = vunpack.i.l.bf16 %v17863_v59  ;;  %v13915_v38 = vunpack.i.l.bf16 %v17869_v20  ;;  %20375 = vst [vmem:[#allocation77_spill] sm:$0xff] %v18349_v30  ;;  %v7195_v8 = vsel %vm20379_vm1, %v14140_v10, %v14141_v15 }
 0x731   : > { %11523 = vmatpush1.bf16.msra.mxu0 %v11522_v34  ;;  %v18341_v21 = vpop.permute.xlu0 %14303  ;;  %v11524_v0 = vpack.c.bf16 %v7146_v45, %v7143_v50  ;;  %v11526_v50 = vpack.c.bf16 %v7145_v31, %v18201_v3  ;;  %v20376_v34 = vunpack.i.l.bf16 %v17965_v24  ;;  %v20377_v45 = vunpack.i.h.bf16 %v17793_v5  ;;  %vm20380_vm0 = vmmov %vm20379_vm1 }
 0x732   : > { %v19797_v35 = vunpack.i.l.bf16 %v18341_v21  ;;  %v14146_v26 = vunpack.i.h.bf16 %v18011_v13  ;;  %v13920_v36 = vunpack.i.l.bf16 %v17875_v2  ;;  %v13966_v3 = vunpack.i.h.bf16 %v17946_v39 }
 0x733   : > { %14723 = vrot.lane.b32.xlu1 %v20144_v28, %s20354_s17  ;;  %14478 = vrot.lane.b32.xlu0 %v20144_v28, %s19882_s13  ;;  %v7193_v27 = vsel %vm20378_vm2, %v20377_v45, %v20376_v34  ;;  %v13971_v31 = vunpack.i.h.bf16 %v17957_v49  ;;  %v20381_v10 = vunpack.i.h.bf16 %v17863_v59  ;;  %vm20382_vm7 = vcmask 334848   ;;  %s20387_s13 = smov 61   ;;  %vm20390_vm2 = vmmov %vm20389_vm3 }
 0x734   : > { %11525 = vmatprep.subr.bf16.mxu0 %v11524_v0  ;;  %v7196_v30 = vsel %vm20380_vm0, %v14141_v15, %v19797_v35  ;;  %v20384_v13 = vunpack.i.h.bf16 %v17869_v20  ;;  %v13976_v15 = vunpack.i.h.bf16 %v17965_v24  ;;  %vm20391_vm1 = vmmov %vm20390_vm2  ;;  %vm20393_vm0 = vcmask 195584  }
 0x735   : > { %11527 = vmatpush1.bf16.msra.mxu0 %v11526_v50  ;;  %v18370_v5 = vpop.permute.xlu0 %14308  ;;  %v11528_v34 = vpack.c.bf16 %v7196_v30, %v7193_v27  ;;  %v18375_v45 = vsel %vm20382_vm7, %v13910_v23, %v20381_v10  ;;  %v11530_v23 = vpack.c.bf16 %v7195_v8, %v18210_v25  ;;  %v20388_v30 = vunpack.i.h.bf16 %v17801_v62 }
 0x736   : > { %20383 = vst [vmem:[#allocation78_spill] sm:$0xff] %v18375_v45  ;;  %v18380_v0 = vsel %vm20385_vm9, %v13915_v38, %v20384_v13  ;;  %v19803_v35 = vunpack.i.l.bf16 %v18370_v5  ;;  %v7245_v38 = vsel %vm20390_vm2, %v14145_v41, %v14146_v26  ;;  %v14151_v27 = vunpack.i.h.bf16 %v18019_v63  ;;  %vm20401_vm2 = vmmov %vm20391_vm1 }
 0x737   : > { %20386 = vst [vmem:[#allocation79_spill] sm:$0xff] %v18380_v0  ;;  %14733 = vrot.lane.b32.xlu1 %v17979_v56, %s20387_s13  ;;  %14488 = vrot.lane.b32.xlu0 %v17979_v56, %s20290_s27  ;;  %v7243_v50 = vsel %vm20389_vm3, %v20388_v30, %v13980_v19  ;;  %v14150_v10 = vunpack.i.l.bf16 %v18019_v63  ;;  %v20392_v0 = vunpack.i.h.bf16 %v17875_v2  ;;  %v20394_v62 = vunpack.i.l.bf16 %v17946_v39  ;;  %v18414_v63 = vpop.permute.xlu1 %14288 }
 0x738   : > { %11529 = vmatprep.subr.bf16.mxu0 %v11528_v34  ;;  %v7246_v13 = vsel %vm20391_vm1, %v14146_v26, %v19803_v35  ;;  %vm20395_vm7 = vcmask 564224   ;;  %v20396_v41 = vunpack.i.l.bf16 %v17957_v49  ;;  %vm20397_vm9 = vcmask 556032  }
 0x739   : > { %v18402_v45 = vsel %vm20393_vm0, %v13920_v36, %v20392_v0  ;;  %v18407_v25 = vsel %vm20395_vm7, %v20394_v62, %v13966_v3  ;;  %11531 = vmatpush1.bf16.msra.mxu0 %v11530_v23  ;;  %v18416_v34 = vpop.permute.xlu0 %14313  ;;  %v11532_v26 = vpack.c.bf16 %v7246_v13, %v7243_v50  ;;  %v13981_v30 = vunpack.i.h.bf16 %v17975_v37 }
 0x73a   : > { %v18412_v8 = vsel %vm20397_vm9, %v20396_v41, %v13971_v31  ;;  %v13986_v36 = vunpack.i.h.bf16 %v17985_v33  ;;  %v13990_v39 = vunpack.i.l.bf16 %v17993_v17  ;;  %v19802_v3 = vunpack.i.l.bf16 %v18416_v34 }
 0x73b   : > { %v20398_v49 = vunpack.i.l.bf16 %v17965_v24  ;;  %vm20399_vm3 = vcmask 547840   ;;  %14743 = vrot.lane.b32.xlu1 %v17937_v42, %s20387_s13  ;;  %14498 = vrot.lane.b32.xlu0 %v20144_v28, %s19885_s12  ;;  %v11534_v37 = vpack.c.bf16 %v7245_v38, %v18235_v40  ;;  %v20400_v33 = vunpack.i.h.bf16 %v17807_v54  ;;  %s20403_s12 = smov 60  }
 0x73c   : > { %v7295_v50 = vsel %vm498_vm4, %v14150_v10, %v14151_v27  ;;  %v14156_v13 = vunpack.i.h.bf16 %v18027_v46  ;;  %v14155_v24 = vunpack.i.l.bf16 %v18027_v46  ;;  %11533 = vmatprep.subr.bf16.mxu0 %v11532_v26  ;;  %v13991_v62 = vunpack.i.h.bf16 %v17993_v17 }
 0x73d   : > { %v18426_v31 = vsel %vm20399_vm3, %v20398_v49, %v13976_v15  ;;  %v7293_v23 = vsel %vm498_vm4, %v20400_v33, %v13985_v29  ;;  %v7296_v15 = vsel %vm498_vm4, %v14151_v27, %v19802_v3  ;;  %v13996_v41 = vunpack.i.h.bf16 %v18001_v61  ;;  %11535 = vmatpush1.bf16.msra.mxu0 %v11534_v37  ;;  %v18445_v54 = vpop.permute.xlu0 %14318  ;;  %v18458_v33 = vpop.permute.xlu1 %14418 }
 0x73e   : > { %v13995_v40 = vunpack.i.l.bf16 %v18001_v61  ;;  %v11536_v38 = vpack.c.bf16 %v7296_v15, %v7293_v23  ;;  %v18448_v10 = vsel %vm20401_vm2, %v13980_v19, %v13981_v30  ;;  %v18451_v46 = vsel %vm498_vm4, %v13985_v29, %v13986_v36 }
 0x73f   : > { %v19801_v26 = vunpack.i.l.bf16 %v18445_v54  ;;  %v20402_v27 = vunpack.i.h.bf16 %v17815_v18  ;;  %v19798_v49 = vunpack.i.l.bf16 %v18009_v7  ;;  %14753 = vrot.lane.b32.xlu1 %v17756_v12, %s20403_s12  ;;  %14508 = vrot.lane.b32.xlu0 %v17979_v56, %s20292_s5  ;;  %v11538_v61 = vpack.c.bf16 %v7295_v50, %v18249_v53 }
 0x740   : > { %v7345_v19 = vsel %vm549_vm5, %v14155_v24, %v14156_v13  ;;  %v14161_v29 = vunpack.i.h.bf16 %v18035_v9  ;;  %v14160_v18 = vunpack.i.l.bf16 %v18035_v9  ;;  %11537 = vmatprep.subr.bf16.mxu0 %v11536_v38  ;;  %v18472_v36 = vsel %vm549_vm5, %v13990_v39, %v13991_v62 }
 0x741   : > { %v7343_v17 = vsel %vm549_vm5, %v20402_v27, %v13990_v39  ;;  %v7346_v30 = vsel %vm549_vm5, %v14156_v13, %v19801_v26  ;;  %v18475_v37 = vsel %vm600_vm6, %v13995_v40, %v13996_v41  ;;  %v14005_v23 = vunpack.i.l.bf16 %v18017_v60  ;;  %11539 = vmatpush1.bf16.msra.mxu0 %v11538_v61  ;;  %v18478_v53 = vpop.permute.xlu0 %14323 }
 0x742   : > { %v11540_v50 = vpack.c.bf16 %v7346_v30, %v7343_v17  ;;  %v14006_v24 = vunpack.i.h.bf16 %v18017_v60  ;;  %v19800_v9 = vunpack.i.l.bf16 %v18478_v53  ;;  %v20404_v15 = vunpack.i.h.bf16 %v17821_v55 }
 0x743   : > { %v14011_v39 = vunpack.i.h.bf16 %v18025_v16  ;;  %v14010_v62 = vunpack.i.l.bf16 %v18025_v16  ;;  %14763 = vrot.lane.b32.xlu1 %v20144_v28, %s20302_s3  ;;  %14518 = vrot.lane.b32.xlu0 %v20144_v28, %s20279_s11  ;;  %v11542_v41 = vpack.c.bf16 %v7345_v19, %v18254_v52  ;;  %v20405_v60 = vunpack.i.h.bf16 %v17827_v11  ;;  %v18504_v52 = vpop.permute.xlu1 %14428  ;;  %s20424_s11 = smov 59  }
 0x744   : > { %v7393_v13 = vsel %vm600_vm6, %v20404_v15, %v13995_v40  ;;  %vm20406_vm1 = vcmask 384000   ;;  %v7395_v40 = vsel %vm600_vm6, %v14160_v18, %v14161_v29  ;;  %v14166_v38 = vunpack.i.h.bf16 %v18043_v22  ;;  %11541 = vmatprep.subr.bf16.mxu0 %v11540_v50 }
 0x745   : > { %v7443_v55 = vsel %vm20406_vm1, %v20405_v60, %v19798_v49  ;;  %v14165_v16 = vunpack.i.l.bf16 %v18043_v22  ;;  %v7396_v27 = vsel %vm600_vm6, %v14161_v29, %v19800_v9  ;;  %v14015_v17 = vunpack.i.l.bf16 %v18033_v57  ;;  %11543 = vmatpush1.bf16.msra.mxu0 %v11542_v41  ;;  %v18506_v61 = vpop.permute.xlu0 %14328  ;;  %vm20413_vm3 = vmmov %vm20406_vm1 }
 0x746   : > { %v11544_v11 = vpack.c.bf16 %v7396_v27, %v7393_v13  ;;  %v20407_v19 = vunpack.i.h.bf16 %v17833_v4  ;;  %vm20408_vm0 = vcmask 375808   ;;  %v14016_v30 = vunpack.i.h.bf16 %v18033_v57  ;;  %v20410_v4 = vld [vmem:[#allocation70_spill] sm:$0xff]  ;;  %vm20415_vm2 = vmmov %vm20406_vm1 }
 0x747   : > { %v14020_v22 = vunpack.i.l.bf16 %v18041_v6  ;;  %v19799_v50 = vunpack.i.l.bf16 %v18506_v61  ;;  %vm20409_vm7 = vmmov %vm20408_vm0  ;;  %v14171_v15 = vunpack.i.h.bf16 %v18051_v1  ;;  %v14170_v60 = vunpack.i.l.bf16 %v18051_v1  ;;  %14773 = vrot.lane.b32.xlu1 %v20144_v28, %s20403_s12  ;;  %14528 = vrot.lane.b32.xlu0 %v17979_v56, %s20297_s1 }
 0x748   : > { %v7493_v18 = vsel %vm20408_vm0, %v20407_v19, %v14005_v23  ;;  %v7494_v29 = vsel %vm20409_vm7, %v14005_v23, %v14006_v24  ;;  %v11546_v13 = vpack.c.bf16 %v7395_v40, %v20410_v4  ;;  %v20411_v57 = vunpack.i.h.bf16 %v17839_v58  ;;  %v20414_v23 = vld [vmem:[#allocation72_spill] sm:$0xff]  ;;  %11545 = vmatprep.subr.bf16.mxu0 %v11544_v11 }
 0x749   : > { %vm20412_vm9 = vcmask 367616   ;;  %v7445_v27 = vsel %vm20413_vm3, %v14165_v16, %v14166_v38  ;;  %v14296_v24 = vunpack.i.h.bf16 %v20414_v23  ;;  %v7446_v1 = vsel %vm20415_vm2, %v14166_v38, %v19799_v50  ;;  %v14334_v40 = vpop.permute.xlu0 %14333 }
 0x74a   : > { %v18525_v41 = vsel %vm20412_vm9, %v20411_v57, %v14010_v62  ;;  %vm20416_vm1 = vmmov %vm20412_vm9  ;;  %v14021_v0 = vunpack.i.h.bf16 %v18041_v6  ;;  %11547 = vmatpush1.bf16.msra.mxu0 %v11546_v13  ;;  %v11548_v58 = vpack.c.bf16 %v7446_v1, %v7443_v55  ;;  %v20417_v4 = vunpack.i.h.bf16 %v17845_v32  ;;  %v18552_v32 = vpop.permute.xlu1 %14438 }
 0x74b   : > { %v18533_v19 = vsel %vm20416_vm1, %v14010_v62, %v14011_v39  ;;  %vm20418_vm0 = vcmask 359424   ;;  %v14336_v16 = vunpack.i.h.bf16 %v14334_v40  ;;  %v14335_v49 = vunpack.i.l.bf16 %v14334_v40  ;;  %v20423_v62 = vld [vmem:[#allocation38_spill] sm:$0xff]  ;;  %14783 = vrot.lane.b32.xlu1 %v17756_v12, %s20424_s11  ;;  %14538 = vrot.lane.b32.xlu0 %v20144_v28, %s19898_s10 }
 0x74c   : > { %v18539_v57 = vsel %vm20418_vm0, %v20417_v4, %v14015_v17  ;;  %vm20419_vm7 = vmmov %vm20418_vm0  ;;  %v20420_v38 = vunpack.i.h.bf16 %v17851_v14  ;;  %vm20421_vm9 = vcmask 351232   ;;  %vm20422_vm3 = vcmask 375808   ;;  %11549 = vmatprep.subr.bf16.mxu0 %v11548_v58  ;;  %v20434_v58 = vld [vmem:[#allocation26_spill] sm:$0xff] }
 0x74d   : > { %v18542_v11 = vsel %vm20419_vm7, %v14015_v17, %v14016_v30  ;;  %v7495_v6 = vsel %vm20422_vm3, %v14170_v60, %v14171_v15  ;;  %v14176_v13 = vunpack.i.h.bf16 %v20423_v62  ;;  %v14175_v55 = vunpack.i.l.bf16 %v20423_v62  ;;  %v20425_v17 = vld [vmem:[#allocation71_spill] sm:$0xff]  ;;  %vm20428_vm1 = vmmov %vm20422_vm3  ;;  %v14339_v50 = vpop.permute.xlu0 %14338 }
 0x74e   : > { %v18547_v39 = vsel %vm20421_vm9, %v20420_v38, %v14020_v22  ;;  %v11550_v30 = vpack.c.bf16 %v7445_v27, %v20425_v17  ;;  %v20426_v14 = vunpack.i.l.bf16 %v20414_v23  ;;  %vm20427_vm2 = vcmask 564224   ;;  %vm20429_vm0 = vmmov %vm20428_vm1  ;;  %v20430_v38 = vld [vmem:[#allocation24_spill] sm:$0xff]  ;;  %v20432_v17 = vld [vmem:[#allocation73_spill] sm:$0xff] }
 0x74f   : > { %v14301_v60 = vunpack.i.h.bf16 %v18300_v47  ;;  %v7496_v40 = vsel %vm20428_vm1, %v14171_v15, %v14335_v49  ;;  %v7497_v4 = vsel %vm20429_vm0, %v14335_v49, %v14336_v16  ;;  %v14025_v62 = vunpack.i.l.bf16 %v20430_v38  ;;  %vm20431_vm7 = vmmov %vm20421_vm9  ;;  %14793 = vrot.lane.b32.xlu1 %v17937_v42, %s20424_s11  ;;  %14548 = vrot.lane.b32.xlu0 %v17979_v56, %s20302_s3 }
 0x750   : > { %v7097_v1 = vsel %vm20427_vm2, %v20426_v14, %v14296_v24  ;;  %11551 = vmatpush1.bf16.msra.mxu0 %v11550_v30  ;;  %v11552_v9 = vpack.c.bf16 %v7496_v40, %v7493_v18  ;;  %v11716_v26 = vpack.c.bf16 %v7497_v4, %v7494_v29  ;;  %v18567_v3 = vsel %vm20431_vm7, %v14020_v22, %v14021_v0 }
 0x751   : > { %v14341_v27 = vunpack.i.h.bf16 %v14339_v50  ;;  %v14340_v23 = vunpack.i.l.bf16 %v14339_v50  ;;  %v11554_v24 = vpack.c.bf16 %v7495_v6, %v20432_v17  ;;  %vm20433_vm9 = vcmask 367616   ;;  %v10545_v50 = vld [vmem:[%s20437_s19 + $0x20] sm:$0xff] }
 0x752   : > { %v7545_v14 = vsel %vm20433_vm9, %v14175_v55, %v14176_v13  ;;  %v14181_v35 = vunpack.i.h.bf16 %v20434_v58  ;;  %v14180_v15 = vunpack.i.l.bf16 %v20434_v58  ;;  %v11718_v49 = vpack.c.bf16 %v7097_v1, %v18407_v25  ;;  %11553 = vmatprep.subr.bf16.mxu0 %v11552_v9  ;;  %11717 = vmatprep.subr.bf16.mxu1 %v11716_v26  ;;  %vm20438_vm2 = vmmov %vm20433_vm9  ;;  %v18588_v55 = vpop.permute.xlu1 %14448  ;;  %v20442_v1 = vld [vmem:[#allocation23_spill] sm:$0xff] }
 0x753   : > { %v20435_v0 = vunpack.i.l.bf16 %v18300_v47  ;;  %vm20436_vm3 = vcmask 556032   ;;  %v14306_v22 = vunpack.i.h.bf16 %v18341_v21  ;;  %v7546_v29 = vsel %vm20438_vm2, %v14176_v13, %v14340_v23  ;;  %vm20439_vm1 = vmmov %vm20438_vm2  ;;  %v14344_v47 = vpop.permute.xlu0 %14343  ;;  %9786 = vperm.xlu1 %12881, %v10545_v50   ;;  %14558 = vrot.lane.b32.xlu0 %v20144_v28, %s20281_s23 }
 0x754   : > { %v7547_v16 = vsel %vm20439_vm1, %v14340_v23, %v14341_v27  ;;  %v14026_v6 = vunpack.i.h.bf16 %v20430_v38  ;;  %11555 = vmatpush1.bf16.msra.mxu0 %v11554_v24  ;;  %11719 = vmatpush3.bf16.msra.mxu1 %v11718_v49  ;;  %v11556_v25 = vpack.c.bf16 %v7546_v29, %v18525_v41  ;;  %v20440_v26 = vunpack.i.h.bf16 %v17857_v43  ;;  %v20444_v27 = vld [vmem:[#allocation59_spill] sm:$0xff] }
 0x755   : > { %v7147_v18 = vsel %vm20436_vm3, %v20435_v0, %v14301_v60  ;;  %v11720_v9 = vpack.c.bf16 %v7547_v16, %v18533_v19  ;;  %vm20441_vm0 = vcmask 343040   ;;  %v14030_v13 = vunpack.i.l.bf16 %v20442_v1  ;;  %v20453_v16 = vld [vmem:[#allocation42_spill] sm:$0xff] }
 0x756   : > { %v18595_v30 = vsel %vm20441_vm0, %v20440_v26, %v14025_v62  ;;  %v14346_v60 = vunpack.i.h.bf16 %v14344_v47  ;;  %v14345_v40 = vunpack.i.l.bf16 %v14344_v47  ;;  %v11558_v4 = vpack.c.bf16 %v7545_v14, %v18305_v48  ;;  %11557 = vmatprep.subr.bf16.mxu0 %v11556_v25  ;;  %vm20449_vm1 = vmmov %vm20441_vm0  ;;  %v20458_v26 = vld [vmem:[#allocation37_spill] sm:$0xff] }
 0x757   : > { %vm20443_vm7 = vcmask 359424   ;;  %v14186_v23 = vunpack.i.h.bf16 %v20444_v27  ;;  %v14185_v17 = vunpack.i.l.bf16 %v20444_v27  ;;  %v11722_v43 = vpack.c.bf16 %v7147_v18, %v18412_v8  ;;  %11721 = vmatprep.subr.bf16.mxu1 %v11720_v9  ;;  %14568 = vrot.lane.b32.xlu0 %v17979_v56, %s20308_s2  ;;  %v20460_v27 = vld [vmem:[#allocation75_spill] sm:$0xff] }
 0x758   : > { %v7595_v38 = vsel %vm20443_vm7, %v14180_v15, %v14181_v35  ;;  %v20445_v41 = vunpack.i.l.bf16 %v18341_v21  ;;  %vm20446_vm9 = vcmask 547840   ;;  %v14311_v24 = vunpack.i.h.bf16 %v18370_v5  ;;  %vm20447_vm3 = vmmov %vm20443_vm7  ;;  %11559 = vmatpush1.bf16.msra.mxu0 %v11558_v4  ;;  %v14349_v15 = vpop.permute.xlu0 %14348 }
 0x759   : > { %v7596_v48 = vsel %vm20447_vm3, %v14181_v35, %v14345_v40  ;;  %vm20448_vm2 = vmmov %vm20447_vm3  ;;  %v14031_v58 = vunpack.i.h.bf16 %v20442_v1  ;;  %11723 = vmatpush3.bf16.msra.mxu1 %v11722_v43  ;;  %v7694_v21 = vsel %vm20449_vm1, %v14025_v62, %v14026_v6  ;;  %v14351_v0 = vunpack.i.h.bf16 %v14349_v15 }
 0x75a   : > { %v7197_v19 = vsel %vm20446_vm9, %v20445_v41, %v14306_v22  ;;  %v7597_v14 = vsel %vm20448_vm2, %v14345_v40, %v14346_v60  ;;  %v11560_v49 = vpack.c.bf16 %v7596_v48, %v18539_v57  ;;  %v14350_v18 = vunpack.i.l.bf16 %v14349_v15  ;;  %v18624_v57 = vpop.permute.xlu1 %14463 }
 0x75b   : > { %v11724_v8 = vpack.c.bf16 %v7597_v14, %v18542_v11  ;;  %v11562_v22 = vpack.c.bf16 %v7595_v38, %v18310_v51  ;;  %v20450_v50 = vunpack.i.h.bf16 %v17863_v59  ;;  %vm20451_vm0 = vcmask 334848   ;;  %14578 = vrot.lane.b32.xlu0 %v20144_v28, %s19922_s8  ;;  %s20739_s8 = sld [smem:[#allocation85_spill]] }
 0x75c   : > { %vm20452_vm7 = vcmask 351232   ;;  %v14191_v47 = vunpack.i.h.bf16 %v20453_v16  ;;  %v14190_v25 = vunpack.i.l.bf16 %v20453_v16  ;;  %11561 = vmatprep.subr.bf16.mxu0 %v11560_v49  ;;  %v11726_v11 = vpack.c.bf16 %v7197_v19, %v18426_v31  ;;  %v14354_v60 = vpop.permute.xlu0 %14353  ;;  %vm20459_vm1 = vmmov %vm20451_vm0  ;;  %v20469_v16 = vld [vmem:[#allocation76_spill] sm:$0xff] }
 0x75d   : > { %v18619_v35 = vsel %vm20451_vm0, %v20450_v50, %v14030_v13  ;;  %v7645_v29 = vsel %vm20452_vm7, %v14185_v17, %v14186_v23  ;;  %v20454_v51 = vunpack.i.l.bf16 %v18370_v5  ;;  %vm20455_vm9 = vcmask 539648   ;;  %11725 = vmatprep.subr.bf16.mxu1 %v11724_v8  ;;  %vm20456_vm3 = vmmov %vm20452_vm7  ;;  %11563 = vmatpush1.bf16.msra.mxu0 %v11562_v22 }
 0x75e   : > { %v14316_v62 = vunpack.i.h.bf16 %v18416_v34  ;;  %v7646_v6 = vsel %vm20456_vm3, %v14186_v23, %v14350_v18  ;;  %vm20457_vm2 = vmmov %vm20456_vm3  ;;  %v14035_v1 = vunpack.i.l.bf16 %v20458_v26  ;;  %11727 = vmatpush3.bf16.msra.mxu1 %v11726_v11  ;;  %v7744_v5 = vsel %vm20459_vm1, %v14030_v13, %v14031_v58  ;;  %v20462_v23 = vld [vmem:[#allocation40_spill] sm:$0xff]  ;;  %v18653_v15 = vpop.permute.xlu1 %14473 }
 0x75f   : > { %v7247_v59 = vsel %vm20455_vm9, %v20454_v51, %v14311_v24  ;;  %v7647_v9 = vsel %vm20457_vm2, %v14350_v18, %v14351_v0  ;;  %v11564_v40 = vpack.c.bf16 %v7646_v6, %v18547_v39  ;;  %v14356_v4 = vunpack.i.h.bf16 %v14354_v60  ;;  %v20468_v18 = vld [vmem:[#allocation25_spill] sm:$0xff]  ;;  %vm20470_vm2 = vmmov %vm20459_vm1  ;;  %v20471_v11 = vld [vmem:[#allocation60_spill] sm:$0xff]  ;;  %14588 = vrot.lane.b32.xlu0 %v17979_v56, %s20313_s25 }
 0x760   : > { %v11728_v31 = vpack.c.bf16 %v7647_v9, %v18567_v3  ;;  %v14355_v38 = vunpack.i.l.bf16 %v14354_v60  ;;  %v11566_v17 = vpack.c.bf16 %v7645_v29, %v20460_v27  ;;  %vm20461_vm0 = vcmask 343040   ;;  %v14359_v49 = vpop.permute.xlu0 %14358 }
 0x761   : > { %v7695_v43 = vsel %vm20461_vm0, %v14190_v25, %v14191_v47  ;;  %v14196_v41 = vunpack.i.h.bf16 %v20462_v23  ;;  %v14195_v19 = vunpack.i.l.bf16 %v20462_v23  ;;  %11565 = vmatprep.subr.bf16.mxu0 %v11564_v40  ;;  %v11730_v39 = vpack.c.bf16 %v7247_v59, %v18448_v10  ;;  %vm20464_vm7 = vmmov %vm20461_vm0 }
 0x762   : > { %v20463_v3 = vunpack.i.l.bf16 %v18416_v34  ;;  %v14321_v24 = vunpack.i.h.bf16 %v18445_v54  ;;  %11729 = vmatprep.subr.bf16.mxu1 %v11728_v31  ;;  %v7696_v48 = vsel %vm20464_vm7, %v14191_v47, %v14355_v38  ;;  %vm20465_vm9 = vmmov %vm20461_vm0  ;;  %v14036_v58 = vunpack.i.h.bf16 %v20458_v26  ;;  %11567 = vmatpush1.bf16.msra.mxu0 %v11566_v17 }
 0x763   : > { %v7697_v14 = vsel %vm20465_vm9, %v14355_v38, %v14356_v4  ;;  %11731 = vmatpush3.bf16.msra.mxu1 %v11730_v39  ;;  %v11568_v10 = vpack.c.bf16 %v7696_v48, %v18595_v30  ;;  %v20466_v34 = vunpack.i.h.bf16 %v17869_v20  ;;  %vm20467_vm3 = vcmask 203776   ;;  %vm20473_vm0 = vmmov %vm20459_vm1  ;;  %v20475_v38 = vld [vmem:[#allocation78_spill] sm:$0xff]  ;;  %14598 = vrot.lane.b32.xlu0 %v20144_v28, %s20313_s25 }
 0x764   : > { %v7297_v13 = vsel %vm498_vm4, %v20463_v3, %v14316_v62  ;;  %v11732_v8 = vpack.c.bf16 %v7697_v14, %v7694_v21  ;;  %v14040_v22 = vunpack.i.l.bf16 %v20468_v18  ;;  %v14361_v50 = vunpack.i.h.bf16 %v14359_v49  ;;  %v14364_v60 = vpop.permute.xlu0 %14363  ;;  %vm20474_vm7 = vmmov %vm20467_vm3  ;;  %v18683_v3 = vpop.permute.xlu1 %14483 }
 0x765   : > { %v7793_v0 = vsel %vm20467_vm3, %v20466_v34, %v14035_v1  ;;  %v14360_v29 = vunpack.i.l.bf16 %v14359_v49  ;;  %v11570_v47 = vpack.c.bf16 %v7695_v43, %v20469_v16  ;;  %v7745_v25 = vsel %vm20470_vm2, %v14195_v19, %v14196_v41  ;;  %11569 = vmatprep.subr.bf16.mxu0 %v11568_v10  ;;  %vm20480_vm2 = vmmov %vm20467_vm3  ;;  %v20483_v10 = vld [vmem:[#allocation39_spill] sm:$0xff] }
 0x766   : > { %v14201_v51 = vunpack.i.h.bf16 %v20471_v11  ;;  %v14200_v59 = vunpack.i.l.bf16 %v20471_v11  ;;  %v11734_v20 = vpack.c.bf16 %v7297_v13, %v18451_v46  ;;  %v20472_v30 = vunpack.i.l.bf16 %v18445_v54  ;;  %11733 = vmatprep.subr.bf16.mxu1 %v11732_v8 }
 0x767   : > { %v14326_v62 = vunpack.i.h.bf16 %v18478_v53  ;;  %v7746_v6 = vsel %vm20459_vm1, %v14196_v41, %v14360_v29  ;;  %v7747_v9 = vsel %vm20473_vm0, %v14360_v29, %v14361_v50  ;;  %v14041_v26 = vunpack.i.h.bf16 %v20468_v18  ;;  %11571 = vmatpush1.bf16.msra.mxu0 %v11570_v47  ;;  %v20478_v41 = vld [vmem:[#allocation46_spill] sm:$0xff]  ;;  %vm20481_vm1 = vmmov %vm20480_vm2  ;;  %v20484_v50 = vld [vmem:[#allocation44_spill] sm:$0xff]  ;;  %14608 = vrot.lane.b32.xlu0 %v17979_v56, %s20320_s9 }
 0x768   : > { %v7347_v21 = vsel %vm549_vm5, %v20472_v30, %v14321_v24  ;;  %11735 = vmatpush3.bf16.msra.mxu1 %v11734_v20  ;;  %v11572_v40 = vpack.c.bf16 %v7746_v6, %v18619_v35  ;;  %v11736_v31 = vpack.c.bf16 %v7747_v9, %v7744_v5  ;;  %v7794_v46 = vsel %vm20474_vm7, %v14035_v1, %v14036_v58  ;;  %v14369_v14 = vpop.permute.xlu0 %14368  ;;  %v20485_v47 = vld [vmem:[#allocation79_spill] sm:$0xff]  ;;  %v18714_v6 = vpop.permute.xlu1 %14493 }
 0x769   : > { %v14366_v54 = vunpack.i.h.bf16 %v14364_v60  ;;  %v14365_v4 = vunpack.i.l.bf16 %v14364_v60  ;;  %v11574_v27 = vpack.c.bf16 %v7745_v25, %v20475_v38  ;;  %v20476_v17 = vunpack.i.h.bf16 %v17875_v2 }
 0x76a   : > { %vm20477_vm9 = vcmask 195584   ;;  %v7795_v23 = vsel %vm20467_vm3, %v14200_v59, %v14201_v51  ;;  %v14206_v19 = vunpack.i.h.bf16 %v20478_v41  ;;  %v14205_v39 = vunpack.i.l.bf16 %v20478_v41  ;;  %11573 = vmatprep.subr.bf16.mxu0 %v11572_v40  ;;  %11737 = vmatprep.subr.bf16.mxu1 %v11736_v31 }
 0x76b   : > { %v7843_v43 = vsel %vm20477_vm9, %v20476_v17, %v14040_v22  ;;  %v11738_v35 = vpack.c.bf16 %v7347_v21, %v18472_v36  ;;  %v20479_v1 = vunpack.i.l.bf16 %v18478_v53  ;;  %v14331_v5 = vunpack.i.h.bf16 %v18506_v61  ;;  %11575 = vmatpush1.bf16.msra.mxu0 %v11574_v27  ;;  %vm20482_vm0 = vmmov %vm20477_vm9  ;;  %14618 = vrot.lane.b32.xlu0 %v17937_v42, %s20320_s9  ;;  %v20498_v17 = vld [vmem:[#allocation62_spill] sm:$0xff] }
 0x76c   : > { %v7796_v13 = vsel %vm20480_vm2, %v14201_v51, %v14365_v4  ;;  %v7797_v24 = vsel %vm20481_vm1, %v14365_v4, %v14366_v54  ;;  %v14001_v48 = vunpack.i.h.bf16 %v18009_v7  ;;  %v7844_v36 = vsel %vm20482_vm0, %v14040_v22, %v14041_v26  ;;  %vm20486_vm7 = vmmov %vm20482_vm0  ;;  %v20496_v54 = vld [vmem:[#allocation41_spill] sm:$0xff] }
 0x76d   : > { %v7397_v2 = vsel %vm600_vm6, %v20479_v1, %v14326_v62  ;;  %11739 = vmatpush3.bf16.msra.mxu1 %v11738_v35  ;;  %v11576_v58 = vpack.c.bf16 %v7796_v13, %v7793_v0  ;;  %v11740_v49 = vpack.c.bf16 %v7797_v24, %v7794_v46  ;;  %v14046_v53 = vunpack.i.h.bf16 %v20483_v10  ;;  %vm20489_vm3 = vmmov %vm20482_vm0 }
 0x76e   : > { %v14045_v8 = vunpack.i.l.bf16 %v20483_v10  ;;  %v14371_v34 = vunpack.i.h.bf16 %v14369_v14  ;;  %v14370_v18 = vunpack.i.l.bf16 %v14369_v14  ;;  %v14211_v29 = vunpack.i.h.bf16 %v20484_v50  ;;  %vm20490_vm2 = vmmov %vm20482_vm0  ;;  %v20507_v10 = vld [vmem:[#allocation61_spill] sm:$0xff] }
 0x76f   : > { %v14210_v16 = vunpack.i.l.bf16 %v20484_v50  ;;  %11577 = vmatprep.subr.bf16.mxu0 %v11576_v58  ;;  %v11578_v25 = vpack.c.bf16 %v7795_v23, %v20485_v47  ;;  %v11742_v0 = vpack.c.bf16 %v7397_v2, %v18475_v37  ;;  %v7845_v22 = vsel %vm20486_vm7, %v14205_v39, %v14206_v19  ;;  %11741 = vmatprep.subr.bf16.mxu1 %v11740_v49  ;;  %v14374_v37 = vpop.permute.xlu0 %14373  ;;  %v20501_v39 = vld [vmem:[#allocation29_spill] sm:$0xff]  ;;  %v20504_v58 = vld [vmem:[#allocation30_spill] sm:$0xff]  ;;  %v20505_v49 = vld [vmem:[#allocation16_spill] sm:$0xff] }
 0x770   : > { %v20487_v11 = vunpack.i.l.bf16 %v18506_v61  ;;  %vm20488_vm9 = vcmask 384000   ;;  %v7846_v59 = vsel %vm20489_vm3, %v14206_v19, %v14370_v18  ;;  %v7847_v20 = vsel %vm20490_vm2, %v14370_v18, %v14371_v34  ;;  %14628 = vrot.lane.b32.xlu0 %v17756_v12, %s19977_s0 }
 0x771   : > { %v13925_v30 = vunpack.i.l.bf16 %v17881_v44  ;;  %v20491_v21 = vunpack.i.l.bf16 %v18009_v7  ;;  %vm20492_vm1 = vmmov %vm20488_vm9  ;;  %11579 = vmatpush1.bf16.msra.mxu0 %v11578_v25  ;;  %11743 = vmatpush3.bf16.msra.mxu1 %v11742_v0  ;;  %v11580_v9 = vpack.c.bf16 %v7846_v59, %v7843_v43  ;;  %v11744_v61 = vpack.c.bf16 %v7847_v20, %v7844_v36  ;;  %v20509_v0 = vld [vmem:[#allocation18_spill] sm:$0xff]  ;;  %v10538_v59 = vld [vmem:[%s20307_s29 + $0x118] sm:$0xff] }
 0x772   : > { %v7447_v51 = vsel %vm20488_vm9, %v20487_v11, %v14331_v5  ;;  %vm20493_vm0 = vcmask 187392   ;;  %v14376_v60 = vunpack.i.h.bf16 %v14374_v37  ;;  %v14375_v40 = vunpack.i.l.bf16 %v14374_v37  ;;  %v20510_v37 = vld [vmem:[#allocation43_spill] sm:$0xff] }
 0x773   : > { %v7444_v62 = vsel %vm20492_vm1, %v20491_v21, %v14001_v48  ;;  %v7894_v26 = vsel %vm20493_vm0, %v14045_v8, %v14046_v53  ;;  %v20494_v31 = vunpack.i.h.bf16 %v17881_v44  ;;  %vm20495_vm7 = vmmov %vm20493_vm0  ;;  %v19813_v4 = vunpack.i.l.bf16 %v20496_v54  ;;  %11581 = vmatprep.subr.bf16.mxu0 %v11580_v9  ;;  %11745 = vmatprep.subr.bf16.mxu1 %v11744_v61  ;;  %v18730_v2 = vpop.permute.xlu0 %14378  ;;  %v10539_v44 = vld [vmem:[%s20307_s29 + $0x120] sm:$0xff] }
 0x774   : > { %vm20497_vm9 = vmmov %vm20493_vm0  ;;  %v11582_v38 = vpack.c.bf16 %v7845_v22, %v18402_v45  ;;  %v11746_v27 = vpack.c.bf16 %v7447_v51, %v7444_v62  ;;  %v14216_v43 = vunpack.i.h.bf16 %v20498_v17  ;;  %v14215_v23 = vunpack.i.l.bf16 %v20498_v17  ;;  %v10531_v45 = vld [vmem:[%s20307_s29 + $0xe0] sm:$0xff]  ;;  %v10534_v62 = vld [vmem:[%s20307_s29 + $0xf8] sm:$0xff]  ;;  %14638 = vrot.lane.b32.xlu0 %v20144_v28, %s19936_s24 }
 0x775   : > { %v7893_v46 = vsel %vm20495_vm7, %v20494_v31, %v14045_v8  ;;  %v7895_v7 = vsel %vm20497_vm9, %v14210_v16, %v14211_v29  ;;  %vm20499_vm3 = vmmov %vm20493_vm0  ;;  %v13931_v35 = vunpack.i.h.bf16 %v20501_v39  ;;  %v20502_v13 = vmov %v20494_v31  ;;  %v18744_v8 = vpop.permute.xlu1 %14503 }
 0x776   : > { %v7897_v41 = vsel %vm20499_vm3, %v14375_v40, %v14376_v60  ;;  %vm20500_vm2 = vmmov %vm20493_vm0  ;;  %11583 = vmatpush1.bf16.msra.mxu0 %v11582_v38  ;;  %11747 = vmatpush3.bf16.msra.mxu1 %v11746_v27  ;;  %v13930_v48 = vunpack.i.l.bf16 %v20501_v39  ;;  %v19811_v14 = vunpack.i.l.bf16 %v18730_v2  ;;  %v20506_v36 = vpack.c.bf16 %v20504_v58, %v20505_v49  ;;  %v20512_v38 = vld [vmem:[#allocation17_spill] sm:$0xff] }
 0x777   : > { %v7896_v19 = vsel %vm20500_vm2, %v14211_v29, %v14375_v40  ;;  %v11750_v1 = vpack.c.bf16 %v7897_v41, %v7894_v26  ;;  %vm20503_vm1 = vmmov %vm20493_vm0  ;;  %v19812_v53 = vunpack.i.l.bf16 %v20507_v10  ;;  %v7943_v18 = vsel %vm1161_vm10, %v13931_v35, %v19813_v4  ;;  %v20508_v29 = vld [vmem:[#allocation47_spill] sm:$0xff]  ;;  %v18761_v11 = vpop.permute.xlu0 %14383  ;;  %v20511_v40 = vld [vmem:[#allocation64_spill] sm:$0xff] }
 0x778   : > { %v11584_v5 = vpack.c.bf16 %v7896_v19, %v7893_v46  ;;  %v7892_v24 = vsel %vm20503_vm1, %v13925_v30, %v20502_v13  ;;  %11749 = vmatprep.subr.bf16.mxu1 %v20506_v36  ;;  %v7945_v50 = vsel %vm1161_vm10, %v14215_v23, %v14216_v43  ;;  %v14221_v16 = vunpack.i.h.bf16 %v20508_v29  ;;  %14648 = vrot.lane.b32.xlu0 %v20144_v28, %s19977_s0  ;;  %v20515_v36 = vld [vmem:[#allocation32_spill] sm:$0xff] }
 0x779   : > { %v11586_v34 = vpack.c.bf16 %v7895_v7, %v7892_v24  ;;  %v14220_v47 = vunpack.i.l.bf16 %v20508_v29  ;;  %10173 = vmatmul.mubr.f32.vlgmr.msra.gmra.mrb[20].mxu1 %v10531_v45  ;;  %9865 = vmatmul.mubr.f32.vlgmr.msra.gmra.mrb[24].mxu0 %v10531_v45  ;;  %v7946_v25 = vsel %vm1161_vm10, %v14216_v43, %v19811_v14  ;;  %v13936_v22 = vunpack.i.h.bf16 %v20509_v0  ;;  %v18785_v17 = vpop.permute.xlu1 %14513  ;;  %v20514_v24 = vld [vmem:[#allocation49_spill] sm:$0xff]  ;;  %v20552_v14 = vld [vmem:[#allocation54_spill] sm:$0xff] }
 0x77a   : > { %11585 = vmatprep.subr.bf16.mxu0 %v11584_v5  ;;  %11751 = vmatpush3.bf16.msra.mxu1 %v11750_v1  ;;  %v11588_v51 = vpack.c.bf16 %v7946_v25, %v7943_v18  ;;  %v7942_v20 = vsel %vm1161_vm10, %v13930_v48, %v13931_v35  ;;  %v13935_v30 = vunpack.i.l.bf16 %v20509_v0  ;;  %v19807_v21 = vunpack.i.l.bf16 %v18761_v11  ;;  %v20513_v35 = vld [vmem:[#allocation45_spill] sm:$0xff] }
 0x77b   : > { %11587 = vmatpush1.bf16.msra.mxu0 %v11586_v34  ;;  %10177 = vmatprep.mubr.f32.mxu1 %v10539_v44  ;;  %v19808_v9 = vunpack.i.l.bf16 %v20510_v37  ;;  %v11590_v61 = vpack.c.bf16 %v7945_v50, %v7942_v20  ;;  %v7993_v26 = vsel %vm1212_vm11, %v13936_v22, %v19812_v53  ;;  %v7995_v60 = vsel %vm1212_vm11, %v14220_v47, %v14221_v16  ;;  %v18787_v43 = vpop.permute.xlu0 %14388 }
 0x77c   : > { %9870 = vmatprep.mubr.f32.mxu0 %v10539_v44  ;;  %11589 = vmatprep.subr.bf16.mxu0 %v11588_v51  ;;  %v14226_v31 = vunpack.i.h.bf16 %v20511_v40  ;;  %v14225_v46 = vunpack.i.l.bf16 %v20511_v40  ;;  %v7996_v7 = vsel %vm1212_vm11, %v14221_v16, %v19807_v21  ;;  %v13941_v27 = vunpack.i.h.bf16 %v20512_v38  ;;  %v20516_v16 = vld [vmem:[#allocation31_spill] sm:$0xff] }
 0x77d   : > { %10178 = vmatmul.mubr.f32.gmra.mrb[22].mxu1 %v10538_v59  ;;  %9871 = vmatmul.mubr.f32.gmra.mrb[26].mxu0 %v10538_v59  ;;  %v11592_v23 = vpack.c.bf16 %v7996_v7, %v7993_v26  ;;  %v7992_v41 = vsel %vm1212_vm11, %v13935_v30, %v13936_v22  ;;  %v13940_v19 = vunpack.i.l.bf16 %v20512_v38  ;;  %v19806_v39 = vunpack.i.l.bf16 %v18787_v43  ;;  %v20517_v22 = vld [vmem:[#allocation63_spill] sm:$0xff]  ;;  %v18814_v30 = vpop.permute.xlu1 %14523  ;;  %v20518_v26 = vld [vmem:[#allocation66_spill] sm:$0xff]  ;;  %v20519_v7 = vld [vmem:[#allocation48_spill] sm:$0xff] }
 0x77e   : > { %9941 = vmatprep.mubr.f32.mxu0 %v10534_v62  ;;  %10247 = vmatprep.mubr.f32.mxu1 %v10534_v62  ;;  %v19805_v1 = vunpack.i.l.bf16 %v20513_v35  ;;  %v11594_v5 = vpack.c.bf16 %v7995_v60, %v7992_v41  ;;  %v8043_v45 = vsel %vm1263_vm13, %v13941_v27, %v19808_v9  ;;  %v8045_v13 = vsel %vm1263_vm13, %v14225_v46, %v14226_v31 }
 0x77f   : > { %11591 = vmatpush1.bf16.msra.mxu0 %v11590_v61  ;;  %v14231_v48 = vunpack.i.h.bf16 %v20514_v24  ;;  %v14230_v58 = vunpack.i.l.bf16 %v20514_v24  ;;  %v8046_v49 = vsel %vm1263_vm13, %v14226_v31, %v19806_v39  ;;  %v13946_v34 = vunpack.i.h.bf16 %v20515_v36  ;;  %v18806_v18 = vpop.permute.xlu0 %14393  ;;  %14658 = vrot.lane.b32.xlu0 %v17979_v56, %s19986_s4 }
 0x780   : > { %11593 = vmatprep.subr.bf16.mxu0 %v11592_v23  ;;  %v13945_v44 = vunpack.i.l.bf16 %v20515_v36  ;;  %v11596_v50 = vpack.c.bf16 %v8046_v49, %v8043_v45  ;;  %v8042_v29 = vsel %vm1263_vm13, %v13940_v19, %v13941_v27  ;;  %v13951_v47 = vunpack.i.h.bf16 %v20516_v16 }
 0x781   : > { %v13950_v25 = vunpack.i.l.bf16 %v20516_v16  ;;  %v19804_v0 = vunpack.i.l.bf16 %v18806_v18  ;;  %v14071_v51 = vunpack.i.h.bf16 %v20517_v22  ;;  %v14070_v59 = vunpack.i.l.bf16 %v20517_v22 }
 0x782   : > { %v11598_v20 = vpack.c.bf16 %v8045_v13, %v8042_v29  ;;  %v8093_v62 = vsel %vm1314_vm15, %v13946_v34, %v19805_v1  ;;  %v8095_v61 = vsel %vm1314_vm15, %v14230_v58, %v14231_v48  ;;  %v14236_v60 = vunpack.i.h.bf16 %v20518_v26 }
 0x783   : > { %11595 = vmatpush1.bf16.msra.mxu0 %v11594_v5  ;;  %v14235_v40 = vunpack.i.l.bf16 %v20518_v26  ;;  %v8096_v31 = vsel %vm1314_vm15, %v14231_v48, %v19804_v0  ;;  %v8092_v46 = vsel %vm1314_vm15, %v13945_v44, %v13946_v34  ;;  %v14076_v38 = vunpack.i.h.bf16 %v20519_v7  ;;  %v14399_v23 = vpop.permute.xlu0 %14398  ;;  %v20520_v5 = vld [vmem:[#allocation20_spill] sm:$0xff]  ;;  %v20522_v48 = vld [vmem:[#allocation51_spill] sm:$0xff]  ;;  %14668 = vrot.lane.b32.xlu0 %v17937_v42, %s19986_s4  ;;  %v20525_v26 = vld [vmem:[#allocation65_spill] sm:$0xff] }
 0x784   : > { %11597 = vmatprep.subr.bf16.mxu0 %v11596_v50  ;;  %v14075_v27 = vunpack.i.l.bf16 %v20519_v7  ;;  %v11600_v41 = vpack.c.bf16 %v8096_v31, %v8093_v62  ;;  %v8142_v19 = vsel %vm1365_vm8, %v13950_v25, %v13951_v47  ;;  %v13956_v45 = vunpack.i.h.bf16 %v20520_v5 }
 0x785   : > { %v14401_v13 = vunpack.i.h.bf16 %v14399_v23  ;;  %v14400_v24 = vunpack.i.l.bf16 %v14399_v23  ;;  %v18833_v58 = vsel %vm1365_vm8, %v14070_v59, %v14071_v51  ;;  %v11602_v49 = vpack.c.bf16 %v8095_v61, %v8092_v46  ;;  %v18849_v51 = vpop.permute.xlu1 %14533 }
 0x786   : > { %20521 = vst [vmem:[#allocation70_spill] sm:$0xff] %v18833_v58  ;;  %v14241_v36 = vunpack.i.h.bf16 %v20522_v48  ;;  %v14240_v34 = vunpack.i.l.bf16 %v20522_v48  ;;  %v8145_v44 = vsel %vm1365_vm8, %v14235_v40, %v14236_v60  ;;  %v8143_v29 = vsel %vm1365_vm8, %v13951_v47, %v14070_v59  ;;  %v20528_v48 = vld [vmem:[#allocation19_spill] sm:$0xff] }
 0x787   : > { %11599 = vmatpush1.bf16.msra.mxu0 %v11598_v20  ;;  %v18841_v50 = vsel %vm1365_vm8, %v14400_v24, %v14401_v13  ;;  %v8146_v16 = vsel %vm1365_vm8, %v14236_v60, %v14400_v24  ;;  %v13955_v25 = vunpack.i.l.bf16 %v20520_v5  ;;  %v18847_v22 = vsel %vm1416_vm14, %v14075_v27, %v14076_v38  ;;  %v14404_v62 = vpop.permute.xlu0 %14403  ;;  %14678 = vrot.lane.b32.xlu0 %v17756_v12, %s19995_s18  ;;  %v20526_v38 = vld [vmem:[#allocation53_spill] sm:$0xff] }
 0x788   : > { %11601 = vmatprep.subr.bf16.mxu0 %v11600_v41  ;;  %20523 = vst [vmem:[#allocation72_spill] sm:$0xff] %v18841_v50  ;;  %20524 = vst [vmem:[#allocation38_spill] sm:$0xff] %v18847_v22  ;;  %v11604_v61 = vpack.c.bf16 %v8146_v16, %v8143_v29  ;;  %v14081_v40 = vunpack.i.h.bf16 %v20525_v26  ;;  %v14406_v31 = vunpack.i.h.bf16 %v14404_v62  ;;  %v14405_v46 = vunpack.i.l.bf16 %v14404_v62 }
 0x789   : > { %v8193_v47 = vsel %vm1416_vm14, %v13956_v45, %v14075_v27  ;;  %v14080_v59 = vunpack.i.l.bf16 %v20525_v26  ;;  %v11606_v60 = vpack.c.bf16 %v8145_v44, %v8142_v19  ;;  %v8195_v7 = vsel %vm1416_vm14, %v14240_v34, %v14241_v36  ;;  %v18873_v26 = vpop.permute.xlu1 %14543 }
 0x78a   : > { %v14246_v23 = vunpack.i.h.bf16 %v20526_v38  ;;  %v14245_v41 = vunpack.i.l.bf16 %v20526_v38  ;;  %v18862_v5 = vsel %vm1416_vm14, %v14405_v46, %v14406_v31  ;;  %v8196_v13 = vsel %vm1416_vm14, %v14241_v36, %v14405_v46 }
 0x78b   : > { %11603 = vmatpush1.bf16.msra.mxu0 %v11602_v49  ;;  %20527 = vst [vmem:[#allocation71_spill] sm:$0xff] %v18862_v5  ;;  %v8192_v27 = vsel %vm1416_vm14, %v13955_v25, %v13956_v45  ;;  %v14409_v24 = vpop.permute.xlu0 %14408  ;;  %v11608_v49 = vpack.c.bf16 %v8196_v13, %v8193_v47  ;;  %v13961_v34 = vunpack.i.h.bf16 %v20528_v48  ;;  %v13960_v44 = vunpack.i.l.bf16 %v20528_v48  ;;  %14688 = vrot.lane.b32.xlu0 %v20144_v28, %s20290_s27  ;;  %v20538_v13 = vld [vmem:[#allocation36_spill] sm:$0xff] }
 0x78c   : > { %11605 = vmatprep.subr.bf16.mxu0 %v11604_v61  ;;  %v14411_v29 = vunpack.i.h.bf16 %v14409_v24  ;;  %v14410_v16 = vunpack.i.l.bf16 %v14409_v24  ;;  %vm20529_vm8 = vcmask 7168   ;;  %v11610_v61 = vpack.c.bf16 %v8195_v7, %v8192_v27  ;;  %v20539_v24 = vld [vmem:[#allocation34_spill] sm:$0xff] }
 0x78d   : > { %v18871_v62 = vsel %vm20529_vm8, %v14080_v59, %v14081_v40  ;;  %vm20531_vm14 = vmmov %vm20529_vm8  ;;  %vm20545_vm2 = vcmask 1039360   ;;  %v14256_v53 = vunpack.i.h.bf16 %v20552_v14  ;;  %v14255_v4 = vunpack.i.l.bf16 %v20552_v14 }
 0x78e   : > { %20530 = vst [vmem:[#allocation24_spill] sm:$0xff] %v18871_v62  ;;  %v8245_v45 = vsel %vm20531_vm14, %v14245_v41, %v14246_v23  ;;  %vm20532_vm0 = vmmov %vm20529_vm8  ;;  %v20537_v41 = vld [vmem:[#allocation27_spill] sm:$0xff]  ;;  %v20562_v62 = vld [vmem:[#allocation57_spill] sm:$0xff] }
 0x78f   : > { %11607 = vmatpush1.bf16.msra.mxu0 %v11606_v60  ;;  %v18879_v36 = vsel %vm20532_vm0, %v14410_v16, %v14411_v29  ;;  %vm20534_vm7 = vmmov %vm20532_vm0  ;;  %v18885_v46 = vpop.permute.xlu0 %14413  ;;  %v11616_v27 = vpack.c.bf16 %v20538_v13, %v20537_v41  ;;  %14698 = vrot.lane.b32.xlu0 %v20144_v28, %s19995_s18  ;;  %v20541_v29 = vld [vmem:[#allocation28_spill] sm:$0xff]  ;;  %v14420_v41 = vunpack.i.l.bf16 %v18458_v33  ;;  %v18902_v13 = vpop.permute.xlu1 %14553 }
 0x790   : > { %11609 = vmatprep.subr.bf16.mxu0 %v11608_v49  ;;  %20533 = vst [vmem:[#allocation73_spill] sm:$0xff] %v18879_v36  ;;  %v8243_v25 = vsel %vm20534_vm7, %v13961_v34, %v14080_v59  ;;  %vm20535_vm9 = vmmov %vm20532_vm0  ;;  %v14416_v7 = vunpack.i.h.bf16 %v18885_v46  ;;  %v19810_v38 = vunpack.i.l.bf16 %v18885_v46  ;;  %v14086_v59 = vunpack.i.h.bf16 %v20539_v24 }
 0x791   : > { %v8246_v31 = vsel %vm20535_vm9, %v14246_v23, %v14410_v16  ;;  %vm20536_vm3 = vmmov %vm20532_vm0  ;;  %v20540_v23 = vld [vmem:[#allocation56_spill] sm:$0xff]  ;;  %v20542_v16 = vld [vmem:[#allocation15_spill] sm:$0xff]  ;;  %20544 = vst [vmem:[#allocation26_spill] sm:$0xff] %v18902_v13  ;;  %vm20551_vm0 = vcmask 1031168   ;;  %vm20553_vm7 = vcmask 1022976   ;;  %vm20554_vm9 = vcmask 883712  }
 0x792   : > { %v11612_v47 = vpack.c.bf16 %v8246_v31, %v8243_v25  ;;  %v8242_v60 = vsel %vm20536_vm3, %v13960_v44, %v13961_v34  ;;  %v19809_v48 = vunpack.i.l.bf16 %v20540_v23  ;;  %v14085_v34 = vunpack.i.l.bf16 %v20539_v24  ;;  %v20543_v44 = vld [vmem:[#allocation33_spill] sm:$0xff]  ;;  %vm20546_vm1 = vmmov %vm20545_vm2 }
 0x793   : > { %11611 = vmatpush1.bf16.msra.mxu0 %v11610_v61  ;;  %v11614_v49 = vpack.c.bf16 %v8245_v45, %v8242_v60  ;;  %v11618_v61 = vpack.c.bf16 %v20542_v16, %v20541_v29  ;;  %v19814_v25 = vunpack.i.h.bf16 %v20543_v44  ;;  %v19815_v31 = vunpack.i.h.bf16 %v18458_v33  ;;  %v18904_v45 = vpop.permute.xlu0 %14423  ;;  %v20547_v29 = vld [vmem:[#allocation22_spill] sm:$0xff]  ;;  %14708 = vrot.lane.b32.xlu0 %v17979_v56, %s20354_s17  ;;  %vm20549_vm8 = vmmov %vm20546_vm1 }
 0x794   : > { %11613 = vmatprep.subr.bf16.mxu0 %v11612_v47  ;;  %v8305_v47 = vsel %vm20545_vm2, %v14086_v59, %v19810_v38  ;;  %v8308_v60 = vsel %vm20546_vm1, %v14416_v7, %v19809_v48  ;;  %v14095_v24 = vunpack.i.l.bf16 %v20543_v44  ;;  %v19816_v16 = vunpack.i.h.bf16 %v20547_v29  ;;  %vm20550_vm14 = vmmov %vm20546_vm1 }
 0x795   : > { %v19817_v40 = vunpack.i.l.bf16 %v20547_v29  ;;  %v14251_v19 = vunpack.i.h.bf16 %v20540_v23  ;;  %v11620_v39 = vpack.c.bf16 %v8308_v60, %v8305_v47  ;;  %v8304_v21 = vsel %vm20550_vm14, %v14085_v34, %v14086_v59  ;;  %v20555_v59 = vld [vmem:[#allocation21_spill] sm:$0xff]  ;;  %v18943_v47 = vpop.permute.xlu1 %14563  ;;  %vm20557_vm3 = vmmov %vm20551_vm0 }
 0x796   : > { %v19821_v9 = vunpack.i.h.bf16 %v18904_v45  ;;  %v14425_v48 = vunpack.i.l.bf16 %v18904_v45  ;;  %20556 = vst [vmem:[#allocation23_spill] sm:$0xff] %v18943_v47  ;;  %vm20559_vm2 = vmmov %vm20551_vm0  ;;  %v20565_v22 = vunpack.i.h.bf16 %v20555_v59 }
 0x797   : > { %11615 = vmatpush1.bf16.msra.mxu0 %v11614_v49  ;;  %v20548_v49 = vld [vmem:[#allocation50_spill] sm:$0xff]  ;;  %v8307_v1 = vsel %vm20549_vm8, %v14251_v19, %v14416_v7  ;;  %v18924_v38 = vpop.permute.xlu0 %14433  ;;  %v8405_v19 = vsel %vm20553_vm7, %v14095_v24, %v19814_v25  ;;  %v18939_v7 = vsel %vm20554_vm9, %v19817_v40, %v19816_v16  ;;  %14718 = vrot.lane.b32.xlu0 %v17937_v42, %s20354_s17  ;;  %vm20560_vm1 = vmmov %vm20553_vm7  ;;  %v14056_v25 = vunpack.i.h.bf16 %v20507_v10 }
 0x798   : > { %11617 = vmatprep.subr.bf16.mxu0 %v11616_v27  ;;  %v19818_v20 = vunpack.i.h.bf16 %v20548_v49  ;;  %v14090_v0 = vunpack.i.l.bf16 %v20548_v49  ;;  %v8358_v27 = vsel %vm20551_vm0, %v14420_v41, %v19815_v31  ;;  %v11622_v60 = vpack.c.bf16 %v8307_v1, %v8304_v21  ;;  %vm20561_vm8 = vmmov %vm20551_vm0 }
 0x799   : > { %v8357_v16 = vsel %vm20559_vm2, %v14256_v53, %v14420_v41  ;;  %v14430_v21 = vunpack.i.l.bf16 %v18504_v52  ;;  %v14261_v53 = vunpack.i.h.bf16 %v20562_v62  ;;  %v14260_v41 = vunpack.i.l.bf16 %v20562_v62  ;;  %vm20564_vm14 = vmmov %vm20560_vm1 }
 0x79a   : > { %v8355_v14 = vsel %vm20557_vm3, %v14090_v0, %v19818_v20  ;;  %v8408_v20 = vsel %vm20560_vm1, %v14425_v48, %v19821_v9  ;;  %v8354_v31 = vsel %vm20561_vm8, %v14255_v4, %v14090_v0  ;;  %v20566_v4 = vunpack.i.l.bf16 %v20555_v59  ;;  %vm20577_vm3 = vmmov %vm20560_vm1 }
 0x79b   : > { %11619 = vmatpush1.bf16.msra.mxu0 %v11618_v61  ;;  %v11624_v40 = vpack.c.bf16 %v8358_v27, %v8355_v14  ;;  %v14051_v61 = vunpack.i.h.bf16 %v20496_v54  ;;  %v18956_v1 = vpop.permute.xlu0 %14443  ;;  %v20563_v27 = vld [vmem:[#allocation67_spill] sm:$0xff]  ;;  %14728 = vrot.lane.b32.xlu0 %v17756_v12, %s20387_s13  ;;  %v8407_v36 = vsel %vm20564_vm14, %v14261_v53, %v14425_v48  ;;  %v11628_v9 = vpack.c.bf16 %v8408_v20, %v8405_v19  ;;  %v18985_v12 = vpop.permute.xlu1 %14573 }
 0x79c   : > { %11621 = vmatprep.subr.bf16.mxu0 %v11620_v39  ;;  %v20558_v39 = vld [vmem:[#allocation35_spill] sm:$0xff]  ;;  %v14100_v34 = vunpack.i.l.bf16 %v20563_v27  ;;  %vm20567_vm0 = vcmask 867328   ;;  %vm20570_vm7 = vcmask 850944   ;;  %20572 = vst [vmem:[#allocation59_spill] sm:$0xff] %v18985_v12  ;;  %v14435_v48 = vunpack.i.l.bf16 %v18924_v38 }
 0x79d   : > { %v18975_v0 = vsel %vm20567_vm0, %v20566_v4, %v20565_v22  ;;  %v20568_v62 = vunpack.i.h.bf16 %v20558_v39  ;;  %v20573_v22 = vunpack.i.h.bf16 %v18504_v52  ;;  %vm20574_vm9 = vcmask 891904  }
 0x79e   : > { %v20575_v4 = vunpack.i.l.bf16 %v20496_v54  ;;  %v8404_v12 = vsel %vm20577_vm3, %v14260_v41, %v14095_v24  ;;  %v20578_v54 = vunpack.i.h.bf16 %v20563_v27  ;;  %vm20579_vm2 = vmmov %vm20574_vm9  ;;  %vm20584_vm14 = vcmask 883712  }
 0x79f   : > { %11623 = vmatpush1.bf16.msra.mxu0 %v11622_v60  ;;  %v11626_v60 = vpack.c.bf16 %v8357_v16, %v8354_v31  ;;  %v20571_v31 = vld [vmem:[#allocation69_spill] sm:$0xff]  ;;  %v18989_v19 = vpop.permute.xlu0 %14453  ;;  %v8458_v53 = vsel %vm20574_vm9, %v14430_v21, %v20573_v22  ;;  %v11630_v47 = vpack.c.bf16 %v8407_v36, %v8404_v12  ;;  %14738 = vrot.lane.b32.xlu0 %v20144_v28, %s20297_s1  ;;  %v20580_v22 = vld [vmem:[#allocation52_spill] sm:$0xff]  ;;  %vm20581_vm1 = vmmov %vm20579_vm2  ;;  %v14440_v36 = vunpack.i.l.bf16 %v18552_v32 }
 0x7a0   : > { %11625 = vmatprep.subr.bf16.mxu0 %v11624_v40  ;;  %v20569_v40 = vunpack.i.l.bf16 %v20558_v39  ;;  %v14265_v16 = vunpack.i.l.bf16 %v20571_v31  ;;  %v14266_v20 = vunpack.i.h.bf16 %v20571_v31  ;;  %vm20582_vm8 = vmmov %vm20581_vm1  ;;  %v20583_v12 = vunpack.i.h.bf16 %v18924_v38 }
 0x7a1   : > { %vm20588_vm0 = vmmov %vm20584_vm14 }
 0x7a2   : > { %v18982_v14 = vsel %vm20570_vm7, %v20569_v40, %v20568_v62  ;;  %v7944_v62 = vsel %vm1161_vm10, %v20575_v4, %v14051_v61  ;;  %v20576_v40 = vunpack.i.l.bf16 %v20507_v10  ;;  %v8455_v61 = vsel %vm20579_vm2, %v14100_v34, %v20578_v54  ;;  %v20585_v54 = vld [vmem:[#allocation74_spill] sm:$0xff]  ;;  %vm20597_vm3 = vmmov %vm20588_vm0 }
 0x7a3   : > { %11627 = vmatpush1.bf16.msra.mxu0 %v11626_v60  ;;  %v14381_v60 = vunpack.i.h.bf16 %v18730_v2  ;;  %v14061_v10 = vunpack.i.h.bf16 %v20510_v37  ;;  %v8457_v4 = vsel %vm20581_vm1, %v14266_v20, %v14430_v21  ;;  %v11632_v31 = vpack.c.bf16 %v8458_v53, %v8455_v61  ;;  %v14459_v41 = vpop.permute.xlu0 %14458  ;;  %v19023_v53 = vpop.permute.xlu1 %14583  ;;  %14748 = vrot.lane.b32.xlu0 %v20144_v28, %s20387_s13 }
 0x7a4   : > { %v19000_v5 = vsel %vm1212_vm11, %v20576_v40, %v14056_v25  ;;  %11629 = vmatprep.subr.bf16.mxu0 %v11628_v9  ;;  %v8454_v24 = vsel %vm20582_vm8, %v14265_v16, %v14100_v34  ;;  %v8508_v40 = vsel %vm20584_vm14, %v14435_v48, %v20583_v12  ;;  %v14271_v58 = vunpack.i.h.bf16 %v20585_v54  ;;  %v20586_v34 = vld [vmem:[#allocation55_spill] sm:$0xff] }
 0x7a5   : > { %v14270_v50 = vunpack.i.l.bf16 %v20585_v54  ;;  %v14461_v25 = vunpack.i.h.bf16 %v14459_v41  ;;  %v14460_v13 = vunpack.i.l.bf16 %v14459_v41  ;;  %v14110_v21 = vunpack.i.l.bf16 %v20580_v22 }
 0x7a6   : > { %v14275_v16 = vunpack.i.l.bf16 %v20586_v34  ;;  %v11634_v20 = vpack.c.bf16 %v8457_v4, %v8454_v24  ;;  %v8507_v12 = vsel %vm20588_vm0, %v14271_v58, %v14435_v48  ;;  %v11636_v54 = vpack.c.bf16 %v8508_v40, %v18939_v7  ;;  %v20598_v40 = vld [vmem:[#allocation68_spill] sm:$0xff] }
 0x7a7   : > { %11631 = vmatpush1.bf16.msra.mxu0 %v11630_v47  ;;  %v20587_v47 = vunpack.i.l.bf16 %v18730_v2  ;;  %vm20590_vm7 = vcmask 1039360   ;;  %v20591_v9 = vunpack.i.l.bf16 %v20540_v23  ;;  %v19829_v24 = vunpack.i.h.bf16 %v18956_v1  ;;  %14758 = vrot.lane.b32.xlu0 %v17979_v56, %s20403_s12 }
 0x7a8   : > { %11633 = vmatprep.subr.bf16.mxu0 %v11632_v31  ;;  %v20589_v31 = vunpack.i.l.bf16 %v18885_v46  ;;  %vm20592_vm9 = vmmov %vm20590_vm7  ;;  %v14445_v2 = vunpack.i.l.bf16 %v18956_v1  ;;  %v20593_v58 = vunpack.i.h.bf16 %v18552_v32  ;;  %v20595_v46 = vunpack.i.l.bf16 %v20510_v37 }
 0x7a9   : > { %v7947_v61 = vsel %vm1161_vm10, %v20587_v47, %v14381_v60  ;;  %v8309_v4 = vsel %vm20592_vm9, %v20591_v9, %v14461_v25  ;;  %v19040_v60 = vpop.permute.xlu0 %14468  ;;  %vm20594_vm10 = vcmask 875520   ;;  %v14276_v23 = vunpack.i.h.bf16 %v20586_v34 }
 0x7aa   : > { %v8306_v41 = vsel %vm20590_vm7, %v20589_v31, %v14460_v13  ;;  %v8558_v7 = vsel %vm20594_vm10, %v14440_v36, %v20593_v58  ;;  %v19048_v13 = vsel %vm1263_vm13, %v20595_v46, %v14061_v10  ;;  %v20596_v48 = vunpack.i.l.bf16 %v20547_v29  ;;  %vm20600_vm2 = vmmov %vm20594_vm10  ;;  %v19067_v46 = vpop.permute.xlu1 %14593 }
 0x7ab   : > { %11635 = vmatpush1.bf16.msra.mxu0 %v11634_v20  ;;  %v11752_v47 = vpack.c.bf16 %v8309_v4, %v8306_v41  ;;  %v11754_v9 = vpack.c.bf16 %v7947_v61, %v7944_v62  ;;  %v14386_v31 = vunpack.i.h.bf16 %v18761_v11  ;;  %v20599_v37 = vunpack.i.h.bf16 %v20580_v22  ;;  %vm20601_vm1 = vmmov %vm20600_vm2  ;;  %v20603_v61 = vld [vmem:[#allocation58_spill] sm:$0xff]  ;;  %14768 = vrot.lane.b32.xlu0 %v17937_v42, %s20403_s12 }
 0x7ac   : > { %v8504_v25 = vsel %vm20597_vm3, %v14270_v50, %v20596_v48  ;;  %11637 = vmatprep.subr.bf16.mxu0 %v11636_v54  ;;  %v14120_v34 = vunpack.i.l.bf16 %v20598_v40  ;;  %v8554_v4 = vsel %vm20601_vm1, %v14275_v16, %v14110_v21  ;;  %vm20602_vm8 = vmmov %vm20601_vm1  ;;  %v14286_v54 = vunpack.i.h.bf16 %v20603_v61 }
 0x7ad   : > { %v11638_v41 = vpack.c.bf16 %v8507_v12, %v8504_v25  ;;  %11753 = vmatprep.subr.bf16.mxu1 %v11752_v47  ;;  %v8555_v10 = vsel %vm20600_vm2, %v14110_v21, %v20599_v37  ;;  %v8557_v50 = vsel %vm20602_vm8, %v14276_v23, %v14440_v36  ;;  %v14451_v12 = vunpack.i.h.bf16 %v18588_v55  ;;  %v14479_v47 = vpop.permute.xlu0 %14478  ;;  %v20605_v25 = vld [vmem:[#allocation77_spill] sm:$0xff] }
 0x7ae   : > { %11755 = vmatpush3.bf16.msra.mxu1 %v11754_v9  ;;  %v11640_v62 = vpack.c.bf16 %v8558_v7, %v8555_v10  ;;  %v14450_v58 = vunpack.i.l.bf16 %v18588_v55  ;;  %vm20604_vm14 = vcmask 867328   ;;  %v14281_v21 = vunpack.i.h.bf16 %v20605_v25 }
 0x7af   : > { %11639 = vmatpush1.bf16.msra.mxu0 %v11638_v41  ;;  %v8608_v48 = vsel %vm20604_vm14, %v14445_v2, %v19829_v24  ;;  %v14280_v36 = vunpack.i.l.bf16 %v20605_v25  ;;  %v14481_v16 = vunpack.i.h.bf16 %v14479_v47  ;;  %v14480_v7 = vunpack.i.l.bf16 %v14479_v47  ;;  %vm20607_vm0 = vmmov %vm20604_vm14  ;;  %14778 = vrot.lane.b32.xlu0 %v20144_v28, %s20308_s2 }
 0x7b0   : > { %11641 = vmatprep.subr.bf16.mxu0 %v11640_v62  ;;  %v14285_v23 = vunpack.i.l.bf16 %v20603_v61  ;;  %v11642_v9 = vpack.c.bf16 %v8557_v50, %v8554_v4  ;;  %v20606_v37 = vunpack.i.l.bf16 %v18761_v11  ;;  %v8607_v41 = vsel %vm20607_vm0, %v14281_v21, %v14445_v2  ;;  %vm20614_vm10 = vmmov %vm20607_vm0 }
 0x7b1   : > { %v11644_v24 = vpack.c.bf16 %v8608_v48, %v18975_v0  ;;  %v20608_v20 = vunpack.i.h.bf16 %v20548_v49  ;;  %vm20609_vm7 = vcmask 1031168   ;;  %v20610_v62 = vunpack.i.h.bf16 %v18458_v33  ;;  %v19102_v48 = vpop.permute.xlu1 %14603 }
 0x7b2   : > { %v7997_v10 = vsel %vm1212_vm11, %v20606_v37, %v14386_v31  ;;  %vm20611_vm9 = vmmov %vm20609_vm7  ;;  %v14456_v4 = vunpack.i.h.bf16 %v18989_v19  ;;  %v14455_v11 = vunpack.i.l.bf16 %v18989_v19  ;;  %v19090_v31 = vpop.permute.xlu0 %14488  ;;  %vm20612_vm11 = vcmask 859136  }
 0x7b3   : > { %v8356_v25 = vsel %vm20609_vm7, %v20608_v20, %v14480_v7  ;;  %v8359_v61 = vsel %vm20611_vm9, %v20610_v62, %v14481_v16  ;;  %11643 = vmatpush1.bf16.msra.mxu0 %v11642_v9  ;;  %v8658_v0 = vsel %vm20612_vm11, %v14450_v58, %v14451_v12  ;;  %v14066_v49 = vunpack.i.h.bf16 %v20513_v35  ;;  %vm20615_vm3 = vmmov %vm20612_vm11  ;;  %14788 = vrot.lane.b32.xlu0 %v17979_v56, %s20424_s11 }
 0x7b4   : > { %v11756_v42 = vpack.c.bf16 %v8359_v61, %v8356_v25  ;;  %v20613_v2 = vunpack.i.l.bf16 %v20555_v59  ;;  %v8657_v20 = vsel %vm20615_vm3, %v14286_v54, %v14450_v58  ;;  %v11758_v50 = vpack.c.bf16 %v7997_v10, %v19000_v5  ;;  %11645 = vmatprep.subr.bf16.mxu0 %v11644_v24  ;;  %vm20616_vm2 = vmmov %vm20615_vm3  ;;  %v19117_v10 = vld [vmem:[%s20307_s29 + $0xf0] sm:$0xff] }
 0x7b5   : > { %v8654_v47 = vsel %vm20616_vm2, %v14285_v23, %v14120_v34  ;;  %v14391_v21 = vunpack.i.h.bf16 %v18787_v43  ;;  %v20617_v7 = vunpack.i.h.bf16 %v20598_v40  ;;  %vm20618_vm1 = vmmov %vm20616_vm2  ;;  %v14291_v54 = vunpack.i.h.bf16 %v18414_v63  ;;  %v19146_v56 = vpop.permute.xlu1 %14613 }
 0x7b6   : > { %v8604_v33 = vsel %vm20614_vm10, %v14280_v36, %v20613_v2  ;;  %11757 = vmatprep.subr.bf16.mxu1 %v11756_v42  ;;  %v14290_v5 = vunpack.i.l.bf16 %v18414_v63  ;;  %v11650_v58 = vpack.c.bf16 %v8657_v20, %v8654_v47  ;;  %v14471_v23 = vunpack.i.h.bf16 %v19040_v60  ;;  %v14499_v37 = vpop.permute.xlu0 %14498 }
 0x7b7   : > { %v11646_v16 = vpack.c.bf16 %v8607_v41, %v8604_v33  ;;  %v8655_v36 = vsel %vm20618_vm1, %v14120_v34, %v20617_v7  ;;  %11759 = vmatpush3.bf16.msra.mxu1 %v11758_v50  ;;  %v14470_v9 = vunpack.i.l.bf16 %v19040_v60  ;;  %vm20619_vm8 = vcmask 850944   ;;  %14798 = vrot.lane.b32.xlu0 %v20144_v28, %s20424_s11 }
 0x7b8   : > { %v11648_v24 = vpack.c.bf16 %v8658_v0, %v8655_v36  ;;  %v8708_v34 = vsel %vm20619_vm8, %v14455_v11, %v14456_v4  ;;  %v14466_v63 = vunpack.i.h.bf16 %v18624_v57  ;;  %v14465_v41 = vunpack.i.l.bf16 %v18624_v57  ;;  %vm20621_vm14 = vmmov %vm20619_vm8 }
 0x7b9   : > { %11647 = vmatpush1.bf16.msra.mxu0 %v11646_v16  ;;  %v14501_v25 = vunpack.i.h.bf16 %v14499_v37  ;;  %v14500_v62 = vunpack.i.l.bf16 %v14499_v37  ;;  %v14475_v61 = vunpack.i.l.bf16 %v18653_v15  ;;  %v14486_v42 = vunpack.i.h.bf16 %v18683_v3  ;;  %vm20628_vm9 = vmmov %vm20619_vm8 }
 0x7ba   : > { %11649 = vmatprep.subr.bf16.mxu0 %v11648_v24  ;;  %v14485_v0 = vunpack.i.l.bf16 %v18683_v3  ;;  %v20620_v2 = vunpack.i.l.bf16 %v18787_v43  ;;  %v8707_v20 = vsel %vm20621_vm14, %v14291_v54, %v14455_v11  ;;  %v11652_v50 = vpack.c.bf16 %v8708_v34, %v18982_v14  ;;  %v19144_v43 = vld [vmem:[%s20307_s29 + $0x130] sm:$0xff]  ;;  %v19150_v14 = vpop.permute.xlu0 %14508 }
 0x7bb   : > { %v20622_v47 = vunpack.i.h.bf16 %v20543_v44  ;;  %vm20623_vm0 = vcmask 1022976   ;;  %v20624_v7 = vunpack.i.h.bf16 %v18904_v45  ;;  %v19830_v11 = vunpack.i.h.bf16 %v19090_v31 }
 0x7bc   : > { %v8047_v33 = vsel %vm1263_vm13, %v20620_v2, %v14391_v21  ;;  %9942 = vmatmul.mubr.f32.vlgmr.msra.gmra.mrb[24].mxu0 %v19117_v10  ;;  %vm20625_vm7 = vmmov %vm20623_vm0  ;;  %v14490_v21 = vunpack.i.l.bf16 %v19090_v31  ;;  %vm20626_vm13 = vcmask 842752   ;;  %v20627_v54 = vunpack.i.l.bf16 %v20558_v39 }
 0x7bd   : > { %v8406_v16 = vsel %vm20623_vm0, %v20622_v47, %v14500_v62  ;;  %v8409_v36 = vsel %vm20625_vm7, %v20624_v7, %v14501_v25  ;;  %11651 = vmatpush1.bf16.msra.mxu0 %v11650_v58  ;;  %v8758_v45 = vsel %vm20626_vm13, %v14470_v9, %v14471_v23  ;;  %9947 = vmatprep.mubr.f32.mxu0 %v19144_v43  ;;  %v14476_v37 = vunpack.i.h.bf16 %v18653_v15  ;;  %vm20630_vm11 = vmmov %vm20626_vm13  ;;  %v19193_v7 = vld [vmem:[%s20307_s29 + $0x128] sm:$0xff] }
 0x7be   : > { %v11760_v44 = vpack.c.bf16 %v8409_v36, %v8406_v16  ;;  %v8704_v24 = vsel %vm20628_vm9, %v14290_v5, %v20627_v54  ;;  %v14495_v34 = vunpack.i.l.bf16 %v18714_v6  ;;  %v11762_v25 = vpack.c.bf16 %v8047_v33, %v19048_v13  ;;  %11653 = vmatprep.subr.bf16.mxu0 %v11652_v50  ;;  %vm20631_vm10 = vmmov %vm20630_vm11 }
 0x7bf   : > { %v20629_v58 = vunpack.i.l.bf16 %v20513_v35  ;;  %v14396_v2 = vunpack.i.h.bf16 %v18806_v18  ;;  %v11654_v47 = vpack.c.bf16 %v8707_v20, %v8704_v24  ;;  %v8755_v15 = vsel %vm20630_vm11, %v14465_v41, %v14466_v63  ;;  %vm20632_vm3 = vmmov %vm20631_vm10  ;;  %v10546_v35 = vld [vmem:[%s20437_s19 + $0x28] sm:$0xff] }
 0x7c0   : > { %11761 = vmatprep.subr.bf16.mxu1 %v11760_v44  ;;  %v8754_v5 = vsel %vm20631_vm10, %v14475_v61, %v14465_v41  ;;  %v8757_v13 = vsel %vm20632_vm3, %v14476_v37, %v14470_v9  ;;  %v11656_v33 = vpack.c.bf16 %v8758_v45, %v8755_v15  ;;  %vm20633_vm2 = vcmask 711680   ;;  %v19182_v20 = vld [vmem:[%s20307_s29 + $0x108] sm:$0xff]  ;;  %v14519_v61 = vpop.permute.xlu0 %14518  ;;  %9948 = vmatmul.mubr.f32.gmra.mrb[26].mxu0 %v19193_v7 }
 0x7c1   : > { %v8094_v62 = vsel %vm1314_vm15, %v20629_v58, %v14066_v49  ;;  %11763 = vmatpush3.bf16.msra.mxu1 %v11762_v25  ;;  %v8805_v49 = vsel %vm20633_vm2, %v14485_v0, %v14486_v42  ;;  %v14496_v50 = vunpack.i.h.bf16 %v18714_v6  ;;  %v14511_v41 = vunpack.i.h.bf16 %v19150_v14  ;;  %11655 = vmatpush1.bf16.msra.mxu0 %v11654_v47  ;;  %vm20634_vm1 = vmmov %vm20633_vm2  ;;  %v19203_v58 = vpop.permute.xlu1 %14623 }
 0x7c2   : > { %v14510_v9 = vunpack.i.l.bf16 %v19150_v14  ;;  %v8808_v16 = vsel %vm20634_vm1, %v14490_v21, %v19830_v11  ;;  %vm20635_vm8 = vmmov %vm20634_vm1  ;;  %v14506_v44 = vunpack.i.h.bf16 %v18744_v8  ;;  %v14521_v6 = vunpack.i.h.bf16 %v14519_v61  ;;  %11657 = vmatprep.subr.bf16.mxu0 %v11656_v33  ;;  %9791 = vperm.xlu0 %12880, %v10546_v35  }
 0x7c3   : > { %v8804_v36 = vsel %vm20635_vm8, %v14495_v34, %v14485_v0  ;;  %v14520_v45 = vunpack.i.l.bf16 %v14519_v61  ;;  %v14505_v54 = vunpack.i.l.bf16 %v18744_v8  ;;  %v14515_v24 = vunpack.i.l.bf16 %v18785_v17  ;;  %10018 = vmatprep.mubr.f32.mxu0 %v19182_v20  ;;  %vm20637_vm14 = vmmov %vm20634_vm1 }
 0x7c4   : > { %v20636_v37 = vunpack.i.l.bf16 %v18806_v18  ;;  %v11658_v47 = vpack.c.bf16 %v8757_v13, %v8754_v5  ;;  %v8807_v0 = vsel %vm20637_vm14, %v14496_v50, %v14490_v21  ;;  %v11660_v34 = vpack.c.bf16 %v8808_v16, %v8805_v49  ;;  %v19215_v5 = vpop.permute.xlu0 %14528 }
 0x7c5   : > { %v20638_v15 = vunpack.i.h.bf16 %v20563_v27  ;;  %vm20639_vm0 = vcmask 891904   ;;  %v20640_v61 = vunpack.i.h.bf16 %v18504_v52  ;;  %v14526_v18 = vunpack.i.h.bf16 %v18814_v30 }
 0x7c6   : > { %v8097_v25 = vsel %vm1314_vm15, %v20636_v37, %v14396_v2  ;;  %vm20641_vm7 = vmmov %vm20639_vm0  ;;  %v14525_v2 = vunpack.i.l.bf16 %v18814_v30  ;;  %11659 = vmatpush1.bf16.msra.mxu0 %v11658_v47  ;;  %vm20642_vm15 = vcmask 703488   ;;  %v14516_v27 = vunpack.i.h.bf16 %v18785_v17  ;;  %v19228_v37 = vpop.permute.xlu1 %14633 }
 0x7c7   : > { %v8456_v33 = vsel %vm20639_vm0, %v20638_v15, %v14520_v45  ;;  %v8459_v11 = vsel %vm20641_vm7, %v20640_v61, %v14521_v6  ;;  %v8858_v21 = vsel %vm20642_vm15, %v14510_v9, %v14511_v41  ;;  %v11766_v35 = vpack.c.bf16 %v8097_v25, %v8094_v62  ;;  %11661 = vmatprep.subr.bf16.mxu0 %v11660_v34  ;;  %vm20643_vm13 = vmmov %vm20642_vm15  ;;  %v20648_v34 = vld [vmem:[#allocation26_spill] sm:$0xff] }
 0x7c8   : > { %v11764_v13 = vpack.c.bf16 %v8459_v11, %v8456_v33  ;;  %v14531_v49 = vunpack.i.h.bf16 %v19215_v5  ;;  %v14530_v52 = vunpack.i.l.bf16 %v19215_v5  ;;  %v11662_v50 = vpack.c.bf16 %v8807_v0, %v8804_v36  ;;  %vm20644_vm9 = vmmov %vm20643_vm13  ;;  %v14539_v17 = vpop.permute.xlu0 %14538 }
 0x7c9   : > { %v8855_v16 = vsel %vm20643_vm13, %v14505_v54, %v14506_v44  ;;  %v8857_v11 = vsel %vm20644_vm9, %v14516_v27, %v14510_v9  ;;  %vm20645_vm11 = vmmov %vm20644_vm9  ;;  %vm20646_vm10 = vcmask 695296   ;;  %v14536_v25 = vunpack.i.h.bf16 %v18849_v51 }
 0x7ca   : > { %11765 = vmatprep.subr.bf16.mxu1 %v11764_v13  ;;  %v11664_v6 = vpack.c.bf16 %v8858_v21, %v8855_v16  ;;  %v8854_v45 = vsel %vm20645_vm11, %v14515_v24, %v14505_v54  ;;  %11663 = vmatpush1.bf16.msra.mxu0 %v11662_v50  ;;  %v8905_v62 = vsel %vm20646_vm10, %v14525_v2, %v14526_v18  ;;  %vm20647_vm3 = vmmov %vm20646_vm10  ;;  %v14535_v9 = vunpack.i.l.bf16 %v18849_v51 }
 0x7cb   : > { %11767 = vmatpush3.bf16.msra.mxu1 %v11766_v35  ;;  %v8908_v36 = vsel %vm20647_vm3, %v14530_v52, %v14531_v49  ;;  %v14541_v47 = vunpack.i.h.bf16 %v14539_v17  ;;  %v14540_v0 = vunpack.i.l.bf16 %v14539_v17  ;;  %v14546_v54 = vunpack.i.h.bf16 %v18873_v26  ;;  %vm20649_vm2 = vmmov %vm20647_vm3 }
 0x7cc   : > { %11665 = vmatprep.subr.bf16.mxu0 %v11664_v6  ;;  %v14545_v24 = vunpack.i.l.bf16 %v18873_v26  ;;  %v14555_v15 = vunpack.i.l.bf16 %v20648_v34  ;;  %v11666_v33 = vpack.c.bf16 %v8857_v11, %v8854_v45  ;;  %v8907_v61 = vsel %vm20649_vm2, %v14536_v25, %v14530_v52  ;;  %v19248_v50 = vpop.permute.xlu0 %14548  ;;  %vm20654_vm14 = vmmov %vm20649_vm2  ;;  %v20658_v25 = vld [vmem:[#allocation70_spill] sm:$0xff] }
 0x7cd   : > { %v11668_v13 = vpack.c.bf16 %v8908_v36, %v8905_v62  ;;  %v20650_v21 = vunpack.i.h.bf16 %v20547_v29  ;;  %vm20651_vm1 = vcmask 883712   ;;  %v20652_v35 = vunpack.i.h.bf16 %v18924_v38  ;;  %v19254_v29 = vpop.permute.xlu1 %14643  ;;  %v20657_v36 = vld [vmem:[#allocation72_spill] sm:$0xff] }
 0x7ce   : > { %vm20653_vm8 = vmmov %vm20651_vm1  ;;  %11667 = vmatpush1.bf16.msra.mxu0 %v11666_v33  ;;  %v8904_v6 = vsel %vm20654_vm14, %v14535_v9, %v14525_v2  ;;  %v14556_v17 = vunpack.i.h.bf16 %v20648_v34  ;;  %v14551_v11 = vunpack.i.h.bf16 %v19248_v50  ;;  %v14550_v52 = vunpack.i.l.bf16 %v19248_v50 }
 0x7cf   : > { %v8506_v27 = vsel %vm20651_vm1, %v20650_v21, %v14540_v0  ;;  %v8509_v51 = vsel %vm20653_vm8, %v20652_v35, %v14541_v47  ;;  %11669 = vmatprep.subr.bf16.mxu0 %v11668_v13  ;;  %v11670_v45 = vpack.c.bf16 %v8907_v61, %v8904_v6  ;;  %vm20655_vm0 = vcmask 687104   ;;  %v20662_v13 = vld [vmem:[#allocation23_spill] sm:$0xff] }
 0x7d0   : > { %v11768_v16 = vpack.c.bf16 %v8509_v51, %v8506_v27  ;;  %v8954_v38 = vsel %vm20655_vm0, %v14555_v15, %v14545_v24  ;;  %vm20656_vm7 = vmmov %vm20655_vm0  ;;  %v20659_v47 = vpack.c.bf16 %v20657_v36, %v20658_v25  ;;  %v14559_v34 = vpop.permute.xlu0 %14558  ;;  %v14566_v21 = vunpack.i.h.bf16 %v20662_v13  ;;  %v20663_v35 = vld [vmem:[#allocation59_spill] sm:$0xff] }
 0x7d1   : > { %v8957_v62 = vsel %vm20656_vm7, %v14556_v17, %v14550_v52  ;;  %vm20660_vm15 = vmmov %vm20655_vm0  ;;  %v14561_v61 = vunpack.i.h.bf16 %v14559_v34  ;;  %v14560_v15 = vunpack.i.l.bf16 %v14559_v34  ;;  %v14565_v27 = vunpack.i.l.bf16 %v20662_v13  ;;  %v10542_v13 = vld [vmem:[%s20307_s29 + $0x138] sm:$0xff] }
 0x7d2   : > { %11769 = vmatprep.subr.bf16.mxu1 %v11768_v16  ;;  %v8955_v2 = vsel %vm20660_vm15, %v14545_v24, %v14546_v54  ;;  %vm20661_vm13 = vmmov %vm20655_vm0  ;;  %v11674_v0 = vpack.c.bf16 %v8957_v62, %v8954_v38  ;;  %11671 = vmatpush1.bf16.msra.mxu0 %v11670_v45  ;;  %v14575_v51 = vunpack.i.l.bf16 %v20663_v35  ;;  %v20664_v16 = vunpack.i.h.bf16 %v20580_v22 }
 0x7d3   : > { %11771 = vmatpush3.bf16.msra.mxu1 %v20659_v47  ;;  %v8958_v9 = vsel %vm20661_vm13, %v14550_v52, %v14551_v11  ;;  %vm20665_vm9 = vcmask 875520   ;;  %v20666_v6 = vunpack.i.h.bf16 %v18552_v32  ;;  %v19276_v52 = vpop.permute.xlu1 %14653  ;;  %v14576_v62 = vunpack.i.h.bf16 %v20663_v35  ;;  %v20670_v32 = vld [vmem:[#allocation71_spill] sm:$0xff] }
 0x7d4   : > { %v11672_v33 = vpack.c.bf16 %v8958_v9, %v8955_v2  ;;  %v8556_v24 = vsel %vm20665_vm9, %v20664_v16, %v14560_v15  ;;  %vm20667_vm11 = vmmov %vm20665_vm9  ;;  %v19278_v45 = vpop.permute.xlu0 %14568  ;;  %vm20668_vm10 = vcmask 678912   ;;  %v20671_v2 = vld [vmem:[#allocation38_spill] sm:$0xff]  ;;  %vm20676_vm8 = vcmask 867328  }
 0x7d5   : > { %v8559_v17 = vsel %vm20667_vm11, %v20666_v6, %v14561_v61  ;;  %v14571_v36 = vunpack.i.h.bf16 %v19278_v45  ;;  %v14570_v25 = vunpack.i.l.bf16 %v19278_v45  ;;  %v9004_v22 = vsel %vm20668_vm10, %v14575_v51, %v14565_v27  ;;  %vm20669_vm3 = vmmov %vm20668_vm10 }
 0x7d6   : > { %11673 = vmatprep.subr.bf16.mxu0 %v11672_v33  ;;  %v11772_v38 = vpack.c.bf16 %v8559_v17, %v8556_v24  ;;  %v20672_v9 = vpack.c.bf16 %v20670_v32, %v20671_v2  ;;  %vm20673_vm2 = vmmov %vm20669_vm3  ;;  %v14586_v51 = vunpack.i.h.bf16 %v19023_v53  ;;  %v14585_v6 = vunpack.i.l.bf16 %v19023_v53 }
 0x7d7   : > { %11675 = vmatpush1.bf16.msra.mxu0 %v11674_v0  ;;  %v9007_v47 = vsel %vm20669_vm3, %v14576_v62, %v14570_v25  ;;  %v9005_v0 = vsel %vm20673_vm2, %v14565_v27, %v14566_v21  ;;  %vm20674_vm1 = vmmov %vm20673_vm2  ;;  %v19295_v24 = vpop.permute.xlu1 %14663  ;;  %v14595_v17 = vunpack.i.l.bf16 %v19067_v46  ;;  %v20675_v27 = vunpack.i.h.bf16 %v20555_v59 }
 0x7d8   : > { %11773 = vmatprep.subr.bf16.mxu1 %v11772_v38  ;;  %v9008_v34 = vsel %vm20674_vm1, %v14570_v25, %v14571_v36  ;;  %v11678_v33 = vpack.c.bf16 %v9007_v47, %v9004_v22  ;;  %v14579_v61 = vpop.permute.xlu0 %14578  ;;  %v20677_v62 = vunpack.i.h.bf16 %v18956_v1  ;;  %vm20678_vm14 = vmmov %vm20676_vm8  ;;  %v14596_v32 = vunpack.i.h.bf16 %v19067_v46 }
 0x7d9   : > { %11775 = vmatpush3.bf16.msra.mxu1 %v20672_v9  ;;  %v11676_v15 = vpack.c.bf16 %v9008_v34, %v9005_v0  ;;  %v14581_v35 = vunpack.i.h.bf16 %v14579_v61  ;;  %v14580_v16 = vunpack.i.l.bf16 %v14579_v61  ;;  %v14616_v0 = vunpack.i.h.bf16 %v19146_v56  ;;  %v20682_v61 = vld [vmem:[#allocation24_spill] sm:$0xff] }
 0x7da   : > { %v14615_v53 = vunpack.i.l.bf16 %v19146_v56  ;;  %vm20679_vm0 = vcmask 670720   ;;  %vm20687_vm9 = vcmask 859136   ;;  %vm20691_vm2 = vcmask 662528  }
 0x7db   : > { %11677 = vmatprep.subr.bf16.mxu0 %v11676_v15  ;;  %v8606_v38 = vsel %vm20676_vm8, %v20675_v27, %v14580_v16  ;;  %v8609_v25 = vsel %vm20678_vm14, %v20677_v62, %v14581_v35  ;;  %v9054_v34 = vsel %vm20679_vm0, %v14595_v17, %v14585_v6  ;;  %vm20680_vm7 = vmmov %vm20679_vm0  ;;  %v19315_v46 = vpop.permute.xlu1 %14673  ;;  %v14605_v17 = vunpack.i.l.bf16 %v19102_v48 }
 0x7dc   : > { %11679 = vmatpush1.bf16.msra.mxu0 %v11678_v33  ;;  %v14589_v22 = vpop.permute.xlu0 %14588  ;;  %v11776_v47 = vpack.c.bf16 %v8609_v25, %v8606_v38  ;;  %v20681_v33 = vld [vmem:[#allocation73_spill] sm:$0xff]  ;;  %vm20684_vm15 = vmmov %vm20679_vm0  ;;  %v14606_v25 = vunpack.i.h.bf16 %v19102_v48  ;;  %v14676_v19 = vunpack.i.h.bf16 %v19315_v46 }
 0x7dd   : > { %v14591_v2 = vunpack.i.h.bf16 %v14589_v22  ;;  %v14590_v9 = vunpack.i.l.bf16 %v14589_v22  ;;  %v20683_v1 = vpack.c.bf16 %v20681_v33, %v20682_v61  ;;  %v9055_v15 = vsel %vm20684_vm15, %v14585_v6, %v14586_v51  ;;  %vm20685_vm13 = vmmov %vm20679_vm0 }
 0x7de   : > { %11777 = vmatprep.subr.bf16.mxu1 %v11776_v47  ;;  %v20686_v22 = vunpack.i.h.bf16 %v20598_v40  ;;  %vm20688_vm11 = vmmov %vm20687_vm9  ;;  %vm20698_vm15 = vcmask 850944  }
 0x7df   : > { %v9057_v59 = vsel %vm20680_vm7, %v14596_v32, %v14590_v9  ;;  %11779 = vmatpush3.bf16.msra.mxu1 %v20683_v1  ;;  %v9058_v35 = vsel %vm20685_vm13, %v14590_v9, %v14591_v2  ;;  %v8659_v6 = vsel %vm20688_vm11, %v14451_v12, %v14616_v0  ;;  %v14626_v32 = vunpack.i.h.bf16 %v19203_v58  ;;  %vm20689_vm10 = vmmov %vm20679_vm0  ;;  %v19331_v12 = vpop.permute.xlu1 %14683 }
 0x7e0   : > { %v11682_v16 = vpack.c.bf16 %v9057_v59, %v9054_v34  ;;  %v14599_v27 = vpop.permute.xlu0 %14598  ;;  %v11680_v38 = vpack.c.bf16 %v9058_v35, %v9055_v15  ;;  %v8656_v47 = vsel %vm20687_vm9, %v20686_v22, %v14615_v53  ;;  %v14625_v9 = vunpack.i.l.bf16 %v19203_v58  ;;  %vm20690_vm3 = vmmov %vm20679_vm0 }
 0x7e1   : > { %v14601_v62 = vunpack.i.h.bf16 %v14599_v27  ;;  %v14600_v56 = vunpack.i.l.bf16 %v14599_v27  ;;  %v11782_v59 = vpack.c.bf16 %v8659_v6, %v8656_v47  ;;  %vm20692_vm1 = vmmov %vm20691_vm2  ;;  %v14636_v35 = vunpack.i.h.bf16 %v19228_v37 }
 0x7e2   : > { %11681 = vmatprep.subr.bf16.mxu0 %v11680_v38  ;;  %10248 = vmatmul.mubr.f32.vlgmr.msra.gmra.mrb[24].mxu1 %v19117_v10  ;;  %v9105_v10 = vsel %vm20691_vm2, %v14605_v17, %v14606_v25  ;;  %vm20693_vm8 = vmmov %vm20692_vm1  ;;  %vm20700_vm9 = vcmask 842752   ;;  %vm20707_vm2 = vcmask 506880  }
 0x7e3   : > { %11683 = vmatpush1.bf16.msra.mxu0 %v11682_v16  ;;  %10252 = vmatprep.mubr.f32.mxu1 %v19144_v43  ;;  %v9056_v48 = vsel %vm20689_vm10, %v14586_v51, %v14600_v56  ;;  %v9059_v40 = vsel %vm20690_vm3, %v14591_v2, %v14601_v62  ;;  %v9106_v43 = vsel %vm20693_vm8, %v14606_v25, %v14625_v9  ;;  %vm20694_vm14 = vmmov %vm20692_vm1  ;;  %v14646_v16 = vunpack.i.h.bf16 %v19254_v29  ;;  %v19344_v62 = vpop.permute.xlu1 %14693 }
 0x7e4   : > { %v14609_v34 = vpop.permute.xlu0 %14608  ;;  %v11780_v53 = vpack.c.bf16 %v9059_v40, %v9056_v48  ;;  %vm20695_vm0 = vmmov %vm20692_vm1  ;;  %v14645_v25 = vunpack.i.l.bf16 %v19254_v29  ;;  %v20697_v29 = vunpack.i.h.bf16 %v20558_v39  ;;  %vm20705_vm10 = vcmask 703488  }
 0x7e5   : > { %v14611_v55 = vunpack.i.h.bf16 %v14609_v34  ;;  %v14610_v33 = vunpack.i.l.bf16 %v14609_v34  ;;  %vm20696_vm7 = vmmov %vm20695_vm0 }
 0x7e6   : > { %10253 = vmatmul.mubr.f32.gmra.mrb[26].mxu1 %v19193_v7  ;;  %11781 = vmatprep.subr.bf16.mxu1 %v11780_v53  ;;  %v14635_v7 = vunpack.i.l.bf16 %v19228_v37  ;;  %vm20699_vm13 = vmmov %vm20698_vm15 }
 0x7e7   : > { %11783 = vmatpush3.bf16.msra.mxu1 %v11782_v59  ;;  %v9108_v58 = vsel %vm20692_vm1, %v14610_v33, %v14611_v55  ;;  %v9109_v51 = vsel %vm20694_vm14, %v14611_v55, %v14626_v32  ;;  %10322 = vmatprep.mubr.f32.mxu1 %v19182_v20  ;;  %v14666_v59 = vunpack.i.h.bf16 %v19295_v24  ;;  %v19352_v55 = vpop.permute.xlu1 %14703  ;;  %vm20701_vm11 = vmmov %vm20700_vm9 }
 0x7e8   : > { %v14619_v2 = vpop.permute.xlu0 %14618  ;;  %v11684_v0 = vpack.c.bf16 %v9108_v58, %v9105_v10  ;;  %v11784_v61 = vpack.c.bf16 %v9109_v51, %v9106_v43  ;;  %v9157_v6 = vsel %vm498_vm4, %v14646_v16, %v14635_v7  ;;  %v9158_v9 = vsel %vm498_vm4, %v14635_v7, %v14636_v35  ;;  %vm20706_vm3 = vmmov %vm20705_vm10 }
 0x7e9   : > { %v14621_v1 = vunpack.i.h.bf16 %v14619_v2  ;;  %v14620_v15 = vunpack.i.l.bf16 %v14619_v2  ;;  %v14665_v58 = vunpack.i.l.bf16 %v19295_v24  ;;  %v8759_v39 = vsel %vm20700_vm9, %v14471_v23, %v14666_v59  ;;  %vm20708_vm1 = vmmov %vm20707_vm2 }
 0x7ea   : > { %11685 = vmatprep.subr.bf16.mxu0 %v11684_v0  ;;  %11785 = vmatprep.subr.bf16.mxu1 %v11784_v61  ;;  %v14656_v61 = vunpack.i.h.bf16 %v19276_v52  ;;  %vm20709_vm8 = vmmov %vm20708_vm1 }
 0x7eb   : > { %v9104_v27 = vsel %vm20695_vm0, %v14620_v15, %v14605_v17  ;;  %v9107_v38 = vsel %vm20696_vm7, %v14621_v1, %v14610_v33  ;;  %v14655_v1 = vunpack.i.l.bf16 %v19276_v52  ;;  %v8756_v7 = vsel %vm20701_vm11, %v14466_v63, %v14665_v58  ;;  %v14714_v16 = vpop.permute.xlu1 %14713  ;;  %vm20710_vm14 = vmmov %vm20708_vm1 }
 0x7ec   : > { %v11686_v20 = vpack.c.bf16 %v9107_v38, %v9104_v27  ;;  %v14629_v56 = vpop.permute.xlu0 %14628  ;;  %v11790_v38 = vpack.c.bf16 %v8759_v39, %v8756_v7  ;;  %v14716_v39 = vunpack.i.h.bf16 %v14714_v16  ;;  %vm20712_vm0 = vmmov %vm20708_vm1  ;;  %vm20713_vm7 = vcmask 498688  }
 0x7ed   : > { %v14631_v22 = vunpack.i.h.bf16 %v14629_v56  ;;  %v14630_v47 = vunpack.i.l.bf16 %v14629_v56  ;;  %v9205_v23 = vsel %vm549_vm5, %v14655_v1, %v14656_v61  ;;  %vm20716_vm9 = vmmov %vm20713_vm7  ;;  %vm20717_vm11 = vcmask 695296  }
 0x7ee   : > { %11687 = vmatpush1.bf16.msra.mxu0 %v11686_v20  ;;  %v8859_v3 = vsel %vm20705_vm10, %v14511_v41, %v14716_v39  ;;  %vm20720_vm10 = vmmov %vm20713_vm7 }
 0x7ef   : > { %v9154_v32 = vsel %vm498_vm4, %v14645_v25, %v14630_v47  ;;  %v9155_v37 = vsel %vm498_vm4, %v14630_v47, %v14631_v22 }
 0x7f0   : > { %v11690_v17 = vpack.c.bf16 %v9157_v6, %v9154_v32  ;;  %v14639_v48 = vpop.permute.xlu0 %14638  ;;  %v11688_v40 = vpack.c.bf16 %v9158_v9, %v9155_v37  ;;  %v14686_v6 = vunpack.i.h.bf16 %v19331_v12  ;;  %v14724_v32 = vpop.permute.xlu1 %14723  ;;  %v14685_v37 = vunpack.i.l.bf16 %v19331_v12 }
 0x7f1   : > { %v14641_v34 = vunpack.i.h.bf16 %v14639_v48  ;;  %v14640_v53 = vunpack.i.l.bf16 %v14639_v48  ;;  %v14696_v9 = vunpack.i.h.bf16 %v19344_v62 }
 0x7f2   : > { %11689 = vmatprep.subr.bf16.mxu0 %v11688_v40  ;;  %v9258_v12 = vsel %vm600_vm6, %v14685_v37, %v14686_v6 }
 0x7f3   : > { %v8706_v33 = vsel %vm20698_vm15, %v20697_v29, %v14640_v53  ;;  %v8709_v10 = vsel %vm20699_vm13, %v14456_v4, %v14641_v34  ;;  %11691 = vmatpush1.bf16.msra.mxu0 %v11690_v17  ;;  %v14675_v4 = vunpack.i.l.bf16 %v19315_v46  ;;  %v14695_v53 = vunpack.i.l.bf16 %v19344_v62  ;;  %vm20714_vm15 = vmmov %vm20713_vm7 }
 0x7f4   : > { %v11786_v43 = vpack.c.bf16 %v8709_v10, %v8706_v33  ;;  %v14649_v51 = vpop.permute.xlu0 %14648  ;;  %v9257_v33 = vsel %vm600_vm6, %v14696_v9, %v14685_v37  ;;  %vm20715_vm13 = vmmov %vm20713_vm7 }
 0x7f5   : > { %v14651_v2 = vunpack.i.h.bf16 %v14649_v51  ;;  %v14650_v0 = vunpack.i.l.bf16 %v14649_v51  ;;  %v9206_v56 = vsel %vm549_vm5, %v14656_v61, %v14675_v4 }
 0x7f6   : > { %11787 = vmatpush3.bf16.msra.mxu1 %v11786_v43  ;;  %v19387_v43 = vpop.permute.xlu1 %14733 }
 0x7f7   : > { %v9156_v15 = vsel %vm498_vm4, %v14631_v22, %v14650_v0  ;;  %v9159_v24 = vsel %vm498_vm4, %v14636_v35, %v14651_v2  ;;  %vm20702_vm4 = vcmask 711680   ;;  %v14736_v9 = vunpack.i.h.bf16 %v19387_v43 }
 0x7f8   : > { %v14659_v27 = vpop.permute.xlu0 %14658  ;;  %v11788_v52 = vpack.c.bf16 %v9159_v24, %v9156_v15  ;;  %v14715_v15 = vunpack.i.l.bf16 %v14714_v16 }
 0x7f9   : > { %v14661_v60 = vunpack.i.h.bf16 %v14659_v27  ;;  %v14660_v20 = vunpack.i.l.bf16 %v14659_v27 }
 0x7fa   : > { %11789 = vmatprep.subr.bf16.mxu1 %v11788_v52 }
 0x7fb   : > { %11791 = vmatpush3.bf16.msra.mxu1 %v11790_v38  ;;  %v9208_v46 = vsel %vm549_vm5, %v14660_v20, %v14661_v60  ;;  %v9209_v35 = vsel %vm549_vm5, %v14661_v60, %v14676_v19  ;;  %v20703_v19 = vunpack.i.h.bf16 %v19090_v31  ;;  %v14706_v38 = vunpack.i.h.bf16 %v19352_v55 }
 0x7fc   : > { %v14669_v25 = vpop.permute.xlu0 %14668  ;;  %v11692_v57 = vpack.c.bf16 %v9208_v46, %v9205_v23  ;;  %v11792_v22 = vpack.c.bf16 %v9209_v35, %v9206_v56  ;;  %v14705_v60 = vunpack.i.l.bf16 %v19352_v55  ;;  %v14725_v31 = vunpack.i.l.bf16 %v14724_v32 }
 0x7fd   : > { %v14671_v63 = vunpack.i.h.bf16 %v14669_v25  ;;  %v14670_v47 = vunpack.i.l.bf16 %v14669_v25  ;;  %v8856_v46 = vsel %vm20706_vm3, %v14506_v44, %v14715_v15  ;;  %vm20721_vm3 = vmmov %vm20713_vm7 }
 0x7fe   : > { %11693 = vmatprep.subr.bf16.mxu0 %v11692_v57  ;;  %11793 = vmatprep.subr.bf16.mxu1 %v11792_v22  ;;  %v11798_v25 = vpack.c.bf16 %v8859_v3, %v8856_v46  ;;  %v9305_v14 = vsel %vm20707_vm2, %v14705_v60, %v14706_v38  ;;  %v9306_v22 = vsel %vm20709_vm8, %v14706_v38, %v14725_v31 }
 0x7ff   : > { %v9204_v17 = vsel %vm549_vm5, %v14670_v47, %v14655_v1  ;;  %v9207_v48 = vsel %vm549_vm5, %v14671_v63, %v14660_v20  ;;  %vm20704_vm5 = vmmov %vm20702_vm4  ;;  %v14744_v20 = vpop.permute.xlu1 %14743 }
 0x800   : > { %v11694_v40 = vpack.c.bf16 %v9207_v48, %v9204_v17  ;;  %v14679_v34 = vpop.permute.xlu0 %14678  ;;  %v14735_v17 = vunpack.i.l.bf16 %v19387_v43  ;;  %v14746_v48 = vunpack.i.h.bf16 %v14744_v20 }
 0x801   : > { %v14681_v59 = vunpack.i.h.bf16 %v14679_v34  ;;  %v14680_v29 = vunpack.i.l.bf16 %v14679_v34 }
 0x802   : > { %11695 = vmatpush1.bf16.msra.mxu0 %v11694_v40  ;;  %v9358_v43 = vsel %vm20716_vm9, %v14735_v17, %v14736_v9  ;;  %vm20731_vm9 = vcmask 130048  }
 0x803   : > { %v9254_v10 = vsel %vm600_vm6, %v14695_v53, %v14680_v29  ;;  %v9255_v58 = vsel %vm600_vm6, %v14680_v29, %v14681_v59  ;;  %v19409_v47 = vpop.permute.xlu1 %14753  ;;  %v14745_v29 = vunpack.i.l.bf16 %v14744_v20 }
 0x804   : > { %v11698_v51 = vpack.c.bf16 %v9257_v33, %v9254_v10  ;;  %v14689_v2 = vpop.permute.xlu0 %14688  ;;  %v11696_v0 = vpack.c.bf16 %v9258_v12, %v9255_v58  ;;  %v9357_v12 = vsel %vm20713_vm7, %v14746_v48, %v14735_v17  ;;  %v14756_v20 = vunpack.i.h.bf16 %v19409_v47  ;;  %v10535_v17 = vld [vmem:[%s20307_s29 + $0x100] sm:$0xff] }
 0x805   : > { %v14691_v61 = vunpack.i.h.bf16 %v14689_v2  ;;  %v14690_v1 = vunpack.i.l.bf16 %v14689_v2  ;;  %v14755_v3 = vunpack.i.l.bf16 %v19409_v47 }
 0x806   : > { %11697 = vmatprep.subr.bf16.mxu0 %v11696_v0 }
 0x807   : > { %v8806_v62 = vsel %vm20702_vm4, %v14486_v42, %v14690_v1  ;;  %v8809_v4 = vsel %vm20704_vm5, %v20703_v19, %v14691_v61  ;;  %11699 = vmatpush1.bf16.msra.mxu0 %v11698_v51  ;;  %v14726_v42 = vunpack.i.h.bf16 %v14724_v32  ;;  %v14764_v58 = vpop.permute.xlu1 %14763  ;;  %vm20718_vm4 = vmmov %vm20717_vm11  ;;  %vm20719_vm5 = vcmask 687104  }
 0x808   : > { %v11794_v24 = vpack.c.bf16 %v8809_v4, %v8806_v62  ;;  %v14699_v7 = vpop.permute.xlu0 %14698  ;;  %v14766_v19 = vunpack.i.h.bf16 %v14764_v58  ;;  %vm20722_vm2 = vmmov %vm20719_vm5 }
 0x809   : > { %v14701_v27 = vunpack.i.h.bf16 %v14699_v7  ;;  %v14700_v52 = vunpack.i.l.bf16 %v14699_v7 }
 0x80a   : > { %11795 = vmatpush3.bf16.msra.mxu1 %v11794_v24  ;;  %v14765_v24 = vunpack.i.l.bf16 %v14764_v58  ;;  %v8959_v30 = vsel %vm20719_vm5, %v14551_v11, %v14766_v19 }
 0x80b   : > { %v9256_v23 = vsel %vm600_vm6, %v14681_v59, %v14700_v52  ;;  %v9259_v16 = vsel %vm600_vm6, %v14686_v6, %v14701_v27  ;;  %vm20711_vm6 = vmmov %vm20708_vm1  ;;  %v14774_v7 = vpop.permute.xlu1 %14773 }
 0x80c   : > { %v14709_v56 = vpop.permute.xlu0 %14708  ;;  %v11796_v35 = vpack.c.bf16 %v9259_v16, %v9256_v23  ;;  %v14775_v5 = vunpack.i.l.bf16 %v14774_v7  ;;  %v8956_v31 = vsel %vm20722_vm2, %v14546_v54, %v14765_v24 }
 0x80d   : > { %v14711_v55 = vunpack.i.h.bf16 %v14709_v56  ;;  %v14710_v57 = vunpack.i.l.bf16 %v14709_v56  ;;  %v11806_v46 = vpack.c.bf16 %v8959_v30, %v8956_v31 }
 0x80e   : > { %11797 = vmatprep.subr.bf16.mxu1 %v11796_v35 }
 0x80f   : > { %11799 = vmatpush3.bf16.msra.mxu1 %v11798_v25  ;;  %v9308_v41 = vsel %vm20708_vm1, %v14710_v57, %v14711_v55  ;;  %v9309_v63 = vsel %vm20710_vm14, %v14711_v55, %v14726_v42  ;;  %v14784_v25 = vpop.permute.xlu1 %14783  ;;  %vm20723_vm1 = vcmask 490496  }
 0x810   : > { %v14719_v8 = vpop.permute.xlu0 %14718  ;;  %v11700_v6 = vpack.c.bf16 %v9308_v41, %v9305_v14  ;;  %v11800_v44 = vpack.c.bf16 %v9309_v63, %v9306_v22  ;;  %v9405_v50 = vsel %vm20723_vm1, %v14755_v3, %v14756_v20  ;;  %vm20724_vm8 = vmmov %vm20723_vm1  ;;  %v14785_v48 = vunpack.i.l.bf16 %v14784_v25 }
 0x811   : > { %v14721_v32 = vunpack.i.h.bf16 %v14719_v8  ;;  %v14720_v37 = vunpack.i.l.bf16 %v14719_v8  ;;  %vm20725_vm14 = vmmov %vm20723_vm1 }
 0x812   : > { %11701 = vmatprep.subr.bf16.mxu0 %v11700_v6  ;;  %11801 = vmatprep.subr.bf16.mxu1 %v11800_v44  ;;  %v9406_v55 = vsel %vm20725_vm14, %v14756_v20, %v14775_v5 }
 0x813   : > { %v9304_v40 = vsel %vm20711_vm6, %v14720_v37, %v14705_v60  ;;  %v9307_v34 = vsel %vm20712_vm0, %v14721_v32, %v14710_v57  ;;  %vm20726_vm6 = vmmov %vm20723_vm1  ;;  %v14794_v8 = vpop.permute.xlu1 %14793 }
 0x814   : > { %v11702_v53 = vpack.c.bf16 %v9307_v34, %v9304_v40  ;;  %v14729_v59 = vpop.permute.xlu0 %14728  ;;  %vm20727_vm0 = vmmov %vm20723_vm1  ;;  %v14795_v40 = vunpack.i.l.bf16 %v14794_v8 }
 0x815   : > { %v14731_v33 = vunpack.i.h.bf16 %v14729_v59  ;;  %v14730_v10 = vunpack.i.l.bf16 %v14729_v59  ;;  %vm20728_vm7 = vmmov %vm20727_vm0  ;;  %v10543_v59 = vld [vmem:[%s20307_s29 + $0x140] sm:$0xff] }
 0x816   : > { %11703 = vmatpush1.bf16.msra.mxu0 %v11702_v53 }
 0x817   : > { %v9354_v51 = vsel %vm20714_vm15, %v14745_v29, %v14730_v10  ;;  %v9355_v2 = vsel %vm20715_vm13, %v14730_v10, %v14731_v33  ;;  %vm20729_vm15 = vcmask 678912   ;;  %v14796_v10 = vunpack.i.h.bf16 %v14794_v8  ;;  %v20737_v8 = vld [vmem:[#allocation8_spill] sm:$0xff] }
 0x818   : > { %v11706_v0 = vpack.c.bf16 %v9357_v12, %v9354_v51  ;;  %v14739_v61 = vpop.permute.xlu0 %14738  ;;  %v11704_v1 = vpack.c.bf16 %v9358_v43, %v9355_v2  ;;  %vm20730_vm13 = vmmov %vm20729_vm15 }
 0x819   : > { %v14741_v39 = vunpack.i.h.bf16 %v14739_v61  ;;  %v14740_v62 = vunpack.i.l.bf16 %v14739_v61 }
 0x81a   : > { %11705 = vmatprep.subr.bf16.mxu0 %v11704_v1 }
 0x81b   : > { %v8906_v4 = vsel %vm20717_vm11, %v14526_v18, %v14740_v62  ;;  %v8909_v15 = vsel %vm20718_vm4, %v14531_v49, %v14741_v39  ;;  %11707 = vmatpush1.bf16.msra.mxu0 %v11706_v0  ;;  %v14776_v18 = vunpack.i.h.bf16 %v14774_v7  ;;  %v10537_v39 = vld [vmem:[%s20307_s29 + $0x110] sm:$0xff]  ;;  %vm20732_vm11 = vmmov %vm20731_vm9 }
 0x81c   : > { %v11802_v27 = vpack.c.bf16 %v8909_v15, %v8906_v4  ;;  %v14749_v52 = vpop.permute.xlu0 %14748  ;;  %v10544_v15 = vld [vmem:[%s20307_s29 + $0x148] sm:$0xff]  ;;  %vm20733_vm4 = vmmov %vm20731_vm9  ;;  %s20735_s29 = sld [smem:[#allocation5_spill]] }
 0x81d   : > { %v14751_v38 = vunpack.i.h.bf16 %v14749_v52  ;;  %v14750_v60 = vunpack.i.l.bf16 %v14749_v52  ;;  %vm20734_vm5 = vmmov %vm20733_vm4 }
 0x81e   : > { %11803 = vmatpush3.bf16.msra.mxu1 %v11802_v27 }
 0x81f   : > { %v9356_v49 = vsel %vm20720_vm10, %v14731_v33, %v14750_v60  ;;  %v9359_v42 = vsel %vm20721_vm3, %v14736_v9, %v14751_v38  ;;  %v14786_v9 = vunpack.i.h.bf16 %v14784_v25 }
 0x820   : > { %v14759_v23 = vpop.permute.xlu0 %14758  ;;  %v11804_v16 = vpack.c.bf16 %v9359_v42, %v9356_v49 }
 0x821   : > { %v14761_v56 = vunpack.i.h.bf16 %v14759_v23  ;;  %v14760_v35 = vunpack.i.l.bf16 %v14759_v23 }
 0x822   : > { %11805 = vmatprep.subr.bf16.mxu1 %v11804_v16  ;;  %s244_s15 = scalar_lea.vmem %s20739_s8, %s20735_s29 }
 0x823   : > { %11807 = vmatpush3.bf16.msra.mxu1 %v11806_v46  ;;  %v9408_v11 = vsel %vm20724_vm8, %v14760_v35, %v14761_v56  ;;  %v9409_v57 = vsel %vm20726_vm6, %v14761_v56, %v14776_v18 }
 0x824   : > { %v14769_v14 = vpop.permute.xlu0 %14768  ;;  %v11708_v26 = vpack.c.bf16 %v9408_v11, %v9405_v50  ;;  %v11808_v41 = vpack.c.bf16 %v9409_v57, %v9406_v55 }
 0x825   : > { %v14771_v54 = vunpack.i.h.bf16 %v14769_v14  ;;  %v14770_v22 = vunpack.i.l.bf16 %v14769_v14 }
 0x826   : > { %11709 = vmatprep.subr.bf16.mxu0 %v11708_v26  ;;  %11809 = vmatprep.subr.bf16.mxu1 %v11808_v41 }
 0x827   : > { %v9404_v63 = vsel %vm20727_vm0, %v14770_v22, %v14755_v3  ;;  %v9407_v47 = vsel %vm20728_vm7, %v14771_v54, %v14760_v35  ;;  %v9787_v3 = vpop.permute.xlu1 %9786  ;;  %v20736_v22 = vld [vmem:[#allocation6_spill] sm:$0xff] }
 0x828   : > { %v11710_v6 = vpack.c.bf16 %v9407_v47, %v9404_v63  ;;  %v14779_v44 = vpop.permute.xlu0 %14778 }
 0x829   : > { %v14781_v32 = vunpack.i.h.bf16 %v14779_v44  ;;  %v14780_v37 = vunpack.i.l.bf16 %v14779_v44 }
 0x82a   : > { %11711 = vmatpush1.bf16.msra.mxu0 %v11710_v6 }
 0x82b   : > { %v9006_v34 = vsel %vm20729_vm15, %v14566_v21, %v14780_v37  ;;  %v9009_v53 = vsel %vm20730_vm13, %v14571_v36, %v14781_v32  ;;  %v9454_v21 = vsel %vm2700_vm12, %v14795_v40, %v14785_v48  ;;  %v9455_v36 = vsel %vm2700_vm12, %v14785_v48, %v14786_v9  ;;  %v20738_v37 = vld [vmem:[#allocation7_spill] sm:$0xff] }
 0x82c   : > { %v11810_v29 = vpack.c.bf16 %v9009_v53, %v9006_v34  ;;  %v14789_v33 = vpop.permute.xlu0 %14788  ;;  %v20740_v53 = vld [vmem:[#allocation10_spill] sm:$0xff] }
 0x82d   : > { %v14791_v58 = vunpack.i.h.bf16 %v14789_v33  ;;  %v14790_v12 = vunpack.i.l.bf16 %v14789_v33  ;;  %10019 = vmatmul.mubr.f32.vlgmr.msra.gmra.mrb[24].mxu0 %v10535_v17 }
 0x82e   : > { %11811 = vmatpush3.bf16.msra.mxu1 %v11810_v29  ;;  %10024 = vmatprep.mubr.f32.mxu0 %v10543_v59 }
 0x82f   : > { %v9457_v45 = vsel %vm2700_vm12, %v14796_v10, %v14790_v12  ;;  %v9458_v51 = vsel %vm2700_vm12, %v14790_v12, %v14791_v58  ;;  %v20741_v12 = vld [vmem:[#allocation9_spill] sm:$0xff] }
 0x830   : > { %v11714_v2 = vpack.c.bf16 %v9457_v45, %v9454_v21  ;;  %v14799_v43 = vpop.permute.xlu0 %14798  ;;  %v11712_v0 = vpack.c.bf16 %v9458_v51, %v9455_v36  ;;  %v20742_v51 = vld [vmem:[#allocation12_spill] sm:$0xff] }
 0x831   : > { %v14801_v61 = vunpack.i.h.bf16 %v14799_v43  ;;  %v14800_v1 = vunpack.i.l.bf16 %v14799_v43  ;;  %10323 = vmatmul.mubr.f32.vlgmr.msra.gmra.mrb[28].mxu1 %v10535_v17  ;;  %10025 = vmatmul.mubr.f32.gmra.mrb[26].mxu0 %v10542_v13  ;;  %v20743_v43 = vld [vmem:[#allocation13_spill] sm:$0xff] }
 0x832   : > { %11713 = vmatprep.subr.bf16.mxu0 %v11712_v0  ;;  %10327 = vmatprep.mubr.f32.mxu1 %v10543_v59 }
 0x833   : > { %11715 = vmatpush1.bf16.msra.mxu0 %v11714_v2  ;;  %10095 = vmatprep.mubr.f32.mxu0 %v20144_v28  ;;  %v9456_v62 = vsel %vm2700_vm12, %v14786_v9, %v14800_v1  ;;  %v9459_v19 = vsel %vm2700_vm12, %v14791_v58, %v14801_v61  ;;  %v20744_v61 = vld [vmem:[#allocation14_spill] sm:$0xff] }
 0x834   : > { %v11812_v4 = vpack.c.bf16 %v9459_v19, %v9456_v62 }
 0x835   : > { %10328 = vmatmul.mubr.f32.gmra.mrb[30].mxu1 %v10542_v13 }
 0x836   : > { %10547 = vmatmul.mubr.msk.f32.vlgmr.msra.gmra.mrb[24].mxu0 %vm20731_vm9, %v10537_v39  ;;  %11813 = vmatprep.subr.bf16.mxu1 %v11812_v4 }
 0x837   : > { %11815 = vmatpush3.bf16.msra.mxu1 %v11812_v4  ;;  %10101 = vmatprep.mubr.f32.mxu0 %v20144_v28 }
 0x838   : > { %10925 = vmatprep.mubr.msk.f32.mxu1 %vm20732_vm11, %v10537_v39  ;;  %v20745_v39 = vld [vmem:[#allocation11_spill] sm:$0xff] }
 0x83a   : > { %10548 = vmatmul.mubr.msk.f32.gmra.mrb[26].mxu0 %vm20733_vm4, %v10544_v15  ;;  %10926 = vmatmul.mubr.msk.f32.vlgmr.msra.gmra.mrb[32].mxu1 %vm20734_vm5, %v10544_v15 }
 0x841   : > { %v9792_v42 = vpop.permute.xlu0 %9791 }
 0x84c   : > { %v10821_v24 = vpop.f32.mrb[20].mxu1 }
 0x84d   : > { %v10822_v7 = vpop.f32.mrb[21].mxu1 }
 0x84e   : > { %v10823_v27 = vadd.f32 %v10822_v7, %v10821_v24 }
 0x850   : > { %v10824_v52 = vpop.f32.mrb[22].mxu1  ;;  %v10175_v28 = vadd.f32 %v10823_v27, %v9787_v3 }
 0x851   : > { %v10825_v38 = vpop.f32.mrb[23].mxu1 }
 0x852   : > { %v10826_v60 = vadd.f32 %v10825_v38, %v10824_v52 }
 0x854   : > { %v10180_v23 = vadd.f32 %v10826_v60, %v9792_v42 }
 0x8b5   : > { %v10859_v20 = vpop.f32.mrb[24].mxu1 }
 0x8b6   : > { %v10860_v30 = vpop.f32.mrb[25].mxu1 }
 0x8b7   : > { %v10861_v18 = vadd.f32 %v10860_v30, %v10859_v20 }
 0x8b9   : > { %v10250_v5 = vadd.f32 %v10861_v18, %v10175_v28  ;;  %v10862_v49 = vpop.f32.mrb[26].mxu1 }
 0x8ba   : > { %v10863_v31 = vpop.f32.mrb[27].mxu1 }
 0x8bb   : > { %v10864_v16 = vadd.f32 %v10863_v31, %v10862_v49 }
 0x8bd   : > { %v10255_v46 = vadd.f32 %v10864_v16, %v10180_v23 }
 0x904   : > { %v10897_v56 = vpop.f32.mrb[28].mxu1 }
 0x905   : > { %v10898_v35 = vpop.f32.mrb[29].mxu1 }
 0x906   : > { %v10899_v25 = vadd.f32 %v10898_v35, %v10897_v56 }
 0x908   : > { %v10900_v50 = vpop.f32.mrb[30].mxu1  ;;  %v10325_v11 = vadd.f32 %v10899_v25, %v10250_v5 }
 0x909   : > { %v10097_v55 = vpop.f32.mrb[24].mxu0  ;;  %v10901_v57 = vpop.f32.mrb[31].mxu1 }
 0x90a   : > { %v11832_v14 = vadd.f32 %v10097_v55, %v9787_v3  ;;  %v10902_v26 = vadd.f32 %v10901_v57, %v10900_v50  ;;  %v10099_v41 = vpop.f32.mrb[25].mxu0 }
 0x90b   : > { %v11833_v54 = vadd.f32 %v10099_v41, %v9787_v3 }
 0x90c   : > { %v10408_v63 = vmul.f32 %v11832_v14, %v20736_v22  ;;  %v10330_v47 = vadd.f32 %v10902_v26, %v10255_v46 }
 0x90d   : > { %v10409_v6 = vmul.f32 %v11833_v54, %v20737_v8  ;;  %v10103_v44 = vpop.f32.mrb[26].mxu0  ;;  %v10927_v32 = vpop.f32.mrb[32].mxu1 }
 0x90e   : > { %v10414_v9 = vadd.f32 %v10408_v63, %v20738_v37  ;;  %v11834_v17 = vadd.f32 %v10103_v44, %v9792_v42  ;;  %v10405_v48 = vadd.f32 %v10927_v32, %v10330_v47  ;;  %v10105_v40 = vpop.f32.mrb[27].mxu0  ;;  %v10399_v34 = vpop.f32.mrb[33].mxu1 }
 0x90f   : > { %v10415_v59 = vadd.f32 %v10409_v6, %v20740_v53  ;;  %v11835_v29 = vadd.f32 %v10105_v40, %v9792_v42  ;;  %v10400_v33 = vadd.f32 %v10399_v34, %v10325_v11 }
 0x910   : > { %v10420_v10 = vmax.f32 %v10414_v9, 0.0  ;;  %v10411_v58 = vmul.f32 %v11834_v17, %v20736_v22  ;;  %v10413_v13 = vmul.f32 %v10405_v48, %v20741_v12 }
 0x911   : > { %v10421_v21 = vmax.f32 %v10415_v59, 0.0  ;;  %v10412_v45 = vmul.f32 %v11835_v29, %v20737_v8  ;;  %v10410_v36 = vmul.f32 %v10400_v33, %v20741_v12 }
 0x912   : > { %10426 = vst [vmem:[%s244_s15] sm:$0xff] %v10420_v10  ;;  %v10417_v2 = vadd.f32 %v10411_v58, %v20742_v51  ;;  %v10419_v0 = vadd.f32 %v10413_v13, %v20743_v43 }
 0x913   : > { %10427 = vst [vmem:[%s244_s15 + $0x8] sm:$0xff] %v10421_v21  ;;  %v10418_v1 = vadd.f32 %v10412_v45, %v20744_v61  ;;  %v10416_v62 = vadd.f32 %v10410_v36, %v20745_v39 }
 0x914   : > { %v10423_v19 = vmax.f32 %v10417_v2, 0.0  ;;  %v10425_v4 = vmax.f32 %v10419_v0, 0.0 }
 0x915   : > { %v10424_v15 = vmax.f32 %v10418_v1, 0.0  ;;  %v10422_v24 = vmax.f32 %v10416_v62, 0.0 }
 0x916   : > { %10429 = vst [vmem:[%s244_s15 + $0x18] sm:$0xff] %v10423_v19  ;;  %10431 = vst [vmem:[%s244_s15 + $0x28] sm:$0xff] %v10425_v4 }
 0x917   : > { %10430 = vst [vmem:[%s244_s15 + $0x20] sm:$0xff] %v10424_v15  ;;  %10428 = vst [vmem:[%s244_s15 + $0x10] sm:$0xff] %v10422_v24 }
 0x918 PF: > { %s20746_s23 = sld [smem:[#allocation4_spill]] }
 0x91e   : > { %s15_s18 = sadd.s32 1, %s20746_s23  }
 0x91f   : > { %p12_p4 = scmp.ge.s32.totalorder %s15_s18, 4  }
 0x921   :  { %14 = sbr.rel (!%p12_p4) target bundleno = 7 (0x7), region = 77 }

</bundles_post_ra>
